<compile_context>
chip_gen: v6e
topology: v6e:2x2x1
jax: 0.10.0
libtpu: 0.0.40
codegen_flags: <defaults>
</compile_context>

<pallas_src>
import jax
import jax.numpy as jnp
from jax import lax
from jax.experimental import pallas as pl
from jax.experimental.pallas import tpu as pltpu

EPS = 1e-5
LANES = 128
# bf16 MXU operands give 2-4x MXU throughput but ~1e-3 error (breaks the 2e-4
# self-test); keep the f32 default for validation.
USE_BF16_MATMUL = False


# --------------------------------------------------------------------------- #
# small helpers
# --------------------------------------------------------------------------- #
def _round_up(v, m):
    return (v + m - 1) // m * m


def _pad_channels(v, c_pad):
    c = v.shape[-1]
    v = v.astype(jnp.float32)
    if c == c_pad:
        return v
    pad = [(0, 0)] * (v.ndim - 1) + [(0, c_pad - c)]
    return jnp.pad(v, pad)


def _sum_sumsq(y):
    """Per-channel [sum, sum of squares] over rows of (rows, nout)."""
    s = jnp.sum(y, axis=0, keepdims=True)
    sq = jnp.sum(y * y, axis=0, keepdims=True)
    return jnp.concatenate([s, sq], axis=0)            # (2, nout)


# --------------------------------------------------------------------------- #
# in-kernel helpers
# --------------------------------------------------------------------------- #
def _fill_halo(halo_ref, x):
    """Write x (h, w, c) into the interior of the (h+2, w+2, c) halo scratch
    and zero only the 1-px border.  The border is zeroed every step (not just
    program_id==0) so correctness is independent of how the batch grid axis is
    sharded across TensorCores (each core has its own scratch)."""
    h, w, c = x.shape
    zr = jnp.zeros((1, w + 2, c), jnp.float32)
    zc = jnp.zeros((h, 1, c), jnp.float32)
    halo_ref[0:1, :, :] = zr
    halo_ref[h + 1:h + 2, :, :] = zr
    halo_ref[1:h + 1, 0:1, :] = zc
    halo_ref[1:h + 1, w + 1:w + 2, :] = zc
    halo_ref[1:h + 1, 1:w + 1, :] = x


def _conv3x3(halo_ref, w_ref, h, w):
    """3x3 'SAME' conv from an already-filled halo scratch.

    The three kx-shifted slabs are concatenated ONCE into an (h+2, w, 3c) slab
    and re-used across the ky loop (one K=3c MXU dot per ky, f32 accumulation),
    instead of rebuilding the patch per ky.
    w_ref: (3, 3*c, nout) with K index = kx*c + ci.
    NOTE: the (h, w, 3c) -> (h*w, 3c) reshape is layout-preserving when w % 8 == 0.
    """
    c = halo_ref.shape[-1]
    shifted = jnp.concatenate(
        [halo_ref[:, 0:w, :], halo_ref[:, 1:w + 1, :], halo_ref[:, 2:w + 2, :]],
        axis=-1)                                        # (h+2, w, 3c)
    acc = None
    for ky in range(3):
        patch = shifted[ky:ky + h].reshape(h * w, 3 * c).astype(w_ref.dtype)
        part = jnp.dot(patch, w_ref[ky], preferred_element_type=jnp.float32)
        acc = part if acc is None else acc + part
    return acc                                          # (h*w, nout) float32


# --------------------------------------------------------------------------- #
# kernels
# --------------------------------------------------------------------------- #
def _pass1_kernel(x_ref, w1_ref, wres_ref, y1_ref, yres_ref,
                  st1_ref, stres_ref, halo_ref):
    # x_ref:(1,H,W,Cinp)  w1_ref:(3,3*Cinp,Cp)  wres_ref:(Cinp,Cp)
    # y1_ref/yres_ref:(1,H,W,Cp) raw conv outputs; st*:(1,2,Cp) partial BN stats
    _, h, w, cin = x_ref.shape
    cp = w1_ref.shape[-1]
    x = x_ref[0]

    # convRes (1x1): a single K=Cin matmul — NOT folded into the 3x3 matmul
    # (folding costs 9x its FLOPs and doubles resident weight VMEM).
    xm = x.reshape(h * w, cin).astype(wres_ref.dtype)
    yres = jnp.dot(xm, wres_ref[...], preferred_element_type=jnp.float32)
    yres_ref[0] = yres.reshape(h, w, cp)
    stres_ref[0] = _sum_sumsq(yres)

    # conv1 (3x3 SAME) via halo scratch + single kx-shifted slab
    _fill_halo(halo_ref, x)
    y1 = _conv3x3(halo_ref, w1_ref, h, w)
    y1_ref[0] = y1.reshape(h, w, cp)
    st1_ref[0] = _sum_sumsq(y1)


def _pass2_kernel(y1_ref, sc_ref, sh_ref, w2_ref, y2_ref, st2_ref, halo_ref):
    # y1_ref:(1,H,W,Cp) raw conv1; sc/sh:(1,Cp) fused bn1 scale/shift
    # w2_ref:(3,3*Cp,Cp); y2_ref:(1,H,W,Cp) raw conv2; st2:(1,2,Cp) bn2 stats
    _, h, w, c = y1_ref.shape
    scale = sc_ref[...].reshape(1, 1, c)
    shift = sh_ref[...].reshape(1, 1, c)
    z = jnp.maximum(y1_ref[0] * scale + shift, 0.0)     # relu(bn1(conv1(x)))
    _fill_halo(halo_ref, z)
    y2 = _conv3x3(halo_ref, w2_ref, h, w)
    y2_ref[0] = y2.reshape(h, w, c)
    st2_ref[0] = _sum_sumsq(y2)


def _pass3_kernel(y2_ref, yres_ref, sc2_ref, sh2_ref, scr_ref, shr_ref, out_ref):
    # out = relu(bn2(conv2) + relu(bnRes(convRes)))  — pure elementwise,
    # lane-dense blocks; reads raw convRes directly (no res_act round trip).
    c = y2_ref.shape[-1]
    bn2 = y2_ref[0] * sc2_ref[...].reshape(1, 1, c) + sh2_ref[...].reshape(1, 1, c)
    res = jnp.maximum(
        yres_ref[0] * scr_ref[...].reshape(1, 1, c) + shr_ref[...].reshape(1, 1, c),
        0.0)
    out_ref[0] = jnp.maximum(bn2 + res, 0.0)


# --------------------------------------------------------------------------- #
# wrapper
# --------------------------------------------------------------------------- #
def _prepare_weights(wres, w1, w2, cinp, cp):
    """Channel-pad and re-layout weights for the per-ky im2col dots."""
    cin, cout = wres.shape
    f32 = jnp.float32
    w1p = jnp.zeros((3, 3, cinp, cp), f32).at[:, :, :cin, :cout].set(w1)
    w2p = jnp.zeros((3, 3, cp, cp), f32).at[:, :, :cout, :cout].set(w2)
    wresp = jnp.zeros((cinp, cp), f32).at[:cin, :cout].set(wres)
    w1k = w1p.reshape(3, 3 * cinp, cp)                  # K index = kx*cinp + ci
    w2k = w2p.reshape(3, 3 * cp, cp)
    if USE_BF16_MATMUL:
        w1k, w2k, wresp = (v.astype(jnp.bfloat16) for v in (w1k, w2k, wresp))
    return w1k, w2k, wresp


def _bn_affine(stats, gamma, beta, count):
    """Single-pass BN: stats=(2,C)=[sum, sumsq] over (N,H,W) -> fused scale/shift.
    Padded gamma/beta lanes are zero, so padded output lanes stay exactly zero."""
    mean = stats[0] / count
    var = jnp.maximum(stats[1] / count - mean * mean, 0.0)
    scale = gamma * lax.rsqrt(var + EPS)
    shift = beta - mean * scale
    return scale.reshape(1, -1), shift.reshape(1, -1)


def _vmem_cap_bytes():
    """Generation-aware VMEM ceiling: ~75% of physical per-core VMEM
    (≈96 MiB on v5e/v6e's 128 MiB, ≈48 MiB on v7x's 64 MiB)."""
    try:
        cap = int(pltpu.get_tpu_info().vmem_capacity_bytes)
    except Exception:
        cap = 64 * 2 ** 20            # conservative fallback (v7x per-core)
    return min(int(cap * 0.75), 100 * 2 ** 20)


def _cparams(per_step_bytes, vmem_cap):
    # ~3x the per-step estimate (double-buffered blocks + working values) with
    # headroom, clamped to the generation-aware ceiling.
    limit = int(min(max(3 * per_step_bytes, 16 * 2 ** 20), vmem_cap))
    return pltpu.CompilerParams(dimension_semantics=("parallel",),
                                vmem_limit_bytes=limit)


@jax.jit
def basic_block_de(x_nchw, params):
    """x_nchw: (B, Cin, H, W) float32. Returns (B, Cout, H, W) float32."""
    wres, w1, w2, gr, br, g1, b1, g2, b2 = params
    b, cin, h, w = x_nchw.shape
    cout = wres.shape[1]
    cinp = _round_up(cin, LANES)
    cp = _round_up(cout, LANES)
    f32 = jnp.float32
    count = b * h * w
    wbytes = 2 if USE_BF16_MATMUL else 4
    vmem_cap = _vmem_cap_bytes()

    # NCHW -> NHWC + channel pad to a 128-lane multiple (XLA glue).
    x = _pad_channels(jnp.transpose(x_nchw, (0, 2, 3, 1)), cinp)

    w1k, w2k, wresp = _prepare_weights(wres, w1, w2, cinp, cp)
    g1p, b1p = _pad_channels(g1, cp), _pad_channels(b1, cp)
    grp, brp = _pad_channels(gr, cp), _pad_channels(br, cp)
    g2p, b2p = _pad_channels(g2, cp), _pad_channels(b2, cp)

    # ---- pass 1: conv1 (3x3) + separate convRes (1x1), bn1/bnRes statistics - #
    est1 = (4 * (h * w * cinp + 2 * h * w * cp              # streamed blocks
                 + (h + 2) * (w + 2) * cinp                 # halo scratch
                 + (h + 2) * w * 3 * cinp                   # kx-shifted slab
                 + 2 * h * w * cp)                          # accumulators
            + wbytes * (9 * cinp * cp + cinp * cp))         # weights
    y1, yres, st1, stres = pl.pallas_call(
        _pass1_kernel,
        grid=(b,),
        in_specs=[
            pl.BlockSpec((1, h, w, cinp), lambda i: (i, 0, 0, 0)),
            pl.BlockSpec((3, 3 * cinp, cp), lambda i: (0, 0, 0)),
            pl.BlockSpec((cinp, cp), lambda i: (0, 0)),
        ],
        out_specs=[
            pl.BlockSpec((1, h, w, cp), lambda i: (i, 0, 0, 0)),
            pl.BlockSpec((1, h, w, cp), lambda i: (i, 0, 0, 0)),
            pl.BlockSpec((1, 2, cp), lambda i: (i, 0, 0)),
            pl.BlockSpec((1, 2, cp), lambda i: (i, 0, 0)),
        ],
        out_shape=[
            jax.ShapeDtypeStruct((b, h, w, cp), f32),
            jax.ShapeDtypeStruct((b, h, w, cp), f32),
            jax.ShapeDtypeStruct((b, 2, cp), f32),
            jax.ShapeDtypeStruct((b, 2, cp), f32),
        ],
        scratch_shapes=[pltpu.VMEM((h + 2, w + 2, cinp), f32)],
        compiler_params=_cparams(est1, vmem_cap),
    )(x, w1k, wresp)
    # cross-tile BN reduction (tiny per-channel glue between passes)
    scale1, shift1 = _bn_affine(jnp.sum(st1, axis=0), g1p, b1p, count)
    scaler, shiftr = _bn_affine(jnp.sum(stres, axis=0), grp, brp, count)

    # ---- pass 2: relu(bn1) scale/shift + conv2 (3x3), bn2 statistics -------- #
    est2 = (4 * (2 * h * w * cp
                 + (h + 2) * (w + 2) * cp
                 + (h + 2) * w * 3 * cp
                 + 2 * h * w * cp)
            + wbytes * 9 * cp * cp)
    y2, st2 = pl.pallas_call(
        _pass2_kernel,
        grid=(b,),
        in_specs=[
            pl.BlockSpec((1, h, w, cp), lambda i: (i, 0, 0, 0)),
            pl.BlockSpec((1, cp), lambda i: (0, 0)),
            pl.BlockSpec((1, cp), lambda i: (0, 0)),
            pl.BlockSpec((3, 3 * cp, cp), lambda i: (0, 0, 0)),
        ],
        out_specs=[
            pl.BlockSpec((1, h, w, cp), lambda i: (i, 0, 0, 0)),
            pl.BlockSpec((1, 2, cp), lambda i: (i, 0, 0)),
        ],
        out_shape=[
            jax.ShapeDtypeStruct((b, h, w, cp), f32),
            jax.ShapeDtypeStruct((b, 2, cp), f32),
        ],
        scratch_shapes=[pltpu.VMEM((h + 2, w + 2, cp), f32)],
        compiler_params=_cparams(est2, vmem_cap),
    )(y1, scale1, shift1, w2k)
    scale2, shift2 = _bn_affine(jnp.sum(st2, axis=0), g2p, b2p, count)

    # ---- pass 3: bn2 + bnRes/relu on raw convRes + residual add + relu ------ #
    est3 = 4 * (3 * h * w * cp)
    outp = pl.pallas_call(
        _pass3_kernel,
        grid=(b,),
        in_specs=[
            pl.BlockSpec((1, h, w, cp), lambda i: (i, 0, 0, 0)),
            pl.BlockSpec((1, h, w, cp), lambda i: (i, 0, 0, 0)),
            pl.BlockSpec((1, cp), lambda i: (0, 0)),
            pl.BlockSpec((1, cp), lambda i: (0, 0)),
            pl.BlockSpec((1, cp), lambda i: (0, 0)),
            pl.BlockSpec((1, cp), lambda i: (0, 0)),
        ],
        out_specs=pl.BlockSpec((1, h, w, cp), lambda i: (i, 0, 0, 0)),
        out_shape=jax.ShapeDtypeStruct((b, h, w, cp), f32),
        input_output_aliases={0: 0},          # reuse the y2 buffer for the output
        compiler_params=_cparams(est3, vmem_cap),
    )(y2, yres, scale2, shift2, scaler, shiftr)

    # drop channel padding, NHWC -> NCHW
    return jnp.transpose(outp[:, :, :, :cout], (0, 3, 1, 2))


# --------------------------------------------------------------------------- #
# pure-JAX reference (identical semantics) for validation
# --------------------------------------------------------------------------- #
def reference_basic_block_de(x_nchw, params):
    wres, w1, w2, gr, br, g1, b1, g2, b2 = params
    x = jnp.transpose(x_nchw, (0, 2, 3, 1)).astype(jnp.float32)
    dn = ('NHWC', 'HWIO', 'NHWC')

    def conv(inp, w_hwio, pad):
        return lax.conv_general_dilated(inp, w_hwio, (1, 1), pad,
                                        dimension_numbers=dn)

    def bn(y, g, bta):
        mean = jnp.mean(y, axis=(0, 1, 2), keepdims=True)
        var = jnp.mean((y - mean) ** 2, axis=(0, 1, 2), keepdims=True)
        return ((y - mean) * lax.rsqrt(var + EPS) * g.reshape(1, 1, 1, -1)
                + bta.reshape(1, 1, 1, -1))

    cin, cout = wres.shape
    res = jnp.maximum(bn(conv(x, wres.reshape(1, 1, cin, cout), 'VALID'), gr, br), 0.0)
    out = jnp.maximum(bn(conv(x, w1, 'SAME'), g1, b1), 0.0)
    out = bn(conv(out, w2, 'SAME'), g2, b2)
    out = jnp.maximum(out + res, 0.0)
    return jnp.transpose(out, (0, 3, 1, 2))


def init_params(key, inplanes, planes):
    k1, k2, k3 = jax.random.split(key, 3)
    wres = 0.1 * jax.random.normal(k1, (inplanes, planes), jnp.float32)       # 1x1 (Cin,Cout)
    w1 = 0.1 * jax.random.normal(k2, (3, 3, inplanes, planes), jnp.float32)   # 3x3 HWIO
    w2 = 0.1 * jax.random.normal(k3, (3, 3, planes, planes), jnp.float32)     # 3x3 HWIO
    ones = jnp.ones((planes,), jnp.float32)
    zeros = jnp.zeros((planes,), jnp.float32)
    # (wres, w1, w2, gammaRes, betaRes, gamma1, beta1, gamma2, beta2)
    return (wres, w1, w2, ones, zeros, ones, zeros, ones, zeros)


if __name__ == "__main__":
    key = jax.random.PRNGKey(0)
    kx, kp = jax.random.split(key)

    B, inplanes, planes, H, W = 2, 4, 8, 16, 16
    x = jax.random.normal(kx, (B, inplanes, H, W), jnp.float32)   # NCHW, like PyTorch
    params = init_params(kp, inplanes, planes)

    out = jax.block_until_ready(basic_block_de(x, params))
    ref = jax.block_until_ready(reference_basic_block_de(x, params))

    assert out.shape == (B, planes, H, W)
    err = float(jnp.max(jnp.abs(out - ref)))
    assert err < 2e-4, err
    print("KERNEL_OK")
</pallas_src>

<mosaic_0001>
module attributes {stable_mosaic.version = 11 : i64} {
  func.func @_pass1_kernel(%arg0: i32, %arg1: memref<1x16x16x128xf32, #tpu.memory_space<vmem>>, %arg2: memref<3x384x128xf32, #tpu.memory_space<vmem>>, %arg3: memref<128x128xf32, #tpu.memory_space<vmem>>, %arg4: memref<1x16x16x128xf32, #tpu.memory_space<vmem>>, %arg5: memref<1x16x16x128xf32, #tpu.memory_space<vmem>>, %arg6: memref<1x2x128xf32, #tpu.memory_space<vmem>>, %arg7: memref<1x2x128xf32, #tpu.memory_space<vmem>>, %arg8: memref<18x18x128xf32, #tpu.memory_space<vmem>>) attributes {dimension_semantics = [#tpu.dimension_semantics<parallel>], iteration_bounds = array<i64: 2>, scalar_prefetch = 0 : i64, scratch_operands = 1 : i64, tpu.core_type = #tpu.core_type<tc>, window_params = [{transform_indices = @transform_0, window_bounds = array<i64: 1, 16, 16, 128>}, {pipeline_mode = #tpu.pipeline_mode<synchronous>, transform_indices = @transform_1, window_bounds = array<i64: 3, 384, 128>}, {pipeline_mode = #tpu.pipeline_mode<synchronous>, transform_indices = @transform_2, window_bounds = array<i64: 128, 128>}, {transform_indices = @transform_3, window_bounds = array<i64: 1, 16, 16, 128>}, {transform_indices = @transform_4, window_bounds = array<i64: 1, 16, 16, 128>}, {transform_indices = @transform_5, window_bounds = array<i64: 1, 2, 128>}, {transform_indices = @transform_6, window_bounds = array<i64: 1, 2, 128>}]} {
    %c0 = arith.constant 0 : index
    %c0_0 = arith.constant 0 : index
    %c0_1 = arith.constant 0 : index
    %c0_2 = arith.constant 0 : index
    %0 = vector.load %arg1[%c0, %c0_0, %c0_1, %c0_2] : memref<1x16x16x128xf32, #tpu.memory_space<vmem>>, vector<1x16x16x128xf32>
    %1 = vector.shape_cast %0 : vector<1x16x16x128xf32> to vector<16x16x128xf32>
    %2 = vector.shape_cast %1 : vector<16x16x128xf32> to vector<256x128xf32>
    %c0_3 = arith.constant 0 : index
    %c0_4 = arith.constant 0 : index
    %3 = vector.load %arg3[%c0_3, %c0_4] : memref<128x128xf32, #tpu.memory_space<vmem>>, vector<128x128xf32>
    %cst = arith.constant dense<0.000000e+00> : vector<256x128xf32>
    %4 = tpu.matmul %2, %3, %cst {dimension_numbers = #tpu.dot_dimension_numbers<[1], [0], [0], [1], [0, 0, 1, 1], [], []>} : vector<256x128xf32>, vector<128x128xf32>, vector<256x128xf32> -> vector<256x128xf32>
    %5 = vector.shape_cast %4 : vector<256x128xf32> to vector<16x16x128xf32>
    %c0_5 = arith.constant 0 : index
    %c0_6 = arith.constant 0 : index
    %c0_7 = arith.constant 0 : index
    %c0_8 = arith.constant 0 : index
    %6 = vector.load %arg5[%c0_5, %c0_6, %c0_7, %c0_8] : memref<1x16x16x128xf32, #tpu.memory_space<vmem>>, vector<1x16x16x128xf32>
    %7 = vector.shape_cast %6 : vector<1x16x16x128xf32> to vector<16x16x128xf32>
    %8 = vector.shape_cast %5 : vector<16x16x128xf32> to vector<1x16x16x128xf32>
    tpu.vector_store %arg5[%c0_5, %c0_6, %c0_7, %c0_8], %8 {strides = array<i32>} : memref<1x16x16x128xf32, #tpu.memory_space<vmem>>, vector<1x16x16x128xf32>,
    %cst_9 = arith.constant dense<0.000000e+00> : vector<128xf32>
    %9 = vector.multi_reduction <add>, %4, %cst_9 [0] : vector<256x128xf32> to vector<128xf32>
    %10 = vector.shape_cast %9 : vector<128xf32> to vector<1x128xf32>
    %11 = arith.mulf %4, %4 : vector<256x128xf32>
    %cst_10 = arith.constant dense<0.000000e+00> : vector<128xf32>
    %12 = vector.multi_reduction <add>, %11, %cst_10 [0] : vector<256x128xf32> to vector<128xf32>
    %13 = vector.shape_cast %12 : vector<128xf32> to vector<1x128xf32>
    %14 = tpu.concatenate %10, %13 in 0 : vector<1x128xf32>, vector<1x128xf32> -> vector<2x128xf32>
    %c0_11 = arith.constant 0 : index
    %c0_12 = arith.constant 0 : index
    %c0_13 = arith.constant 0 : index
    %15 = vector.load %arg7[%c0_11, %c0_12, %c0_13] : memref<1x2x128xf32, #tpu.memory_space<vmem>>, vector<1x2x128xf32>
    %16 = vector.shape_cast %15 : vector<1x2x128xf32> to vector<2x128xf32>
    %17 = vector.shape_cast %14 : vector<2x128xf32> to vector<1x2x128xf32>
    tpu.vector_store %arg7[%c0_11, %c0_12, %c0_13], %17 {strides = array<i32>} : memref<1x2x128xf32, #tpu.memory_space<vmem>>, vector<1x2x128xf32>,
    %cst_14 = arith.constant 0.000000e+00 : f32
    %18 = vector.broadcast %cst_14 : f32 to vector<1x18x128xf32>
    %cst_15 = arith.constant 0.000000e+00 : f32
    %19 = vector.broadcast %cst_15 : f32 to vector<16x1x128xf32>
    %c0_16 = arith.constant 0 : index
    %c0_17 = arith.constant 0 : index
    %c0_18 = arith.constant 0 : index
    %20 = vector.load %arg8[%c0_16, %c0_17, %c0_18] : memref<18x18x128xf32, #tpu.memory_space<vmem>>, vector<1x18x128xf32>
    tpu.vector_store %arg8[%c0_16, %c0_17, %c0_18], %18 {strides = array<i32>} : memref<18x18x128xf32, #tpu.memory_space<vmem>>, vector<1x18x128xf32>,
    %c17 = arith.constant 17 : index
    %c0_19 = arith.constant 0 : index
    %c0_20 = arith.constant 0 : index
    %21 = vector.load %arg8[%c17, %c0_19, %c0_20] : memref<18x18x128xf32, #tpu.memory_space<vmem>>, vector<1x18x128xf32>
    tpu.vector_store %arg8[%c17, %c0_19, %c0_20], %18 {strides = array<i32>} : memref<18x18x128xf32, #tpu.memory_space<vmem>>, vector<1x18x128xf32>,
    %c1 = arith.constant 1 : index
    %c0_21 = arith.constant 0 : index
    %c0_22 = arith.constant 0 : index
    %22 = vector.load %arg8[%c1, %c0_21, %c0_22] : memref<18x18x128xf32, #tpu.memory_space<vmem>>, vector<16x1x128xf32>
    tpu.vector_store %arg8[%c1, %c0_21, %c0_22], %19 {strides = array<i32>} : memref<18x18x128xf32, #tpu.memory_space<vmem>>, vector<16x1x128xf32>,
    %c1_23 = arith.constant 1 : index
    %c17_24 = arith.constant 17 : index
    %c0_25 = arith.constant 0 : index
    %23 = vector.load %arg8[%c1_23, %c17_24, %c0_25] : memref<18x18x128xf32, #tpu.memory_space<vmem>>, vector<16x1x128xf32>
    tpu.vector_store %arg8[%c1_23, %c17_24, %c0_25], %19 {strides = array<i32>} : memref<18x18x128xf32, #tpu.memory_space<vmem>>, vector<16x1x128xf32>,
    %c1_26 = arith.constant 1 : index
    %c1_27 = arith.constant 1 : index
    %c0_28 = arith.constant 0 : index
    %24 = vector.load %arg8[%c1_26, %c1_27, %c0_28] : memref<18x18x128xf32, #tpu.memory_space<vmem>>, vector<16x16x128xf32>
    tpu.vector_store %arg8[%c1_26, %c1_27, %c0_28], %1 {strides = array<i32>} : memref<18x18x128xf32, #tpu.memory_space<vmem>>, vector<16x16x128xf32>,
    %c0_29 = arith.constant 0 : index
    %c0_30 = arith.constant 0 : index
    %c0_31 = arith.constant 0 : index
    %25 = vector.load %arg8[%c0_29, %c0_30, %c0_31] : memref<18x18x128xf32, #tpu.memory_space<vmem>>, vector<18x16x128xf32>
    %c0_32 = arith.constant 0 : index
    %c1_33 = arith.constant 1 : index
    %c0_34 = arith.constant 0 : index
    %26 = vector.load %arg8[%c0_32, %c1_33, %c0_34] : memref<18x18x128xf32, #tpu.memory_space<vmem>>, vector<18x16x128xf32>
    %c0_35 = arith.constant 0 : index
    %c2 = arith.constant 2 : index
    %c0_36 = arith.constant 0 : index
    %27 = vector.load %arg8[%c0_35, %c2, %c0_36] : memref<18x18x128xf32, #tpu.memory_space<vmem>>, vector<18x16x128xf32>
    %28 = tpu.concatenate %25, %26, %27 in 2 : vector<18x16x128xf32>, vector<18x16x128xf32>, vector<18x16x128xf32> -> vector<18x16x384xf32>
    %29 = vector.extract_strided_slice %28 {offsets = [0, 0, 0], sizes = [16, 16, 384], strides = [1, 1, 1]} : vector<18x16x384xf32> to vector<16x16x384xf32>
    %30 = vector.shape_cast %29 : vector<16x16x384xf32> to vector<256x384xf32>
    %c0_37 = arith.constant 0 : index
    %c0_38 = arith.constant 0 : index
    %c0_39 = arith.constant 0 : index
    %31 = vector.load %arg2[%c0_37, %c0_38, %c0_39] : memref<3x384x128xf32, #tpu.memory_space<vmem>>, vector<1x384x128xf32>
    %32 = vector.shape_cast %31 : vector<1x384x128xf32> to vector<384x128xf32>
    %cst_40 = arith.constant dense<0.000000e+00> : vector<256x128xf32>
    %33 = tpu.matmul %30, %32, %cst_40 {dimension_numbers = #tpu.dot_dimension_numbers<[1], [0], [0], [1], [0, 0, 1, 1], [], []>} : vector<256x384xf32>, vector<384x128xf32>, vector<256x128xf32> -> vector<256x128xf32>
    %34 = vector.extract_strided_slice %28 {offsets = [1, 0, 0], sizes = [16, 16, 384], strides = [1, 1, 1]} : vector<18x16x384xf32> to vector<16x16x384xf32>
    %35 = vector.shape_cast %34 : vector<16x16x384xf32> to vector<256x384xf32>
    %c1_41 = arith.constant 1 : index
    %c0_42 = arith.constant 0 : index
    %c0_43 = arith.constant 0 : index
    %36 = vector.load %arg2[%c1_41, %c0_42, %c0_43] : memref<3x384x128xf32, #tpu.memory_space<vmem>>, vector<1x384x128xf32>
    %37 = vector.shape_cast %36 : vector<1x384x128xf32> to vector<384x128xf32>
    %cst_44 = arith.constant dense<0.000000e+00> : vector<256x128xf32>
    %38 = tpu.matmul %35, %37, %cst_44 {dimension_numbers = #tpu.dot_dimension_numbers<[1], [0], [0], [1], [0, 0, 1, 1], [], []>} : vector<256x384xf32>, vector<384x128xf32>, vector<256x128xf32> -> vector<256x128xf32>
    %39 = arith.addf %33, %38 : vector<256x128xf32>
    %40 = vector.extract_strided_slice %28 {offsets = [2, 0, 0], sizes = [16, 16, 384], strides = [1, 1, 1]} : vector<18x16x384xf32> to vector<16x16x384xf32>
    %41 = vector.shape_cast %40 : vector<16x16x384xf32> to vector<256x384xf32>
    %c2_45 = arith.constant 2 : index
    %c0_46 = arith.constant 0 : index
    %c0_47 = arith.constant 0 : index
    %42 = vector.load %arg2[%c2_45, %c0_46, %c0_47] : memref<3x384x128xf32, #tpu.memory_space<vmem>>, vector<1x384x128xf32>
    %43 = vector.shape_cast %42 : vector<1x384x128xf32> to vector<384x128xf32>
    %cst_48 = arith.constant dense<0.000000e+00> : vector<256x128xf32>
    %44 = tpu.matmul %41, %43, %cst_48 {dimension_numbers = #tpu.dot_dimension_numbers<[1], [0], [0], [1], [0, 0, 1, 1], [], []>} : vector<256x384xf32>, vector<384x128xf32>, vector<256x128xf32> -> vector<256x128xf32>
    %45 = arith.addf %39, %44 : vector<256x128xf32>
    %46 = vector.shape_cast %45 : vector<256x128xf32> to vector<16x16x128xf32>
    %c0_49 = arith.constant 0 : index
    %c0_50 = arith.constant 0 : index
    %c0_51 = arith.constant 0 : index
    %c0_52 = arith.constant 0 : index
    %47 = vector.load %arg4[%c0_49, %c0_50, %c0_51, %c0_52] : memref<1x16x16x128xf32, #tpu.memory_space<vmem>>, vector<1x16x16x128xf32>
    %48 = vector.shape_cast %47 : vector<1x16x16x128xf32> to vector<16x16x128xf32>
    %49 = vector.shape_cast %46 : vector<16x16x128xf32> to vector<1x16x16x128xf32>
    tpu.vector_store %arg4[%c0_49, %c0_50, %c0_51, %c0_52], %49 {strides = array<i32>} : memref<1x16x16x128xf32, #tpu.memory_space<vmem>>, vector<1x16x16x128xf32>,
    %cst_53 = arith.constant dense<0.000000e+00> : vector<128xf32>
    %50 = vector.multi_reduction <add>, %45, %cst_53 [0] : vector<256x128xf32> to vector<128xf32>
    %51 = vector.shape_cast %50 : vector<128xf32> to vector<1x128xf32>
    %52 = arith.mulf %45, %45 : vector<256x128xf32>
    %cst_54 = arith.constant dense<0.000000e+00> : vector<128xf32>
    %53 = vector.multi_reduction <add>, %52, %cst_54 [0] : vector<256x128xf32> to vector<128xf32>
    %54 = vector.shape_cast %53 : vector<128xf32> to vector<1x128xf32>
    %55 = tpu.concatenate %51, %54 in 0 : vector<1x128xf32>, vector<1x128xf32> -> vector<2x128xf32>
    %c0_55 = arith.constant 0 : index
    %c0_56 = arith.constant 0 : index
    %c0_57 = arith.constant 0 : index
    %56 = vector.load %arg6[%c0_55, %c0_56, %c0_57] : memref<1x2x128xf32, #tpu.memory_space<vmem>>, vector<1x2x128xf32>
    %57 = vector.shape_cast %56 : vector<1x2x128xf32> to vector<2x128xf32>
    %58 = vector.shape_cast %55 : vector<2x128xf32> to vector<1x2x128xf32>
    tpu.vector_store %arg6[%c0_55, %c0_56, %c0_57], %58 {strides = array<i32>} : memref<1x2x128xf32, #tpu.memory_space<vmem>>, vector<1x2x128xf32>,
    return
  }
  func.func @transform_0(%arg0: i32) -> (i32, i32, i32, i32) {
    %c0_i32 = arith.constant 0 : i32
    %c0_i32_0 = arith.constant 0 : i32
    %c0_i32_1 = arith.constant 0 : i32
    %c0_i32_2 = arith.constant 0 : i32
    return %arg0, %c0_i32, %c0_i32_0, %c0_i32_1 : i32, i32, i32, i32
  }
  func.func @transform_1(%arg0: i32) -> (i32, i32, i32) {
    %c0_i32 = arith.constant 0 : i32
    %c0_i32_0 = arith.constant 0 : i32
    %c0_i32_1 = arith.constant 0 : i32
    %c0_i32_2 = arith.constant 0 : i32
    return %c0_i32, %c0_i32_0, %c0_i32_1 : i32, i32, i32
  }
  func.func @transform_2(%arg0: i32) -> (i32, i32) {
    %c0_i32 = arith.constant 0 : i32
    %c0_i32_0 = arith.constant 0 : i32
    %c0_i32_1 = arith.constant 0 : i32
    return %c0_i32, %c0_i32_0 : i32, i32
  }
  func.func @transform_3(%arg0: i32) -> (i32, i32, i32, i32) {
    %c0_i32 = arith.constant 0 : i32
    %c0_i32_0 = arith.constant 0 : i32
    %c0_i32_1 = arith.constant 0 : i32
    %c0_i32_2 = arith.constant 0 : i32
    return %arg0, %c0_i32, %c0_i32_0, %c0_i32_1 : i32, i32, i32, i32
  }
  func.func @transform_4(%arg0: i32) -> (i32, i32, i32, i32) {
    %c0_i32 = arith.constant 0 : i32
    %c0_i32_0 = arith.constant 0 : i32
    %c0_i32_1 = arith.constant 0 : i32
    %c0_i32_2 = arith.constant 0 : i32
    return %arg0, %c0_i32, %c0_i32_0, %c0_i32_1 : i32, i32, i32, i32
  }
  func.func @transform_5(%arg0: i32) -> (i32, i32, i32) {
    %c0_i32 = arith.constant 0 : i32
    %c0_i32_0 = arith.constant 0 : i32
    %c0_i32_1 = arith.constant 0 : i32
    return %arg0, %c0_i32, %c0_i32_0 : i32, i32, i32
  }
  func.func @transform_6(%arg0: i32) -> (i32, i32, i32) {
    %c0_i32 = arith.constant 0 : i32
    %c0_i32_0 = arith.constant 0 : i32
    %c0_i32_1 = arith.constant 0 : i32
    return %arg0, %c0_i32, %c0_i32_0 : i32, i32, i32
  }
}

module attributes {stable_mosaic.version = 11 : i64} {
  func.func @_pass2_kernel(%arg0: i32, %arg1: memref<1x16x16x128xf32, #tpu.memory_space<vmem>>, %arg2: memref<1x128xf32, #tpu.memory_space<vmem>>, %arg3: memref<1x128xf32, #tpu.memory_space<vmem>>, %arg4: memref<3x384x128xf32, #tpu.memory_space<vmem>>, %arg5: memref<1x16x16x128xf32, #tpu.memory_space<vmem>>, %arg6: memref<1x2x128xf32, #tpu.memory_space<vmem>>, %arg7: memref<18x18x128xf32, #tpu.memory_space<vmem>>) attributes {dimension_semantics = [#tpu.dimension_semantics<parallel>], iteration_bounds = array<i64: 2>, scalar_prefetch = 0 : i64, scratch_operands = 1 : i64, tpu.core_type = #tpu.core_type<tc>, window_params = [{transform_indices = @transform_0, window_bounds = array<i64: 1, 16, 16, 128>}, {pipeline_mode = #tpu.pipeline_mode<synchronous>, transform_indices = @transform_1, window_bounds = array<i64: 1, 128>}, {pipeline_mode = #tpu.pipeline_mode<synchronous>, transform_indices = @transform_2, window_bounds = array<i64: 1, 128>}, {pipeline_mode = #tpu.pipeline_mode<synchronous>, transform_indices = @transform_3, window_bounds = array<i64: 3, 384, 128>}, {transform_indices = @transform_4, window_bounds = array<i64: 1, 16, 16, 128>}, {transform_indices = @transform_5, window_bounds = array<i64: 1, 2, 128>}]} {
    %c0 = arith.constant 0 : index
    %c0_0 = arith.constant 0 : index
    %0 = vector.load %arg2[%c0, %c0_0] : memref<1x128xf32, #tpu.memory_space<vmem>>, vector<1x128xf32>
    %1 = vector.shape_cast %0 : vector<1x128xf32> to vector<1x1x128xf32>
    %c0_1 = arith.constant 0 : index
    %c0_2 = arith.constant 0 : index
    %2 = vector.load %arg3[%c0_1, %c0_2] : memref<1x128xf32, #tpu.memory_space<vmem>>, vector<1x128xf32>
    %3 = vector.shape_cast %2 : vector<1x128xf32> to vector<1x1x128xf32>
    %c0_3 = arith.constant 0 : index
    %c0_4 = arith.constant 0 : index
    %c0_5 = arith.constant 0 : index
    %c0_6 = arith.constant 0 : index
    %4 = vector.load %arg1[%c0_3, %c0_4, %c0_5, %c0_6] : memref<1x16x16x128xf32, #tpu.memory_space<vmem>>, vector<1x16x16x128xf32>
    %5 = vector.shape_cast %4 : vector<1x16x16x128xf32> to vector<16x16x128xf32>
    %6 = vector.broadcast %1 : vector<1x1x128xf32> to vector<16x16x128xf32>
    %7 = arith.mulf %5, %6 : vector<16x16x128xf32>
    %8 = vector.broadcast %3 : vector<1x1x128xf32> to vector<16x16x128xf32>
    %9 = arith.addf %7, %8 : vector<16x16x128xf32>
    %cst = arith.constant 0.000000e+00 : f32
    %10 = vector.broadcast %cst : f32 to vector<16x16x128xf32>
    %11 = arith.maximumf %9, %10 : vector<16x16x128xf32>
    %cst_7 = arith.constant 0.000000e+00 : f32
    %12 = vector.broadcast %cst_7 : f32 to vector<1x18x128xf32>
    %cst_8 = arith.constant 0.000000e+00 : f32
    %13 = vector.broadcast %cst_8 : f32 to vector<16x1x128xf32>
    %c0_9 = arith.constant 0 : index
    %c0_10 = arith.constant 0 : index
    %c0_11 = arith.constant 0 : index
    %14 = vector.load %arg7[%c0_9, %c0_10, %c0_11] : memref<18x18x128xf32, #tpu.memory_space<vmem>>, vector<1x18x128xf32>
    tpu.vector_store %arg7[%c0_9, %c0_10, %c0_11], %12 {strides = array<i32>} : memref<18x18x128xf32, #tpu.memory_space<vmem>>, vector<1x18x128xf32>,
    %c17 = arith.constant 17 : index
    %c0_12 = arith.constant 0 : index
    %c0_13 = arith.constant 0 : index
    %15 = vector.load %arg7[%c17, %c0_12, %c0_13] : memref<18x18x128xf32, #tpu.memory_space<vmem>>, vector<1x18x128xf32>
    tpu.vector_store %arg7[%c17, %c0_12, %c0_13], %12 {strides = array<i32>} : memref<18x18x128xf32, #tpu.memory_space<vmem>>, vector<1x18x128xf32>,
    %c1 = arith.constant 1 : index
    %c0_14 = arith.constant 0 : index
    %c0_15 = arith.constant 0 : index
    %16 = vector.load %arg7[%c1, %c0_14, %c0_15] : memref<18x18x128xf32, #tpu.memory_space<vmem>>, vector<16x1x128xf32>
    tpu.vector_store %arg7[%c1, %c0_14, %c0_15], %13 {strides = array<i32>} : memref<18x18x128xf32, #tpu.memory_space<vmem>>, vector<16x1x128xf32>,
    %c1_16 = arith.constant 1 : index
    %c17_17 = arith.constant 17 : index
    %c0_18 = arith.constant 0 : index
    %17 = vector.load %arg7[%c1_16, %c17_17, %c0_18] : memref<18x18x128xf32, #tpu.memory_space<vmem>>, vector<16x1x128xf32>
    tpu.vector_store %arg7[%c1_16, %c17_17, %c0_18], %13 {strides = array<i32>} : memref<18x18x128xf32, #tpu.memory_space<vmem>>, vector<16x1x128xf32>,
    %c1_19 = arith.constant 1 : index
    %c1_20 = arith.constant 1 : index
    %c0_21 = arith.constant 0 : index
    %18 = vector.load %arg7[%c1_19, %c1_20, %c0_21] : memref<18x18x128xf32, #tpu.memory_space<vmem>>, vector<16x16x128xf32>
    tpu.vector_store %arg7[%c1_19, %c1_20, %c0_21], %11 {strides = array<i32>} : memref<18x18x128xf32, #tpu.memory_space<vmem>>, vector<16x16x128xf32>,
    %c0_22 = arith.constant 0 : index
    %c0_23 = arith.constant 0 : index
    %c0_24 = arith.constant 0 : index
    %19 = vector.load %arg7[%c0_22, %c0_23, %c0_24] : memref<18x18x128xf32, #tpu.memory_space<vmem>>, vector<18x16x128xf32>
    %c0_25 = arith.constant 0 : index
    %c1_26 = arith.constant 1 : index
    %c0_27 = arith.constant 0 : index
    %20 = vector.load %arg7[%c0_25, %c1_26, %c0_27] : memref<18x18x128xf32, #tpu.memory_space<vmem>>, vector<18x16x128xf32>
    %c0_28 = arith.constant 0 : index
    %c2 = arith.constant 2 : index
    %c0_29 = arith.constant 0 : index
    %21 = vector.load %arg7[%c0_28, %c2, %c0_29] : memref<18x18x128xf32, #tpu.memory_space<vmem>>, vector<18x16x128xf32>
    %22 = tpu.concatenate %19, %20, %21 in 2 : vector<18x16x128xf32>, vector<18x16x128xf32>, vector<18x16x128xf32> -> vector<18x16x384xf32>
    %23 = vector.extract_strided_slice %22 {offsets = [0, 0, 0], sizes = [16, 16, 384], strides = [1, 1, 1]} : vector<18x16x384xf32> to vector<16x16x384xf32>
    %24 = vector.shape_cast %23 : vector<16x16x384xf32> to vector<256x384xf32>
    %c0_30 = arith.constant 0 : index
    %c0_31 = arith.constant 0 : index
    %c0_32 = arith.constant 0 : index
    %25 = vector.load %arg4[%c0_30, %c0_31, %c0_32] : memref<3x384x128xf32, #tpu.memory_space<vmem>>, vector<1x384x128xf32>
    %26 = vector.shape_cast %25 : vector<1x384x128xf32> to vector<384x128xf32>
    %cst_33 = arith.constant dense<0.000000e+00> : vector<256x128xf32>
    %27 = tpu.matmul %24, %26, %cst_33 {dimension_numbers = #tpu.dot_dimension_numbers<[1], [0], [0], [1], [0, 0, 1, 1], [], []>} : vector<256x384xf32>, vector<384x128xf32>, vector<256x128xf32> -> vector<256x128xf32>
    %28 = vector.extract_strided_slice %22 {offsets = [1, 0, 0], sizes = [16, 16, 384], strides = [1, 1, 1]} : vector<18x16x384xf32> to vector<16x16x384xf32>
    %29 = vector.shape_cast %28 : vector<16x16x384xf32> to vector<256x384xf32>
    %c1_34 = arith.constant 1 : index
    %c0_35 = arith.constant 0 : index
    %c0_36 = arith.constant 0 : index
    %30 = vector.load %arg4[%c1_34, %c0_35, %c0_36] : memref<3x384x128xf32, #tpu.memory_space<vmem>>, vector<1x384x128xf32>
    %31 = vector.shape_cast %30 : vector<1x384x128xf32> to vector<384x128xf32>
    %cst_37 = arith.constant dense<0.000000e+00> : vector<256x128xf32>
    %32 = tpu.matmul %29, %31, %cst_37 {dimension_numbers = #tpu.dot_dimension_numbers<[1], [0], [0], [1], [0, 0, 1, 1], [], []>} : vector<256x384xf32>, vector<384x128xf32>, vector<256x128xf32> -> vector<256x128xf32>
    %33 = arith.addf %27, %32 : vector<256x128xf32>
    %34 = vector.extract_strided_slice %22 {offsets = [2, 0, 0], sizes = [16, 16, 384], strides = [1, 1, 1]} : vector<18x16x384xf32> to vector<16x16x384xf32>
    %35 = vector.shape_cast %34 : vector<16x16x384xf32> to vector<256x384xf32>
    %c2_38 = arith.constant 2 : index
    %c0_39 = arith.constant 0 : index
    %c0_40 = arith.constant 0 : index
    %36 = vector.load %arg4[%c2_38, %c0_39, %c0_40] : memref<3x384x128xf32, #tpu.memory_space<vmem>>, vector<1x384x128xf32>
    %37 = vector.shape_cast %36 : vector<1x384x128xf32> to vector<384x128xf32>
    %cst_41 = arith.constant dense<0.000000e+00> : vector<256x128xf32>
    %38 = tpu.matmul %35, %37, %cst_41 {dimension_numbers = #tpu.dot_dimension_numbers<[1], [0], [0], [1], [0, 0, 1, 1], [], []>} : vector<256x384xf32>, vector<384x128xf32>, vector<256x128xf32> -> vector<256x128xf32>
    %39 = arith.addf %33, %38 : vector<256x128xf32>
    %40 = vector.shape_cast %39 : vector<256x128xf32> to vector<16x16x128xf32>
    %c0_42 = arith.constant 0 : index
    %c0_43 = arith.constant 0 : index
    %c0_44 = arith.constant 0 : index
    %c0_45 = arith.constant 0 : index
    %41 = vector.load %arg5[%c0_42, %c0_43, %c0_44, %c0_45] : memref<1x16x16x128xf32, #tpu.memory_space<vmem>>, vector<1x16x16x128xf32>
    %42 = vector.shape_cast %41 : vector<1x16x16x128xf32> to vector<16x16x128xf32>
    %43 = vector.shape_cast %40 : vector<16x16x128xf32> to vector<1x16x16x128xf32>
    tpu.vector_store %arg5[%c0_42, %c0_43, %c0_44, %c0_45], %43 {strides = array<i32>} : memref<1x16x16x128xf32, #tpu.memory_space<vmem>>, vector<1x16x16x128xf32>,
    %cst_46 = arith.constant dense<0.000000e+00> : vector<128xf32>
    %44 = vector.multi_reduction <add>, %39, %cst_46 [0] : vector<256x128xf32> to vector<128xf32>
    %45 = vector.shape_cast %44 : vector<128xf32> to vector<1x128xf32>
    %46 = arith.mulf %39, %39 : vector<256x128xf32>
    %cst_47 = arith.constant dense<0.000000e+00> : vector<128xf32>
    %47 = vector.multi_reduction <add>, %46, %cst_47 [0] : vector<256x128xf32> to vector<128xf32>
    %48 = vector.shape_cast %47 : vector<128xf32> to vector<1x128xf32>
    %49 = tpu.concatenate %45, %48 in 0 : vector<1x128xf32>, vector<1x128xf32> -> vector<2x128xf32>
    %c0_48 = arith.constant 0 : index
    %c0_49 = arith.constant 0 : index
    %c0_50 = arith.constant 0 : index
    %50 = vector.load %arg6[%c0_48, %c0_49, %c0_50] : memref<1x2x128xf32, #tpu.memory_space<vmem>>, vector<1x2x128xf32>
    %51 = vector.shape_cast %50 : vector<1x2x128xf32> to vector<2x128xf32>
    %52 = vector.shape_cast %49 : vector<2x128xf32> to vector<1x2x128xf32>
    tpu.vector_store %arg6[%c0_48, %c0_49, %c0_50], %52 {strides = array<i32>} : memref<1x2x128xf32, #tpu.memory_space<vmem>>, vector<1x2x128xf32>,
    return
  }
  func.func @transform_0(%arg0: i32) -> (i32, i32, i32, i32) {
    %c0_i32 = arith.constant 0 : i32
    %c0_i32_0 = arith.constant 0 : i32
    %c0_i32_1 = arith.constant 0 : i32
    %c0_i32_2 = arith.constant 0 : i32
    return %arg0, %c0_i32, %c0_i32_0, %c0_i32_1 : i32, i32, i32, i32
  }
  func.func @transform_1(%arg0: i32) -> (i32, i32) {
    %c0_i32 = arith.constant 0 : i32
    %c0_i32_0 = arith.constant 0 : i32
    %c0_i32_1 = arith.constant 0 : i32
    return %c0_i32, %c0_i32_0 : i32, i32
  }
  func.func @transform_2(%arg0: i32) -> (i32, i32) {
    %c0_i32 = arith.constant 0 : i32
    %c0_i32_0 = arith.constant 0 : i32
    %c0_i32_1 = arith.constant 0 : i32
    return %c0_i32, %c0_i32_0 : i32, i32
  }
  func.func @transform_3(%arg0: i32) -> (i32, i32, i32) {
    %c0_i32 = arith.constant 0 : i32
    %c0_i32_0 = arith.constant 0 : i32
    %c0_i32_1 = arith.constant 0 : i32
    %c0_i32_2 = arith.constant 0 : i32
    return %c0_i32, %c0_i32_0, %c0_i32_1 : i32, i32, i32
  }
  func.func @transform_4(%arg0: i32) -> (i32, i32, i32, i32) {
    %c0_i32 = arith.constant 0 : i32
    %c0_i32_0 = arith.constant 0 : i32
    %c0_i32_1 = arith.constant 0 : i32
    %c0_i32_2 = arith.constant 0 : i32
    return %arg0, %c0_i32, %c0_i32_0, %c0_i32_1 : i32, i32, i32, i32
  }
  func.func @transform_5(%arg0: i32) -> (i32, i32, i32) {
    %c0_i32 = arith.constant 0 : i32
    %c0_i32_0 = arith.constant 0 : i32
    %c0_i32_1 = arith.constant 0 : i32
    return %arg0, %c0_i32, %c0_i32_0 : i32, i32, i32
  }
}

module attributes {stable_mosaic.version = 11 : i64} {
  func.func @_pass3_kernel(%arg0: i32, %arg1: memref<1x16x16x128xf32, #tpu.memory_space<vmem>>, %arg2: memref<1x16x16x128xf32, #tpu.memory_space<vmem>>, %arg3: memref<1x128xf32, #tpu.memory_space<vmem>>, %arg4: memref<1x128xf32, #tpu.memory_space<vmem>>, %arg5: memref<1x128xf32, #tpu.memory_space<vmem>>, %arg6: memref<1x128xf32, #tpu.memory_space<vmem>>, %arg7: memref<1x16x16x128xf32, #tpu.memory_space<vmem>>) attributes {dimension_semantics = [#tpu.dimension_semantics<parallel>], iteration_bounds = array<i64: 2>, scalar_prefetch = 0 : i64, scratch_operands = 0 : i64, tpu.core_type = #tpu.core_type<tc>, window_params = [{transform_indices = @transform_0, window_bounds = array<i64: 1, 16, 16, 128>}, {transform_indices = @transform_1, window_bounds = array<i64: 1, 16, 16, 128>}, {pipeline_mode = #tpu.pipeline_mode<synchronous>, transform_indices = @transform_2, window_bounds = array<i64: 1, 128>}, {pipeline_mode = #tpu.pipeline_mode<synchronous>, transform_indices = @transform_3, window_bounds = array<i64: 1, 128>}, {pipeline_mode = #tpu.pipeline_mode<synchronous>, transform_indices = @transform_4, window_bounds = array<i64: 1, 128>}, {pipeline_mode = #tpu.pipeline_mode<synchronous>, transform_indices = @transform_5, window_bounds = array<i64: 1, 128>}, {transform_indices = @transform_6, window_bounds = array<i64: 1, 16, 16, 128>}]} {
    %c0 = arith.constant 0 : index
    %c0_0 = arith.constant 0 : index
    %c0_1 = arith.constant 0 : index
    %c0_2 = arith.constant 0 : index
    %0 = vector.load %arg1[%c0, %c0_0, %c0_1, %c0_2] : memref<1x16x16x128xf32, #tpu.memory_space<vmem>>, vector<1x16x16x128xf32>
    %1 = vector.shape_cast %0 : vector<1x16x16x128xf32> to vector<16x16x128xf32>
    %c0_3 = arith.constant 0 : index
    %c0_4 = arith.constant 0 : index
    %2 = vector.load %arg3[%c0_3, %c0_4] : memref<1x128xf32, #tpu.memory_space<vmem>>, vector<1x128xf32>
    %3 = vector.shape_cast %2 : vector<1x128xf32> to vector<1x1x128xf32>
    %4 = vector.broadcast %3 : vector<1x1x128xf32> to vector<16x16x128xf32>
    %5 = arith.mulf %1, %4 : vector<16x16x128xf32>
    %c0_5 = arith.constant 0 : index
    %c0_6 = arith.constant 0 : index
    %6 = vector.load %arg4[%c0_5, %c0_6] : memref<1x128xf32, #tpu.memory_space<vmem>>, vector<1x128xf32>
    %7 = vector.shape_cast %6 : vector<1x128xf32> to vector<1x1x128xf32>
    %8 = vector.broadcast %7 : vector<1x1x128xf32> to vector<16x16x128xf32>
    %9 = arith.addf %5, %8 : vector<16x16x128xf32>
    %c0_7 = arith.constant 0 : index
    %c0_8 = arith.constant 0 : index
    %c0_9 = arith.constant 0 : index
    %c0_10 = arith.constant 0 : index
    %10 = vector.load %arg2[%c0_7, %c0_8, %c0_9, %c0_10] : memref<1x16x16x128xf32, #tpu.memory_space<vmem>>, vector<1x16x16x128xf32>
    %11 = vector.shape_cast %10 : vector<1x16x16x128xf32> to vector<16x16x128xf32>
    %c0_11 = arith.constant 0 : index
    %c0_12 = arith.constant 0 : index
    %12 = vector.load %arg5[%c0_11, %c0_12] : memref<1x128xf32, #tpu.memory_space<vmem>>, vector<1x128xf32>
    %13 = vector.shape_cast %12 : vector<1x128xf32> to vector<1x1x128xf32>
    %14 = vector.broadcast %13 : vector<1x1x128xf32> to vector<16x16x128xf32>
    %15 = arith.mulf %11, %14 : vector<16x16x128xf32>
    %c0_13 = arith.constant 0 : index
    %c0_14 = arith.constant 0 : index
    %16 = vector.load %arg6[%c0_13, %c0_14] : memref<1x128xf32, #tpu.memory_space<vmem>>, vector<1x128xf32>
    %17 = vector.shape_cast %16 : vector<1x128xf32> to vector<1x1x128xf32>
    %18 = vector.broadcast %17 : vector<1x1x128xf32> to vector<16x16x128xf32>
    %19 = arith.addf %15, %18 : vector<16x16x128xf32>
    %cst = arith.constant 0.000000e+00 : f32
    %20 = vector.broadcast %cst : f32 to vector<16x16x128xf32>
    %21 = arith.maximumf %19, %20 : vector<16x16x128xf32>
    %22 = arith.addf %9, %21 : vector<16x16x128xf32>
    %cst_15 = arith.constant 0.000000e+00 : f32
    %23 = vector.broadcast %cst_15 : f32 to vector<16x16x128xf32>
    %24 = arith.maximumf %22, %23 : vector<16x16x128xf32>
    %c0_16 = arith.constant 0 : index
    %c0_17 = arith.constant 0 : index
    %c0_18 = arith.constant 0 : index
    %c0_19 = arith.constant 0 : index
    %25 = vector.load %arg7[%c0_16, %c0_17, %c0_18, %c0_19] : memref<1x16x16x128xf32, #tpu.memory_space<vmem>>, vector<1x16x16x128xf32>
    %26 = vector.shape_cast %25 : vector<1x16x16x128xf32> to vector<16x16x128xf32>
    %27 = vector.shape_cast %24 : vector<16x16x128xf32> to vector<1x16x16x128xf32>
    tpu.vector_store %arg7[%c0_16, %c0_17, %c0_18, %c0_19], %27 {strides = array<i32>} : memref<1x16x16x128xf32, #tpu.memory_space<vmem>>, vector<1x16x16x128xf32>,
    return
  }
  func.func @transform_0(%arg0: i32) -> (i32, i32, i32, i32) {
    %c0_i32 = arith.constant 0 : i32
    %c0_i32_0 = arith.constant 0 : i32
    %c0_i32_1 = arith.constant 0 : i32
    %c0_i32_2 = arith.constant 0 : i32
    return %arg0, %c0_i32, %c0_i32_0, %c0_i32_1 : i32, i32, i32, i32
  }
  func.func @transform_1(%arg0: i32) -> (i32, i32, i32, i32) {
    %c0_i32 = arith.constant 0 : i32
    %c0_i32_0 = arith.constant 0 : i32
    %c0_i32_1 = arith.constant 0 : i32
    %c0_i32_2 = arith.constant 0 : i32
    return %arg0, %c0_i32, %c0_i32_0, %c0_i32_1 : i32, i32, i32, i32
  }
  func.func @transform_2(%arg0: i32) -> (i32, i32) {
    %c0_i32 = arith.constant 0 : i32
    %c0_i32_0 = arith.constant 0 : i32
    %c0_i32_1 = arith.constant 0 : i32
    return %c0_i32, %c0_i32_0 : i32, i32
  }
  func.func @transform_3(%arg0: i32) -> (i32, i32) {
    %c0_i32 = arith.constant 0 : i32
    %c0_i32_0 = arith.constant 0 : i32
    %c0_i32_1 = arith.constant 0 : i32
    return %c0_i32, %c0_i32_0 : i32, i32
  }
  func.func @transform_4(%arg0: i32) -> (i32, i32) {
    %c0_i32 = arith.constant 0 : i32
    %c0_i32_0 = arith.constant 0 : i32
    %c0_i32_1 = arith.constant 0 : i32
    return %c0_i32, %c0_i32_0 : i32, i32
  }
  func.func @transform_5(%arg0: i32) -> (i32, i32) {
    %c0_i32 = arith.constant 0 : i32
    %c0_i32_0 = arith.constant 0 : i32
    %c0_i32_1 = arith.constant 0 : i32
    return %c0_i32, %c0_i32_0 : i32, i32
  }
  func.func @transform_6(%arg0: i32) -> (i32, i32, i32, i32) {
    %c0_i32 = arith.constant 0 : i32
    %c0_i32_0 = arith.constant 0 : i32
    %c0_i32_1 = arith.constant 0 : i32
    %c0_i32_2 = arith.constant 0 : i32
    return %arg0, %c0_i32, %c0_i32_0, %c0_i32_1 : i32, i32, i32, i32
  }
}

</mosaic_0001>

<bundles_post_ra>
// kernel: basic_block_de.5
= control target key start
LH: loop header
LB: loop body
LE: loop exit
PB: predicated region body
PF: predicated region fallthrough
CT: control target
= control target key end

     0   :  { %s758_s21 = smov 0   ;;  %s1129_s0 = inlined_call_operand.vmem [shape: f32[2,16,16,128], index: 0, kind: input, shape index: {}, may-alias: {0,6}]   ;;  %s1130_s1 = inlined_call_operand.vmem [shape: f32[2,16,16,128], index: 1, kind: input, shape index: {}]   ;;  %s1131_s2 = inlined_call_operand.vmem [shape: f32[1,128], index: 2, kind: input, shape index: {}]   ;;  %s1132_s3 = inlined_call_operand.vmem [shape: f32[1,128], index: 3, kind: input, shape index: {}]   ;;  %s1133_s4 = inlined_call_operand.vmem [shape: f32[1,128], index: 4, kind: input, shape index: {}]   ;;  %s1134_s5 = inlined_call_operand.vmem [shape: f32[1,128], index: 5, kind: input, shape index: {}]   ;;  %s1135_s6 = inlined_call_operand.vmem [shape: f32[2,16,16,128], index: 6, kind: output, shape index: {}, may-alias: {0,6}]  }
   0x1 LB: > { %s687_s22 = sadd.s32 4294967295, %s721_s21   ;;  %p691_p0 = scmp.ge.s32.totalorder %s721_s21, 1  ;;  %s721_s21 = sphi %s758_s21, %s16_s21  }
   0x2   : > { %p222_p1 = scmp.lt.s32.totalorder %s721_s21, 3 }
   0x4   : > { %p223_p2 = pnand %p691_p0, %p222_p1 }
   0x5   : > { %p257_p3 = scmp.lt.s32.totalorder (!%p223_p2), %s687_s22, 1 }
   0x6   : > { %226 = sbr.rel (%p223_p2) target bundleno = 79 (0x4f), region = 44 }
   0xb   : > { %s1137_s22 = smov (!%p257_p3, %s687_s22), 1  ;;  %v771_v0 = vld [vmem:[%s1131_s2] ss:$0 sm:$0xff] }
   0xc   : > { %s766_s23 = sshll.u32 %s1137_s22, 8  ;;  %v782_v1 = vld [vmem:[%s1132_s3] ss:$0 sm:$0xff] }
   0xd   : > { %s777_s28 = scalar_lea.vmem %s1129_s0, %s766_s23  ;;  %s845_s9 = scalar_lea.vmem %s1130_s1, %s766_s23  ;;  %v863_v50 = vld [vmem:[%s1133_s4] ss:$0 sm:$0xff] }
   0xe   : > { %v272_v2 = vld [vmem:[%s777_s28] sm:$0xff]  ;;  %v273_v3 = vld [vmem:[%s777_s28 + $0x8] sm:$0xff]  ;;  %v274_v4 = vld [vmem:[%s777_s28 + $0x10] sm:$0xff]  ;;  %s937_s16 = scalar_lea.vmem %s1135_s6, %s766_s23 }
   0xf   : > { %v275_v5 = vld [vmem:[%s777_s28 + $0x18] sm:$0xff]  ;;  %v276_v6 = vld [vmem:[%s777_s28 + $0x20] sm:$0xff]  ;;  %v277_v7 = vld [vmem:[%s777_s28 + $0x28] sm:$0xff]  ;;  %v311_v8 = vmul.f32 %v771_v0, %v272_v2  ;;  %v312_v9 = vmul.f32 %v771_v0, %v273_v3  ;;  %v313_v10 = vmul.f32 %v771_v0, %v274_v4 }
  0x10   : > { %v278_v11 = vld [vmem:[%s777_s28 + $0x30] sm:$0xff]  ;;  %v279_v12 = vld [vmem:[%s777_s28 + $0x38] sm:$0xff]  ;;  %v280_v13 = vld [vmem:[%s777_s28 + $0x40] sm:$0xff]  ;;  %v314_v14 = vmul.f32 %v771_v0, %v275_v5  ;;  %v315_v15 = vmul.f32 %v771_v0, %v276_v6  ;;  %v316_v16 = vmul.f32 %v771_v0, %v277_v7 }
  0x11   : > { %v281_v17 = vld [vmem:[%s777_s28 + $0x48] sm:$0xff]  ;;  %v282_v18 = vld [vmem:[%s777_s28 + $0x50] sm:$0xff]  ;;  %v283_v19 = vld [vmem:[%s777_s28 + $0x58] sm:$0xff]  ;;  %v803_v20 = vadd.f32 %v782_v1, %v311_v8  ;;  %v806_v21 = vadd.f32 %v782_v1, %v312_v9  ;;  %v809_v22 = vadd.f32 %v782_v1, %v313_v10  ;;  %v317_v23 = vmul.f32 %v771_v0, %v278_v11 }
  0x12   : > { %v284_v24 = vld [vmem:[%s777_s28 + $0x60] sm:$0xff]  ;;  %v285_v25 = vld [vmem:[%s777_s28 + $0x68] sm:$0xff]  ;;  %v286_v26 = vld [vmem:[%s777_s28 + $0x70] sm:$0xff]  ;;  %v816_v27 = vadd.f32 %v782_v1, %v314_v14  ;;  %v819_v28 = vadd.f32 %v782_v1, %v315_v15  ;;  %v822_v29 = vadd.f32 %v782_v1, %v316_v16  ;;  %v318_v30 = vmul.f32 %v771_v0, %v279_v12 }
  0x13   : > { %v287_v31 = vld [vmem:[%s777_s28 + $0x78] sm:$0xff]  ;;  %v827_v32 = vadd.f32 %v782_v1, %v317_v23  ;;  %v319_v33 = vmul.f32 %v771_v0, %v280_v13  ;;  %v320_v34 = vmul.f32 %v771_v0, %v281_v17  ;;  %v321_v35 = vmul.f32 %v771_v0, %v282_v18  ;;  %v288_v36 = vld [vmem:[%s777_s28 + $0x80] sm:$0xff]  ;;  %v289_v37 = vld [vmem:[%s777_s28 + $0x88] sm:$0xff] }
  0x14   : > { %v290_v38 = vld [vmem:[%s777_s28 + $0x90] sm:$0xff]  ;;  %v836_v39 = vadd.f32 %v782_v1, %v318_v30  ;;  %v322_v40 = vmul.f32 %v771_v0, %v283_v19  ;;  %v323_v41 = vmul.f32 %v771_v0, %v284_v24  ;;  %v324_v42 = vmul.f32 %v771_v0, %v285_v25  ;;  %v291_v43 = vld [vmem:[%s777_s28 + $0x98] sm:$0xff]  ;;  %v292_v44 = vld [vmem:[%s777_s28 + $0xa0] sm:$0xff] }
  0x15   : > { %v293_v45 = vld [vmem:[%s777_s28 + $0xa8] sm:$0xff]  ;;  %v851_v46 = vadd.f32 %v782_v1, %v319_v33  ;;  %v854_v47 = vadd.f32 %v782_v1, %v320_v34  ;;  %v857_v48 = vadd.f32 %v782_v1, %v321_v35  ;;  %v325_v49 = vmul.f32 %v771_v0, %v286_v26  ;;  %v382_v59 = vld [vmem:[%s845_s9] sm:$0xff]  ;;  %v384_v5 = vld [vmem:[%s845_s9 + $0x10] sm:$0xff] }
  0x16   : > { %v866_v51 = vadd.f32 %v782_v1, %v322_v40  ;;  %v869_v52 = vadd.f32 %v782_v1, %v323_v41  ;;  %v872_v53 = vadd.f32 %v782_v1, %v324_v42  ;;  %v326_v54 = vmul.f32 %v771_v0, %v287_v31  ;;  %v885_v60 = vld [vmem:[%s1134_s5] ss:$0 sm:$0xff]  ;;  %v383_v4 = vld [vmem:[%s845_s9 + $0x8] sm:$0xff]  ;;  %v385_v6 = vld [vmem:[%s845_s9 + $0x18] sm:$0xff] }
  0x17   : > { %v876_v55 = vadd.f32 %v782_v1, %v325_v49  ;;  %v327_v56 = vmul.f32 %v771_v0, %v288_v36  ;;  %v328_v57 = vmul.f32 %v771_v0, %v289_v37  ;;  %v329_v58 = vmul.f32 %v771_v0, %v290_v38  ;;  %v386_v13 = vld [vmem:[%s845_s9 + $0x20] sm:$0xff]  ;;  %v387_v14 = vld [vmem:[%s845_s9 + $0x28] sm:$0xff]  ;;  %v388_v15 = vld [vmem:[%s845_s9 + $0x30] sm:$0xff] }
  0x18   : > { %v888_v61 = vadd.f32 %v782_v1, %v326_v54  ;;  %v330_v62 = vmul.f32 %v771_v0, %v291_v43  ;;  %v892_v63 = vmul.f32 %v771_v0, %v292_v44  ;;  %v895_v2 = vmul.f32 %v771_v0, %v293_v45  ;;  %v389_v24 = vld [vmem:[%s845_s9 + $0x38] sm:$0xff]  ;;  %v940_v49 = vld [vmem:[%s777_s28 + $0xb0] sm:$0xff] }
  0x19   : > { %v421_v3 = vmul.f32 %v863_v50, %v382_v59  ;;  %v902_v7 = vadd.f32 %v782_v1, %v327_v56  ;;  %v905_v8 = vadd.f32 %v782_v1, %v328_v57  ;;  %v908_v9 = vadd.f32 %v782_v1, %v329_v58  ;;  %v943_v54 = vld [vmem:[%s777_s28 + $0xb8] sm:$0xff]  ;;  %v946_v56 = vld [vmem:[%s777_s28 + $0xc0] sm:$0xff]  ;;  %v949_v57 = vld [vmem:[%s777_s28 + $0xc8] sm:$0xff] }
  0x1a   : > { %v422_v10 = vmul.f32 %v863_v50, %v383_v4  ;;  %v423_v11 = vmul.f32 %v863_v50, %v384_v5  ;;  %v424_v12 = vmul.f32 %v863_v50, %v385_v6  ;;  %v917_v16 = vadd.f32 %v782_v1, %v330_v62  ;;  %v952_v58 = vld [vmem:[%s777_s28 + $0xd0] sm:$0xff]  ;;  %v958_v59 = vld [vmem:[%s777_s28 + $0xe0] sm:$0xff]  ;;  %v961_v62 = vld [vmem:[%s777_s28 + $0xe8] sm:$0xff] }
  0x1b   : > { %v460_v17 = vadd.f32 %v885_v60, %v421_v3  ;;  %v425_v18 = vmul.f32 %v863_v50, %v386_v13  ;;  %v426_v19 = vmul.f32 %v863_v50, %v387_v14  ;;  %v427_v23 = vmul.f32 %v863_v50, %v388_v15  ;;  %v964_v3 = vld [vmem:[%s777_s28 + $0xf0] sm:$0xff]  ;;  %v967_v4 = vld [vmem:[%s777_s28 + $0xf8] sm:$0xff] }
  0x1c   : > { %v461_v25 = vadd.f32 %v885_v60, %v422_v10  ;;  %v462_v26 = vadd.f32 %v885_v60, %v423_v11  ;;  %v463_v30 = vadd.f32 %v885_v60, %v424_v12  ;;  %v428_v31 = vmul.f32 %v863_v50, %v389_v24  ;;  %v390_v12 = vld [vmem:[%s845_s9 + $0x40] sm:$0xff] }
  0x1d   : > { %v492_v33 = vmax.f32 %v460_v17, 0.0  ;;  %v464_v34 = vadd.f32 %v885_v60, %v425_v18  ;;  %v465_v35 = vadd.f32 %v885_v60, %v426_v19  ;;  %v466_v36 = vadd.f32 %v885_v60, %v427_v23  ;;  %v391_v18 = vld [vmem:[%s845_s9 + $0x48] sm:$0xff] }
  0x1e   : > { %v493_v37 = vmax.f32 %v461_v25, 0.0  ;;  %v494_v38 = vmax.f32 %v462_v26, 0.0  ;;  %v495_v40 = vmax.f32 %v463_v30, 0.0  ;;  %v467_v41 = vadd.f32 %v885_v60, %v428_v31  ;;  %v394_v25 = vld [vmem:[%s845_s9 + $0x60] sm:$0xff]  ;;  %v395_v26 = vld [vmem:[%s845_s9 + $0x68] sm:$0xff] }
  0x1f   : > { %v524_v42 = vadd.f32 %v492_v33, %v803_v20  ;;  %v496_v43 = vmax.f32 %v464_v34, 0.0  ;;  %v497_v44 = vmax.f32 %v465_v35, 0.0  ;;  %v498_v45 = vmax.f32 %v466_v36, 0.0  ;;  %v955_v20 = vld [vmem:[%s777_s28 + $0xd8] sm:$0xff] }
  0x20   : > { %v525_v5 = vadd.f32 %v493_v37, %v806_v21  ;;  %v526_v6 = vadd.f32 %v494_v38, %v809_v22  ;;  %v527_v10 = vadd.f32 %v495_v40, %v816_v27  ;;  %v499_v11 = vmax.f32 %v467_v41, 0.0  ;;  %v392_v21 = vld [vmem:[%s845_s9 + $0x50] sm:$0xff]  ;;  %v393_v22 = vld [vmem:[%s845_s9 + $0x58] sm:$0xff] }
  0x21   : > { %v556_v13 = vmax.f32 %v524_v42, 0.0  ;;  %v528_v14 = vadd.f32 %v496_v43, %v819_v28  ;;  %v529_v15 = vadd.f32 %v497_v44, %v822_v29  ;;  %v530_v17 = vadd.f32 %v498_v45, %v827_v32  ;;  %v396_v28 = vld [vmem:[%s845_s9 + $0x70] sm:$0xff]  ;;  %v397_v33 = vld [vmem:[%s845_s9 + $0x78] sm:$0xff] }
  0x22   : > { %v557_v19 = vmax.f32 %v525_v5, 0.0  ;;  %v558_v27 = vmax.f32 %v526_v6, 0.0  ;;  %v559_v23 = vmax.f32 %v527_v10, 0.0  ;;  %v531_v24 = vadd.f32 %v499_v11, %v836_v39 }
  0x23   : > { %588 = vst [vmem:[%s937_s16] sm:$0xff] %v556_v13  ;;  %v560_v29 = vmax.f32 %v528_v14, 0.0  ;;  %v561_v32 = vmax.f32 %v529_v15, 0.0  ;;  %v562_v30 = vmax.f32 %v530_v17, 0.0  ;;  %v429_v31 = vmul.f32 %v863_v50, %v390_v12 }
  0x24   : > { %589 = vst [vmem:[%s937_s16 + $0x8] sm:$0xff] %v557_v19  ;;  %590 = vst [vmem:[%s937_s16 + $0x10] sm:$0xff] %v558_v27  ;;  %v563_v34 = vmax.f32 %v531_v24, 0.0  ;;  %v430_v39 = vmul.f32 %v863_v50, %v391_v18  ;;  %v431_v35 = vmul.f32 %v863_v50, %v392_v21  ;;  %v432_v36 = vmul.f32 %v863_v50, %v393_v22 }
  0x25   : > { %591 = vst [vmem:[%s937_s16 + $0x18] sm:$0xff] %v559_v23  ;;  %592 = vst [vmem:[%s937_s16 + $0x20] sm:$0xff] %v560_v29  ;;  %v468_v37 = vadd.f32 %v885_v60, %v429_v31  ;;  %v433_v38 = vmul.f32 %v863_v50, %v394_v25  ;;  %v434_v40 = vmul.f32 %v863_v50, %v395_v26  ;;  %v398_v25 = vld [vmem:[%s845_s9 + $0x80] sm:$0xff] }
  0x26   : > { %593 = vst [vmem:[%s937_s16 + $0x28] sm:$0xff] %v561_v32  ;;  %594 = vst [vmem:[%s937_s16 + $0x30] sm:$0xff] %v562_v30  ;;  %v435_v41 = vmul.f32 %v863_v50, %v396_v28  ;;  %v469_v42 = vadd.f32 %v885_v60, %v430_v39  ;;  %v470_v43 = vadd.f32 %v885_v60, %v431_v35  ;;  %v399_v32 = vld [vmem:[%s845_s9 + $0x88] sm:$0xff]  ;;  %v401_v30 = vld [vmem:[%s845_s9 + $0x98] sm:$0xff] }
  0x27   : > { %595 = vst [vmem:[%s937_s16 + $0x38] sm:$0xff] %v563_v34  ;;  %v471_v44 = vadd.f32 %v885_v60, %v432_v36  ;;  %v436_v45 = vmul.f32 %v863_v50, %v397_v33  ;;  %v500_v5 = vmax.f32 %v468_v37, 0.0  ;;  %v472_v6 = vadd.f32 %v885_v60, %v433_v38  ;;  %v402_v34 = vld [vmem:[%s845_s9 + $0xa0] sm:$0xff]  ;;  %v403_v35 = vld [vmem:[%s845_s9 + $0xa8] sm:$0xff] }
  0x28   : > { %v473_v10 = vadd.f32 %v885_v60, %v434_v40  ;;  %v474_v11 = vadd.f32 %v885_v60, %v435_v41  ;;  %v501_v12 = vmax.f32 %v469_v42, 0.0  ;;  %v502_v13 = vmax.f32 %v470_v43, 0.0  ;;  %v404_v40 = vld [vmem:[%s845_s9 + $0xb0] sm:$0xff] }
  0x29   : > { %v503_v14 = vmax.f32 %v471_v44, 0.0  ;;  %v475_v15 = vadd.f32 %v885_v60, %v436_v45  ;;  %v532_v17 = vadd.f32 %v500_v5, %v851_v46  ;;  %v504_v18 = vmax.f32 %v472_v6, 0.0 }
  0x2a   : > { %v505_v21 = vmax.f32 %v473_v10, 0.0  ;;  %v506_v22 = vmax.f32 %v474_v11, 0.0  ;;  %v533_v19 = vadd.f32 %v501_v12, %v854_v47  ;;  %v534_v27 = vadd.f32 %v502_v13, %v857_v48  ;;  %v400_v47 = vld [vmem:[%s845_s9 + $0x90] sm:$0xff] }
  0x2b   : > { %v535_v23 = vadd.f32 %v503_v14, %v866_v51  ;;  %v507_v24 = vmax.f32 %v475_v15, 0.0  ;;  %v564_v26 = vmax.f32 %v532_v17, 0.0  ;;  %v536_v28 = vadd.f32 %v504_v18, %v869_v52 }
  0x2c   : > { %v537_v29 = vadd.f32 %v505_v21, %v872_v53  ;;  %v538_v46 = vadd.f32 %v506_v22, %v876_v55  ;;  %v565_v48 = vmax.f32 %v533_v19, 0.0  ;;  %v566_v31 = vmax.f32 %v534_v27, 0.0 }
  0x2d   : > { %v567_v33 = vmax.f32 %v535_v23, 0.0  ;;  %v539_v51 = vadd.f32 %v507_v24, %v888_v61  ;;  %596 = vst [vmem:[%s937_s16 + $0x40] sm:$0xff] %v564_v26  ;;  %v568_v52 = vmax.f32 %v536_v28, 0.0  ;;  %v437_v55 = vmul.f32 %v863_v50, %v398_v25  ;;  %v405_v25 = vld [vmem:[%s845_s9 + $0xb8] sm:$0xff] }
  0x2e   : > { %v569_v53 = vmax.f32 %v537_v29, 0.0  ;;  %v570_v39 = vmax.f32 %v538_v46, 0.0  ;;  %597 = vst [vmem:[%s937_s16 + $0x48] sm:$0xff] %v565_v48  ;;  %598 = vst [vmem:[%s937_s16 + $0x50] sm:$0xff] %v566_v31  ;;  %v438_v37 = vmul.f32 %v863_v50, %v399_v32  ;;  %v439_v61 = vmul.f32 %v863_v50, %v400_v47  ;;  %v406_v46 = vld [vmem:[%s845_s9 + $0xc0] sm:$0xff] }
  0x2f   : > { %599 = vst [vmem:[%s937_s16 + $0x58] sm:$0xff] %v567_v33  ;;  %v571_v36 = vmax.f32 %v539_v51, 0.0  ;;  %v440_v38 = vmul.f32 %v863_v50, %v401_v30  ;;  %600 = vst [vmem:[%s937_s16 + $0x60] sm:$0xff] %v568_v52  ;;  %v476_v41 = vadd.f32 %v885_v60, %v437_v55  ;;  %v370_v42 = vadd.f32 %v782_v1, %v892_v63  ;;  %v407_v30 = vld [vmem:[%s845_s9 + $0xc8] sm:$0xff]  ;;  %v408_v51 = vld [vmem:[%s845_s9 + $0xd0] sm:$0xff] }
  0x30   : > { %601 = vst [vmem:[%s937_s16 + $0x68] sm:$0xff] %v569_v53  ;;  %602 = vst [vmem:[%s937_s16 + $0x70] sm:$0xff] %v570_v39  ;;  %v441_v43 = vmul.f32 %v863_v50, %v402_v34  ;;  %v371_v44 = vadd.f32 %v782_v1, %v895_v2  ;;  %v477_v45 = vadd.f32 %v885_v60, %v438_v37  ;;  %v409_v37 = vld [vmem:[%s845_s9 + $0xd8] sm:$0xff] }
  0x31   : > { %603 = vst [vmem:[%s937_s16 + $0x78] sm:$0xff] %v571_v36  ;;  %v478_v5 = vadd.f32 %v885_v60, %v439_v61  ;;  %v479_v6 = vadd.f32 %v885_v60, %v440_v38  ;;  %v442_v10 = vmul.f32 %v863_v50, %v403_v35  ;;  %v508_v11 = vmax.f32 %v476_v41, 0.0 }
  0x32   : > { %v480_v12 = vadd.f32 %v885_v60, %v441_v43  ;;  %v333_v63 = vmul.f32 %v771_v0, %v940_v49  ;;  %v443_v13 = vmul.f32 %v863_v50, %v404_v40  ;;  %v509_v14 = vmax.f32 %v477_v45, 0.0  ;;  %v410_v40 = vld [vmem:[%s845_s9 + $0xe0] sm:$0xff] }
  0x33   : > { %v510_v2 = vmax.f32 %v478_v5, 0.0  ;;  %v511_v15 = vmax.f32 %v479_v6, 0.0  ;;  %v481_v17 = vadd.f32 %v885_v60, %v442_v10  ;;  %v540_v18 = vadd.f32 %v508_v11, %v902_v7 }
  0x34   : > { %v512_v21 = vmax.f32 %v480_v12, 0.0  ;;  %v372_v22 = vadd.f32 %v782_v1, %v333_v63  ;;  %v482_v19 = vadd.f32 %v885_v60, %v443_v13  ;;  %v541_v27 = vadd.f32 %v509_v14, %v905_v8  ;;  %v411_v13 = vld [vmem:[%s845_s9 + $0xe8] sm:$0xff] }
  0x35   : > { %v542_v49 = vadd.f32 %v510_v2, %v908_v9  ;;  %v543_v23 = vadd.f32 %v511_v15, %v917_v16  ;;  %v513_v24 = vmax.f32 %v481_v17, 0.0  ;;  %v572_v26 = vmax.f32 %v540_v18, 0.0 }
  0x36   : > { %v544_v28 = vadd.f32 %v512_v21, %v370_v42  ;;  %v514_v7 = vmax.f32 %v482_v19, 0.0  ;;  %v334_v29 = vmul.f32 %v771_v0, %v943_v54  ;;  %v573_v32 = vmax.f32 %v541_v27, 0.0 }
  0x37   : > { %v574_v47 = vmax.f32 %v542_v49, 0.0  ;;  %v575_v8 = vmax.f32 %v543_v23, 0.0  ;;  %v545_v9 = vadd.f32 %v513_v24, %v371_v44  ;;  %604 = vst [vmem:[%s937_s16 + $0x80] sm:$0xff] %v572_v26  ;;  %v444_v33 = vmul.f32 %v863_v50, %v405_v25  ;;  %v413_v24 = vld [vmem:[%s845_s9 + $0xf8] sm:$0xff] }
  0x38   : > { %v576_v16 = vmax.f32 %v544_v28, 0.0  ;;  %v546_v48 = vadd.f32 %v514_v7, %v372_v22  ;;  %v373_v31 = vadd.f32 %v782_v1, %v334_v29  ;;  %605 = vst [vmem:[%s937_s16 + $0x88] sm:$0xff] %v573_v32  ;;  %v335_v34 = vmul.f32 %v771_v0, %v946_v56  ;;  %v412_v22 = vld [vmem:[%s845_s9 + $0xf0] sm:$0xff] }
  0x39   : > { %606 = vst [vmem:[%s937_s16 + $0x90] sm:$0xff] %v574_v47  ;;  %607 = vst [vmem:[%s937_s16 + $0x98] sm:$0xff] %v575_v8  ;;  %v577_v54 = vmax.f32 %v545_v9, 0.0  ;;  %v445_v52 = vmul.f32 %v863_v50, %v406_v46  ;;  %v336_v53 = vmul.f32 %v771_v0, %v949_v57  ;;  %v483_v55 = vadd.f32 %v885_v60, %v444_v33 }
  0x3a   : > { %608 = vst [vmem:[%s937_s16 + $0xa0] sm:$0xff] %v576_v16  ;;  %v578_v39 = vmax.f32 %v546_v48, 0.0  ;;  %v446_v35 = vmul.f32 %v863_v50, %v407_v30  ;;  %v337_v36 = vmul.f32 %v771_v0, %v952_v58  ;;  %v374_v61 = vadd.f32 %v782_v1, %v335_v34 }
  0x3b   : > { %609 = vst [vmem:[%s937_s16 + $0xa8] sm:$0xff] %v577_v54  ;;  %v484_v56 = vadd.f32 %v885_v60, %v445_v52  ;;  %v375_v38 = vadd.f32 %v782_v1, %v336_v53  ;;  %v447_v57 = vmul.f32 %v863_v50, %v408_v51  ;;  %v515_v41 = vmax.f32 %v483_v55, 0.0 }
  0x3c   : > { %610 = vst [vmem:[%s937_s16 + $0xb0] sm:$0xff] %v578_v39  ;;  %v485_v42 = vadd.f32 %v885_v60, %v446_v35  ;;  %v376_v43 = vadd.f32 %v782_v1, %v337_v36  ;;  %v338_v58 = vmul.f32 %v771_v0, %v955_v20  ;;  %v448_v5 = vmul.f32 %v863_v50, %v409_v37 }
  0x3d   : > { %v516_v44 = vmax.f32 %v484_v56, 0.0  ;;  %v486_v45 = vadd.f32 %v885_v60, %v447_v57  ;;  %v339_v6 = vmul.f32 %v771_v0, %v958_v59  ;;  %v547_v10 = vadd.f32 %v515_v41, %v373_v31 }
  0x3e   : > { %v517_v11 = vmax.f32 %v485_v42, 0.0  ;;  %v377_v12 = vadd.f32 %v782_v1, %v338_v58  ;;  %v449_v63 = vmul.f32 %v863_v50, %v410_v40  ;;  %v487_v2 = vadd.f32 %v885_v60, %v448_v5 }
  0x3f   : > { %v548_v14 = vadd.f32 %v516_v44, %v374_v61  ;;  %v518_v20 = vmax.f32 %v486_v45, 0.0  ;;  %v378_v15 = vadd.f32 %v782_v1, %v339_v6  ;;  %v579_v17 = vmax.f32 %v547_v10, 0.0 }
  0x40   : > { %v549_v18 = vadd.f32 %v517_v11, %v375_v38  ;;  %v488_v59 = vadd.f32 %v885_v60, %v449_v63  ;;  %v340_v21 = vmul.f32 %v771_v0, %v961_v62  ;;  %v519_v49 = vmax.f32 %v487_v2, 0.0 }
  0x41   : > { %v580_v19 = vmax.f32 %v548_v14, 0.0  ;;  %v550_v27 = vadd.f32 %v518_v20, %v376_v43  ;;  %v450_v23 = vmul.f32 %v863_v50, %v411_v13  ;;  %611 = vst [vmem:[%s937_s16 + $0xb8] sm:$0xff] %v579_v17  ;;  %v341_v7 = vmul.f32 %v771_v0, %v964_v3 }
  0x42   : > { %v581_v25 = vmax.f32 %v549_v18, 0.0  ;;  %v520_v26 = vmax.f32 %v488_v59, 0.0  ;;  %v379_v28 = vadd.f32 %v782_v1, %v340_v21  ;;  %v551_v62 = vadd.f32 %v519_v49, %v377_v12 }
  0x43   : > { %612 = vst [vmem:[%s937_s16 + $0xc0] sm:$0xff] %v580_v19  ;;  %v582_v29 = vmax.f32 %v550_v27, 0.0  ;;  %v489_v46 = vadd.f32 %v885_v60, %v450_v23  ;;  %v451_v32 = vmul.f32 %v863_v50, %v412_v22  ;;  %v342_v8 = vmul.f32 %v771_v0, %v967_v4 }
  0x44   : > { %613 = vst [vmem:[%s937_s16 + $0xc8] sm:$0xff] %v581_v25  ;;  %v552_v47 = vadd.f32 %v520_v26, %v378_v15  ;;  %v452_v9 = vmul.f32 %v863_v50, %v413_v24  ;;  %v583_v30 = vmax.f32 %v551_v62, 0.0  ;;  %v380_v16 = vadd.f32 %v782_v1, %v341_v7 }
  0x45   : > { %614 = vst [vmem:[%s937_s16 + $0xd0] sm:$0xff] %v582_v29  ;;  %v521_v3 = vmax.f32 %v489_v46, 0.0  ;;  %v490_v48 = vadd.f32 %v885_v60, %v451_v32  ;;  %v381_v33 = vadd.f32 %v782_v1, %v342_v8 }
  0x46   : > { %v584_v31 = vmax.f32 %v552_v47, 0.0  ;;  %v491_v51 = vadd.f32 %v885_v60, %v452_v9  ;;  %615 = vst [vmem:[%s937_s16 + $0xd8] sm:$0xff] %v583_v30 }
  0x47   : > { %v553_v54 = vadd.f32 %v521_v3, %v379_v28  ;;  %v522_v0 = vmax.f32 %v490_v48, 0.0 }
  0x48   : > { %616 = vst [vmem:[%s937_s16 + $0xe0] sm:$0xff] %v584_v31  ;;  %v523_v50 = vmax.f32 %v491_v51, 0.0 }
  0x49   : > { %v585_v4 = vmax.f32 %v553_v54, 0.0  ;;  %v554_v34 = vadd.f32 %v522_v0, %v380_v16 }
  0x4a   : > { %v555_v52 = vadd.f32 %v523_v50, %v381_v33 }
  0x4b   : > { %617 = vst [vmem:[%s937_s16 + $0xe8] sm:$0xff] %v585_v4  ;;  %v586_v53 = vmax.f32 %v554_v34, 0.0 }
  0x4c   : > { %v587_v39 = vmax.f32 %v555_v52, 0.0 }
  0x4d   : > { %618 = vst [vmem:[%s937_s16 + $0xf0] sm:$0xff] %v586_v53 }
  0x4e   : > { %619 = vst [vmem:[%s937_s16 + $0xf8] sm:$0xff] %v587_v39 }
  0x4f PF: > { %s16_s21 = sadd.s32 1, %s721_s21  }
  0x50   : > { %p13_p4 = scmp.ge.s32.totalorder %s16_s21, 4  }
  0x52   :  { %15 = sbr.rel (!%p13_p4) target bundleno = 1 (0x1), region = 77 }

// kernel: basic_block_de.4
= control target key start
LH: loop header
LB: loop body
LE: loop exit
PB: predicated region body
PF: predicated region fallthrough
CT: control target
= control target key end

     0   :  { %s2921_s18 = smov 0   ;;  %s4444_s0 = inlined_call_operand.vmem [shape: f32[2,16,16,128], index: 0, kind: input, shape index: {}]   ;;  %s4445_s1 = inlined_call_operand.vmem [shape: f32[1,128], index: 1, kind: input, shape index: {}]   ;;  %s4446_s2 = inlined_call_operand.vmem [shape: f32[1,128], index: 2, kind: input, shape index: {}]   ;;  %s4447_s3 = inlined_call_operand.vmem [shape: f32[3,384,128], index: 3, kind: input, shape index: {}]   ;;  %s4448_s4 = inlined_call_operand.vmem [shape: f32[2,16,16,128], index: 4, kind: output, shape index: {0}]   ;;  %s4449_s5 = inlined_call_operand.vmem [shape: f32[2,2,128], index: 5, kind: output, shape index: {1}]  }
   0x1 LB: > { %s2313_s19 = sadd.s32 4294967295, %s2888_s18   ;;  %p2317_p0 = scmp.ge.s32.totalorder %s2888_s18, 1  ;;  %s2888_s18 = sphi %s2921_s18, %s16_s18  }
   0x2   : > { %p190_p1 = scmp.lt.s32.totalorder %s2888_s18, 3 }
   0x4   : > { %p191_p2 = pnand %p2317_p0, %p190_p1 }
   0x6   : > { %194 = sbr.rel (%p191_p2) target bundleno = 585 (0x249), region = 36 }
   0xb   : > { %v2372_v0 = vld [vmem:[%s4447_s3 + $0x2f8] sm:$0xff]  ;;  %v2371_v2 = vld [vmem:[%s4447_s3 + $0x2f0] sm:$0xff]  ;;  %p2940_p3 = scmp.lt.s32.totalorder %s2313_s19, 1  ;;  %v2890_v3 = vmov 0.0   ;;  %v2370_v5 = vld [vmem:[%s4447_s3 + $0x2e8] sm:$0xff]  ;;  %vm2224_vm0 = vcmask 1040384  }
   0xc   : > { %v2340_v1 = vld [vmem:[%s4447_s3 + $0x1f8] sm:$0xff]  ;;  %655 = vmatprep.subr.mxu0 %v2890_v3  ;;  %378 = vst [vmem:[#allocation2] sm:$0xff] %v2890_v3  ;;  %379 = vst [vmem:[#allocation2 + $0x8] sm:$0xff] %v2890_v3  ;;  %2569 = vmatprep.subr.mxu1 %v2372_v0  ;;  %v2339_v4 = vld [vmem:[%s4447_s3 + $0x1f0] sm:$0xff] }
   0xd   : > { %380 = vst [vmem:[#allocation2 + $0x10] sm:$0x3] %v2890_v3  ;;  %382 = vst [vmem:[#allocation2 + $0x198] sm:$0xff] %v2890_v3  ;;  %656 = vmatpush1.msra.mxu0 %v2340_v1  ;;  %2570 = vmatpush3.msra.mxu1 %v2372_v0  ;;  %s4483_s19 = smov (!%p2940_p3, %s2313_s19), 1  ;;  %v2338_v6 = vld [vmem:[%s4447_s3 + $0x1e8] sm:$0xff]  ;;  %v2369_v7 = vld [vmem:[%s4447_s3 + $0x2e0] sm:$0xff] }
   0xe   : > { %383 = vst [vmem:[#allocation2 + $0x1a0] sm:$0xff] %v2890_v3  ;;  %384 = vst [vmem:[#allocation2 + $0x1a8] sm:$0x3] %v2890_v3  ;;  %657 = vmatprep.subr.mxu0 %v2890_v3  ;;  %2571 = vmatprep.subr.mxu1 %v2371_v2  ;;  %v2337_v8 = vld [vmem:[%s4447_s3 + $0x1e0] sm:$0xff]  ;;  %s2423_s12 = sshll.u32 %s4483_s19, 8  ;;  %v2368_v9 = vld [vmem:[%s4447_s3 + $0x2d8] sm:$0xff] }
   0xf   : > { %386 = vst [vmem:[#allocation2 + $0x18] sm:$0x1] %v2890_v3  ;;  %387 = vst [vmem:[#allocation2 + $0x30] sm:$0x1] %v2890_v3  ;;  %658 = vmatpush1.msra.mxu0 %v2339_v4  ;;  %2572 = vmatpush3.msra.mxu1 %v2371_v2  ;;  %v2336_v10 = vld [vmem:[%s4447_s3 + $0x1d8] sm:$0xff]  ;;  %v2367_v11 = vld [vmem:[%s4447_s3 + $0x2d0] sm:$0xff]  ;;  %s3022_s23 = scalar_lea.vmem %s4444_s0, %s2423_s12  ;;  %s4370_s9 = scalar_lea.vmem %s4448_s4, %s2423_s12 }
  0x10   : > { %388 = vst [vmem:[#allocation2 + $0x48] sm:$0x1] %v2890_v3  ;;  %389 = vst [vmem:[#allocation2 + $0x60] sm:$0x1] %v2890_v3  ;;  %659 = vmatprep.subr.mxu0 %v2890_v3  ;;  %2573 = vmatprep.subr.mxu1 %v2370_v5  ;;  %v2335_v12 = vld [vmem:[%s4447_s3 + $0x1d0] sm:$0xff]  ;;  %v2366_v13 = vld [vmem:[%s4447_s3 + $0x2c8] sm:$0xff] }
  0x11   : > { %390 = vst [vmem:[#allocation2 + $0x78] sm:$0x1] %v2890_v3  ;;  %391 = vst [vmem:[#allocation2 + $0x90] sm:$0x1] %v2890_v3  ;;  %660 = vmatpush1.msra.mxu0 %v2338_v6  ;;  %2574 = vmatpush3.msra.mxu1 %v2370_v5  ;;  %v2334_v14 = vld [vmem:[%s4447_s3 + $0x1c8] sm:$0xff]  ;;  %v238_v17 = vld [vmem:[%s3022_s23] sm:$0xff] }
  0x12   : > { %392 = vst [vmem:[#allocation2 + $0xa8] sm:$0x1] %v2890_v3  ;;  %393 = vst [vmem:[#allocation2 + $0xc0] sm:$0x1] %v2890_v3  ;;  %661 = vmatprep.subr.mxu0 %v2890_v3  ;;  %2575 = vmatprep.subr.mxu1 %v2369_v7  ;;  %v3037_v15 = vld [vmem:[%s4445_s1] ss:$0 sm:$0xff] }
  0x13   : > { %394 = vst [vmem:[#allocation2 + $0xd8] sm:$0x1] %v2890_v3  ;;  %395 = vst [vmem:[#allocation2 + $0xf0] sm:$0x1] %v2890_v3  ;;  %662 = vmatpush1.msra.mxu0 %v2337_v8  ;;  %2576 = vmatpush3.msra.mxu1 %v2369_v7  ;;  %v3043_v16 = vld [vmem:[%s4446_s2] ss:$0 sm:$0xff]  ;;  %v276_v20 = vmul.f32 %v3037_v15, %v238_v17 }
  0x14   : > { %396 = vst [vmem:[#allocation2 + $0x108] sm:$0x1] %v2890_v3  ;;  %397 = vst [vmem:[#allocation2 + $0x120] sm:$0x1] %v2890_v3  ;;  %663 = vmatprep.subr.mxu0 %v2890_v3  ;;  %2577 = vmatprep.subr.mxu1 %v2368_v9  ;;  %v239_v18 = vld [vmem:[%s3022_s23 + $0x8] sm:$0xff]  ;;  %v2365_v19 = vld [vmem:[%s4447_s3 + $0x2c0] sm:$0xff] }
  0x15   : > { %398 = vst [vmem:[#allocation2 + $0x138] sm:$0x1] %v2890_v3  ;;  %399 = vst [vmem:[#allocation2 + $0x150] sm:$0x1] %v2890_v3  ;;  %664 = vmatpush1.msra.mxu0 %v2336_v10  ;;  %2578 = vmatpush3.msra.mxu1 %v2368_v9  ;;  %v277_v21 = vmul.f32 %v3037_v15, %v239_v18  ;;  %v2333_v22 = vld [vmem:[%s4447_s3 + $0x1c0] sm:$0xff]  ;;  %v240_v23 = vld [vmem:[%s3022_s23 + $0x10] sm:$0xff]  ;;  %v314_v26 = vadd.f32 %v3043_v16, %v276_v20 }
  0x16   : > { %400 = vst [vmem:[#allocation2 + $0x168] sm:$0x1] %v2890_v3  ;;  %401 = vst [vmem:[#allocation2 + $0x180] sm:$0x1] %v2890_v3  ;;  %665 = vmatprep.subr.mxu0 %v2890_v3  ;;  %2579 = vmatprep.subr.mxu1 %v2367_v11  ;;  %v241_v24 = vld [vmem:[%s3022_s23 + $0x18] sm:$0xff]  ;;  %v278_v28 = vmul.f32 %v3037_v15, %v240_v23  ;;  %v242_v31 = vld [vmem:[%s3022_s23 + $0x20] sm:$0xff] }
  0x17   : > { %402 = vst [vmem:[#allocation2 + $0x29] sm:$0x1] %v2890_v3  ;;  %403 = vst [vmem:[#allocation2 + $0x41] sm:$0x1] %v2890_v3  ;;  %666 = vmatpush1.msra.mxu0 %v2335_v12  ;;  %2580 = vmatpush3.msra.mxu1 %v2367_v11  ;;  %v2364_v25 = vld [vmem:[%s4447_s3 + $0x2b8] sm:$0xff]  ;;  %v315_v27 = vadd.f32 %v3043_v16, %v277_v21  ;;  %v279_v30 = vmul.f32 %v3037_v15, %v241_v24  ;;  %v243_v32 = vld [vmem:[%s3022_s23 + $0x28] sm:$0xff] }
  0x18   : > { %404 = vst [vmem:[#allocation2 + $0x59] sm:$0x1] %v2890_v3  ;;  %405 = vst [vmem:[#allocation2 + $0x71] sm:$0x1] %v2890_v3  ;;  %667 = vmatprep.subr.mxu0 %v2890_v3  ;;  %2581 = vmatprep.subr.mxu1 %v2366_v13  ;;  %v2332_v29 = vld [vmem:[%s4447_s3 + $0x1b8] sm:$0xff]  ;;  %v2363_v33 = vld [vmem:[%s4447_s3 + $0x2b0] sm:$0xff]  ;;  %v316_v36 = vadd.f32 %v3043_v16, %v278_v28  ;;  %v280_v37 = vmul.f32 %v3037_v15, %v242_v31 }
  0x19   : > { %406 = vst [vmem:[#allocation2 + $0x89] sm:$0x1] %v2890_v3  ;;  %407 = vst [vmem:[#allocation2 + $0xa1] sm:$0x1] %v2890_v3  ;;  %668 = vmatpush1.msra.mxu0 %v2334_v14  ;;  %2582 = vmatpush3.msra.mxu1 %v2366_v13  ;;  %v3074_v34 = vmax.f32 %v314_v26, 0.0  ;;  %v3076_v35 = vmax.f32 %v315_v27, 0.0  ;;  %v317_v39 = vadd.f32 %v3043_v16, %v279_v30 }
  0x1a   : > { %408 = vst [vmem:[#allocation2 + $0xb9] sm:$0x1] %v2890_v3  ;;  %409 = vst [vmem:[#allocation2 + $0xd1] sm:$0x1] %v2890_v3  ;;  %669 = vmatprep.subr.mxu0 %v2890_v3  ;;  %2583 = vmatprep.subr.mxu1 %v2365_v19  ;;  %v2331_v38 = vld [vmem:[%s4447_s3 + $0x1b0] sm:$0xff]  ;;  %v281_v40 = vmul.f32 %v3037_v15, %v243_v32  ;;  %v245_v42 = vld [vmem:[%s3022_s23 + $0x38] sm:$0xff]  ;;  %v318_v45 = vadd.f32 %v3043_v16, %v280_v37 }
  0x1b   : > { %410 = vst [vmem:[#allocation2 + $0xe9] sm:$0x1] %v2890_v3  ;;  %411 = vst [vmem:[#allocation2 + $0x101] sm:$0x1] %v2890_v3  ;;  %670 = vmatpush1.msra.mxu0 %v2333_v22  ;;  %2584 = vmatpush3.msra.mxu1 %v2365_v19  ;;  %v244_v41 = vld [vmem:[%s3022_s23 + $0x30] sm:$0xff]  ;;  %v2362_v43 = vld [vmem:[%s4447_s3 + $0x2a8] sm:$0xff]  ;;  %v283_v47 = vmul.f32 %v3037_v15, %v245_v42 }
  0x1c   : > { %412 = vst [vmem:[#allocation2 + $0x119] sm:$0x1] %v2890_v3  ;;  %413 = vst [vmem:[#allocation2 + $0x131] sm:$0x1] %v2890_v3  ;;  %671 = vmatprep.subr.mxu0 %v2890_v3  ;;  %2585 = vmatprep.subr.mxu1 %v2364_v25  ;;  %v3093_v44 = vmax.f32 %v316_v36, 0.0  ;;  %v282_v46 = vmul.f32 %v3037_v15, %v244_v41  ;;  %v2330_v48 = vld [vmem:[%s4447_s3 + $0x1a8] sm:$0xff]  ;;  %v319_v50 = vadd.f32 %v3043_v16, %v281_v40 }
  0x1d   : > { %414 = vst [vmem:[#allocation2 + $0x149] sm:$0x1] %v2890_v3  ;;  %415 = vst [vmem:[#allocation2 + $0x161] sm:$0x1] %v2890_v3  ;;  %672 = vmatpush1.msra.mxu0 %v2332_v29  ;;  %2586 = vmatpush3.msra.mxu1 %v2364_v25  ;;  %v3102_v49 = vmax.f32 %v317_v39, 0.0  ;;  %v246_v51 = vld [vmem:[%s3022_s23 + $0x40] sm:$0xff]  ;;  %v321_v56 = vadd.f32 %v3043_v16, %v283_v47 }
  0x1e   : > { %416 = vst [vmem:[#allocation2 + $0x179] sm:$0x1] %v2890_v3  ;;  %417 = vst [vmem:[#allocation2 + $0x191] sm:$0x1] %v2890_v3  ;;  %673 = vmatprep.subr.mxu0 %v2890_v3  ;;  %2587 = vmatprep.subr.mxu1 %v2363_v33  ;;  %v247_v52 = vld [vmem:[%s3022_s23 + $0x48] sm:$0xff]  ;;  %v2361_v53 = vld [vmem:[%s4447_s3 + $0x2a0] sm:$0xff]  ;;  %v320_v55 = vadd.f32 %v3043_v16, %v282_v46  ;;  %v284_v57 = vmul.f32 %v3037_v15, %v246_v51 }
  0x1f   : > { %418 = vst [vmem:[#allocation2 + $0x19] sm:$0xff] %v3074_v34  ;;  %419 = vst [vmem:[#allocation2 + $0x21] sm:$0xff] %v3076_v35  ;;  %674 = vmatpush1.msra.mxu0 %v2331_v38  ;;  %2588 = vmatpush3.msra.mxu1 %v2363_v33  ;;  %v3111_v54 = vmax.f32 %v318_v45, 0.0  ;;  %v2329_v58 = vld [vmem:[%s4447_s3 + $0x1a0] sm:$0xff]  ;;  %v3121_v59 = vmax.f32 %v319_v50, 0.0  ;;  %v285_v60 = vmul.f32 %v3037_v15, %v247_v52  ;;  %v248_v61 = vld [vmem:[%s3022_s23 + $0x50] sm:$0xff] }
  0x20   : > { %420 = vst [vmem:[#allocation2 + $0x31] sm:$0xff] %v3093_v44  ;;  %675 = vmatprep.subr.mxu0 %v2890_v3  ;;  %2589 = vmatprep.subr.mxu1 %v2362_v43  ;;  %421 = vst [vmem:[#allocation2 + $0x39] sm:$0xff] %v3102_v49  ;;  %v249_v62 = vld [vmem:[%s3022_s23 + $0x58] sm:$0xff]  ;;  %v3130_v0 = vmax.f32 %v320_v55, 0.0  ;;  %v3132_v1 = vmax.f32 %v321_v56, 0.0  ;;  %v322_v2 = vadd.f32 %v3043_v16, %v284_v57  ;;  %v250_v8 = vld [vmem:[%s3022_s23 + $0x60] sm:$0xff] }
  0x21   : > { %676 = vmatpush1.msra.mxu0 %v2330_v48  ;;  %2590 = vmatpush3.msra.mxu1 %v2362_v43  ;;  %v2360_v63 = vld [vmem:[%s4447_s3 + $0x298] sm:$0xff]  ;;  %422 = vst [vmem:[#allocation2 + $0x49] sm:$0xff] %v3111_v54  ;;  %v286_v4 = vmul.f32 %v3037_v15, %v248_v61  ;;  %423 = vst [vmem:[#allocation2 + $0x51] sm:$0xff] %v3121_v59  ;;  %v323_v6 = vadd.f32 %v3043_v16, %v285_v60  ;;  %v251_v9 = vld [vmem:[%s3022_s23 + $0x68] sm:$0xff]  ;;  %s2322_s12 = sshll.u32 %s4483_s19, 1 }
  0x22   : > { %677 = vmatprep.subr.mxu0 %v2890_v3  ;;  %2591 = vmatprep.subr.mxu1 %v2361_v53  ;;  %v2328_v5 = vld [vmem:[%s4447_s3 + $0x198] sm:$0xff]  ;;  %v287_v7 = vmul.f32 %v3037_v15, %v249_v62  ;;  %v2359_v10 = vld [vmem:[%s4447_s3 + $0x290] sm:$0xff]  ;;  %424 = vst [vmem:[#allocation2 + $0x61] sm:$0xff] %v3130_v0  ;;  %425 = vst [vmem:[#allocation2 + $0x69] sm:$0xff] %v3132_v1  ;;  %v3150_v11 = vmax.f32 %v322_v2, 0.0  ;;  %v288_v13 = vmul.f32 %v3037_v15, %v250_v8  ;;  %s235_s13 = scalar_lea.vmem %s4449_s5, %s2322_s12 }
  0x23   : > { %678 = vmatpush1.msra.mxu0 %v2329_v58  ;;  %2592 = vmatpush3.msra.mxu1 %v2361_v53  ;;  %v324_v12 = vadd.f32 %v3043_v16, %v286_v4  ;;  %v289_v14 = vmul.f32 %v3037_v15, %v251_v9  ;;  %v2327_v17 = vld [vmem:[%s4447_s3 + $0x190] sm:$0xff]  ;;  %v3159_v18 = vmax.f32 %v323_v6, 0.0  ;;  %v2358_v21 = vld [vmem:[%s4447_s3 + $0x288] sm:$0xff]  ;;  %v253_v25 = vld [vmem:[%s3022_s23 + $0x78] sm:$0xff] }
  0x24   : > { %679 = vmatprep.subr.mxu0 %v2890_v3  ;;  %2593 = vmatprep.subr.mxu1 %v2360_v63  ;;  %v325_v19 = vadd.f32 %v3043_v16, %v287_v7  ;;  %v252_v20 = vld [vmem:[%s3022_s23 + $0x70] sm:$0xff]  ;;  %426 = vst [vmem:[#allocation2 + $0x79] sm:$0xff] %v3150_v11  ;;  %v326_v23 = vadd.f32 %v3043_v16, %v288_v13  ;;  %v2326_v27 = vld [vmem:[%s4447_s3 + $0x188] sm:$0xff]  ;;  %v254_v30 = vld [vmem:[%s3022_s23 + $0x80] sm:$0xff] }
  0x25   : > { %680 = vmatpush1.msra.mxu0 %v2328_v5  ;;  %2594 = vmatpush3.msra.mxu1 %v2360_v63  ;;  %v3167_v22 = vmax.f32 %v324_v12, 0.0  ;;  %v327_v24 = vadd.f32 %v3043_v16, %v289_v14  ;;  %v290_v26 = vmul.f32 %v3037_v15, %v252_v20  ;;  %427 = vst [vmem:[#allocation2 + $0x81] sm:$0xff] %v3159_v18  ;;  %v2357_v31 = vld [vmem:[%s4447_s3 + $0x280] sm:$0xff]  ;;  %v255_v37 = vld [vmem:[%s3022_s23 + $0x88] sm:$0xff]  ;;  %v256_v46 = vld [vmem:[%s3022_s23 + $0x90] sm:$0xff] }
  0x26   : > { %681 = vmatprep.subr.mxu0 %v2890_v3  ;;  %2595 = vmatprep.subr.mxu1 %v2359_v10  ;;  %v3178_v28 = vmax.f32 %v325_v19, 0.0  ;;  %v291_v29 = vmul.f32 %v3037_v15, %v253_v25  ;;  %v3186_v32 = vmax.f32 %v326_v23, 0.0  ;;  %v292_v38 = vmul.f32 %v3037_v15, %v254_v30  ;;  %v2325_v39 = vld [vmem:[%s4447_s3 + $0x180] sm:$0xff]  ;;  %v257_v51 = vld [vmem:[%s3022_s23 + $0x98] sm:$0xff]  ;;  %v259_v62 = vld [vmem:[%s3022_s23 + $0xa8] sm:$0xff] }
  0x27   : > { %682 = vmatpush1.msra.mxu0 %v2327_v17  ;;  %2596 = vmatpush3.msra.mxu1 %v2359_v10  ;;  %428 = vst [vmem:[#allocation2 + $0x91] sm:$0xff] %v3167_v22  ;;  %v3188_v33 = vmax.f32 %v327_v24, 0.0  ;;  %v328_v36 = vadd.f32 %v3043_v16, %v290_v26  ;;  %v293_v41 = vmul.f32 %v3037_v15, %v255_v37  ;;  %v524_v42 = vld [vmem:[#allocation2 + $0x1a] sm:$0xff]  ;;  %v525_v47 = vld [vmem:[#allocation2 + $0x22] sm:$0xff]  ;;  %v2355_v63 = vld [vmem:[%s4447_s3 + $0x270] sm:$0xff] }
  0x28   : > { %683 = vmatprep.subr.mxu0 %v2890_v3  ;;  %2597 = vmatprep.subr.mxu1 %v2358_v21  ;;  %429 = vst [vmem:[#allocation2 + $0x99] sm:$0xff] %v3178_v28  ;;  %v329_v40 = vadd.f32 %v3043_v16, %v291_v29  ;;  %430 = vst [vmem:[#allocation2 + $0xa9] sm:$0xff] %v3186_v32  ;;  %v330_v45 = vadd.f32 %v3043_v16, %v292_v38  ;;  %v2356_v53 = vld [vmem:[%s4447_s3 + $0x278] sm:$0xff]  ;;  %v258_v61 = vld [vmem:[%s3022_s23 + $0xa0] sm:$0xff] }
  0x29   : > { %684 = vmatpush1.msra.mxu0 %v2326_v27  ;;  %2598 = vmatpush3.msra.mxu1 %v2358_v21  ;;  %431 = vst [vmem:[#allocation2 + $0xb1] sm:$0xff] %v3188_v33  ;;  %v3202_v43 = vmax.f32 %v328_v36, 0.0  ;;  %v331_v50 = vadd.f32 %v3043_v16, %v293_v41  ;;  %v294_v52 = vmul.f32 %v3037_v15, %v256_v46  ;;  %v573_v55 = vld [vmem:[%s4447_s3 + $0x78] sm:$0xff]  ;;  %v572_v7 = vld [vmem:[%s4447_s3 + $0x70] sm:$0xff]  ;;  %v2354_v20 = vld [vmem:[%s4447_s3 + $0x268] sm:$0xff] }
  0x2a   : > { %685 = vmatprep.subr.mxu0 %v2890_v3  ;;  %2599 = vmatprep.subr.mxu1 %v2357_v31  ;;  %v3207_v48 = vmax.f32 %v329_v40, 0.0  ;;  %v3219_v56 = vmax.f32 %v330_v45, 0.0  ;;  %v295_v57 = vmul.f32 %v3037_v15, %v257_v51  ;;  %v526_v2 = vld [vmem:[#allocation2 + $0x32] sm:$0xff]  ;;  %v296_v5 = vmul.f32 %v3037_v15, %v258_v61  ;;  %v527_v12 = vld [vmem:[#allocation2 + $0x3a] sm:$0xff]  ;;  %v571_v21 = vld [vmem:[%s4447_s3 + $0x68] sm:$0xff] }
  0x2b   : > { %686 = vmatpush1.msra.mxu0 %v2325_v39  ;;  %2600 = vmatpush3.msra.mxu1 %v2357_v31  ;;  %432 = vst [vmem:[#allocation2 + $0xc1] sm:$0xff] %v3202_v43  ;;  %v3224_v58 = vmax.f32 %v331_v50, 0.0  ;;  %v332_v60 = vadd.f32 %v3043_v16, %v294_v52  ;;  %v297_v6 = vmul.f32 %v3037_v15, %v259_v62  ;;  %v260_v9 = vld [vmem:[%s3022_s23 + $0xb0] sm:$0xff]  ;;  %v261_v10 = vld [vmem:[%s3022_s23 + $0xb8] sm:$0xff]  ;;  %v262_v27 = vld [vmem:[%s3022_s23 + $0xc0] sm:$0xff] }
  0x2c   : > { %2601 = vmatprep.mubr.f32.mxu1 %v524_v42  ;;  %687 = vmatprep.subr.mxu0 %v2890_v3  ;;  %433 = vst [vmem:[#allocation2 + $0xc9] sm:$0xff] %v3207_v48  ;;  %434 = vst [vmem:[#allocation2 + $0xd9] sm:$0xff] %v3219_v56  ;;  %v333_v4 = vadd.f32 %v3043_v16, %v295_v57  ;;  %v334_v14 = vadd.f32 %v3043_v16, %v296_v5  ;;  %v263_v29 = vld [vmem:[%s3022_s23 + $0xc8] sm:$0xff]  ;;  %v2353_v30 = vld [vmem:[%s4447_s3 + $0x260] sm:$0xff] }
  0x2d   : > { %2602 = vmatmul.mubr.f32.vlgmr.msra.gmra.mxu1 %v525_v47  ;;  %1105 = vmatprep.subr.mxu1 %v2890_v3  ;;  %435 = vst [vmem:[#allocation2 + $0xe1] sm:$0xff] %v3224_v58  ;;  %v3241_v8 = vmax.f32 %v332_v60, 0.0  ;;  %v335_v17 = vadd.f32 %v3043_v16, %v297_v6  ;;  %v298_v19 = vmul.f32 %v3037_v15, %v260_v9  ;;  %v528_v31 = vld [vmem:[#allocation2 + $0x4a] sm:$0xff]  ;;  %v570_v39 = vld [vmem:[%s4447_s3 + $0x60] sm:$0xff]  ;;  %v529_v42 = vld [vmem:[#allocation2 + $0x52] sm:$0xff] }
  0x2e   : > { %688 = vmatpush2.msra.mxu0 %v2356_v53  ;;  %1106 = vmatpush1.msra.mxu1 %v573_v55  ;;  %v3247_v13 = vmax.f32 %v333_v4, 0.0  ;;  %v299_v23 = vmul.f32 %v3037_v15, %v261_v10  ;;  %v3262_v24 = vmax.f32 %v334_v14, 0.0  ;;  %v300_v37 = vmul.f32 %v3037_v15, %v262_v27  ;;  %v264_v41 = vld [vmem:[%s3022_s23 + $0xd0] sm:$0xff]  ;;  %v265_v50 = vld [vmem:[%s3022_s23 + $0xd8] sm:$0xff]  ;;  %v266_v62 = vld [vmem:[%s3022_s23 + $0xe0] sm:$0xff] }
  0x2f   : > { %689 = vmatprep.subr.mxu0 %v2890_v3  ;;  %1107 = vmatprep.subr.mxu1 %v2890_v3  ;;  %436 = vst [vmem:[#allocation2 + $0xf1] sm:$0xff] %v3241_v8  ;;  %v3264_v25 = vmax.f32 %v335_v17, 0.0  ;;  %v336_v26 = vadd.f32 %v3043_v16, %v298_v19  ;;  %v301_v38 = vmul.f32 %v3037_v15, %v263_v29  ;;  %v2352_v52 = vld [vmem:[%s4447_s3 + $0x258] sm:$0xff]  ;;  %v3313_v4 = vld [vmem:[#allocation2 + $0x62] sm:$0xff]  ;;  %v268_v9 = vld [vmem:[%s3022_s23 + $0xf0] sm:$0xff] }
  0x30   : > { %690 = vmatpush2.msra.mxu0 %v2355_v63  ;;  %2604 = vmatprep.mubr.f32.mxu1 %v526_v2  ;;  %437 = vst [vmem:[#allocation2 + $0xf9] sm:$0xff] %v3247_v13  ;;  %v337_v36 = vadd.f32 %v3043_v16, %v299_v23  ;;  %438 = vst [vmem:[#allocation2 + $0x109] sm:$0xff] %v3262_v24  ;;  %v338_v46 = vadd.f32 %v3043_v16, %v300_v37  ;;  %v569_v53 = vld [vmem:[%s4447_s3 + $0x58] sm:$0xff]  ;;  %v267_v63 = vld [vmem:[%s3022_s23 + $0xe8] sm:$0xff] }
  0x31   : > { %1108 = vmatpush1.msra.mxu1 %v572_v7  ;;  %691 = vmatprep.subr.mxu0 %v2890_v3  ;;  %439 = vst [vmem:[#allocation2 + $0x111] sm:$0xff] %v3264_v25  ;;  %v3281_v40 = vmax.f32 %v336_v26, 0.0  ;;  %v339_v47 = vadd.f32 %v3043_v16, %v301_v38  ;;  %v302_v51 = vmul.f32 %v3037_v15, %v264_v41  ;;  %v2351_v2 = vld [vmem:[%s4447_s3 + $0x250] sm:$0xff]  ;;  %v269_v14 = vld [vmem:[%s3022_s23 + $0xf8] sm:$0xff]  ;;  %v2350_v27 = vld [vmem:[%s4447_s3 + $0x248] sm:$0xff] }
  0x32   : > { %2605 = vmatmul.mubr.f32.gmra.mxu1 %v527_v12  ;;  %1109 = vmatprep.subr.mxu1 %v2890_v3  ;;  %v3286_v45 = vmax.f32 %v337_v36, 0.0  ;;  %v303_v55 = vmul.f32 %v3037_v15, %v265_v50  ;;  %v3302_v57 = vmax.f32 %v338_v46, 0.0  ;;  %v304_v6 = vmul.f32 %v3037_v15, %v266_v62  ;;  %v568_v10 = vld [vmem:[%s4447_s3 + $0x50] sm:$0xff]  ;;  %v567_v29 = vld [vmem:[%s4447_s3 + $0x48] sm:$0xff]  ;;  %v2349_v37 = vld [vmem:[%s4447_s3 + $0x240] sm:$0xff] }
  0x33   : > { %692 = vmatpush2.msra.mxu0 %v2354_v20  ;;  %1110 = vmatpush1.msra.mxu1 %v571_v21  ;;  %440 = vst [vmem:[#allocation2 + $0x121] sm:$0xff] %v3281_v40  ;;  %v3304_v60 = vmax.f32 %v339_v47, 0.0  ;;  %v340_v61 = vadd.f32 %v3043_v16, %v302_v51  ;;  %v305_v7 = vmul.f32 %v3037_v15, %v267_v63  ;;  %v3330_v19 = vld [vmem:[#allocation2 + $0x6a] sm:$0xff]  ;;  %v3362_v38 = vld [vmem:[#allocation2 + $0x7a] sm:$0xff]  ;;  %v3392_v51 = vld [vmem:[#allocation2 + $0x92] sm:$0xff] }
  0x34   : > { %693 = vmatprep.subr.mxu0 %v2890_v3  ;;  %1111 = vmatprep.subr.mxu1 %v2890_v3  ;;  %441 = vst [vmem:[#allocation2 + $0x129] sm:$0xff] %v3286_v45  ;;  %v341_v5 = vadd.f32 %v3043_v16, %v303_v55  ;;  %442 = vst [vmem:[#allocation2 + $0x139] sm:$0xff] %v3302_v57  ;;  %v306_v17 = vmul.f32 %v3037_v15, %v268_v9  ;;  %v566_v41 = vld [vmem:[%s4447_s3 + $0x40] sm:$0xff]  ;;  %v2348_v46 = vld [vmem:[%s4447_s3 + $0x238] sm:$0xff] }
  0x35   : > { %694 = vmatpush2.msra.mxu0 %v2353_v30  ;;  %2607 = vmatprep.mubr.f32.mxu1 %v528_v31  ;;  %443 = vst [vmem:[#allocation2 + $0x141] sm:$0xff] %v3304_v60  ;;  %v3324_v12 = vmax.f32 %v340_v61, 0.0  ;;  %v342_v21 = vadd.f32 %v3043_v16, %v304_v6  ;;  %v343_v23 = vadd.f32 %v3043_v16, %v305_v7  ;;  %v565_v47 = vld [vmem:[%s4447_s3 + $0x38] sm:$0xff]  ;;  %v2347_v50 = vld [vmem:[%s4447_s3 + $0x230] sm:$0xff]  ;;  %v2346_v55 = vld [vmem:[%s4447_s3 + $0x228] sm:$0xff] }
  0x36   : > { %1112 = vmatpush1.msra.mxu1 %v570_v39  ;;  %695 = vmatprep.subr.mxu0 %v2890_v3  ;;  %v3332_v20 = vmax.f32 %v341_v5, 0.0  ;;  %v307_v26 = vmul.f32 %v3037_v15, %v269_v14  ;;  %v3346_v30 = vadd.f32 %v3043_v16, %v306_v17  ;;  %v563_v61 = vld [vmem:[%s4447_s3 + $0x28] sm:$0xff]  ;;  %v2345_v62 = vld [vmem:[%s4447_s3 + $0x220] sm:$0xff]  ;;  %v3421_v5 = vld [vmem:[#allocation2 + $0xb2] sm:$0xff] }
  0x37   : > { %2608 = vmatmul.mubr.f32.gmra.mxu1 %v529_v42  ;;  %1113 = vmatprep.subr.mxu1 %v2890_v3  ;;  %444 = vst [vmem:[#allocation2 + $0x151] sm:$0xff] %v3324_v12  ;;  %v3350_v15 = vmax.f32 %v342_v21, 0.0  ;;  %v3352_v31 = vmax.f32 %v343_v23, 0.0  ;;  %v3373_v42 = vld [vmem:[#allocation2 + $0x82] sm:$0xff]  ;;  %v3414_v63 = vld [vmem:[#allocation2 + $0xaa] sm:$0xff]  ;;  %v2344_v6 = vld [vmem:[%s4447_s3 + $0x218] sm:$0xff] }
  0x38   : > { %696 = vmatpush2.msra.mxu0 %v2352_v52  ;;  %1114 = vmatpush1.msra.mxu1 %v569_v53  ;;  %445 = vst [vmem:[#allocation2 + $0x159] sm:$0xff] %v3332_v20  ;;  %v3355_v36 = vadd.f32 %v3043_v16, %v307_v26  ;;  %v4451_v39 = vmax.f32 %v3346_v30, 0.0  ;;  %v564_v52 = vld [vmem:[%s4447_s3 + $0x30] sm:$0xff]  ;;  %v3399_v53 = vld [vmem:[#allocation2 + $0x9a] sm:$0xff]  ;;  %v2342_v21 = vld [vmem:[%s4447_s3 + $0x208] sm:$0xff] }
  0x39   : > { %697 = vmatprep.subr.mxu0 %v2890_v3  ;;  %1115 = vmatprep.subr.mxu1 %v2890_v3  ;;  %446 = vst [vmem:[#allocation2 + $0x169] sm:$0xff] %v3350_v15  ;;  %447 = vst [vmem:[#allocation2 + $0x171] sm:$0xff] %v3352_v31  ;;  %v561_v7 = vld [vmem:[%s4447_s3 + $0x18] sm:$0xff]  ;;  %v2343_v9 = vld [vmem:[%s4447_s3 + $0x210] sm:$0xff] }
  0x3a   : > { %698 = vmatpush2.msra.mxu0 %v2351_v2  ;;  %2610 = vmatprep.mubr.f32.mxu1 %v3313_v4  ;;  %v4450_v16 = vmax.f32 %v3355_v36, 0.0  ;;  %448 = vst [vmem:[#allocation2 + $0x181] sm:$0xff] %v4451_v39  ;;  %v562_v2 = vld [vmem:[%s4447_s3 + $0x20] sm:$0xff]  ;;  %v560_v14 = vld [vmem:[%s4447_s3 + $0x10] sm:$0xff]  ;;  %v559_v23 = vld [vmem:[%s4447_s3 + $0x8] sm:$0xff] }
  0x3b   : > { %1116 = vmatpush1.msra.mxu1 %v568_v10  ;;  %699 = vmatprep.subr.mxu0 %v2890_v3  ;;  %v3436_v10 = vld [vmem:[#allocation2 + $0xc2] sm:$0xff]  ;;  %v3443_v17 = vld [vmem:[#allocation2 + $0xca] sm:$0xff] }
  0x3c   : > { %2611 = vmatmul.mubr.f32.gmra.mxu1 %v3330_v19  ;;  %1117 = vmatprep.subr.mxu1 %v2890_v3  ;;  %449 = vst [vmem:[#allocation2 + $0x189] sm:$0xff] %v4450_v16  ;;  %v2341_v26 = vld [vmem:[%s4447_s3 + $0x200] sm:$0xff]  ;;  %v3560_v39 = vld [vmem:[#allocation2 + $0x50] sm:$0xff] }
  0x3d   : > { %700 = vmatpush2.msra.mxu0 %v2350_v27  ;;  %1118 = vmatpush1.msra.mxu1 %v567_v29  ;;  %v3458_v27 = vld [vmem:[#allocation2 + $0xda] sm:$0xff] }
  0x3e   : > { %701 = vmatprep.subr.mxu0 %v2890_v3  ;;  %1119 = vmatprep.subr.mxu1 %v2890_v3  ;;  %v558_v29 = vld [vmem:[%s4447_s3] sm:$0xff] }
  0x3f   : > { %702 = vmatpush2.msra.mxu0 %v2349_v37  ;;  %2613 = vmatprep.mubr.f32.mxu1 %v3362_v38  ;;  %v3465_v37 = vld [vmem:[#allocation2 + $0x18] sm:$0xff] }
  0x40   : > { %1120 = vmatpush1.msra.mxu1 %v566_v41  ;;  %703 = vmatprep.subr.mxu0 %v2890_v3  ;;  %v3467_v41 = vld [vmem:[#allocation2 + $0xe2] sm:$0xff]  ;;  %v3553_v16 = vld [vmem:[#allocation2 + $0x152] sm:$0xff] }
  0x41   : > { %2614 = vmatmul.mubr.f32.gmra.mxu1 %v3373_v42  ;;  %1121 = vmatprep.subr.mxu1 %v2890_v3  ;;  %4467 = vst [vmem:[#allocation8_spill] sm:$0xff] %v3553_v16 }
  0x42   : > { %704 = vmatpush2.msra.mxu0 %v2348_v46  ;;  %1122 = vmatpush1.msra.mxu1 %v565_v47  ;;  %v589_v46 = vld [vmem:[%s4447_s3 + $0xf8] sm:$0xff] }
  0x43   : > { %705 = vmatprep.subr.mxu0 %v2890_v3  ;;  %1123 = vmatprep.subr.mxu1 %v2890_v3  ;;  %v3474_v47 = vld [vmem:[#allocation2 + $0xf2] sm:$0xff] }
  0x44   : > { %706 = vmatpush2.msra.mxu0 %v2347_v50  ;;  %2616 = vmatprep.mubr.f32.mxu1 %v3392_v51  ;;  %v3481_v50 = vld [vmem:[%s4447_s3 + $0x178] sm:$0xff] }
  0x45   : > { %1124 = vmatpush1.msra.mxu1 %v564_v52  ;;  %707 = vmatprep.subr.mxu0 %v2890_v3  ;;  %v588_v52 = vld [vmem:[%s4447_s3 + $0xf0] sm:$0xff] }
  0x46   : > { %2617 = vmatmul.mubr.f32.gmra.mxu1 %v3399_v53  ;;  %1125 = vmatprep.subr.mxu1 %v2890_v3 }
  0x47   : > { %708 = vmatpush2.msra.mxu0 %v2346_v55  ;;  %1126 = vmatpush1.msra.mxu1 %v563_v61  ;;  %v3488_v55 = vld [vmem:[#allocation2 + $0x20] sm:$0xff] }
  0x48   : > { %709 = vmatprep.subr.mxu0 %v2890_v3  ;;  %1127 = vmatprep.subr.mxu1 %v2890_v3  ;;  %v3491_v61 = vld [vmem:[#allocation2 + $0xfa] sm:$0xff] }
  0x49   : > { %710 = vmatpush2.msra.mxu0 %v2345_v62  ;;  %2619 = vmatprep.mubr.f32.mxu1 %v3414_v63  ;;  %v587_v62 = vld [vmem:[%s4447_s3 + $0xe8] sm:$0xff] }
  0x4a   : > { %1128 = vmatpush1.msra.mxu1 %v562_v2  ;;  %711 = vmatprep.subr.mxu0 %v2890_v3  ;;  %v3499_v2 = vld [vmem:[#allocation2 + $0x10a] sm:$0xff] }
  0x4b   : > { %2620 = vmatmul.mubr.f32.gmra.mxu1 %v3421_v5  ;;  %1129 = vmatprep.subr.mxu1 %v2890_v3 }
  0x4c   : > { %712 = vmatpush2.msra.mxu0 %v2344_v6  ;;  %1130 = vmatpush1.msra.mxu1 %v561_v7  ;;  %v586_v6 = vld [vmem:[%s4447_s3 + $0xe0] sm:$0xff]  ;;  %v3506_v7 = vld [vmem:[#allocation2 + $0x30] sm:$0xff] }
  0x4d   : > { %713 = vmatprep.subr.mxu0 %v2890_v3  ;;  %1131 = vmatprep.subr.mxu1 %v2890_v3 }
  0x4e   : > { %714 = vmatpush2.msra.mxu0 %v2343_v9  ;;  %2622 = vmatprep.mubr.f32.mxu1 %v3436_v10  ;;  %v3509_v9 = vld [vmem:[#allocation2 + $0x112] sm:$0xff] }
  0x4f   : > { %1132 = vmatpush1.msra.mxu1 %v560_v14  ;;  %715 = vmatprep.subr.mxu0 %v2890_v3  ;;  %4462 = vst [vmem:[#allocation3_spill] sm:$0xff] %v3509_v9  ;;  %v585_v14 = vld [vmem:[%s4447_s3 + $0xd8] sm:$0xff] }
  0x50   : > { %2623 = vmatmul.mubr.f32.gmra.mxu1 %v3443_v17  ;;  %1133 = vmatprep.subr.mxu1 %v2890_v3 }
  0x51   : > { %716 = vmatpush2.msra.mxu0 %v2342_v21  ;;  %1134 = vmatpush1.msra.mxu1 %v559_v23  ;;  %v3517_v21 = vld [vmem:[#allocation2 + $0x122] sm:$0xff]  ;;  %v584_v23 = vld [vmem:[%s4447_s3 + $0xd0] sm:$0xff] }
  0x52   : > { %717 = vmatprep.subr.mxu0 %v2890_v3  ;;  %1135 = vmatprep.subr.mxu1 %v2890_v3  ;;  %4463 = vst [vmem:[#allocation4_spill] sm:$0xff] %v3517_v21 }
  0x53   : > { %718 = vmatpush2.msra.mxu0 %v2341_v26  ;;  %719 = vmatprep.mubr.f32.mxu0 %v3074_v34  ;;  %v3524_v26 = vld [vmem:[#allocation2 + $0x38] sm:$0xff] }
  0x54   : > { %2625 = vmatprep.mubr.f32.mxu1 %v3458_v27  ;;  %1136 = vmatpush1.msra.mxu1 %v558_v29  ;;  %v3527_v29 = vld [vmem:[#allocation2 + $0x12a] sm:$0xff] }
  0x55   : > { %720 = vmatmul.mubr.f32.vlgmr.msra.gmra.mxu0 %v3465_v37  ;;  %2626 = vmatmul.mubr.f32.gmra.mxu1 %v3467_v41  ;;  %4464 = vst [vmem:[#allocation5_spill] sm:$0xff] %v3527_v29 }
  0x56   : > { %1137 = vmatprep.subr.mxu1 %v2890_v3  ;;  %724 = vmatprep.mubr.f32.mxu0 %v3076_v35 }
  0x57   : > { %1138 = vmatpush2.msra.mxu1 %v589_v46  ;;  %2628 = vmatprep.mubr.f32.mxu1 %v3474_v47  ;;  %v583_v46 = vld [vmem:[%s4447_s3 + $0xc8] sm:$0xff] }
  0x58   : > { %1139 = vmatprep.subr.mxu1 %v2890_v3  ;;  %2649 = vmatprep.subr.mxu0 %v3481_v50 }
  0x59   : > { %1140 = vmatpush2.msra.mxu1 %v588_v52  ;;  %725 = vmatmul.mubr.f32.gmra.mxu0 %v3488_v55  ;;  %v3535_v52 = vld [vmem:[#allocation2 + $0x13a] sm:$0xff] }
  0x5a   : > { %2629 = vmatmul.mubr.f32.gmra.mxu1 %v3491_v61  ;;  %1141 = vmatprep.subr.mxu1 %v2890_v3  ;;  %4465 = vst [vmem:[#allocation6_spill] sm:$0xff] %v3535_v52 }
  0x5b   : > { %1142 = vmatpush2.msra.mxu1 %v587_v62  ;;  %729 = vmatprep.mubr.f32.mxu0 %v3093_v44  ;;  %v582_v62 = vld [vmem:[%s4447_s3 + $0xc0] sm:$0xff] }
  0x5c   : > { %1143 = vmatprep.subr.mxu1 %v2890_v3  ;;  %2631 = vmatprep.mubr.f32.mxu1 %v3499_v2 }
  0x5d   : > { %1144 = vmatpush2.msra.mxu1 %v586_v6  ;;  %730 = vmatmul.mubr.f32.gmra.mxu0 %v3506_v7  ;;  %v3542_v6 = vld [vmem:[#allocation2 + $0x48] sm:$0xff] }
  0x5e   : > { %2632 = vmatmul.mubr.f32.gmra.mxu1 %v3509_v9  ;;  %1145 = vmatprep.subr.mxu1 %v2890_v3  ;;  %v3609_v9 = vld [vmem:[#allocation2 + $0x78] sm:$0xff] }
  0x5f   : > { %1146 = vmatpush2.msra.mxu1 %v585_v14  ;;  %734 = vmatprep.mubr.f32.mxu0 %v3102_v49  ;;  %v3545_v14 = vld [vmem:[#allocation2 + $0x142] sm:$0xff] }
  0x60   : > { %1147 = vmatprep.subr.mxu1 %v2890_v3  ;;  %2634 = vmatprep.mubr.f32.mxu1 %v3517_v21  ;;  %4466 = vst [vmem:[#allocation7_spill] sm:$0xff] %v3545_v14  ;;  %v3590_v21 = vld [vmem:[#allocation2] sm:$0xff] }
  0x61   : > { %1148 = vmatpush2.msra.mxu1 %v584_v23  ;;  %735 = vmatmul.mubr.f32.gmra.mxu0 %v3524_v26  ;;  %v581_v23 = vld [vmem:[%s4447_s3 + $0xb8] sm:$0xff] }
  0x62   : > { %2635 = vmatmul.mubr.f32.gmra.mxu1 %v3527_v29  ;;  %1149 = vmatprep.subr.mxu1 %v2890_v3  ;;  %v3578_v29 = vld [vmem:[#allocation2 + $0x60] sm:$0xff] }
  0x63   : > { %1150 = vmatpush2.msra.mxu1 %v583_v46  ;;  %739 = vmatprep.mubr.f32.mxu0 %v3111_v54  ;;  %v580_v46 = vld [vmem:[%s4447_s3 + $0xb0] sm:$0xff] }
  0x64   : > { %1151 = vmatprep.subr.mxu1 %v2890_v3  ;;  %2637 = vmatprep.mubr.f32.mxu1 %v3535_v52  ;;  %v3563_v52 = vld [vmem:[#allocation2 + $0x15a] sm:$0xff] }
  0x65   : > { %1152 = vmatpush2.msra.mxu1 %v582_v62  ;;  %740 = vmatmul.mubr.f32.gmra.mxu0 %v3542_v6  ;;  %4468 = vst [vmem:[#allocation9_spill] sm:$0xff] %v3563_v52  ;;  %v579_v62 = vld [vmem:[%s4447_s3 + $0xa8] sm:$0xff] }
  0x66   : > { %2638 = vmatmul.mubr.f32.gmra.mxu1 %v3545_v14  ;;  %1153 = vmatprep.subr.mxu1 %v2890_v3  ;;  %v3571_v14 = vld [vmem:[#allocation2 + $0x16a] sm:$0xff] }
  0x67   : > { %1154 = vmatpush2.msra.mxu1 %v581_v23  ;;  %744 = vmatprep.mubr.f32.mxu0 %v3121_v59  ;;  %4469 = vst [vmem:[#allocation10_spill] sm:$0xff] %v3571_v14  ;;  %v578_v23 = vld [vmem:[%s4447_s3 + $0xa0] sm:$0xff] }
  0x68   : > { %1155 = vmatprep.subr.mxu1 %v2890_v3  ;;  %2640 = vmatprep.mubr.f32.mxu1 %v3553_v16  ;;  %v3581_v16 = vld [vmem:[#allocation2 + $0x172] sm:$0xff] }
  0x69   : > { %1156 = vmatpush2.msra.mxu1 %v580_v46  ;;  %745 = vmatmul.mubr.f32.gmra.mxu0 %v3560_v39  ;;  %4470 = vst [vmem:[#allocation11_spill] sm:$0xff] %v3581_v16  ;;  %v577_v46 = vld [vmem:[%s4447_s3 + $0x98] sm:$0xff] }
  0x6a   : > { %2641 = vmatmul.mubr.f32.gmra.mxu1 %v3563_v52  ;;  %1157 = vmatprep.subr.mxu1 %v2890_v3  ;;  %v554_v52 = vld [vmem:[#allocation2 + $0x182] sm:$0xff] }
  0x6b   : > { %1158 = vmatpush2.msra.mxu1 %v579_v62  ;;  %749 = vmatprep.mubr.f32.mxu0 %v3130_v0  ;;  %v3596_v62 = vld [vmem:[#allocation2 + $0x68] sm:$0xff] }
  0x6c   : > { %1159 = vmatprep.subr.mxu1 %v2890_v3  ;;  %2643 = vmatprep.mubr.f32.mxu1 %v3571_v14  ;;  %v576_v3 = vld [vmem:[%s4447_s3 + $0x90] sm:$0xff] }
  0x6d   : > { %1160 = vmatpush2.msra.mxu1 %v578_v23  ;;  %750 = vmatmul.mubr.f32.gmra.mxu0 %v3578_v29  ;;  %v555_v14 = vld [vmem:[#allocation2 + $0x18a] sm:$0xff] }
  0x6e   : > { %2644 = vmatmul.mubr.f32.gmra.mxu1 %v3581_v16  ;;  %1161 = vmatprep.subr.mxu1 %v3590_v21  ;;  %v575_v23 = vld [vmem:[%s4447_s3 + $0x88] sm:$0xff] }
  0x6f   : > { %1162 = vmatpush2.msra.mxu1 %v577_v46  ;;  %754 = vmatprep.mubr.f32.mxu0 %v3132_v1  ;;  %v574_v46 = vld [vmem:[%s4447_s3 + $0x80] sm:$0xff] }
  0x70   : > { %1163 = vmatprep.subr.mxu1 %v3590_v21  ;;  %2646 = vmatprep.mubr.f32.mxu1 %v554_v52  ;;  %v486_v16 = vld [vmem:[#allocation2 + $0x1] sm:$0xff]  ;;  %v2388_v52 = vld [vmem:[%s4447_s3 + $0x378] sm:$0xff] }
  0x71   : > { %1164 = vmatpush2.msra.mxu1 %v576_v3  ;;  %755 = vmatmul.mubr.f32.gmra.mxu0 %v3596_v62  ;;  %v3623_v3 = vld [vmem:[#allocation2 + $0x80] sm:$0xff] }
  0x72   : > { %2647 = vmatmul.mubr.f32.gmra.mxu1 %v555_v14  ;;  %1165 = vmatprep.subr.mxu1 %v3590_v21  ;;  %v487_v14 = vld [vmem:[#allocation2 + $0x9] sm:$0xff] }
  0x73   : > { %1166 = vmatpush2.msra.mxu1 %v575_v23  ;;  %2650 = vmatpush3.msra.mxu0 %v3481_v50  ;;  %v604_v50 = vld [vmem:[%s4447_s3 + $0x170] sm:$0xff]  ;;  %v603_v23 = vld [vmem:[%s4447_s3 + $0x168] sm:$0xff] }
  0x74   : > { %1167 = vmatprep.subr.mxu1 %v3590_v21  ;;  %759 = vmatprep.mubr.f32.mxu0 %v3150_v11 }
  0x75   : > { %1168 = vmatpush2.msra.mxu1 %v574_v46  ;;  %1169 = vmatprep.mubr.f32.mxu1 %v486_v16  ;;  %v2387_v16 = vld [vmem:[%s4447_s3 + $0x370] sm:$0xff] }
  0x76   : > { %760 = vmatmul.mubr.f32.gmra.mxu0 %v3609_v9  ;;  %1170 = vmatmul.mubr.f32.vlgmr.msra.gmra.mxu1 %v3590_v21  ;;  %v3634_v46 = vld [vmem:[#allocation2 + $0x90] sm:$0xff] }
  0x77   : > { %1604 = vmatprep.subr.mxu1 %v3590_v21  ;;  %764 = vmatprep.mubr.f32.mxu0 %v3159_v18 }
  0x78   : > { %1605 = vmatpush1.msra.mxu1 %v2388_v52  ;;  %1174 = vmatprep.mubr.f32.mxu1 %v487_v14  ;;  %v2386_v52 = vld [vmem:[%s4447_s3 + $0x368] sm:$0xff]  ;;  %v2385_v14 = vld [vmem:[%s4447_s3 + $0x360] sm:$0xff] }
  0x79   : > { %2651 = vmatprep.subr.mxu0 %v604_v50  ;;  %1606 = vmatprep.subr.mxu1 %v3590_v21 }
  0x7a   : > { %765 = vmatmul.mubr.f32.gmra.mxu0 %v3623_v3  ;;  %1175 = vmatmul.mubr.f32.gmra.mxu1 %v3590_v21 }
  0x7b   : > { %2652 = vmatpush3.msra.mxu0 %v604_v50  ;;  %1607 = vmatpush1.msra.mxu1 %v2387_v16  ;;  %v3648_v50 = vld [vmem:[#allocation2 + $0x98] sm:$0xff] }
  0x7c   : > { %769 = vmatprep.mubr.f32.mxu0 %v3167_v22  ;;  %1179 = vmatprep.mubr.f32.mxu1 %v3074_v34  ;;  %v602_v34 = vld [vmem:[%s4447_s3 + $0x160] sm:$0xff]  ;;  %v601_v16 = vld [vmem:[%s4447_s3 + $0x158] sm:$0xff] }
  0x7d   : > { %1608 = vmatprep.subr.mxu1 %v3590_v21  ;;  %2653 = vmatprep.subr.mxu0 %v603_v23 }
  0x7e   : > { %770 = vmatmul.mubr.f32.gmra.mxu0 %v3634_v46  ;;  %1180 = vmatmul.mubr.f32.gmra.mxu1 %v3465_v37  ;;  %v2384_v37 = vld [vmem:[%s4447_s3 + $0x358] sm:$0xff] }
  0x7f   : > { %1609 = vmatpush1.msra.mxu1 %v2386_v52  ;;  %774 = vmatprep.mubr.f32.mxu0 %v3178_v28  ;;  %v2382_v52 = vld [vmem:[%s4447_s3 + $0x348] sm:$0xff] }
  0x80   : > { %1184 = vmatprep.mubr.f32.mxu1 %v3076_v35  ;;  %1610 = vmatprep.subr.mxu1 %v3590_v21  ;;  %v3662_v35 = vld [vmem:[#allocation2 + $0xa8] sm:$0xff] }
  0x81   : > { %2654 = vmatpush3.msra.mxu0 %v603_v23  ;;  %1611 = vmatpush1.msra.mxu1 %v2385_v14  ;;  %v600_v23 = vld [vmem:[%s4447_s3 + $0x150] sm:$0xff]  ;;  %v599_v14 = vld [vmem:[%s4447_s3 + $0x148] sm:$0xff] }
  0x82   : > { %775 = vmatmul.mubr.f32.gmra.mxu0 %v3648_v50  ;;  %1185 = vmatmul.mubr.f32.gmra.mxu1 %v3488_v55  ;;  %v2383_v55 = vld [vmem:[%s4447_s3 + $0x350] sm:$0xff] }
  0x83   : > { %779 = vmatprep.mubr.f32.mxu0 %v3186_v32  ;;  %1189 = vmatprep.mubr.f32.mxu1 %v3093_v44  ;;  %v3675_v44 = vld [vmem:[#allocation2 + $0xb0] sm:$0xff] }
  0x84   : > { %1612 = vmatprep.subr.mxu1 %v3590_v21  ;;  %2655 = vmatprep.subr.mxu0 %v602_v34 }
  0x85   : > { %1613 = vmatpush1.msra.mxu1 %v2384_v37  ;;  %2656 = vmatpush3.msra.mxu0 %v602_v34  ;;  %v2381_v34 = vld [vmem:[%s4447_s3 + $0x340] sm:$0xff] }
  0x86   : > { %780 = vmatmul.mubr.f32.gmra.mxu0 %v3662_v35  ;;  %1190 = vmatmul.mubr.f32.gmra.mxu1 %v3506_v7  ;;  %v598_v37 = vld [vmem:[%s4447_s3 + $0x140] sm:$0xff] }
  0x87   : > { %784 = vmatprep.mubr.f32.mxu0 %v3188_v33  ;;  %1194 = vmatprep.mubr.f32.mxu1 %v3102_v49  ;;  %v3688_v49 = vld [vmem:[#allocation2 + $0xc0] sm:$0xff] }
  0x88   : > { %1614 = vmatprep.subr.mxu1 %v3590_v21  ;;  %2657 = vmatprep.subr.mxu0 %v601_v16 }
  0x89   : > { %1615 = vmatpush1.msra.mxu1 %v2383_v55  ;;  %2658 = vmatpush3.msra.mxu0 %v601_v16  ;;  %v2380_v16 = vld [vmem:[%s4447_s3 + $0x338] sm:$0xff] }
  0x8a   : > { %785 = vmatmul.mubr.f32.gmra.mxu0 %v3675_v44  ;;  %1195 = vmatmul.mubr.f32.gmra.mxu1 %v3524_v26  ;;  %v597_v55 = vld [vmem:[%s4447_s3 + $0x138] sm:$0xff] }
  0x8b   : > { %789 = vmatprep.mubr.f32.mxu0 %v3202_v43  ;;  %1199 = vmatprep.mubr.f32.mxu1 %v3111_v54  ;;  %v3701_v54 = vld [vmem:[#allocation2 + $0xc8] sm:$0xff] }
  0x8c   : > { %1616 = vmatprep.subr.mxu1 %v3590_v21  ;;  %2659 = vmatprep.subr.mxu0 %v600_v23 }
  0x8d   : > { %1617 = vmatpush1.msra.mxu1 %v2382_v52  ;;  %2660 = vmatpush3.msra.mxu0 %v600_v23  ;;  %v2379_v23 = vld [vmem:[%s4447_s3 + $0x330] sm:$0xff] }
  0x8e   : > { %790 = vmatmul.mubr.f32.gmra.mxu0 %v3688_v49  ;;  %1200 = vmatmul.mubr.f32.gmra.mxu1 %v3542_v6  ;;  %v596_v52 = vld [vmem:[%s4447_s3 + $0x130] sm:$0xff] }
  0x8f   : > { %794 = vmatprep.mubr.f32.mxu0 %v3207_v48  ;;  %1204 = vmatprep.mubr.f32.mxu1 %v3121_v59  ;;  %v3714_v59 = vld [vmem:[#allocation2 + $0xd8] sm:$0xff] }
  0x90   : > { %1618 = vmatprep.subr.mxu1 %v3590_v21  ;;  %2661 = vmatprep.subr.mxu0 %v599_v14 }
  0x91   : > { %1619 = vmatpush1.msra.mxu1 %v2381_v34  ;;  %2662 = vmatpush3.msra.mxu0 %v599_v14  ;;  %v2378_v14 = vld [vmem:[%s4447_s3 + $0x328] sm:$0xff] }
  0x92   : > { %795 = vmatmul.mubr.f32.gmra.mxu0 %v3701_v54  ;;  %1205 = vmatmul.mubr.f32.gmra.mxu1 %v3560_v39  ;;  %v595_v34 = vld [vmem:[%s4447_s3 + $0x128] sm:$0xff] }
  0x93   : > { %799 = vmatprep.mubr.f32.mxu0 %v3219_v56  ;;  %1209 = vmatprep.mubr.f32.mxu1 %v3130_v0  ;;  %v3727_v0 = vld [vmem:[#allocation2 + $0xe0] sm:$0xff] }
  0x94   : > { %1620 = vmatprep.subr.mxu1 %v3590_v21  ;;  %2663 = vmatprep.subr.mxu0 %v598_v37 }
  0x95   : > { %1621 = vmatpush1.msra.mxu1 %v2380_v16  ;;  %2664 = vmatpush3.msra.mxu0 %v598_v37  ;;  %v2377_v37 = vld [vmem:[%s4447_s3 + $0x320] sm:$0xff] }
  0x96   : > { %800 = vmatmul.mubr.f32.gmra.mxu0 %v3714_v59  ;;  %1210 = vmatmul.mubr.f32.gmra.mxu1 %v3578_v29  ;;  %v594_v16 = vld [vmem:[%s4447_s3 + $0x120] sm:$0xff] }
  0x97   : > { %804 = vmatprep.mubr.f32.mxu0 %v3224_v58  ;;  %1214 = vmatprep.mubr.f32.mxu1 %v3132_v1  ;;  %v3740_v1 = vld [vmem:[#allocation2 + $0xf0] sm:$0xff] }
  0x98   : > { %1622 = vmatprep.subr.mxu1 %v3590_v21  ;;  %2665 = vmatprep.subr.mxu0 %v597_v55 }
  0x99   : > { %1623 = vmatpush1.msra.mxu1 %v2379_v23  ;;  %2666 = vmatpush3.msra.mxu0 %v597_v55  ;;  %v2376_v55 = vld [vmem:[%s4447_s3 + $0x318] sm:$0xff] }
  0x9a   : > { %805 = vmatmul.mubr.f32.gmra.mxu0 %v3727_v0  ;;  %1215 = vmatmul.mubr.f32.gmra.mxu1 %v3596_v62  ;;  %v593_v23 = vld [vmem:[%s4447_s3 + $0x118] sm:$0xff] }
  0x9b   : > { %809 = vmatprep.mubr.f32.mxu0 %v3241_v8  ;;  %1219 = vmatprep.mubr.f32.mxu1 %v3150_v11  ;;  %v3753_v11 = vld [vmem:[#allocation2 + $0xf8] sm:$0xff] }
  0x9c   : > { %1624 = vmatprep.subr.mxu1 %v3590_v21  ;;  %2667 = vmatprep.subr.mxu0 %v596_v52 }
  0x9d   : > { %1625 = vmatpush1.msra.mxu1 %v2378_v14  ;;  %2668 = vmatpush3.msra.mxu0 %v596_v52  ;;  %v2375_v52 = vld [vmem:[%s4447_s3 + $0x310] sm:$0xff] }
  0x9e   : > { %810 = vmatmul.mubr.f32.gmra.mxu0 %v3740_v1  ;;  %1220 = vmatmul.mubr.f32.gmra.mxu1 %v3609_v9  ;;  %v592_v14 = vld [vmem:[%s4447_s3 + $0x110] sm:$0xff] }
  0x9f   : > { %814 = vmatprep.mubr.f32.mxu0 %v3247_v13  ;;  %1224 = vmatprep.mubr.f32.mxu1 %v3159_v18  ;;  %v3766_v18 = vld [vmem:[#allocation2 + $0x108] sm:$0xff] }
  0xa0   : > { %1626 = vmatprep.subr.mxu1 %v3590_v21  ;;  %2669 = vmatprep.subr.mxu0 %v595_v34 }
  0xa1   : > { %1627 = vmatpush1.msra.mxu1 %v2377_v37  ;;  %2670 = vmatpush3.msra.mxu0 %v595_v34  ;;  %v2374_v34 = vld [vmem:[%s4447_s3 + $0x308] sm:$0xff] }
  0xa2   : > { %815 = vmatmul.mubr.f32.gmra.mxu0 %v3753_v11  ;;  %1225 = vmatmul.mubr.f32.gmra.mxu1 %v3623_v3  ;;  %v591_v37 = vld [vmem:[%s4447_s3 + $0x108] sm:$0xff] }
  0xa3   : > { %819 = vmatprep.mubr.f32.mxu0 %v3262_v24  ;;  %1229 = vmatprep.mubr.f32.mxu1 %v3167_v22  ;;  %v3779_v22 = vld [vmem:[#allocation2 + $0x110] sm:$0xff] }
  0xa4   : > { %1628 = vmatprep.subr.mxu1 %v3590_v21  ;;  %2671 = vmatprep.subr.mxu0 %v594_v16 }
  0xa5   : > { %1629 = vmatpush1.msra.mxu1 %v2376_v55  ;;  %2672 = vmatpush3.msra.mxu0 %v594_v16  ;;  %v2373_v16 = vld [vmem:[%s4447_s3 + $0x300] sm:$0xff] }
  0xa6   : > { %820 = vmatmul.mubr.f32.gmra.mxu0 %v3766_v18  ;;  %1230 = vmatmul.mubr.f32.gmra.mxu1 %v3634_v46  ;;  %v590_v55 = vld [vmem:[%s4447_s3 + $0x100] sm:$0xff] }
  0xa7   : > { %824 = vmatprep.mubr.f32.mxu0 %v3264_v25  ;;  %1234 = vmatprep.mubr.f32.mxu1 %v3178_v28  ;;  %v3792_v28 = vld [vmem:[#allocation2 + $0x120] sm:$0xff] }
  0xa8   : > { %1630 = vmatprep.subr.mxu1 %v3590_v21  ;;  %2673 = vmatprep.subr.mxu0 %v593_v23 }
  0xa9   : > { %1631 = vmatpush1.msra.mxu1 %v2375_v52  ;;  %2674 = vmatpush3.msra.mxu0 %v593_v23  ;;  %v2404_v23 = vld [vmem:[%s4447_s3 + $0x3f8] sm:$0xff] }
  0xaa   : > { %825 = vmatmul.mubr.f32.gmra.mxu0 %v3779_v22  ;;  %1235 = vmatmul.mubr.f32.gmra.mxu1 %v3648_v50  ;;  %v3824_v52 = vld [vmem:[%s4447_s3 + $0x478] sm:$0xff] }
  0xab   : > { %829 = vmatprep.mubr.f32.mxu0 %v3281_v40  ;;  %1239 = vmatprep.mubr.f32.mxu1 %v3186_v32  ;;  %v3805_v32 = vld [vmem:[#allocation2 + $0x128] sm:$0xff] }
  0xac   : > { %1632 = vmatprep.subr.mxu1 %v3590_v21  ;;  %2675 = vmatprep.subr.mxu0 %v592_v14 }
  0xad   : > { %1633 = vmatpush1.msra.mxu1 %v2374_v34  ;;  %2676 = vmatpush3.msra.mxu0 %v592_v14  ;;  %v3833_v14 = vld [vmem:[#allocation2 + $0x140] sm:$0xff]  ;;  %v2402_v34 = vld [vmem:[%s4447_s3 + $0x3e8] sm:$0xff] }
  0xae   : > { %830 = vmatmul.mubr.f32.gmra.mxu0 %v3792_v28  ;;  %1240 = vmatmul.mubr.f32.gmra.mxu1 %v3662_v35 }
  0xaf   : > { %834 = vmatprep.mubr.f32.mxu0 %v3286_v45  ;;  %1244 = vmatprep.mubr.f32.mxu1 %v3188_v33  ;;  %v3818_v33 = vld [vmem:[#allocation2 + $0x138] sm:$0xff] }
  0xb0   : > { %1634 = vmatprep.subr.mxu1 %v3590_v21  ;;  %2677 = vmatprep.subr.mxu0 %v591_v37 }
  0xb1   : > { %1635 = vmatpush1.msra.mxu1 %v2373_v16  ;;  %2678 = vmatpush3.msra.mxu0 %v591_v37  ;;  %v2401_v37 = vld [vmem:[%s4447_s3 + $0x3e0] sm:$0xff]  ;;  %v3854_v16 = vld [vmem:[#allocation2 + $0x158] sm:$0xff] }
  0xb2   : > { %835 = vmatmul.mubr.f32.gmra.mxu0 %v3805_v32  ;;  %1245 = vmatmul.mubr.f32.gmra.mxu1 %v3675_v44 }
  0xb3   : > { %839 = vmatprep.mubr.f32.mxu0 %v3302_v57  ;;  %1249 = vmatprep.mubr.f32.mxu1 %v3202_v43  ;;  %v2403_v43 = vld [vmem:[%s4447_s3 + $0x3f0] sm:$0xff] }
  0xb4   : > { %1636 = vmatprep.subr.mxu1 %v3590_v21  ;;  %2679 = vmatprep.subr.mxu0 %v590_v55 }
  0xb5   : > { %1637 = vmatpush2.msra.mxu1 %v2404_v23  ;;  %2680 = vmatpush3.msra.mxu0 %v590_v55  ;;  %v3864_v55 = vld [vmem:[#allocation2 + $0x168] sm:$0xff]  ;;  %v3874_v23 = vld [vmem:[#allocation2 + $0x170] sm:$0xff] }
  0xb6   : > { %840 = vmatmul.mubr.f32.gmra.mxu0 %v3818_v33  ;;  %1250 = vmatmul.mubr.f32.gmra.mxu1 %v3688_v49 }
  0xb7   : > { %844 = vmatprep.mubr.f32.mxu0 %v3304_v60  ;;  %1254 = vmatprep.mubr.f32.mxu1 %v3207_v48  ;;  %v3844_v48 = vld [vmem:[#allocation2 + $0x150] sm:$0xff] }
  0xb8   : > { %1638 = vmatprep.subr.mxu1 %v3590_v21  ;;  %2729 = vmatprep.subr.mxu0 %v3824_v52 }
  0xb9   : > { %1639 = vmatpush2.msra.mxu1 %v2403_v43  ;;  %v4471_v43 = vmax.f32 %v3346_v30, 0.0  ;;  %v3896_v30 = vld [vmem:[#allocation2 + $0x188] sm:$0xff] }
  0xba   : > { %845 = vmatmul.mubr.f32.gmra.mxu0 %v3833_v14  ;;  %1255 = vmatmul.mubr.f32.gmra.mxu1 %v3701_v54 }
  0xbb   : > { %849 = vmatprep.mubr.f32.mxu0 %v3324_v12  ;;  %1259 = vmatprep.mubr.f32.mxu1 %v3219_v56  ;;  %v2400_v56 = vld [vmem:[%s4447_s3 + $0x3d8] sm:$0xff] }
  0xbc   : > { %1640 = vmatprep.subr.mxu1 %v3590_v21 }
  0xbd   : > { %1641 = vmatpush2.msra.mxu1 %v2402_v34  ;;  %v3885_v34 = vld [vmem:[#allocation2 + $0x180] sm:$0xff] }
  0xbe   : > { %850 = vmatmul.mubr.f32.gmra.mxu0 %v3844_v48  ;;  %1260 = vmatmul.mubr.f32.gmra.mxu1 %v3714_v59 }
  0xbf   : > { %854 = vmatprep.mubr.f32.mxu0 %v3332_v20  ;;  %1264 = vmatprep.mubr.f32.mxu1 %v3224_v58  ;;  %v2399_v58 = vld [vmem:[%s4447_s3 + $0x3d0] sm:$0xff] }
  0xc0   : > { %1642 = vmatprep.subr.mxu1 %v3590_v21 }
  0xc1   : > { %1643 = vmatpush2.msra.mxu1 %v2401_v37  ;;  %v4472_v37 = vmax.f32 %v3355_v36, 0.0  ;;  %v523_v36 = vld [vmem:[#allocation2 + $0xa] sm:$0xff] }
  0xc2   : > { %855 = vmatmul.mubr.f32.gmra.mxu0 %v3854_v16  ;;  %1265 = vmatmul.mubr.f32.gmra.mxu1 %v3727_v0 }
  0xc3   : > { %859 = vmatprep.mubr.f32.mxu0 %v3350_v15  ;;  %1269 = vmatprep.mubr.f32.mxu1 %v3241_v8  ;;  %v2398_v8 = vld [vmem:[%s4447_s3 + $0x3c8] sm:$0xff] }
  0xc4   : > { %1644 = vmatprep.subr.mxu1 %v3590_v21 }
  0xc5   : > { %1645 = vmatpush2.msra.mxu1 %v2400_v56  ;;  %v2396_v56 = vld [vmem:[%s4447_s3 + $0x3b8] sm:$0xff] }
  0xc6   : > { %860 = vmatmul.mubr.f32.gmra.mxu0 %v3864_v55  ;;  %1270 = vmatmul.mubr.f32.gmra.mxu1 %v3740_v1 }
  0xc7   : > { %864 = vmatprep.mubr.f32.mxu0 %v3352_v31  ;;  %1274 = vmatprep.mubr.f32.mxu1 %v3247_v13  ;;  %v2397_v13 = vld [vmem:[%s4447_s3 + $0x3c0] sm:$0xff] }
  0xc8   : > { %1646 = vmatprep.subr.mxu1 %v3590_v21 }
  0xc9   : > { %1647 = vmatpush2.msra.mxu1 %v2399_v58  ;;  %v2419_v58 = vld [vmem:[%s4447_s3 + $0x470] sm:$0xff] }
  0xca   : > { %865 = vmatmul.mubr.f32.gmra.mxu0 %v3874_v23  ;;  %1275 = vmatmul.mubr.f32.gmra.mxu1 %v3753_v11 }
  0xcb   : > { %869 = vmatprep.mubr.f32.mxu0 %v4471_v43  ;;  %1279 = vmatprep.mubr.f32.mxu1 %v3262_v24  ;;  %v522_v24 = vld [vmem:[#allocation2 + $0x2] sm:$0xff] }
  0xcc   : > { %1648 = vmatprep.subr.mxu1 %v3590_v21  ;;  %v2394_v43 = vld [vmem:[%s4447_s3 + $0x3a8] sm:$0xff] }
  0xcd   : > { %1649 = vmatpush2.msra.mxu1 %v2398_v8  ;;  %v2819_v8 = vld [vmem:[#allocation2 + $0x1a] sm:$0xff] }
  0xce   : > { %870 = vmatmul.mubr.f32.gmra.mxu0 %v3885_v34  ;;  %1280 = vmatmul.mubr.f32.gmra.mxu1 %v3766_v18 }
  0xcf   : > { %874 = vmatprep.mubr.f32.mxu0 %v4472_v37  ;;  %1284 = vmatprep.mubr.f32.mxu1 %v3264_v25  ;;  %v2395_v25 = vld [vmem:[%s4447_s3 + $0x3b0] sm:$0xff]  ;;  %v2393_v37 = vld [vmem:[%s4447_s3 + $0x3a0] sm:$0xff] }
  0xd0   : > { %1650 = vmatprep.subr.mxu1 %v3590_v21 }
  0xd1   : > { %1651 = vmatpush2.msra.mxu1 %v2397_v13  ;;  %v3924_v13 = vld [vmem:[#allocation2 + $0x32] sm:$0xff] }
  0xd2   : > { %875 = vmatmul.mubr.f32.gmra.mxu0 %v3896_v30  ;;  %1285 = vmatmul.mubr.f32.gmra.mxu1 %v3779_v22 }
  0xd3   : > { %1289 = vmatprep.mubr.f32.mxu1 %v3281_v40  ;;  %2681 = vmatprep.mubr.f32.mxu0 %v522_v24  ;;  %v2820_v40 = vld [vmem:[#allocation2 + $0x22] sm:$0xff]  ;;  %v3939_v24 = vld [vmem:[#allocation2 + $0x4a] sm:$0xff] }
  0xd4   : > { %1652 = vmatprep.subr.mxu1 %v3590_v21 }
  0xd5   : > { %1653 = vmatpush2.msra.mxu1 %v2396_v56  ;;  %v3944_v56 = vld [vmem:[#allocation2 + $0x52] sm:$0xff] }
  0xd6   : > { %1290 = vmatmul.mubr.f32.gmra.mxu1 %v3792_v28  ;;  %2682 = vmatmul.mubr.f32.vlgmr.msra.gmra.mxu0 %v523_v36  ;;  %v2392_v36 = vld [vmem:[%s4447_s3 + $0x398] sm:$0xff] }
  0xd7   : > { %1294 = vmatprep.mubr.f32.mxu1 %v3286_v45  ;;  %2684 = vmatprep.mubr.f32.mxu0 %v2819_v8  ;;  %v2418_v45 = vld [vmem:[%s4447_s3 + $0x468] sm:$0xff] }
  0xd8   : > { %1654 = vmatprep.subr.mxu1 %v3590_v21  ;;  %2730 = vmatpush3.msra.mxu0 %v3824_v52  ;;  %v3929_v52 = vld [vmem:[#allocation2 + $0x3a] sm:$0xff] }
  0xd9   : > { %1655 = vmatpush2.msra.mxu1 %v2395_v25  ;;  %2731 = vmatprep.subr.mxu0 %v2419_v58  ;;  %v2391_v25 = vld [vmem:[%s4447_s3 + $0x390] sm:$0xff] }
  0xda   : > { %1295 = vmatmul.mubr.f32.gmra.mxu1 %v3805_v32  ;;  %2685 = vmatmul.mubr.f32.gmra.mxu0 %v2820_v40  ;;  %v4473_v40 = vld [vmem:[#allocation3_spill] sm:$0xff] }
  0xdb   : > { %1299 = vmatprep.mubr.f32.mxu1 %v3302_v57  ;;  %2687 = vmatprep.mubr.f32.mxu0 %v3924_v13  ;;  %v2417_v57 = vld [vmem:[%s4447_s3 + $0x460] sm:$0xff] }
  0xdc   : > { %1656 = vmatprep.subr.mxu1 %v3590_v21  ;;  %2732 = vmatpush3.msra.mxu0 %v2419_v58  ;;  %v2415_v58 = vld [vmem:[%s4447_s3 + $0x450] sm:$0xff] }
  0xdd   : > { %1657 = vmatpush2.msra.mxu1 %v2394_v43  ;;  %2733 = vmatprep.subr.mxu0 %v2418_v45  ;;  %v2829_v43 = vld [vmem:[#allocation2 + $0x61] sm:$0xff] }
  0xde   : > { %1300 = vmatmul.mubr.f32.gmra.mxu1 %v3818_v33  ;;  %2688 = vmatmul.mubr.f32.gmra.mxu0 %v3929_v52 }
  0xdf   : > { %1304 = vmatprep.mubr.f32.mxu1 %v3304_v60  ;;  %2690 = vmatprep.mubr.f32.mxu0 %v3939_v24  ;;  %v2416_v60 = vld [vmem:[%s4447_s3 + $0x458] sm:$0xff] }
  0xe0   : > { %1658 = vmatprep.subr.mxu1 %v3590_v21  ;;  %2734 = vmatpush3.msra.mxu0 %v2418_v45 }
  0xe1   : > { %1659 = vmatpush2.msra.mxu1 %v2393_v37  ;;  %2735 = vmatprep.subr.mxu0 %v2417_v57 }
  0xe2   : > { %1305 = vmatmul.mubr.f32.gmra.mxu1 %v3833_v14  ;;  %2691 = vmatmul.mubr.f32.gmra.mxu0 %v3944_v56 }
  0xe3   : > { %1309 = vmatprep.mubr.f32.mxu1 %v3324_v12  ;;  %2693 = vmatprep.mubr.f32.mxu0 %v3313_v4  ;;  %v2390_v4 = vld [vmem:[%s4447_s3 + $0x388] sm:$0xff] }
  0xe4   : > { %1660 = vmatprep.subr.mxu1 %v3590_v21  ;;  %2736 = vmatpush3.msra.mxu0 %v2417_v57  ;;  %v2414_v12 = vld [vmem:[%s4447_s3 + $0x448] sm:$0xff] }
  0xe5   : > { %1661 = vmatpush2.msra.mxu1 %v2392_v36  ;;  %2737 = vmatprep.subr.mxu0 %v2416_v60  ;;  %v4476_v57 = vld [vmem:[#allocation6_spill] sm:$0xff] }
  0xe6   : > { %1310 = vmatmul.mubr.f32.gmra.mxu1 %v3844_v48  ;;  %2694 = vmatmul.mubr.f32.gmra.mxu0 %v3330_v19  ;;  %v2830_v36 = vld [vmem:[#allocation2 + $0x69] sm:$0xff] }
  0xe7   : > { %1314 = vmatprep.mubr.f32.mxu1 %v3332_v20  ;;  %2696 = vmatprep.mubr.f32.mxu0 %v3362_v38  ;;  %v2389_v20 = vld [vmem:[%s4447_s3 + $0x380] sm:$0xff] }
  0xe8   : > { %1662 = vmatprep.subr.mxu1 %v3590_v21  ;;  %2738 = vmatpush3.msra.mxu0 %v2416_v60 }
  0xe9   : > { %1663 = vmatpush2.msra.mxu1 %v2391_v25  ;;  %2739 = vmatprep.subr.mxu0 %v2415_v58  ;;  %v4477_v25 = vld [vmem:[#allocation7_spill] sm:$0xff] }
  0xea   : > { %1315 = vmatmul.mubr.f32.gmra.mxu1 %v3854_v16  ;;  %2697 = vmatmul.mubr.f32.gmra.mxu0 %v3373_v42 }
  0xeb   : > { %1319 = vmatprep.mubr.f32.mxu1 %v3350_v15  ;;  %2699 = vmatprep.mubr.f32.mxu0 %v3392_v51  ;;  %v2413_v15 = vld [vmem:[%s4447_s3 + $0x440] sm:$0xff]  ;;  %v2412_v51 = vld [vmem:[%s4447_s3 + $0x438] sm:$0xff] }
  0xec   : > { %1664 = vmatprep.subr.mxu1 %v3590_v21  ;;  %2740 = vmatpush3.msra.mxu0 %v2415_v58  ;;  %v4478_v58 = vld [vmem:[#allocation8_spill] sm:$0xff] }
  0xed   : > { %1665 = vmatpush2.msra.mxu1 %v2390_v4  ;;  %v3978_v19 = vpop.f32.mrf.mxu1  ;;  %2741 = vmatprep.subr.mxu0 %v2414_v12  ;;  %v2831_v4 = vld [vmem:[#allocation2 + $0x79] sm:$0xff] }
  0xee   : > { %1320 = vmatmul.mubr.f32.gmra.mxu1 %v3864_v55  ;;  %2700 = vmatmul.mubr.f32.gmra.mxu0 %v3399_v53 }
  0xef   : > { %1324 = vmatprep.mubr.f32.mxu1 %v3352_v31  ;;  %2702 = vmatprep.mubr.f32.mxu0 %v3414_v63  ;;  %v3990_v38 = vpop.f32.mrf.mxu1  ;;  %v2825_v31 = vld [vmem:[#allocation2 + $0x31] sm:$0xff] }
  0xf0   : > { %1666 = vmatprep.subr.mxu1 %v3590_v21  ;;  %2742 = vmatpush3.msra.mxu0 %v2414_v12  ;;  %v2411_v63 = vld [vmem:[%s4447_s3 + $0x430] sm:$0xff] }
  0xf1   : > { %1667 = vmatpush2.msra.mxu1 %v2389_v20  ;;  %2743 = vmatprep.subr.mxu0 %v2413_v15 }
  0xf2   : > { %1325 = vmatmul.mubr.f32.gmra.mxu1 %v3874_v23  ;;  %2703 = vmatmul.mubr.f32.gmra.mxu0 %v3421_v5  ;;  %v3995_v42 = vpop.f32.mrf.mxu1  ;;  %v2826_v5 = vld [vmem:[#allocation2 + $0x39] sm:$0xff] }
  0xf3   : > { %2705 = vmatprep.mubr.f32.mxu0 %v3436_v10  ;;  %1668 = vmatprep.mubr.f32.mxu1 %v2825_v31  ;;  %v2832_v31 = vld [vmem:[#allocation2 + $0x81] sm:$0xff] }
  0xf4   : > { %v4001_v53 = vpop.f32.mrf.mxu1  ;;  %2744 = vmatpush3.msra.mxu0 %v2413_v15  ;;  %v4479_v15 = vld [vmem:[#allocation9_spill] sm:$0xff] }
  0xf5   : > { %2745 = vmatprep.subr.mxu0 %v2412_v51 }
  0xf6   : > { %2706 = vmatmul.mubr.f32.gmra.mxu0 %v3443_v17  ;;  %1669 = vmatmul.mubr.f32.vlgmr.msra.gmra.mxu1 %v3506_v7  ;;  %v2410_v17 = vld [vmem:[%s4447_s3 + $0x428] sm:$0xff] }
  0xf7   : > { %2708 = vmatprep.mubr.f32.mxu0 %v3458_v27  ;;  %1673 = vmatprep.mubr.f32.mxu1 %v2826_v5  ;;  %v4009_v21 = vpop.f32.mrf.mxu1  ;;  %v2827_v7 = vld [vmem:[#allocation2 + $0x49] sm:$0xff] }
  0xf8   : > { %2746 = vmatpush3.msra.mxu0 %v2412_v51  ;;  %v4480_v51 = vld [vmem:[#allocation10_spill] sm:$0xff]  ;;  %v4481_v5 = vld [vmem:[#allocation11_spill] sm:$0xff] }
  0xf9   : > { %v4011_v10 = vpop.f32.mrf.mxu1  ;;  %2747 = vmatprep.subr.mxu0 %v2411_v63 }
  0xfa   : > { %2709 = vmatmul.mubr.f32.gmra.mxu0 %v3467_v41  ;;  %1674 = vmatmul.mubr.f32.gmra.mxu1 %v3524_v26  ;;  %v2409_v41 = vld [vmem:[%s4447_s3 + $0x420] sm:$0xff]  ;;  %v2828_v26 = vld [vmem:[#allocation2 + $0x51] sm:$0xff] }
  0xfb   : > { %2711 = vmatprep.mubr.f32.mxu0 %v3474_v47  ;;  %1678 = vmatprep.mubr.f32.mxu1 %v2827_v7  ;;  %v2833_v7 = vld [vmem:[#allocation2 + $0x91] sm:$0xff] }
  0xfc   : > { %v4019_v27 = vpop.f32.mrf.mxu1  ;;  %2748 = vmatpush3.msra.mxu0 %v2411_v63 }
  0xfd   : > { %2749 = vmatprep.subr.mxu0 %v2410_v17 }
  0xfe   : > { %2712 = vmatmul.mubr.f32.gmra.mxu0 %v3491_v61  ;;  %1679 = vmatmul.mubr.f32.gmra.mxu1 %v3542_v6  ;;  %v4023_v8 = vpop.f32.mrf.mxu1  ;;  %v2408_v61 = vld [vmem:[%s4447_s3 + $0x418] sm:$0xff] }
  0xff   : > { %2714 = vmatprep.mubr.f32.mxu0 %v3499_v2  ;;  %1683 = vmatprep.mubr.f32.mxu1 %v2828_v26  ;;  %v4474_v6 = vld [vmem:[#allocation4_spill] sm:$0xff]  ;;  %v4475_v2 = vld [vmem:[#allocation5_spill] sm:$0xff] }
 0x100   : > { %2750 = vmatpush3.msra.mxu0 %v2410_v17 }
 0x101   : > { %v4029_v47 = vpop.f32.mrf.mxu1  ;;  %2751 = vmatprep.subr.mxu0 %v2409_v41 }
 0x102   : > { %2715 = vmatmul.mubr.f32.gmra.mxu0 %v4473_v40  ;;  %1684 = vmatmul.mubr.f32.gmra.mxu1 %v3560_v39  ;;  %v2407_v39 = vld [vmem:[%s4447_s3 + $0x410] sm:$0xff] }
 0x103   : > { %2717 = vmatprep.mubr.f32.mxu0 %v4474_v6  ;;  %1688 = vmatprep.mubr.f32.mxu1 %v2829_v43  ;;  %v4037_v45 = vpop.f32.mrf.mxu1 }
 0x104   : > { %2752 = vmatpush3.msra.mxu0 %v2409_v41 }
 0x105   : > { %2753 = vmatprep.subr.mxu0 %v2408_v61 }
 0x106   : > { %2718 = vmatmul.mubr.f32.gmra.mxu0 %v4475_v2  ;;  %1689 = vmatmul.mubr.f32.gmra.mxu1 %v3578_v29  ;;  %v4041_v37 = vpop.f32.mrf.mxu1  ;;  %v2406_v29 = vld [vmem:[%s4447_s3 + $0x408] sm:$0xff] }
 0x107   : > { %2720 = vmatprep.mubr.f32.mxu0 %v4476_v57  ;;  %1693 = vmatprep.mubr.f32.mxu1 %v2830_v36  ;;  %v2838_v36 = vld [vmem:[#allocation2 + $0xb1] sm:$0xff] }
 0x108   : > { %v4047_v60 = vpop.f32.mrf.mxu1  ;;  %2754 = vmatpush3.msra.mxu0 %v2408_v61 }
 0x109   : > { %2755 = vmatprep.subr.mxu0 %v2407_v39 }
 0x10a   : > { %2721 = vmatmul.mubr.f32.gmra.mxu0 %v4477_v25  ;;  %1694 = vmatmul.mubr.f32.gmra.mxu1 %v3596_v62  ;;  %v2405_v62 = vld [vmem:[%s4447_s3 + $0x400] sm:$0xff] }
 0x10b   : > { %2723 = vmatprep.mubr.f32.mxu0 %v4478_v58  ;;  %1698 = vmatprep.mubr.f32.mxu1 %v2831_v4  ;;  %v4055_v12 = vpop.f32.mrf.mxu1 }
 0x10c   : > { %2756 = vmatpush3.msra.mxu0 %v2407_v39 }
 0x10d   : > { %v4057_v20 = vpop.f32.mrf.mxu1  ;;  %2757 = vmatprep.subr.mxu0 %v2406_v29 }
 0x10e   : > { %2724 = vmatmul.mubr.f32.gmra.mxu0 %v4479_v15  ;;  %1699 = vmatmul.mubr.f32.gmra.mxu1 %v3609_v9  ;;  %v2841_v15 = vld [vmem:[#allocation2 + $0xc1] sm:$0xff] }
 0x10f   : > { %2726 = vmatprep.mubr.f32.mxu0 %v4480_v51  ;;  %1703 = vmatprep.mubr.f32.mxu1 %v2832_v31 }
 0x110   : > { %v4065_v63 = vpop.f32.mrf.mxu1  ;;  %2758 = vmatpush3.msra.mxu0 %v2406_v29 }
 0x111   : > { %2759 = vmatprep.subr.mxu0 %v2405_v62 }
 0x112   : > { %2727 = vmatmul.mubr.f32.gmra.mxu0 %v4481_v5  ;;  %1704 = vmatmul.mubr.f32.gmra.mxu1 %v3623_v3  ;;  %v4069_v17 = vpop.f32.mrf.mxu1  ;;  %v2834_v3 = vld [vmem:[#allocation2 + $0x99] sm:$0xff] }
 0x113   : > { %1708 = vmatprep.mubr.f32.mxu1 %v2833_v7  ;;  %2760 = vmatpush3.msra.mxu0 %v2405_v62  ;;  %v2842_v62 = vld [vmem:[#allocation2 + $0x92] sm:$0xff] }
 0x114   : > { %2761 = vmatprep.mubr.f32.mxu0 %v3924_v13 }
 0x115   : > { %v721_v9 = vpop.f32.mrf.mxu0  ;;  %v4072_v41 = vpop.f32.mrf.mxu1 }
 0x116   : > { %v4075_v26 = vadd.f32 %v3990_v38, %v721_v9  ;;  %1709 = vmatmul.mubr.f32.gmra.mxu1 %v3634_v46  ;;  %2762 = vmatmul.mubr.f32.vlgmr.msra.gmra.mxu0 %v3929_v52  ;;  %v2835_v38 = vld [vmem:[#allocation2 + $0xa9] sm:$0xff] }
 0x117   : > { %v723_v40 = vpop.f32.mrf.mxu0  ;;  %v4079_v61 = vpop.f32.mrf.mxu1  ;;  %1713 = vmatprep.mubr.f32.mxu1 %v2834_v3  ;;  %2764 = vmatprep.mubr.f32.mxu0 %v3939_v24  ;;  %v2836_v52 = vld [vmem:[#allocation2 + $0x62] sm:$0xff] }
 0x118   : > { %v2844_v9 = vld [vmem:[#allocation2 + $0xc9] sm:$0xff] }
 0x119   : > { %v726_v6 = vpop.f32.mrf.mxu0  ;;  %v2845_v40 = vld [vmem:[#allocation2 + $0xaa] sm:$0xff] }
 0x11a   : > { %v4083_v13 = vadd.f32 %v3978_v19, %v726_v6  ;;  %v4085_v43 = vpop.f32.mrf.mxu1  ;;  %1714 = vmatmul.mubr.f32.gmra.mxu1 %v3648_v50  ;;  %2765 = vmatmul.mubr.f32.gmra.mxu0 %v3944_v56  ;;  %v2837_v19 = vld [vmem:[#allocation2 + $0x6a] sm:$0xff]  ;;  %v2839_v56 = vld [vmem:[#allocation2 + $0x7a] sm:$0xff] }
 0x11b   : > { %v728_v46 = vpop.f32.mrf.mxu0  ;;  %1718 = vmatprep.mubr.f32.mxu1 %v2835_v38  ;;  %2767 = vmatprep.mubr.f32.mxu0 %v2836_v52  ;;  %v2847_v52 = vld [vmem:[#allocation2 + $0xd9] sm:$0xff] }
 0x11c   : > { %v4089_v2 = vpop.f32.mrf.mxu1 }
 0x11d   : > { %v731_v39 = vpop.f32.mrf.mxu0 }
 0x11e   : > { %v4092_v24 = vadd.f32 %v4001_v53, %v731_v39  ;;  %v4094_v57 = vpop.f32.mrf.mxu1  ;;  %1719 = vmatmul.mubr.f32.gmra.mxu1 %v3662_v35  ;;  %2768 = vmatmul.mubr.f32.gmra.mxu0 %v2837_v19  ;;  %v2840_v53 = vld [vmem:[#allocation2 + $0x82] sm:$0xff] }
 0x11f   : > { %v733_v50 = vpop.f32.mrf.mxu0  ;;  %1723 = vmatprep.mubr.f32.mxu1 %v2838_v36  ;;  %2770 = vmatprep.mubr.f32.mxu0 %v2839_v56  ;;  %v2848_v39 = vld [vmem:[#allocation2 + $0xc2] sm:$0xff] }
 0x120   : > { %v4097_v25 = vpop.f32.mrf.mxu1 }
 0x121   : > { %v736_v29 = vpop.f32.mrf.mxu0 }
 0x122   : > { %v4100_v58 = vadd.f32 %v3995_v42, %v736_v29  ;;  %v4102_v4 = vpop.f32.mrf.mxu1  ;;  %1724 = vmatmul.mubr.f32.gmra.mxu1 %v3675_v44  ;;  %2771 = vmatmul.mubr.f32.gmra.mxu0 %v2840_v53  ;;  %v2843_v42 = vld [vmem:[#allocation2 + $0x9a] sm:$0xff] }
 0x123   : > { %v738_v35 = vpop.f32.mrf.mxu0  ;;  %1728 = vmatprep.mubr.f32.mxu1 %v2841_v15  ;;  %2773 = vmatprep.mubr.f32.mxu0 %v2842_v62  ;;  %v2850_v29 = vld [vmem:[#allocation2 + $0xe1] sm:$0xff] }
 0x124   : > { %v4105_v51 = vpop.f32.mrf.mxu1  ;;  %v2851_v53 = vld [vmem:[#allocation2 + $0xda] sm:$0xff] }
 0x125   : > { %v741_v31 = vpop.f32.mrf.mxu0 }
 0x126   : > { %v4108_v5 = vadd.f32 %v4011_v10, %v741_v31  ;;  %v4110_v7 = vpop.f32.mrf.mxu1  ;;  %1729 = vmatmul.mubr.f32.gmra.mxu1 %v3688_v49  ;;  %2774 = vmatmul.mubr.f32.gmra.mxu0 %v2843_v42  ;;  %v2846_v10 = vld [vmem:[#allocation2 + $0xb2] sm:$0xff] }
 0x127   : > { %v743_v44 = vpop.f32.mrf.mxu0  ;;  %1733 = vmatprep.mubr.f32.mxu1 %v2844_v9  ;;  %2776 = vmatprep.mubr.f32.mxu0 %v2845_v40  ;;  %v2853_v42 = vld [vmem:[#allocation2 + $0xf1] sm:$0xff] }
 0x128   : > { %v4113_v3 = vpop.f32.mrf.mxu1  ;;  %v2854_v44 = vld [vmem:[#allocation2 + $0xf2] sm:$0xff] }
 0x129   : > { %v746_v6 = vpop.f32.mrf.mxu0 }
 0x12a   : > { %v4116_v46 = vadd.f32 %v4009_v21, %v746_v6  ;;  %v4118_v38 = vpop.f32.mrf.mxu1  ;;  %1734 = vmatmul.mubr.f32.gmra.mxu1 %v3701_v54  ;;  %2777 = vmatmul.mubr.f32.gmra.mxu0 %v2846_v10  ;;  %v2849_v21 = vld [vmem:[#allocation2 + $0xca] sm:$0xff]  ;;  %v2855_v10 = vld [vmem:[#allocation2 + $0xfa] sm:$0xff] }
 0x12b   : > { %v748_v49 = vpop.f32.mrf.mxu0  ;;  %1738 = vmatprep.mubr.f32.mxu1 %v2847_v52  ;;  %2779 = vmatprep.mubr.f32.mxu0 %v2848_v39  ;;  %v2857_v52 = vld [vmem:[#allocation2 + $0x10a] sm:$0xff] }
 0x12c   : > { %v4121_v19 = vpop.f32.mrf.mxu1  ;;  %v2856_v49 = vld [vmem:[#allocation2 + $0xf9] sm:$0xff] }
 0x12d   : > { %v751_v50 = vpop.f32.mrf.mxu0 }
 0x12e   : > { %v4124_v36 = vadd.f32 %v4023_v8, %v751_v50  ;;  %v4126_v56 = vpop.f32.mrf.mxu1  ;;  %1739 = vmatmul.mubr.f32.gmra.mxu1 %v3714_v59  ;;  %2780 = vmatmul.mubr.f32.gmra.mxu0 %v2849_v21  ;;  %v2852_v8 = vld [vmem:[#allocation2 + $0xe2] sm:$0xff] }
 0x12f   : > { %v753_v54 = vpop.f32.mrf.mxu0  ;;  %1743 = vmatprep.mubr.f32.mxu1 %v2850_v29  ;;  %2782 = vmatprep.mubr.f32.mxu0 %v2851_v53  ;;  %v2858_v29 = vld [vmem:[#allocation2 + $0x112] sm:$0xff]  ;;  %v2860_v53 = vld [vmem:[#allocation2 + $0x122] sm:$0xff] }
 0x130   : > { %v4129_v35 = vpop.f32.mrf.mxu1 }
 0x131   : > { %v756_v15 = vpop.f32.mrf.mxu0 }
 0x132   : > { %v4132_v62 = vadd.f32 %v4019_v27, %v756_v15  ;;  %v4134_v31 = vpop.f32.mrf.mxu1  ;;  %1744 = vmatmul.mubr.f32.gmra.mxu1 %v3727_v0  ;;  %2783 = vmatmul.mubr.f32.gmra.mxu0 %v2852_v8 }
 0x133   : > { %v758_v59 = vpop.f32.mrf.mxu0  ;;  %1748 = vmatprep.mubr.f32.mxu1 %v2853_v42  ;;  %2785 = vmatprep.mubr.f32.mxu0 %v2854_v44  ;;  %v2861_v44 = vld [vmem:[#allocation2 + $0x12a] sm:$0xff] }
 0x134   : > { %v4137_v9 = vpop.f32.mrf.mxu1 }
 0x136   : > { %v761_v40 = vpop.f32.mrf.mxu0  ;;  %v1171_v6 = vpop.f32.mrf.mxu1  ;;  %1749 = vmatmul.mubr.f32.gmra.mxu1 %v3740_v1  ;;  %2786 = vmatmul.mubr.f32.gmra.mxu0 %v2855_v10 }
 0x137   : > { %v4141_v27 = vadd.f32 %v4037_v45, %v761_v40  ;;  %v4144_v0 = vadd.f32 %v1171_v6, %v4075_v26  ;;  %1753 = vmatprep.mubr.f32.mxu1 %v2856_v49  ;;  %2788 = vmatprep.mubr.f32.mxu0 %v2857_v52  ;;  %v2859_v26 = vld [vmem:[#allocation2 + $0x109] sm:$0xff]  ;;  %v2863_v40 = vld [vmem:[#allocation2 + $0x13a] sm:$0xff] }
 0x138   : > { %v763_v39 = vpop.f32.mrf.mxu0  ;;  %v1173_v50 = vpop.f32.mrf.mxu1 }
 0x139   : > { %v2864_v39 = vld [vmem:[#allocation2 + $0x142] sm:$0xff]  ;;  %v2866_v50 = vld [vmem:[#allocation2 + $0x152] sm:$0xff] }
 0x13a   : > { %v766_v21 = vpop.f32.mrf.mxu0  ;;  %v1176_v54 = vpop.f32.mrf.mxu1  ;;  %1754 = vmatmul.mubr.f32.gmra.mxu1 %v3753_v11  ;;  %2789 = vmatmul.mubr.f32.gmra.mxu0 %v2858_v29 }
 0x13b   : > { %v4148_v1 = vadd.f32 %v4029_v47, %v766_v21  ;;  %v4151_v45 = vadd.f32 %v1176_v54, %v4083_v13  ;;  %1758 = vmatprep.mubr.f32.mxu1 %v2859_v26  ;;  %2791 = vmatprep.mubr.f32.mxu0 %v2860_v53  ;;  %v2862_v13 = vld [vmem:[#allocation2 + $0x111] sm:$0xff]  ;;  %v2867_v53 = vld [vmem:[#allocation2 + $0x15a] sm:$0xff] }
 0x13c   : > { %v768_v15 = vpop.f32.mrf.mxu0  ;;  %v1178_v8 = vpop.f32.mrf.mxu1 }
 0x13d   : > { %v2869_v15 = vld [vmem:[#allocation2 + $0x16a] sm:$0xff] }
 0x13e   : > { %v771_v59 = vpop.f32.mrf.mxu0  ;;  %v1181_v42 = vpop.f32.mrf.mxu1  ;;  %1759 = vmatmul.mubr.f32.gmra.mxu1 %v3766_v18  ;;  %2792 = vmatmul.mubr.f32.gmra.mxu0 %v2861_v44 }
 0x13f   : > { %v4155_v11 = vadd.f32 %v4047_v60, %v771_v59  ;;  %v4158_v47 = vadd.f32 %v1181_v42, %v4092_v24  ;;  %1763 = vmatprep.mubr.f32.mxu1 %v2862_v13  ;;  %2794 = vmatprep.mubr.f32.mxu0 %v2863_v40  ;;  %v2865_v24 = vld [vmem:[#allocation2 + $0x121] sm:$0xff]  ;;  %v2870_v13 = vld [vmem:[#allocation2 + $0x172] sm:$0xff] }
 0x140   : > { %v773_v6 = vpop.f32.mrf.mxu0  ;;  %v1183_v10 = vpop.f32.mrf.mxu1  ;;  %v2872_v40 = vld [vmem:[#allocation2 + $0x182] sm:$0xff] }
 0x142   : > { %v776_v49 = vpop.f32.mrf.mxu0  ;;  %v1186_v52 = vpop.f32.mrf.mxu1  ;;  %1764 = vmatmul.mubr.f32.gmra.mxu1 %v3779_v22  ;;  %2795 = vmatmul.mubr.f32.gmra.mxu0 %v2864_v39 }
 0x143   : > { %v4162_v18 = vadd.f32 %v4041_v37, %v776_v49  ;;  %v4165_v60 = vadd.f32 %v1186_v52, %v4100_v58  ;;  %1768 = vmatprep.mubr.f32.mxu1 %v2865_v24  ;;  %2797 = vmatprep.mubr.f32.mxu0 %v2866_v50  ;;  %v2868_v58 = vld [vmem:[#allocation2 + $0x129] sm:$0xff]  ;;  %v556_v49 = vld [vmem:[#allocation2 + $0x19a] sm:$0xff] }
 0x144   : > { %v778_v21 = vpop.f32.mrf.mxu0  ;;  %v1188_v54 = vpop.f32.mrf.mxu1  ;;  %v557_v50 = vld [vmem:[#allocation2 + $0x1a2] sm:$0xff] }
 0x146   : > { %v781_v29 = vpop.f32.mrf.mxu0  ;;  %v1191_v26 = vpop.f32.mrf.mxu1  ;;  %1769 = vmatmul.mubr.f32.gmra.mxu1 %v3792_v28  ;;  %2798 = vmatmul.mubr.f32.gmra.mxu0 %v2867_v53 }
 0x147   : > { %v4169_v22 = vadd.f32 %v4057_v20, %v781_v29  ;;  %v4172_v37 = vadd.f32 %v1191_v26, %v4108_v5  ;;  %1773 = vmatprep.mubr.f32.mxu1 %v2868_v58  ;;  %2800 = vmatprep.mubr.f32.mxu0 %v2869_v15  ;;  %v2871_v5 = vld [vmem:[#allocation2 + $0x139] sm:$0xff] }
 0x148   : > { %v783_v8 = vpop.f32.mrf.mxu0  ;;  %v1193_v59 = vpop.f32.mrf.mxu1 }
 0x14a   : > { %v786_v42 = vpop.f32.mrf.mxu0  ;;  %v1196_v44 = vpop.f32.mrf.mxu1  ;;  %1774 = vmatmul.mubr.f32.gmra.mxu1 %v3805_v32  ;;  %2801 = vmatmul.mubr.f32.gmra.mxu0 %v2870_v13  ;;  %v2873_v32 = vld [vmem:[#allocation2 + $0x18a] sm:$0xff] }
 0x14b   : > { %v4176_v28 = vadd.f32 %v4055_v12, %v786_v42  ;;  %v4179_v20 = vadd.f32 %v1196_v44, %v4116_v46  ;;  %1778 = vmatprep.mubr.f32.mxu1 %v2871_v5  ;;  %2803 = vmatprep.mubr.f32.mxu0 %v2872_v40  ;;  %v2874_v46 = vld [vmem:[#allocation2 + $0x141] sm:$0xff]  ;;  %v2876_v42 = vld [vmem:[#allocation2 + $0x159] sm:$0xff]  ;;  %v2877_v40 = vld [vmem:[#allocation2 + $0x169] sm:$0xff] }
 0x14c   : > { %v788_v6 = vpop.f32.mrf.mxu0  ;;  %v1198_v10 = vpop.f32.mrf.mxu1 }
 0x14e   : > { %v791_v52 = vpop.f32.mrf.mxu0  ;;  %v1201_v39 = vpop.f32.mrf.mxu1  ;;  %1779 = vmatmul.mubr.f32.gmra.mxu1 %v3818_v33  ;;  %2804 = vmatmul.mubr.f32.gmra.mxu0 %v2873_v32 }
 0x14f   : > { %v4183_v24 = vadd.f32 %v4069_v17, %v791_v52  ;;  %v4186_v12 = vadd.f32 %v1201_v39, %v4124_v36  ;;  %1783 = vmatprep.mubr.f32.mxu1 %v2874_v46  ;;  %2806 = vmatprep.mubr.f32.mxu0 %v556_v49  ;;  %v2875_v17 = vld [vmem:[#allocation2 + $0x151] sm:$0xff]  ;;  %v2879_v46 = vld [vmem:[#allocation2 + $0x181] sm:$0xff] }
 0x150   : > { %v793_v21 = vpop.f32.mrf.mxu0  ;;  %v1203_v54 = vpop.f32.mrf.mxu1  ;;  %v2878_v49 = vld [vmem:[#allocation2 + $0x171] sm:$0xff] }
 0x152   : > { %v4188_v29 = vpop.f32.mrf.mxu0  ;;  %v1206_v26 = vpop.f32.mrf.mxu1  ;;  %1784 = vmatmul.mubr.f32.gmra.mxu1 %v3833_v14  ;;  %2807 = vmatmul.mubr.f32.gmra.mxu0 %v557_v50 }
 0x153   : > { %v4192_v33 = vadd.f32 %v1206_v26, %v4132_v62  ;;  %1788 = vmatprep.mubr.f32.mxu1 %v2875_v17  ;;  %v2880_v26 = vld [vmem:[#allocation2 + $0x189] sm:$0xff] }
 0x154   : > { %v798_v53 = vpop.f32.mrf.mxu0  ;;  %v1208_v36 = vpop.f32.mrf.mxu1 }
 0x155   : > { %v520_v36 = vld [vmem:[#allocation2 + $0x199] sm:$0xff] }
 0x156   : > { %v801_v58 = vpop.f32.mrf.mxu0  ;;  %v1211_v15 = vpop.f32.mrf.mxu1  ;;  %1789 = vmatmul.mubr.f32.gmra.mxu1 %v3844_v48 }
 0x157   : > { %v4196_v8 = vadd.f32 %v4079_v61, %v801_v58  ;;  %v4199_v59 = vadd.f32 %v1211_v15, %v4141_v27  ;;  %1793 = vmatprep.mubr.f32.mxu1 %v2876_v42 }
 0x158   : > { %v803_v14 = vpop.f32.mrf.mxu0  ;;  %v1213_v44 = vpop.f32.mrf.mxu1 }
 0x159   : > { %v521_v14 = vld [vmem:[#allocation2 + $0x1a1] sm:$0xff] }
 0x15a   : > { %v806_v62 = vpop.f32.mrf.mxu0  ;;  %v1216_v13 = vpop.f32.mrf.mxu1  ;;  %1794 = vmatmul.mubr.f32.gmra.mxu1 %v3854_v16 }
 0x15b   : > { %v4203_v5 = vadd.f32 %v1216_v13, %v4148_v1  ;;  %1798 = vmatprep.mubr.f32.mxu1 %v2877_v40 }
 0x15c   : > { %v808_v48 = vpop.f32.mrf.mxu0  ;;  %v1218_v6 = vpop.f32.mrf.mxu1 }
 0x15e   : > { %v811_v61 = vpop.f32.mrf.mxu0  ;;  %v1221_v10 = vpop.f32.mrf.mxu1  ;;  %1799 = vmatmul.mubr.f32.gmra.mxu1 %v3864_v55 }
 0x15f   : > { %v4207_v27 = vadd.f32 %v1221_v10, %v4155_v11  ;;  %1803 = vmatprep.mubr.f32.mxu1 %v2878_v49 }
 0x160   : > { %v813_v52 = vpop.f32.mrf.mxu0  ;;  %v1223_v39 = vpop.f32.mrf.mxu1 }
 0x162   : > { %v816_v32 = vpop.f32.mrf.mxu0  ;;  %v1226_v16 = vpop.f32.mrf.mxu1  ;;  %1804 = vmatmul.mubr.f32.gmra.mxu1 %v3874_v23 }
 0x163   : > { %v4211_v1 = vadd.f32 %v1226_v16, %v4162_v18  ;;  %1808 = vmatprep.mubr.f32.mxu1 %v2879_v46 }
 0x164   : > { %v818_v50 = vpop.f32.mrf.mxu0  ;;  %v1228_v21 = vpop.f32.mrf.mxu1 }
 0x165   : > { %v1032_v21 = vadd.f32 %v4072_v41, %v806_v62 }
 0x166   : > { %v821_v54 = vpop.f32.mrf.mxu0  ;;  %v1231_v55 = vpop.f32.mrf.mxu1  ;;  %1809 = vmatmul.mubr.f32.gmra.mxu1 %v3885_v34 }
 0x167   : > { %v4215_v11 = vadd.f32 %v1231_v55, %v4169_v22  ;;  %1813 = vmatprep.mubr.f32.mxu1 %v2880_v26  ;;  %v2881_v22 = vld [vmem:[#allocation2] sm:$0xff] }
 0x168   : > { %v823_v17 = vpop.f32.mrf.mxu0  ;;  %v1233_v53 = vpop.f32.mrf.mxu1 }
 0x169   : > { %v1037_v53 = vadd.f32 %v4089_v2, %v811_v61 }
 0x16a   : > { %v826_v23 = vpop.f32.mrf.mxu0  ;;  %v1236_v58 = vpop.f32.mrf.mxu1  ;;  %1814 = vmatmul.mubr.f32.gmra.mxu1 %v3896_v30  ;;  %v1022_v30 = vadd.f32 %v4065_v63, %v4188_v29 }
 0x16b   : > { %v4219_v18 = vadd.f32 %v1236_v58, %v4176_v28  ;;  %1818 = vmatprep.mubr.f32.mxu1 %v520_v36 }
 0x16c   : > { %v828_v15 = vpop.f32.mrf.mxu0  ;;  %v1238_v42 = vpop.f32.mrf.mxu1 }
 0x16e   : > { %v831_v34 = vpop.f32.mrf.mxu0  ;;  %v1241_v44 = vpop.f32.mrf.mxu1  ;;  %1819 = vmatmul.mubr.f32.gmra.mxu1 %v2881_v22 }
 0x16f   : > { %v4222_v13 = vadd.f32 %v1241_v44, %v4183_v24  ;;  %1823 = vmatprep.mubr.f32.mxu1 %v521_v14 }
 0x170   : > { %v833_v40 = vpop.f32.mrf.mxu0  ;;  %v1243_v48 = vpop.f32.mrf.mxu1 }
 0x171   : > { %v1047_v48 = vadd.f32 %v4097_v25, %v821_v54 }
 0x172   : > { %v836_v6 = vpop.f32.mrf.mxu0  ;;  %v1246_v28 = vpop.f32.mrf.mxu1  ;;  %1824 = vmatmul.mubr.f32.gmra.mxu1 %v2881_v22 }
 0x173   : > { %v4226_v10 = vadd.f32 %v1246_v28, %v1022_v30 }
 0x174   : > { %v838_v49 = vpop.f32.mrf.mxu0  ;;  %v1248_v52 = vpop.f32.mrf.mxu1 }
 0x175   : > { %v1052_v52 = vadd.f32 %v4094_v57, %v826_v23 }
 0x176   : > { %v841_v39 = vpop.f32.mrf.mxu0  ;;  %v1251_v16 = vpop.f32.mrf.mxu1 }
 0x177   : > { %v4229_v46 = vadd.f32 %v1251_v16, %v4196_v8  ;;  %v1042_v8 = vadd.f32 %v4085_v43, %v816_v32 }
 0x178   : > { %v843_v24 = vpop.f32.mrf.mxu0  ;;  %v1253_v50 = vpop.f32.mrf.mxu1 }
 0x17a   : > { %v846_v55 = vpop.f32.mrf.mxu0  ;;  %v1256_v26 = vpop.f32.mrf.mxu1 }
 0x17b   : > { %v4232_v17 = vadd.f32 %v1256_v26, %v1032_v21  ;;  %v1057_v21 = vadd.f32 %v4105_v51, %v831_v34 }
 0x17c   : > { %v848_v63 = vpop.f32.mrf.mxu0  ;;  %v1258_v29 = vpop.f32.mrf.mxu1 }
 0x17e   : > { %v851_v36 = vpop.f32.mrf.mxu0  ;;  %v1261_v58 = vpop.f32.mrf.mxu1 }
 0x17f   : > { %v4235_v15 = vadd.f32 %v1261_v58, %v1037_v53  ;;  %v1062_v53 = vadd.f32 %v4102_v4, %v836_v6 }
 0x180   : > { %v853_v42 = vpop.f32.mrf.mxu0  ;;  %v1263_v14 = vpop.f32.mrf.mxu1 }
 0x182   : > { %v856_v44 = vpop.f32.mrf.mxu0  ;;  %v1266_v22 = vpop.f32.mrf.mxu1 }
 0x183   : > { %v4238_v40 = vadd.f32 %v1266_v22, %v1042_v8  ;;  %v1067_v8 = vadd.f32 %v4113_v3, %v841_v39 }
 0x184   : > { %v858_v41 = vpop.f32.mrf.mxu0  ;;  %v1268_v62 = vpop.f32.mrf.mxu1 }
 0x186   : > { %v861_v30 = vpop.f32.mrf.mxu0  ;;  %v1271_v28 = vpop.f32.mrf.mxu1 }
 0x187   : > { %v4241_v49 = vadd.f32 %v1271_v28, %v1047_v48  ;;  %v1072_v28 = vadd.f32 %v4110_v7, %v846_v55 }
 0x188   : > { %v863_v2 = vpop.f32.mrf.mxu0  ;;  %v1273_v61 = vpop.f32.mrf.mxu1 }
 0x18a   : > { %v866_v16 = vpop.f32.mrf.mxu0  ;;  %v1276_v24 = vpop.f32.mrf.mxu1 }
 0x18b   : > { %v4244_v50 = vadd.f32 %v1276_v24, %v1052_v52  ;;  %v1077_v24 = vadd.f32 %v4121_v19, %v851_v36 }
 0x18c   : > { %v868_v43 = vpop.f32.mrf.mxu0  ;;  %v1278_v32 = vpop.f32.mrf.mxu1 }
 0x18e   : > { %v871_v26 = vpop.f32.mrf.mxu0  ;;  %v1281_v63 = vpop.f32.mrf.mxu1 }
 0x18f   : > { %v4247_v29 = vadd.f32 %v1281_v63, %v1057_v21  ;;  %v1082_v63 = vadd.f32 %v4118_v38, %v856_v44 }
 0x190   : > { %v873_v25 = vpop.f32.mrf.mxu0  ;;  %v1283_v54 = vpop.f32.mrf.mxu1 }
 0x192   : > { %v876_v58 = vpop.f32.mrf.mxu0  ;;  %v1286_v42 = vpop.f32.mrf.mxu1 }
 0x193   : > { %v4250_v14 = vadd.f32 %v1286_v42, %v1062_v53  ;;  %v1087_v42 = vadd.f32 %v4129_v35, %v861_v30 }
 0x194   : > { %v878_v57 = vpop.f32.mrf.mxu0  ;;  %v1288_v23 = vpop.f32.mrf.mxu1 }
 0x196   : > { %v1291_v22 = vpop.f32.mrf.mxu1  ;;  %v2683_v41 = vpop.f32.mrf.mxu0 }
 0x197   : > { %v4253_v62 = vadd.f32 %v1291_v22, %v1067_v8  ;;  %v4256_v51 = vadd.f32 %v2683_v41, %v4151_v45  ;;  %v1092_v22 = vadd.f32 %v4126_v56, %v866_v16 }
 0x198   : > { %v1293_v34 = vpop.f32.mrf.mxu1  ;;  %v1396_v48 = vpop.f32.mrf.mxu0 }
 0x199   : > { %v4260_v4 = vadd.f32 %v1396_v48, %v4144_v0 }
 0x19a   : > { %v1296_v6 = vpop.f32.mrf.mxu1  ;;  %v2686_v2 = vpop.f32.mrf.mxu0 }
 0x19b   : > { %v4262_v61 = vadd.f32 %v1296_v6, %v1072_v28  ;;  %v4265_v3 = vadd.f32 %v2686_v2, %v4165_v60  ;;  %v1097_v28 = vadd.f32 %v4137_v9, %v871_v26 }
 0x19c   : > { %v1298_v39 = vpop.f32.mrf.mxu1  ;;  %v1406_v52 = vpop.f32.mrf.mxu0 }
 0x19d   : > { %v4269_v45 = vadd.f32 %v1406_v52, %v4158_v47  ;;  %v1102_v52 = vadd.f32 %v4134_v31, %v876_v58 }
 0x19e   : > { %v1301_v43 = vpop.f32.mrf.mxu1  ;;  %v2689_v32 = vpop.f32.mrf.mxu0 }
 0x19f   : > { %v4271_v7 = vadd.f32 %v1301_v43, %v1077_v24  ;;  %v4274_v0 = vadd.f32 %v2689_v32, %v4179_v20 }
 0x1a0   : > { %v1303_v55 = vpop.f32.mrf.mxu1  ;;  %v1416_v21 = vpop.f32.mrf.mxu0 }
 0x1a1   : > { %v4278_v60 = vadd.f32 %v1416_v21, %v4172_v37 }
 0x1a2   : > { %v1306_v25 = vpop.f32.mrf.mxu1  ;;  %v2692_v54 = vpop.f32.mrf.mxu0 }
 0x1a3   : > { %v4280_v19 = vadd.f32 %v1306_v25, %v1082_v63  ;;  %v4283_v47 = vadd.f32 %v2692_v54, %v4192_v33 }
 0x1a4   : > { %v1308_v36 = vpop.f32.mrf.mxu1  ;;  %v1426_v53 = vpop.f32.mrf.mxu0 }
 0x1a5   : > { %v4287_v20 = vadd.f32 %v1426_v53, %v4186_v12 }
 0x1a6   : > { %v1311_v57 = vpop.f32.mrf.mxu1  ;;  %v2695_v23 = vpop.f32.mrf.mxu0 }
 0x1a7   : > { %v4289_v38 = vadd.f32 %v1311_v57, %v1087_v42  ;;  %v4292_v37 = vadd.f32 %v2695_v23, %v4203_v5 }
 0x1a8   : > { %v1313_v44 = vpop.f32.mrf.mxu1  ;;  %v1436_v8 = vpop.f32.mrf.mxu0 }
 0x1a9   : > { %v4296_v33 = vadd.f32 %v1436_v8, %v4199_v59 }
 0x1aa   : > { %v1316_v41 = vpop.f32.mrf.mxu1  ;;  %v2698_v34 = vpop.f32.mrf.mxu0 }
 0x1ab   : > { %v1317_v35 = vadd.f32 %v1316_v41, %v1092_v22  ;;  %v4299_v12 = vadd.f32 %v2698_v34, %v4211_v1 }
 0x1ac   : > { %v1318_v30 = vpop.f32.mrf.mxu1  ;;  %v1446_v48 = vpop.f32.mrf.mxu0 }
 0x1ad   : > { %v4303_v5 = vadd.f32 %v1446_v48, %v4207_v27 }
 0x1ae   : > { %v1321_v6 = vpop.f32.mrf.mxu1  ;;  %v2701_v2 = vpop.f32.mrf.mxu0 }
 0x1af   : > { %v1322_v39 = vadd.f32 %v1321_v6, %v1097_v28  ;;  %v4306_v56 = vadd.f32 %v2701_v2, %v4219_v18 }
 0x1b0   : > { %v1323_v59 = vpop.f32.mrf.mxu1  ;;  %v1456_v16 = vpop.f32.mrf.mxu0 }
 0x1b1   : > { %v4310_v1 = vadd.f32 %v1456_v16, %v4215_v11 }
 0x1b2   : > { %v1326_v24 = vpop.f32.mrf.mxu1  ;;  %v2704_v43 = vpop.f32.mrf.mxu0 }
 0x1b3   : > { %v1327_v32 = vadd.f32 %v1326_v24, %v1102_v52  ;;  %v4313_v9 = vadd.f32 %v2704_v43, %v4226_v10 }
 0x1b4   : > { %v1328_v27 = vpop.f32.mrf.mxu1  ;;  %v1466_v26 = vpop.f32.mrf.mxu0 }
 0x1b5   : > { %v4316_v55 = vadd.f32 %v1466_v26, %v4222_v13 }
 0x1b6   : > { %v2707_v18 = vpop.f32.mrf.mxu0  ;;  %v1670_v21 = vpop.f32.mrf.mxu1 }
 0x1b7   : > { %v4319_v63 = vadd.f32 %v2707_v18, %v4232_v17 }
 0x1b8   : > { %v1476_v31 = vpop.f32.mrf.mxu0  ;;  %v1672_v58 = vpop.f32.mrf.mxu1 }
 0x1b9   : > { %v4322_v11 = vadd.f32 %v1476_v31, %v4229_v46 }
 0x1ba   : > { %v2710_v25 = vpop.f32.mrf.mxu0  ;;  %v1675_v54 = vpop.f32.mrf.mxu1 }
 0x1bb   : > { %v4325_v10 = vadd.f32 %v2710_v25, %v4238_v40 }
 0x1bc   : > { %v1486_v36 = vpop.f32.mrf.mxu0  ;;  %v1677_v53 = vpop.f32.mrf.mxu1 }
 0x1bd   : > { %v4328_v13 = vadd.f32 %v1486_v36, %v4235_v15 }
 0x1be   : > { %v2713_v42 = vpop.f32.mrf.mxu0  ;;  %v1680_v57 = vpop.f32.mrf.mxu1 }
 0x1bf   : > { %v4331_v17 = vadd.f32 %v2713_v42, %v4244_v50 }
 0x1c0   : > { %v1496_v23 = vpop.f32.mrf.mxu0  ;;  %v1682_v44 = vpop.f32.mrf.mxu1 }
 0x1c1   : > { %v4334_v46 = vadd.f32 %v1496_v23, %v4241_v49 }
 0x1c2   : > { %v2716_v8 = vpop.f32.mrf.mxu0  ;;  %v1685_v22 = vpop.f32.mrf.mxu1 }
 0x1c3   : > { %v4337_v40 = vadd.f32 %v2716_v8, %v4250_v14 }
 0x1c4   : > { %v1506_v41 = vpop.f32.mrf.mxu0  ;;  %v1687_v34 = vpop.f32.mrf.mxu1 }
 0x1c5   : > { %v4340_v15 = vadd.f32 %v1506_v41, %v4247_v29 }
 0x1c6   : > { %v2719_v30 = vpop.f32.mrf.mxu0  ;;  %v1690_v48 = vpop.f32.mrf.mxu1 }
 0x1c7   : > { %v4343_v50 = vadd.f32 %v2719_v30, %v4262_v61 }
 0x1c8   : > { %v1516_v28 = vpop.f32.mrf.mxu0  ;;  %v1692_v6 = vpop.f32.mrf.mxu1 }
 0x1c9   : > { %v4346_v49 = vadd.f32 %v1516_v28, %v4253_v62 }
 0x1ca   : > { %v2722_v2 = vpop.f32.mrf.mxu0  ;;  %v1695_v59 = vpop.f32.mrf.mxu1 }
 0x1cb   : > { %v4349_v14 = vadd.f32 %v2722_v2, %v4280_v19 }
 0x1cc   : > { %v1526_v16 = vpop.f32.mrf.mxu0  ;;  %v1697_v52 = vpop.f32.mrf.mxu1 }
 0x1cd   : > { %v4352_v29 = vadd.f32 %v1526_v16, %v4271_v7 }
 0x1ce   : > { %v2725_v24 = vpop.f32.mrf.mxu0  ;;  %v1700_v43 = vpop.f32.mrf.mxu1 }
 0x1cf   : > { %v4354_v61 = vadd.f32 %v2725_v24, %v1317_v35 }
 0x1d0   : > { %v1536_v27 = vpop.f32.mrf.mxu0  ;;  %v1702_v26 = vpop.f32.mrf.mxu1 }
 0x1d1   : > { %v4357_v62 = vadd.f32 %v1536_v27, %v4289_v38 }
 0x1d2   : > { %v2728_v18 = vpop.f32.mrf.mxu0  ;;  %v1705_v31 = vpop.f32.mrf.mxu1 }
 0x1d3   : > { %v4359_v58 = vadd.f32 %v2728_v18, %v1327_v32 }
 0x1d4   : > { %v1546_v19 = vpop.f32.mrf.mxu0  ;;  %v1707_v25 = vpop.f32.mrf.mxu1 }
 0x1d5   : > { %v4361_v36 = vadd.f32 %v1546_v19, %v1322_v39 }
 0x1d6   : > { %v4363_v7 = vpop.f32.mrf.mxu1  ;;  %v2763_v53 = vpop.f32.mrf.mxu0 }
 0x1d7   : > { %v1901_v42 = vadd.f32 %v2763_v53, %v1675_v54 }
 0x1d8   : > { %v1712_v38 = vpop.f32.mrf.mxu1  ;;  %v1895_v35 = vpop.f32.mrf.mxu0 }
 0x1d9   : > { %v2055_v32 = vadd.f32 %v1901_v42, %v4256_v51  ;;  %v1896_v23 = vadd.f32 %v1895_v35, %v1670_v21 }
 0x1da   : > { %v1715_v44 = vpop.f32.mrf.mxu1  ;;  %v2766_v39 = vpop.f32.mrf.mxu0 }
 0x1db   : > { %2087 = vst [vmem:[%s4370_s9 + $0x8] sm:$0xff] %v2055_v32  ;;  %v2054_v8 = vadd.f32 %v1896_v23, %v4260_v4  ;;  %v1911_v54 = vadd.f32 %v2766_v39, %v1685_v22  ;;  %v2156_v41 = vmul.f32 %v2055_v32, %v2055_v32 }
 0x1dc   : > { %v1717_v34 = vpop.f32.mrf.mxu1  ;;  %v1905_v30 = vpop.f32.mrf.mxu0 }
 0x1dd   : > { %2086 = vst [vmem:[%s4370_s9] sm:$0xff] %v2054_v8  ;;  %v2118_v28 = vadd.f32 %v2055_v32, %v2054_v8  ;;  %v2155_v6 = vmul.f32 %v2054_v8, %v2054_v8  ;;  %v2057_v2 = vadd.f32 %v1911_v54, %v4265_v3  ;;  %v1906_v16 = vadd.f32 %v1905_v30, %v1680_v57 }
 0x1de   : > { %v1720_v52 = vpop.f32.mrf.mxu1  ;;  %v2769_v51 = vpop.f32.mrf.mxu0 }
 0x1df   : > { %v2187_v21 = vadd.f32 %v2156_v41, %v2155_v6  ;;  %2089 = vst [vmem:[%s4370_s9 + $0x18] sm:$0xff] %v2057_v2  ;;  %v2056_v24 = vadd.f32 %v1906_v16, %v4269_v45  ;;  %v1921_v27 = vadd.f32 %v2769_v51, %v1695_v59  ;;  %v2158_v57 = vmul.f32 %v2057_v2, %v2057_v2 }
 0x1e0   : > { %v1722_v4 = vpop.f32.mrf.mxu1  ;;  %v1915_v22 = vpop.f32.mrf.mxu0 }
 0x1e1   : > { %2088 = vst [vmem:[%s4370_s9 + $0x10] sm:$0xff] %v2056_v24  ;;  %v2119_v26 = vadd.f32 %v2118_v28, %v2056_v24  ;;  %v2157_v18 = vmul.f32 %v2056_v24, %v2056_v24  ;;  %v2059_v19 = vadd.f32 %v1921_v27, %v4274_v0  ;;  %v1916_v25 = vadd.f32 %v1915_v22, %v1690_v48 }
 0x1e2   : > { %v1725_v53 = vpop.f32.mrf.mxu1  ;;  %v2772_v3 = vpop.f32.mrf.mxu0 }
 0x1e3   : > { %v2188_v42 = vadd.f32 %v2187_v21, %v2157_v18  ;;  %2091 = vst [vmem:[%s4370_s9 + $0x28] sm:$0xff] %v2059_v19  ;;  %v2058_v38 = vadd.f32 %v1916_v25, %v4278_v60  ;;  %v2120_v35 = vadd.f32 %v2119_v26, %v2057_v2  ;;  %v1931_v32 = vadd.f32 %v2772_v3, %v1705_v31 }
 0x1e4   : > { %v1727_v45 = vpop.f32.mrf.mxu1  ;;  %v1925_v59 = vpop.f32.mrf.mxu0  ;;  %v2160_v0 = vmul.f32 %v2059_v19, %v2059_v19 }
 0x1e5   : > { %2090 = vst [vmem:[%s4370_s9 + $0x20] sm:$0xff] %v2058_v38  ;;  %v2121_v23 = vadd.f32 %v2120_v35, %v2058_v38  ;;  %v2159_v39 = vmul.f32 %v2058_v38, %v2058_v38  ;;  %v2189_v8 = vadd.f32 %v2188_v42, %v2158_v57  ;;  %v1926_v54 = vadd.f32 %v1925_v59, %v1700_v43 }
 0x1e6   : > { %v2061_v48 = vadd.f32 %v1931_v32, %v4283_v47  ;;  %v1730_v41 = vpop.f32.mrf.mxu1  ;;  %v2775_v34 = vpop.f32.mrf.mxu0 }
 0x1e7   : > { %v2190_v30 = vadd.f32 %v2189_v8, %v2159_v39  ;;  %v2060_v28 = vadd.f32 %v1926_v54, %v4287_v20  ;;  %v2122_v60 = vadd.f32 %v2121_v23, %v2059_v19  ;;  %v1941_v31 = vadd.f32 %v2775_v34, %v1715_v44 }
 0x1e8   : > { %2093 = vst [vmem:[%s4370_s9 + $0x38] sm:$0xff] %v2061_v48  ;;  %v1732_v6 = vpop.f32.mrf.mxu1  ;;  %v1935_v2 = vpop.f32.mrf.mxu0  ;;  %v2162_v4 = vmul.f32 %v2061_v48, %v2061_v48 }
 0x1e9   : > { %2092 = vst [vmem:[%s4370_s9 + $0x30] sm:$0xff] %v2060_v28  ;;  %v2123_v16 = vadd.f32 %v2122_v60, %v2060_v28  ;;  %v2161_v51 = vmul.f32 %v2060_v28, %v2060_v28  ;;  %v2191_v21 = vadd.f32 %v2190_v30, %v2160_v0  ;;  %v2063_v43 = vadd.f32 %v1941_v31, %v4292_v37 }
 0x1ea   : > { %v1936_v47 = vadd.f32 %v1935_v2, %v4363_v7  ;;  %v1735_v24 = vpop.f32.mrf.mxu1  ;;  %v2778_v27 = vpop.f32.mrf.mxu0 }
 0x1eb   : > { %v2192_v20 = vadd.f32 %v2191_v21, %v2161_v51  ;;  %2095 = vst [vmem:[%s4370_s9 + $0x48] sm:$0xff] %v2063_v43  ;;  %v2124_v22 = vadd.f32 %v2123_v16, %v2061_v48  ;;  %v1951_v44 = vadd.f32 %v2778_v27, %v1725_v53  ;;  %v2164_v53 = vmul.f32 %v2063_v43, %v2063_v43 }
 0x1ec   : > { %v2062_v26 = vadd.f32 %v1936_v47, %v4296_v33  ;;  %v1737_v18 = vpop.f32.mrf.mxu1  ;;  %v1945_v19 = vpop.f32.mrf.mxu0 }
 0x1ed   : > { %v2193_v25 = vadd.f32 %v2192_v20, %v2162_v4  ;;  %v2065_v3 = vadd.f32 %v1951_v44, %v4299_v12  ;;  %v1946_v57 = vadd.f32 %v1945_v19, %v1720_v52 }
 0x1ee   : > { %2094 = vst [vmem:[%s4370_s9 + $0x40] sm:$0xff] %v2062_v26  ;;  %v2125_v37 = vadd.f32 %v2124_v22, %v2062_v26  ;;  %v2163_v7 = vmul.f32 %v2062_v26, %v2062_v26  ;;  %v1740_v42 = vpop.f32.mrf.mxu1  ;;  %v2781_v38 = vpop.f32.mrf.mxu0 }
 0x1ef   : > { %2097 = vst [vmem:[%s4370_s9 + $0x58] sm:$0xff] %v2065_v3  ;;  %v2064_v35 = vadd.f32 %v1946_v57, %v4303_v5  ;;  %v1961_v32 = vadd.f32 %v2781_v38, %v1735_v24  ;;  %v2166_v30 = vmul.f32 %v2065_v3, %v2065_v3 }
 0x1f0   : > { %v2194_v45 = vadd.f32 %v2193_v25, %v2163_v7  ;;  %v2126_v33 = vadd.f32 %v2125_v37, %v2063_v43  ;;  %v1742_v59 = vpop.f32.mrf.mxu1  ;;  %v1955_v23 = vpop.f32.mrf.mxu0 }
 0x1f1   : > { %2096 = vst [vmem:[%s4370_s9 + $0x50] sm:$0xff] %v2064_v35  ;;  %v2165_v39 = vmul.f32 %v2064_v35, %v2064_v35  ;;  %v2067_v12 = vadd.f32 %v1961_v32, %v4306_v56  ;;  %v1956_v52 = vadd.f32 %v1955_v23, %v1730_v41 }
 0x1f2   : > { %v2127_v8 = vadd.f32 %v2126_v33, %v2064_v35  ;;  %v2195_v54 = vadd.f32 %v2194_v45, %v2164_v53  ;;  %v1745_v0 = vpop.f32.mrf.mxu1  ;;  %v2784_v48 = vpop.f32.mrf.mxu0 }
 0x1f3   : > { %2099 = vst [vmem:[%s4370_s9 + $0x68] sm:$0xff] %v2067_v12  ;;  %v2066_v5 = vadd.f32 %v1956_v52, %v4310_v1  ;;  %v1971_v34 = vadd.f32 %v2784_v48, %v1745_v0  ;;  %v2168_v1 = vmul.f32 %v2067_v12, %v2067_v12 }
 0x1f4   : > { %v2196_v28 = vadd.f32 %v2195_v54, %v2165_v39  ;;  %v2128_v60 = vadd.f32 %v2127_v8, %v2065_v3  ;;  %v1747_v31 = vpop.f32.mrf.mxu1  ;;  %v1965_v6 = vpop.f32.mrf.mxu0 }
 0x1f5   : > { %2098 = vst [vmem:[%s4370_s9 + $0x60] sm:$0xff] %v2066_v5  ;;  %v2167_v2 = vmul.f32 %v2066_v5, %v2066_v5  ;;  %v2069_v56 = vadd.f32 %v1971_v34, %v4313_v9  ;;  %v1966_v41 = vadd.f32 %v1965_v6, %v1740_v42 }
 0x1f6   : > { %v2129_v16 = vadd.f32 %v2128_v60, %v2066_v5  ;;  %v2197_v51 = vadd.f32 %v2196_v28, %v2166_v30  ;;  %v1750_v21 = vpop.f32.mrf.mxu1  ;;  %v2787_v43 = vpop.f32.mrf.mxu0 }
 0x1f7   : > { %2101 = vst [vmem:[%s4370_s9 + $0x78] sm:$0xff] %v2069_v56  ;;  %v2068_v47 = vadd.f32 %v1966_v41, %v4316_v55  ;;  %v2170_v57 = vmul.f32 %v2069_v56, %v2069_v56 }
 0x1f8   : > { %v2198_v24 = vadd.f32 %v2197_v51, %v2167_v2  ;;  %v2130_v27 = vadd.f32 %v2129_v16, %v2067_v12  ;;  %v1752_v4 = vpop.f32.mrf.mxu1  ;;  %v1975_v20 = vpop.f32.mrf.mxu0 }
 0x1f9   : > { %2100 = vst [vmem:[%s4370_s9 + $0x70] sm:$0xff] %v2068_v47  ;;  %v2169_v22 = vmul.f32 %v2068_v47, %v2068_v47  ;;  %v1976_v44 = vadd.f32 %v1975_v20, %v1750_v21 }
 0x1fa   : > { %v2131_v26 = vadd.f32 %v2130_v27, %v2068_v47  ;;  %v2199_v18 = vadd.f32 %v2198_v24, %v2168_v1  ;;  %v1755_v9 = vpop.f32.mrf.mxu1  ;;  %v2790_v19 = vpop.f32.mrf.mxu0 }
 0x1fb   : > { %v2070_v25 = vadd.f32 %v1976_v44, %v4322_v11  ;;  %v1981_v3 = vadd.f32 %v2787_v43, %v1755_v9 }
 0x1fc   : > { %v2200_v37 = vadd.f32 %v2199_v18, %v2169_v22  ;;  %v2132_v55 = vadd.f32 %v2131_v26, %v2069_v56  ;;  %v1757_v7 = vpop.f32.mrf.mxu1  ;;  %v1985_v42 = vpop.f32.mrf.mxu0 }
 0x1fd   : > { %2102 = vst [vmem:[%s4370_s9 + $0x80] sm:$0xff] %v2070_v25  ;;  %v2171_v38 = vmul.f32 %v2070_v25, %v2070_v25  ;;  %v2071_v35 = vadd.f32 %v1981_v3, %v4319_v63 }
 0x1fe   : > { %v2133_v32 = vadd.f32 %v2132_v55, %v2070_v25  ;;  %v2201_v53 = vadd.f32 %v2200_v37, %v2170_v57  ;;  %v1760_v45 = vpop.f32.mrf.mxu1  ;;  %v2793_v12 = vpop.f32.mrf.mxu0 }
 0x1ff   : > { %2103 = vst [vmem:[%s4370_s9 + $0x88] sm:$0xff] %v2071_v35  ;;  %v2172_v33 = vmul.f32 %v2071_v35, %v2071_v35  ;;  %v1986_v59 = vadd.f32 %v1985_v42, %v1760_v45 }
 0x200   : > { %v2202_v23 = vadd.f32 %v2201_v53, %v2171_v38  ;;  %v2134_v11 = vadd.f32 %v2133_v32, %v2071_v35  ;;  %v1762_v39 = vpop.f32.mrf.mxu1  ;;  %v1995_v34 = vpop.f32.mrf.mxu0 }
 0x201   : > { %v2072_v52 = vadd.f32 %v1986_v59, %v4328_v13 }
 0x202   : > { %v2203_v8 = vadd.f32 %v2202_v23, %v2172_v33  ;;  %v1765_v54 = vpop.f32.mrf.mxu1  ;;  %v2796_v13 = vpop.f32.mrf.mxu0 }
 0x203   : > { %2104 = vst [vmem:[%s4370_s9 + $0x90] sm:$0xff] %v2072_v52  ;;  %v2135_v0 = vadd.f32 %v2134_v11, %v2072_v52  ;;  %v2173_v48 = vmul.f32 %v2072_v52, %v2072_v52  ;;  %v1991_v63 = vadd.f32 %v2790_v19, %v1765_v54 }
 0x204   : > { %v1767_v5 = vpop.f32.mrf.mxu1  ;;  %v2005_v24 = vpop.f32.mrf.mxu0 }
 0x205   : > { %v2204_v30 = vadd.f32 %v2203_v8, %v2173_v48  ;;  %v2073_v28 = vadd.f32 %v1991_v63, %v4325_v10 }
 0x206   : > { %v1770_v60 = vpop.f32.mrf.mxu1  ;;  %v2799_v18 = vpop.f32.mrf.mxu0 }
 0x207   : > { %2105 = vst [vmem:[%s4370_s9 + $0x98] sm:$0xff] %v2073_v28  ;;  %v2136_v31 = vadd.f32 %v2135_v0, %v2073_v28  ;;  %v2174_v6 = vmul.f32 %v2073_v28, %v2073_v28  ;;  %v1996_v2 = vadd.f32 %v1995_v34, %v1770_v60 }
 0x208   : > { %v1772_v56 = vpop.f32.mrf.mxu1  ;;  %v2015_v55 = vpop.f32.mrf.mxu0 }
 0x209   : > { %v2205_v41 = vadd.f32 %v2204_v30, %v2174_v6  ;;  %v2074_v16 = vadd.f32 %v1996_v2, %v4334_v46 }
 0x20a   : > { %v1775_v51 = vpop.f32.mrf.mxu1  ;;  %v2802_v45 = vpop.f32.mrf.mxu0 }
 0x20b   : > { %2106 = vst [vmem:[%s4370_s9 + $0xa0] sm:$0xff] %v2074_v16  ;;  %v2137_v21 = vadd.f32 %v2136_v31, %v2074_v16  ;;  %v2175_v43 = vmul.f32 %v2074_v16, %v2074_v16  ;;  %v2001_v47 = vadd.f32 %v2793_v12, %v1775_v51 }
 0x20c   : > { %v1777_v1 = vpop.f32.mrf.mxu1  ;;  %v2025_v52 = vpop.f32.mrf.mxu0 }
 0x20d   : > { %v2206_v10 = vadd.f32 %v2205_v41, %v2175_v43  ;;  %v2075_v27 = vadd.f32 %v2001_v47, %v4331_v17 }
 0x20e   : > { %v1780_v4 = vpop.f32.mrf.mxu1  ;;  %v2805_v34 = vpop.f32.mrf.mxu0 }
 0x20f   : > { %2107 = vst [vmem:[%s4370_s9 + $0xa8] sm:$0xff] %v2075_v27  ;;  %v2138_v20 = vadd.f32 %v2137_v21, %v2075_v27  ;;  %v2176_v22 = vmul.f32 %v2075_v27, %v2075_v27  ;;  %v2006_v44 = vadd.f32 %v2005_v24, %v1780_v4 }
 0x210   : > { %v1782_v26 = vpop.f32.mrf.mxu1  ;;  %v2035_v56 = vpop.f32.mrf.mxu0 }
 0x211   : > { %v2207_v46 = vadd.f32 %v2206_v10, %v2176_v22  ;;  %v2076_v9 = vadd.f32 %v2006_v44, %v4340_v15 }
 0x212   : > { %v1785_v19 = vpop.f32.mrf.mxu1  ;;  %v2808_v47 = vpop.f32.mrf.mxu0 }
 0x213   : > { %2108 = vst [vmem:[%s4370_s9 + $0xb0] sm:$0xff] %v2076_v9  ;;  %v2139_v25 = vadd.f32 %v2138_v20, %v2076_v9  ;;  %v2177_v3 = vmul.f32 %v2076_v9, %v2076_v9  ;;  %v2011_v57 = vadd.f32 %v2796_v13, %v1785_v19 }
 0x214   : > { %v1787_v37 = vpop.f32.mrf.mxu1  ;;  %v2045_v22 = vpop.f32.mrf.mxu0 }
 0x215   : > { %v2208_v17 = vadd.f32 %v2207_v46, %v2177_v3  ;;  %v2077_v7 = vadd.f32 %v2011_v57, %v4337_v40 }
 0x216   : > { %v1790_v42 = vpop.f32.mrf.mxu1 }
 0x217   : > { %2109 = vst [vmem:[%s4370_s9 + $0xb8] sm:$0xff] %v2077_v7  ;;  %v2140_v38 = vadd.f32 %v2139_v25, %v2077_v7  ;;  %v2178_v35 = vmul.f32 %v2077_v7, %v2077_v7  ;;  %v2016_v32 = vadd.f32 %v2015_v55, %v1790_v42 }
 0x218   : > { %v1792_v53 = vpop.f32.mrf.mxu1 }
 0x219   : > { %v2209_v15 = vadd.f32 %v2208_v17, %v2178_v35  ;;  %v2078_v33 = vadd.f32 %v2016_v32, %v4346_v49 }
 0x21a   : > { %v1795_v59 = vpop.f32.mrf.mxu1 }
 0x21b   : > { %2110 = vst [vmem:[%s4370_s9 + $0xc0] sm:$0xff] %v2078_v33  ;;  %v2141_v23 = vadd.f32 %v2140_v38, %v2078_v33  ;;  %v2179_v11 = vmul.f32 %v2078_v33, %v2078_v33  ;;  %v2021_v39 = vadd.f32 %v2799_v18, %v1795_v59 }
 0x21c   : > { %v1797_v12 = vpop.f32.mrf.mxu1 }
 0x21d   : > { %v2210_v40 = vadd.f32 %v2209_v15, %v2179_v11  ;;  %v2079_v8 = vadd.f32 %v2021_v39, %v4343_v50 }
 0x21e   : > { %v1800_v54 = vpop.f32.mrf.mxu1 }
 0x21f   : > { %2111 = vst [vmem:[%s4370_s9 + $0xc8] sm:$0xff] %v2079_v8  ;;  %v2142_v0 = vadd.f32 %v2141_v23, %v2079_v8  ;;  %v2180_v48 = vmul.f32 %v2079_v8, %v2079_v8  ;;  %v2026_v63 = vadd.f32 %v2025_v52, %v1800_v54 }
 0x220   : > { %v1802_v5 = vpop.f32.mrf.mxu1 }
 0x221   : > { %v2211_v49 = vadd.f32 %v2210_v40, %v2180_v48  ;;  %v2080_v30 = vadd.f32 %v2026_v63, %v4352_v29 }
 0x222   : > { %v1805_v28 = vpop.f32.mrf.mxu1 }
 0x223   : > { %2112 = vst [vmem:[%s4370_s9 + $0xd0] sm:$0xff] %v2080_v30  ;;  %v2143_v60 = vadd.f32 %v2142_v0, %v2080_v30  ;;  %v2181_v31 = vmul.f32 %v2080_v30, %v2080_v30  ;;  %v2031_v6 = vadd.f32 %v2802_v45, %v1805_v28 }
 0x224   : > { %v1807_v2 = vpop.f32.mrf.mxu1 }
 0x225   : > { %v2212_v50 = vadd.f32 %v2211_v49, %v2181_v31  ;;  %v2081_v13 = vadd.f32 %v2031_v6, %v4349_v14 }
 0x226   : > { %v1810_v41 = vpop.f32.mrf.mxu1 }
 0x227   : > { %2113 = vst [vmem:[%s4370_s9 + $0xd8] sm:$0xff] %v2081_v13  ;;  %v2144_v16 = vadd.f32 %v2143_v60, %v2081_v13  ;;  %v2182_v51 = vmul.f32 %v2081_v13, %v2081_v13  ;;  %v2036_v21 = vadd.f32 %v2035_v56, %v1810_v41 }
 0x228   : > { %v1812_v43 = vpop.f32.mrf.mxu1 }
 0x229   : > { %v2213_v29 = vadd.f32 %v2212_v50, %v2182_v51  ;;  %v2082_v1 = vadd.f32 %v2036_v21, %v4357_v62 }
 0x22a   : > { %v1815_v24 = vpop.f32.mrf.mxu1 }
 0x22b   : > { %2114 = vst [vmem:[%s4370_s9 + $0xe0] sm:$0xff] %v2082_v1  ;;  %v2145_v10 = vadd.f32 %v2144_v16, %v2082_v1  ;;  %v2183_v27 = vmul.f32 %v2082_v1, %v2082_v1  ;;  %v2041_v4 = vadd.f32 %v2805_v34, %v1815_v24 }
 0x22c   : > { %v1817_v20 = vpop.f32.mrf.mxu1 }
 0x22d   : > { %v2214_v14 = vadd.f32 %v2213_v29, %v2183_v27  ;;  %v2083_v44 = vadd.f32 %v2041_v4, %v4354_v61 }
 0x22e   : > { %v1820_v26 = vpop.f32.mrf.mxu1 }
 0x22f   : > { %2115 = vst [vmem:[%s4370_s9 + $0xe8] sm:$0xff] %v2083_v44  ;;  %v2146_v18 = vadd.f32 %v2145_v10, %v2083_v44  ;;  %v2184_v46 = vmul.f32 %v2083_v44, %v2083_v44  ;;  %v2046_v9 = vadd.f32 %v2045_v22, %v1820_v26 }
 0x230   : > { %v1822_v19 = vpop.f32.mrf.mxu1 }
 0x231   : > { %v2215_v25 = vadd.f32 %v2214_v14, %v2184_v46  ;;  %v2084_v62 = vadd.f32 %v2046_v9, %v4361_v36 }
 0x232   : > { %v1825_v3 = vpop.f32.mrf.mxu1 }
 0x233   : > { %2116 = vst [vmem:[%s4370_s9 + $0xf0] sm:$0xff] %v2084_v62  ;;  %v2147_v57 = vadd.f32 %v2146_v18, %v2084_v62  ;;  %v2185_v37 = vmul.f32 %v2084_v62, %v2084_v62  ;;  %v2051_v55 = vadd.f32 %v2808_v47, %v1825_v3 }
 0x234   : > { %v1827_v17 = vpop.f32.mrf.mxu1 }
 0x235   : > { %v2216_v7 = vadd.f32 %v2215_v25, %v2185_v37  ;;  %v2085_v61 = vadd.f32 %v2051_v55, %v4359_v58 }
 0x237   : > { %2117 = vst [vmem:[%s4370_s9 + $0xf8] sm:$0xff] %v2085_v61  ;;  %v2148_v42 = vadd.f32 %v2147_v57, %v2085_v61  ;;  %v2186_v38 = vmul.f32 %v2085_v61, %v2085_v61 }
 0x239   : > { %v2149_v35 = vrot.slane %v2148_v42, 4  ;;  %v2217_v32 = vadd.f32 %v2216_v7, %v2186_v38 }
 0x23b   : > { %v2150_v53 = vadd.f32 %v2149_v35, %v2148_v42  ;;  %v2218_v45 = vrot.slane %v2217_v32, 4 }
 0x23d   : > { %v2151_v15 = vrot.slane %v2150_v53, 2  ;;  %v2219_v33 = vadd.f32 %v2218_v45, %v2217_v32 }
 0x23f   : > { %v2152_v36 = vadd.f32 %v2151_v15, %v2150_v53  ;;  %v2220_v59 = vrot.slane %v2219_v33, 2 }
 0x241   : > { %v2153_v23 = vrot.slane %v2152_v36, 1  ;;  %v2221_v11 = vadd.f32 %v2220_v59, %v2219_v33 }
 0x243   : > { %v2222_v39 = vrot.slane %v2221_v11, 1  ;;  %v2154_v58 = vadd.f32 %v2153_v23, %v2152_v36 }
 0x245   : > { %v2223_v12 = vadd.f32 %v2222_v39, %v2221_v11 }
 0x247   : > { %v2225_v52 = vsel %vm2224_vm0, %v2154_v58, %v2223_v12 }
 0x248   : > { %2226 = vst [vmem:[%s235_s13] sm:$0x3] %v2225_v52 }
 0x249 PF: > { %s16_s18 = sadd.s32 1, %s2888_s18  }
 0x24a   : > { %p13_p4 = scmp.ge.s32.totalorder %s16_s18, 4  }
 0x24c   :  { %15 = sbr.rel (!%p13_p4) target bundleno = 1 (0x1), region = 82 }

// kernel: basic_block_de.3
= control target key start
LH: loop header
LB: loop body
LE: loop exit
PB: predicated region body
PF: predicated region fallthrough
CT: control target
= control target key end

     0   :  { %s3470_s21 = smov 0   ;;  %s4990_s0 = inlined_call_operand.vmem [shape: f32[2,16,16,128], index: 0, kind: input, shape index: {}]   ;;  %s4991_s1 = inlined_call_operand.vmem [shape: f32[3,384,128], index: 1, kind: input, shape index: {}]   ;;  %s4992_s2 = inlined_call_operand.vmem [shape: f32[128,128], index: 2, kind: input, shape index: {}]   ;;  %s4993_s3 = inlined_call_operand.vmem [shape: f32[2,16,16,128], index: 3, kind: output, shape index: {0}]   ;;  %s4994_s4 = inlined_call_operand.vmem [shape: f32[2,16,16,128], index: 4, kind: output, shape index: {1}]   ;;  %s4995_s5 = inlined_call_operand.vmem [shape: f32[2,2,128], index: 5, kind: output, shape index: {2}]   ;;  %s4996_s6 = inlined_call_operand.vmem [shape: f32[2,2,128], index: 6, kind: output, shape index: {3}]  }
   0x1 LB: > { %s2697_s22 = sadd.s32 4294967295, %s3432_s21   ;;  %p2701_p0 = scmp.ge.s32.totalorder %s3432_s21, 1  ;;  %s3432_s21 = sphi %s3470_s21, %s17_s21  }
   0x2   : > { %p219_p1 = scmp.lt.s32.totalorder %s3432_s21, 3 }
   0x4   : > { %p220_p2 = pnand %p2701_p0, %p219_p1 }
   0x6   : > { %223 = sbr.rel (%p220_p2) target bundleno = 612 (0x264), region = 32 }
   0xb   : > { %v332_v0 = vld [vmem:[%s4992_s2 + $0x78] sm:$0xff]  ;;  %v331_v2 = vld [vmem:[%s4992_s2 + $0x70] sm:$0xff]  ;;  %p3489_p3 = scmp.lt.s32.totalorder %s2697_s22, 1  ;;  %v3434_v3 = vmov 0.0   ;;  %v330_v5 = vld [vmem:[%s4992_s2 + $0x68] sm:$0xff]  ;;  %vm696_vm0 = vcmask 1040384  }
   0xc   : > { %v2725_v1 = vld [vmem:[%s4991_s1 + $0x1f8] sm:$0xff]  ;;  %3003 = vmatprep.subr.mxu0 %v332_v0  ;;  %976 = vmatprep.subr.mxu1 %v3434_v3  ;;  %699 = vst [vmem:[#allocation2] sm:$0xff] %v3434_v3  ;;  %700 = vst [vmem:[#allocation2 + $0x8] sm:$0xff] %v3434_v3  ;;  %v2724_v4 = vld [vmem:[%s4991_s1 + $0x1f0] sm:$0xff] }
   0xd   : > { %701 = vst [vmem:[#allocation2 + $0x10] sm:$0x3] %v3434_v3  ;;  %703 = vst [vmem:[#allocation2 + $0x198] sm:$0xff] %v3434_v3  ;;  %3004 = vmatpush3.msra.mxu0 %v332_v0  ;;  %977 = vmatpush1.msra.mxu1 %v2725_v1  ;;  %s5020_s22 = smov (!%p3489_p3, %s2697_s22), 1  ;;  %v2723_v6 = vld [vmem:[%s4991_s1 + $0x1e8] sm:$0xff]  ;;  %v329_v7 = vld [vmem:[%s4992_s2 + $0x60] sm:$0xff] }
   0xe   : > { %704 = vst [vmem:[#allocation2 + $0x1a0] sm:$0xff] %v3434_v3  ;;  %705 = vst [vmem:[#allocation2 + $0x1a8] sm:$0x3] %v3434_v3  ;;  %3005 = vmatprep.subr.mxu0 %v331_v2  ;;  %978 = vmatprep.subr.mxu1 %v3434_v3  ;;  %s3552_s14 = sshll.u32 %s5020_s22, 8  ;;  %v2722_v8 = vld [vmem:[%s4991_s1 + $0x1e0] sm:$0xff]  ;;  %v328_v9 = vld [vmem:[%s4992_s2 + $0x58] sm:$0xff] }
   0xf   : > { %707 = vst [vmem:[#allocation2 + $0x18] sm:$0x1] %v3434_v3  ;;  %708 = vst [vmem:[#allocation2 + $0x30] sm:$0x1] %v3434_v3  ;;  %3006 = vmatpush3.msra.mxu0 %v331_v2  ;;  %979 = vmatpush1.msra.mxu1 %v2724_v4  ;;  %v2721_v10 = vld [vmem:[%s4991_s1 + $0x1d8] sm:$0xff]  ;;  %s3569_s25 = scalar_lea.vmem %s4990_s0, %s3552_s14  ;;  %v327_v11 = vld [vmem:[%s4992_s2 + $0x50] sm:$0xff]  ;;  %s4460_s30 = scalar_lea.vmem %s4994_s4, %s3552_s14 }
  0x10   : > { %709 = vst [vmem:[#allocation2 + $0x48] sm:$0x1] %v3434_v3  ;;  %710 = vst [vmem:[#allocation2 + $0x60] sm:$0x1] %v3434_v3  ;;  %3007 = vmatprep.subr.mxu0 %v330_v5  ;;  %980 = vmatprep.subr.mxu1 %v3434_v3  ;;  %v2720_v12 = vld [vmem:[%s4991_s1 + $0x1d0] sm:$0xff]  ;;  %v326_v13 = vld [vmem:[%s4992_s2 + $0x48] sm:$0xff]  ;;  %s4914_s20 = scalar_lea.vmem %s4993_s3, %s3552_s14 }
  0x11   : > { %711 = vst [vmem:[#allocation2 + $0x78] sm:$0x1] %v3434_v3  ;;  %712 = vst [vmem:[#allocation2 + $0x90] sm:$0x1] %v3434_v3  ;;  %3008 = vmatpush3.msra.mxu0 %v330_v5  ;;  %981 = vmatpush1.msra.mxu1 %v2723_v6  ;;  %v3582_v14 = vld [vmem:[%s3569_s25] sm:$0xff]  ;;  %v2719_v15 = vld [vmem:[%s4991_s1 + $0x1c8] sm:$0xff] }
  0x12   : > { %713 = vst [vmem:[#allocation2 + $0xa8] sm:$0x1] %v3434_v3  ;;  %714 = vst [vmem:[#allocation2 + $0xc0] sm:$0x1] %v3434_v3  ;;  %3009 = vmatprep.subr.mxu0 %v329_v7  ;;  %982 = vmatprep.subr.mxu1 %v3434_v3  ;;  %v3590_v16 = vld [vmem:[%s3569_s25 + $0x8] sm:$0xff]  ;;  %v3593_v17 = vld [vmem:[%s3569_s25 + $0x10] sm:$0xff] }
  0x13   : > { %715 = vst [vmem:[#allocation2 + $0xd8] sm:$0x1] %v3434_v3  ;;  %716 = vst [vmem:[#allocation2 + $0xf0] sm:$0x1] %v3434_v3  ;;  %3010 = vmatpush3.msra.mxu0 %v329_v7  ;;  %983 = vmatpush1.msra.mxu1 %v2722_v8  ;;  %v325_v18 = vld [vmem:[%s4992_s2 + $0x40] sm:$0xff]  ;;  %v3601_v19 = vld [vmem:[%s3569_s25 + $0x18] sm:$0xff] }
  0x14   : > { %717 = vst [vmem:[#allocation2 + $0x108] sm:$0x1] %v3434_v3  ;;  %718 = vst [vmem:[#allocation2 + $0x120] sm:$0x1] %v3434_v3  ;;  %3011 = vmatprep.subr.mxu0 %v328_v9  ;;  %984 = vmatprep.subr.mxu1 %v3434_v3  ;;  %v2718_v20 = vld [vmem:[%s4991_s1 + $0x1c0] sm:$0xff]  ;;  %v3612_v22 = vld [vmem:[%s3569_s25 + $0x28] sm:$0xff] }
  0x15   : > { %719 = vst [vmem:[#allocation2 + $0x138] sm:$0x1] %v3434_v3  ;;  %720 = vst [vmem:[#allocation2 + $0x150] sm:$0x1] %v3434_v3  ;;  %3012 = vmatpush3.msra.mxu0 %v328_v9  ;;  %985 = vmatpush1.msra.mxu1 %v2721_v10  ;;  %v3609_v21 = vld [vmem:[%s3569_s25 + $0x20] sm:$0xff]  ;;  %v324_v23 = vld [vmem:[%s4992_s2 + $0x38] sm:$0xff] }
  0x16   : > { %721 = vst [vmem:[#allocation2 + $0x168] sm:$0x1] %v3434_v3  ;;  %722 = vst [vmem:[#allocation2 + $0x180] sm:$0x1] %v3434_v3  ;;  %3013 = vmatprep.subr.mxu0 %v327_v11  ;;  %986 = vmatprep.subr.mxu1 %v3434_v3  ;;  %v3620_v24 = vld [vmem:[%s3569_s25 + $0x30] sm:$0xff]  ;;  %v2717_v25 = vld [vmem:[%s4991_s1 + $0x1b8] sm:$0xff] }
  0x17   : > { %723 = vst [vmem:[#allocation2 + $0x29] sm:$0x1] %v3434_v3  ;;  %724 = vst [vmem:[#allocation2 + $0x41] sm:$0x1] %v3434_v3  ;;  %3014 = vmatpush3.msra.mxu0 %v327_v11  ;;  %987 = vmatpush1.msra.mxu1 %v2720_v12  ;;  %v3628_v26 = vld [vmem:[%s3569_s25 + $0x38] sm:$0xff]  ;;  %v3631_v27 = vld [vmem:[%s3569_s25 + $0x40] sm:$0xff] }
  0x18   : > { %725 = vst [vmem:[#allocation2 + $0x59] sm:$0x1] %v3434_v3  ;;  %726 = vst [vmem:[#allocation2 + $0x71] sm:$0x1] %v3434_v3  ;;  %3015 = vmatprep.subr.mxu0 %v326_v13  ;;  %988 = vmatprep.subr.mxu1 %v3434_v3  ;;  %v323_v28 = vld [vmem:[%s4992_s2 + $0x30] sm:$0xff]  ;;  %v3639_v29 = vld [vmem:[%s3569_s25 + $0x48] sm:$0xff] }
  0x19   : > { %727 = vst [vmem:[#allocation2 + $0x89] sm:$0x1] %v3434_v3  ;;  %728 = vst [vmem:[#allocation2 + $0xa1] sm:$0x1] %v3434_v3  ;;  %3016 = vmatpush3.msra.mxu0 %v326_v13  ;;  %989 = vmatpush1.msra.mxu1 %v2719_v15  ;;  %v2716_v30 = vld [vmem:[%s4991_s1 + $0x1b0] sm:$0xff]  ;;  %v3650_v32 = vld [vmem:[%s3569_s25 + $0x58] sm:$0xff] }
  0x1a   : > { %729 = vst [vmem:[#allocation2 + $0xb9] sm:$0x1] %v3434_v3  ;;  %730 = vst [vmem:[#allocation2 + $0xd1] sm:$0x1] %v3434_v3  ;;  %3017 = vmatprep.subr.mxu0 %v325_v18  ;;  %990 = vmatprep.subr.mxu1 %v3434_v3  ;;  %v3647_v31 = vld [vmem:[%s3569_s25 + $0x50] sm:$0xff]  ;;  %v322_v33 = vld [vmem:[%s4992_s2 + $0x28] sm:$0xff] }
  0x1b   : > { %731 = vst [vmem:[#allocation2 + $0xe9] sm:$0x1] %v3434_v3  ;;  %732 = vst [vmem:[#allocation2 + $0x101] sm:$0x1] %v3434_v3  ;;  %3018 = vmatpush3.msra.mxu0 %v325_v18  ;;  %991 = vmatpush1.msra.mxu1 %v2718_v20  ;;  %v3658_v34 = vld [vmem:[%s3569_s25 + $0x60] sm:$0xff]  ;;  %v2715_v35 = vld [vmem:[%s4991_s1 + $0x1a8] sm:$0xff] }
  0x1c   : > { %733 = vst [vmem:[#allocation2 + $0x119] sm:$0x1] %v3434_v3  ;;  %734 = vst [vmem:[#allocation2 + $0x131] sm:$0x1] %v3434_v3  ;;  %3019 = vmatprep.subr.mxu0 %v324_v23  ;;  %992 = vmatprep.subr.mxu1 %v3434_v3  ;;  %v3666_v36 = vld [vmem:[%s3569_s25 + $0x68] sm:$0xff]  ;;  %v3669_v37 = vld [vmem:[%s3569_s25 + $0x70] sm:$0xff] }
  0x1d   : > { %735 = vst [vmem:[#allocation2 + $0x149] sm:$0x1] %v3434_v3  ;;  %736 = vst [vmem:[#allocation2 + $0x161] sm:$0x1] %v3434_v3  ;;  %3020 = vmatpush3.msra.mxu0 %v324_v23  ;;  %993 = vmatpush1.msra.mxu1 %v2717_v25  ;;  %v321_v38 = vld [vmem:[%s4992_s2 + $0x20] sm:$0xff]  ;;  %v3677_v39 = vld [vmem:[%s3569_s25 + $0x78] sm:$0xff] }
  0x1e   : > { %737 = vst [vmem:[#allocation2 + $0x179] sm:$0x1] %v3434_v3  ;;  %738 = vst [vmem:[#allocation2 + $0x191] sm:$0x1] %v3434_v3  ;;  %3021 = vmatprep.subr.mxu0 %v323_v28  ;;  %994 = vmatprep.subr.mxu1 %v3434_v3  ;;  %v2714_v40 = vld [vmem:[%s4991_s1 + $0x1a0] sm:$0xff]  ;;  %v320_v42 = vld [vmem:[%s4992_s2 + $0x18] sm:$0xff] }
  0x1f   : > { %739 = vst [vmem:[#allocation2 + $0x19] sm:$0xff] %v3582_v14  ;;  %740 = vst [vmem:[#allocation2 + $0x21] sm:$0xff] %v3590_v16  ;;  %3022 = vmatpush3.msra.mxu0 %v323_v28  ;;  %995 = vmatpush1.msra.mxu1 %v2716_v30  ;;  %v3685_v41 = vld [vmem:[%s3569_s25 + $0x80] sm:$0xff]  ;;  %v3692_v43 = vld [vmem:[%s3569_s25 + $0x88] sm:$0xff] }
  0x20   : > { %741 = vst [vmem:[#allocation2 + $0x31] sm:$0xff] %v3593_v17  ;;  %742 = vst [vmem:[#allocation2 + $0x39] sm:$0xff] %v3601_v19  ;;  %3023 = vmatprep.subr.mxu0 %v322_v33  ;;  %996 = vmatprep.subr.mxu1 %v3434_v3  ;;  %v2713_v44 = vld [vmem:[%s4991_s1 + $0x198] sm:$0xff]  ;;  %v3700_v45 = vld [vmem:[%s3569_s25 + $0x90] sm:$0xff] }
  0x21   : > { %743 = vst [vmem:[#allocation2 + $0x49] sm:$0xff] %v3609_v21  ;;  %744 = vst [vmem:[#allocation2 + $0x51] sm:$0xff] %v3612_v22  ;;  %3024 = vmatpush3.msra.mxu0 %v322_v33  ;;  %997 = vmatpush1.msra.mxu1 %v2715_v35  ;;  %v3703_v46 = vld [vmem:[%s3569_s25 + $0x98] sm:$0xff]  ;;  %v319_v47 = vld [vmem:[%s4992_s2 + $0x10] sm:$0xff] }
  0x22   : > { %745 = vst [vmem:[#allocation2 + $0x61] sm:$0xff] %v3620_v24  ;;  %746 = vst [vmem:[#allocation2 + $0x69] sm:$0xff] %v3628_v26  ;;  %3025 = vmatprep.subr.mxu0 %v321_v38  ;;  %998 = vmatprep.subr.mxu1 %v3434_v3  ;;  %v2712_v48 = vld [vmem:[%s4991_s1 + $0x190] sm:$0xff]  ;;  %v3715_v49 = vld [vmem:[%s3569_s25 + $0xa0] sm:$0xff] }
  0x23   : > { %747 = vst [vmem:[#allocation2 + $0x79] sm:$0xff] %v3631_v27  ;;  %748 = vst [vmem:[#allocation2 + $0x81] sm:$0xff] %v3639_v29  ;;  %3026 = vmatpush3.msra.mxu0 %v321_v38  ;;  %999 = vmatpush1.msra.mxu1 %v2714_v40  ;;  %v3718_v50 = vld [vmem:[%s3569_s25 + $0xa8] sm:$0xff]  ;;  %v3730_v53 = vld [vmem:[%s3569_s25 + $0xb0] sm:$0xff] }
  0x24   : > { %749 = vst [vmem:[#allocation2 + $0x91] sm:$0xff] %v3647_v31  ;;  %750 = vst [vmem:[#allocation2 + $0x99] sm:$0xff] %v3650_v32  ;;  %3027 = vmatprep.subr.mxu0 %v320_v42  ;;  %1000 = vmatprep.subr.mxu1 %v3434_v3  ;;  %v318_v51 = vld [vmem:[%s4992_s2 + $0x8] sm:$0xff]  ;;  %v3733_v54 = vld [vmem:[%s3569_s25 + $0xb8] sm:$0xff] }
  0x25   : > { %751 = vst [vmem:[#allocation2 + $0xa9] sm:$0xff] %v3658_v34  ;;  %752 = vst [vmem:[#allocation2 + $0xb1] sm:$0xff] %v3666_v36  ;;  %3028 = vmatpush3.msra.mxu0 %v320_v42  ;;  %1001 = vmatpush1.msra.mxu1 %v2713_v44  ;;  %v2711_v52 = vld [vmem:[%s4991_s1 + $0x188] sm:$0xff]  ;;  %v317_v55 = vld [vmem:[%s4992_s2] sm:$0xff] }
  0x26   : > { %753 = vst [vmem:[#allocation2 + $0xc1] sm:$0xff] %v3669_v37  ;;  %754 = vst [vmem:[#allocation2 + $0xc9] sm:$0xff] %v3677_v39  ;;  %3029 = vmatprep.subr.mxu0 %v319_v47  ;;  %1002 = vmatprep.subr.mxu1 %v3434_v3  ;;  %v3741_v56 = vld [vmem:[%s3569_s25 + $0xc0] sm:$0xff]  ;;  %v3746_v57 = vld [vmem:[%s3569_s25 + $0xc8] sm:$0xff] }
  0x27   : > { %755 = vst [vmem:[#allocation2 + $0xd9] sm:$0xff] %v3685_v41  ;;  %756 = vst [vmem:[#allocation2 + $0xe1] sm:$0xff] %v3692_v43  ;;  %3030 = vmatpush3.msra.mxu0 %v319_v47  ;;  %1003 = vmatpush1.msra.mxu1 %v2712_v48  ;;  %v2710_v58 = vld [vmem:[%s4991_s1 + $0x180] sm:$0xff]  ;;  %v3753_v59 = vld [vmem:[%s3569_s25 + $0xd0] sm:$0xff] }
  0x28   : > { %757 = vst [vmem:[#allocation2 + $0xf1] sm:$0xff] %v3700_v45  ;;  %758 = vst [vmem:[#allocation2 + $0xf9] sm:$0xff] %v3703_v46  ;;  %3031 = vmatprep.subr.mxu0 %v318_v51  ;;  %1004 = vmatprep.subr.mxu1 %v3434_v3  ;;  %v2741_v60 = vld [vmem:[%s4991_s1 + $0x278] sm:$0xff]  ;;  %v3769_v63 = vld [vmem:[%s3569_s25 + $0xe0] sm:$0xff] }
  0x29   : > { %759 = vst [vmem:[#allocation2 + $0x109] sm:$0xff] %v3715_v49  ;;  %760 = vst [vmem:[#allocation2 + $0x111] sm:$0xff] %v3718_v50  ;;  %3032 = vmatpush3.msra.mxu0 %v318_v51  ;;  %1005 = vmatpush1.msra.mxu1 %v2711_v52  ;;  %v3761_v61 = vld [vmem:[%s3569_s25 + $0xd8] sm:$0xff]  ;;  %v3772_v0 = vld [vmem:[%s3569_s25 + $0xe8] sm:$0xff] }
  0x2a   : > { %761 = vst [vmem:[#allocation2 + $0x121] sm:$0xff] %v3730_v53  ;;  %762 = vst [vmem:[#allocation2 + $0x129] sm:$0xff] %v3733_v54  ;;  %3033 = vmatprep.subr.mxu0 %v317_v55  ;;  %1006 = vmatprep.subr.mxu1 %v3434_v3  ;;  %v2757_v62 = vld [vmem:[%s4991_s1 + $0x2f8] sm:$0xff]  ;;  %v2740_v1 = vld [vmem:[%s4991_s1 + $0x270] sm:$0xff] }
  0x2b   : > { %763 = vst [vmem:[#allocation2 + $0x139] sm:$0xff] %v3741_v56  ;;  %764 = vst [vmem:[#allocation2 + $0x141] sm:$0xff] %v3746_v57  ;;  %3034 = vmatpush3.msra.mxu0 %v317_v55  ;;  %3035 = vmatprep.mubr.f32.mxu0 %v3582_v14  ;;  %v3783_v2 = vld [vmem:[%s3569_s25 + $0xf0] sm:$0xff]  ;;  %v3786_v4 = vld [vmem:[%s3569_s25 + $0xf8] sm:$0xff] }
  0x2c   : > { %765 = vst [vmem:[#allocation2 + $0x151] sm:$0xff] %v3753_v59  ;;  %766 = vst [vmem:[#allocation2 + $0x159] sm:$0xff] %v3761_v61  ;;  %1007 = vmatpush1.msra.mxu1 %v2710_v58  ;;  %3036 = vmatmul.mubr.f32.vlgmr.msra.gmra.mxu0 %v3590_v16  ;;  %v2739_v5 = vld [vmem:[%s4991_s1 + $0x268] sm:$0xff]  ;;  %v2756_v6 = vld [vmem:[%s4991_s1 + $0x2f0] sm:$0xff] }
  0x2d   : > { %767 = vst [vmem:[#allocation2 + $0x169] sm:$0xff] %v3769_v63  ;;  %768 = vst [vmem:[#allocation2 + $0x171] sm:$0xff] %v3772_v0  ;;  %1008 = vmatprep.subr.mxu1 %v3434_v3  ;;  %3038 = vmatprep.mubr.f32.mxu0 %v3593_v17  ;;  %v2738_v7 = vld [vmem:[%s4991_s1 + $0x260] sm:$0xff]  ;;  %v2737_v8 = vld [vmem:[%s4991_s1 + $0x258] sm:$0xff] }
  0x2e   : > { %1009 = vmatpush2.msra.mxu1 %v2741_v60  ;;  %3083 = vmatprep.subr.mxu0 %v2757_v62  ;;  %769 = vst [vmem:[#allocation2 + $0x181] sm:$0xff] %v3783_v2  ;;  %770 = vst [vmem:[#allocation2 + $0x189] sm:$0xff] %v3786_v4  ;;  %v2755_v9 = vld [vmem:[%s4991_s1 + $0x2e8] sm:$0xff]  ;;  %v2736_v10 = vld [vmem:[%s4991_s1 + $0x250] sm:$0xff] }
  0x2f   : > { %1010 = vmatprep.subr.mxu1 %v3434_v3  ;;  %3084 = vmatpush3.msra.mxu0 %v2757_v62  ;;  %v2735_v11 = vld [vmem:[%s4991_s1 + $0x248] sm:$0xff]  ;;  %v2754_v12 = vld [vmem:[%s4991_s1 + $0x2e0] sm:$0xff]  ;;  %v2753_v15 = vld [vmem:[%s4991_s1 + $0x2d8] sm:$0xff] }
  0x30   : > { %1011 = vmatpush2.msra.mxu1 %v2740_v1  ;;  %3039 = vmatmul.mubr.f32.gmra.mxu0 %v3601_v19  ;;  %v2734_v13 = vld [vmem:[%s4991_s1 + $0x240] sm:$0xff]  ;;  %v2732_v18 = vld [vmem:[%s4991_s1 + $0x230] sm:$0xff]  ;;  %v2731_v20 = vld [vmem:[%s4991_s1 + $0x228] sm:$0xff] }
  0x31   : > { %1012 = vmatprep.subr.mxu1 %v3434_v3  ;;  %3041 = vmatprep.mubr.f32.mxu0 %v3609_v21  ;;  %v2752_v23 = vld [vmem:[%s4991_s1 + $0x2d0] sm:$0xff]  ;;  %v2730_v25 = vld [vmem:[%s4991_s1 + $0x220] sm:$0xff]  ;;  %v2729_v28 = vld [vmem:[%s4991_s1 + $0x218] sm:$0xff] }
  0x32   : > { %1013 = vmatpush2.msra.mxu1 %v2739_v5  ;;  %1040 = vmatprep.mubr.f32.mxu1 %v3582_v14  ;;  %v2733_v14 = vld [vmem:[%s4991_s1 + $0x238] sm:$0xff]  ;;  %v2751_v30 = vld [vmem:[%s4991_s1 + $0x2c8] sm:$0xff]  ;;  %v2728_v33 = vld [vmem:[%s4991_s1 + $0x210] sm:$0xff] }
  0x33   : > { %1014 = vmatprep.subr.mxu1 %v3434_v3  ;;  %3085 = vmatprep.subr.mxu0 %v2756_v6  ;;  %v2727_v35 = vld [vmem:[%s4991_s1 + $0x208] sm:$0xff]  ;;  %v2750_v38 = vld [vmem:[%s4991_s1 + $0x2c0] sm:$0xff]  ;;  %v3882_v42 = vld [vmem:[#allocation2 + $0x18] sm:$0xff] }
  0x34   : > { %1015 = vmatpush2.msra.mxu1 %v2738_v7  ;;  %3042 = vmatmul.mubr.f32.gmra.mxu0 %v3612_v22  ;;  %v2726_v40 = vld [vmem:[%s4991_s1 + $0x200] sm:$0xff]  ;;  %v926_v44 = vld [vmem:[%s4991_s1 + $0x178] sm:$0xff]  ;;  %v925_v47 = vld [vmem:[%s4991_s1 + $0x170] sm:$0xff] }
  0x35   : > { %1016 = vmatprep.subr.mxu1 %v3434_v3  ;;  %3044 = vmatprep.mubr.f32.mxu0 %v3620_v24  ;;  %v3894_v48 = vld [vmem:[#allocation2 + $0x20] sm:$0xff]  ;;  %v2749_v51 = vld [vmem:[%s4991_s1 + $0x2b8] sm:$0xff]  ;;  %v924_v52 = vld [vmem:[%s4991_s1 + $0x168] sm:$0xff] }
  0x36   : > { %1017 = vmatpush2.msra.mxu1 %v2737_v8  ;;  %3086 = vmatpush3.msra.mxu0 %v2756_v6  ;;  %v3907_v55 = vld [vmem:[#allocation2 + $0x30] sm:$0xff]  ;;  %v923_v58 = vld [vmem:[%s4991_s1 + $0x160] sm:$0xff]  ;;  %v2747_v60 = vld [vmem:[%s4991_s1 + $0x2a8] sm:$0xff] }
  0x37   : > { %1018 = vmatprep.subr.mxu1 %v3434_v3  ;;  %3087 = vmatprep.subr.mxu0 %v2755_v9  ;;  %v922_v62 = vld [vmem:[%s4991_s1 + $0x158] sm:$0xff]  ;;  %v2746_v1 = vld [vmem:[%s4991_s1 + $0x2a0] sm:$0xff]  ;;  %v921_v5 = vld [vmem:[%s4991_s1 + $0x150] sm:$0xff] }
  0x38   : > { %1019 = vmatpush2.msra.mxu1 %v2736_v10  ;;  %3045 = vmatmul.mubr.f32.gmra.mxu0 %v3628_v26  ;;  %v2745_v6 = vld [vmem:[%s4991_s1 + $0x298] sm:$0xff]  ;;  %v920_v7 = vld [vmem:[%s4991_s1 + $0x148] sm:$0xff]  ;;  %v2744_v8 = vld [vmem:[%s4991_s1 + $0x290] sm:$0xff] }
  0x39   : > { %1020 = vmatprep.subr.mxu1 %v3434_v3  ;;  %3047 = vmatprep.mubr.f32.mxu0 %v3631_v27  ;;  %v2742_v10 = vld [vmem:[%s4991_s1 + $0x280] sm:$0xff] }
  0x3a   : > { %1021 = vmatpush2.msra.mxu1 %v2735_v11  ;;  %3088 = vmatpush3.msra.mxu0 %v2755_v9  ;;  %v2743_v9 = vld [vmem:[%s4991_s1 + $0x288] sm:$0xff]  ;;  %v3973_v11 = vld [vmem:[#allocation2 + $0x1a] sm:$0xff] }
  0x3b   : > { %1022 = vmatprep.subr.mxu1 %v3434_v3  ;;  %3089 = vmatprep.subr.mxu0 %v2754_v12 }
  0x3c   : > { %1023 = vmatpush2.msra.mxu1 %v2734_v13  ;;  %3048 = vmatmul.mubr.f32.gmra.mxu0 %v3639_v29  ;;  %v3979_v13 = vld [vmem:[#allocation2 + $0x78] sm:$0xff] }
  0x3d   : > { %1024 = vmatprep.subr.mxu1 %v3434_v3  ;;  %3050 = vmatprep.mubr.f32.mxu0 %v3647_v31 }
  0x3e   : > { %1025 = vmatpush2.msra.mxu1 %v2733_v14  ;;  %3090 = vmatpush3.msra.mxu0 %v2754_v12  ;;  %v3976_v12 = vld [vmem:[#allocation2 + $0x22] sm:$0xff]  ;;  %v3987_v14 = vld [vmem:[#allocation2 + $0x32] sm:$0xff] }
  0x3f   : > { %1026 = vmatprep.subr.mxu1 %v3434_v3  ;;  %3091 = vmatprep.subr.mxu0 %v2753_v15 }
  0x40   : > { %1027 = vmatpush2.msra.mxu1 %v2732_v18  ;;  %3051 = vmatmul.mubr.f32.gmra.mxu0 %v3650_v32  ;;  %v3997_v18 = vld [vmem:[#allocation2 + $0x80] sm:$0xff] }
  0x41   : > { %1028 = vmatprep.subr.mxu1 %v3434_v3  ;;  %3053 = vmatprep.mubr.f32.mxu0 %v3658_v34 }
  0x42   : > { %1029 = vmatpush2.msra.mxu1 %v2731_v20  ;;  %3092 = vmatpush3.msra.mxu0 %v2753_v15  ;;  %v893_v15 = vld [vmem:[%s4991_s1 + $0x70] sm:$0xff]  ;;  %v892_v20 = vld [vmem:[%s4991_s1 + $0x68] sm:$0xff] }
  0x43   : > { %1030 = vmatprep.subr.mxu1 %v3434_v3  ;;  %3093 = vmatprep.subr.mxu0 %v2752_v23 }
  0x44   : > { %1031 = vmatpush2.msra.mxu1 %v2730_v25  ;;  %3054 = vmatmul.mubr.f32.gmra.mxu0 %v3666_v36  ;;  %v891_v25 = vld [vmem:[%s4991_s1 + $0x60] sm:$0xff] }
  0x45   : > { %1032 = vmatprep.subr.mxu1 %v3434_v3  ;;  %3056 = vmatprep.mubr.f32.mxu0 %v3669_v37 }
  0x46   : > { %1033 = vmatpush2.msra.mxu1 %v2729_v28  ;;  %3094 = vmatpush3.msra.mxu0 %v2752_v23  ;;  %v4005_v23 = vld [vmem:[#allocation2 + $0x4a] sm:$0xff] }
  0x47   : > { %1034 = vmatprep.subr.mxu1 %v3434_v3  ;;  %3095 = vmatprep.subr.mxu0 %v2751_v30  ;;  %v4015_v28 = vld [vmem:[#allocation2 + $0x90] sm:$0xff] }
  0x48   : > { %1035 = vmatpush2.msra.mxu1 %v2728_v33  ;;  %3057 = vmatmul.mubr.f32.gmra.mxu0 %v3677_v39  ;;  %v4023_v33 = vld [vmem:[#allocation2 + $0x62] sm:$0xff] }
  0x49   : > { %1036 = vmatprep.subr.mxu1 %v3434_v3  ;;  %3059 = vmatprep.mubr.f32.mxu0 %v3685_v41 }
  0x4a   : > { %1037 = vmatpush2.msra.mxu1 %v2727_v35  ;;  %3096 = vmatpush3.msra.mxu0 %v2751_v30  ;;  %v890_v30 = vld [vmem:[%s4991_s1 + $0x58] sm:$0xff]  ;;  %v889_v35 = vld [vmem:[%s4991_s1 + $0x50] sm:$0xff] }
  0x4b   : > { %1038 = vmatprep.subr.mxu1 %v3434_v3  ;;  %3097 = vmatprep.subr.mxu0 %v2750_v38 }
  0x4c   : > { %1039 = vmatpush2.msra.mxu1 %v2726_v40  ;;  %3060 = vmatmul.mubr.f32.gmra.mxu0 %v3692_v43  ;;  %v888_v40 = vld [vmem:[%s4991_s1 + $0x48] sm:$0xff] }
  0x4d   : > { %1041 = vmatmul.mubr.f32.vlgmr.msra.gmra.mxu1 %v3882_v42  ;;  %3163 = vmatprep.subr.mxu1 %v926_v44 }
  0x4e   : > { %3164 = vmatpush3.msra.mxu1 %v926_v44  ;;  %3062 = vmatprep.mubr.f32.mxu0 %v3700_v45  ;;  %v4041_v44 = vld [vmem:[#allocation2 + $0x7a] sm:$0xff] }
  0x4f   : > { %1045 = vmatprep.mubr.f32.mxu1 %v3590_v16  ;;  %3165 = vmatprep.subr.mxu1 %v925_v47  ;;  %v2748_v16 = vld [vmem:[%s4991_s1 + $0x2b0] sm:$0xff] }
  0x50   : > { %3063 = vmatmul.mubr.f32.gmra.mxu0 %v3703_v46  ;;  %3166 = vmatpush3.msra.mxu1 %v925_v47  ;;  %v887_v47 = vld [vmem:[%s4991_s1 + $0x40] sm:$0xff] }
  0x51   : > { %1046 = vmatmul.mubr.f32.gmra.mxu1 %v3894_v48  ;;  %3065 = vmatprep.mubr.f32.mxu0 %v3715_v49 }
  0x52   : > { %1050 = vmatprep.mubr.f32.mxu1 %v3593_v17  ;;  %3098 = vmatpush3.msra.mxu0 %v2750_v38  ;;  %v3919_v17 = vld [vmem:[#allocation2 + $0x38] sm:$0xff] }
  0x53   : > { %3099 = vmatprep.subr.mxu0 %v2749_v51  ;;  %3167 = vmatprep.subr.mxu1 %v924_v52  ;;  %v4033_v38 = vld [vmem:[#allocation2 + $0x98] sm:$0xff] }
  0x54   : > { %3066 = vmatmul.mubr.f32.gmra.mxu0 %v3718_v50  ;;  %3168 = vmatpush3.msra.mxu1 %v924_v52  ;;  %v886_v52 = vld [vmem:[%s4991_s1 + $0x38] sm:$0xff] }
  0x55   : > { %1051 = vmatmul.mubr.f32.gmra.mxu1 %v3907_v55  ;;  %3068 = vmatprep.mubr.f32.mxu0 %v3730_v53 }
  0x56   : > { %1055 = vmatprep.mubr.f32.mxu1 %v3601_v19  ;;  %3100 = vmatpush3.msra.mxu0 %v2749_v51  ;;  %v3931_v19 = vld [vmem:[#allocation2 + $0x48] sm:$0xff] }
  0x57   : > { %3101 = vmatprep.subr.mxu0 %v2748_v16  ;;  %3169 = vmatprep.subr.mxu1 %v923_v58  ;;  %v4051_v51 = vld [vmem:[#allocation2 + $0xa8] sm:$0xff] }
  0x58   : > { %3069 = vmatmul.mubr.f32.gmra.mxu0 %v3733_v54  ;;  %3170 = vmatpush3.msra.mxu1 %v923_v58  ;;  %v885_v58 = vld [vmem:[%s4991_s1 + $0x30] sm:$0xff] }
  0x59   : > { %1056 = vmatmul.mubr.f32.gmra.mxu1 %v3919_v17  ;;  %3071 = vmatprep.mubr.f32.mxu0 %v3741_v56 }
  0x5a   : > { %1060 = vmatprep.mubr.f32.mxu1 %v3609_v21  ;;  %3102 = vmatpush3.msra.mxu0 %v2748_v16  ;;  %v3943_v21 = vld [vmem:[#allocation2 + $0x50] sm:$0xff] }
  0x5b   : > { %3103 = vmatprep.subr.mxu0 %v2747_v60  ;;  %3171 = vmatprep.subr.mxu1 %v922_v62  ;;  %v4059_v16 = vld [vmem:[#allocation2 + $0x92] sm:$0xff] }
  0x5c   : > { %3072 = vmatmul.mubr.f32.gmra.mxu0 %v3746_v57  ;;  %3172 = vmatpush3.msra.mxu1 %v922_v62  ;;  %v884_v62 = vld [vmem:[%s4991_s1 + $0x28] sm:$0xff] }
  0x5d   : > { %1061 = vmatmul.mubr.f32.gmra.mxu1 %v3931_v19  ;;  %3074 = vmatprep.mubr.f32.mxu0 %v3753_v59 }
  0x5e   : > { %1065 = vmatprep.mubr.f32.mxu1 %v3612_v22  ;;  %3104 = vmatpush3.msra.mxu0 %v2747_v60  ;;  %v3955_v22 = vld [vmem:[#allocation2 + $0x60] sm:$0xff]  ;;  %v4069_v60 = vld [vmem:[#allocation2 + $0xb0] sm:$0xff] }
  0x5f   : > { %3105 = vmatprep.subr.mxu0 %v2746_v1  ;;  %3173 = vmatprep.subr.mxu1 %v921_v5 }
  0x60   : > { %3075 = vmatmul.mubr.f32.gmra.mxu0 %v3761_v61  ;;  %3174 = vmatpush3.msra.mxu1 %v921_v5  ;;  %v883_v5 = vld [vmem:[%s4991_s1 + $0x20] sm:$0xff] }
  0x61   : > { %1066 = vmatmul.mubr.f32.gmra.mxu1 %v3943_v21  ;;  %3077 = vmatprep.mubr.f32.mxu0 %v3769_v63 }
  0x62   : > { %1070 = vmatprep.mubr.f32.mxu1 %v3620_v24  ;;  %3106 = vmatpush3.msra.mxu0 %v2746_v1  ;;  %v3966_v24 = vld [vmem:[#allocation2 + $0x68] sm:$0xff] }
  0x63   : > { %3107 = vmatprep.subr.mxu0 %v2745_v6  ;;  %3175 = vmatprep.subr.mxu1 %v920_v7  ;;  %v4077_v1 = vld [vmem:[#allocation2 + $0xaa] sm:$0xff] }
  0x64   : > { %3078 = vmatmul.mubr.f32.gmra.mxu0 %v3772_v0  ;;  %3176 = vmatpush3.msra.mxu1 %v920_v7  ;;  %v919_v7 = vld [vmem:[%s4991_s1 + $0x140] sm:$0xff] }
  0x65   : > { %1071 = vmatmul.mubr.f32.gmra.mxu1 %v3955_v22  ;;  %3108 = vmatpush3.msra.mxu0 %v2745_v6  ;;  %v4087_v6 = vld [vmem:[#allocation2 + $0xc0] sm:$0xff] }
  0x66   : > { %3109 = vmatprep.subr.mxu0 %v2744_v8  ;;  %3080 = vmatprep.mubr.f32.mxu0 %v3783_v2 }
  0x67   : > { %1075 = vmatprep.mubr.f32.mxu1 %v3628_v26  ;;  %3110 = vmatpush3.msra.mxu0 %v2744_v8  ;;  %v894_v26 = vld [vmem:[%s4991_s1 + $0x78] sm:$0xff] }
  0x68   : > { %3081 = vmatmul.mubr.f32.gmra.mxu0 %v3786_v4  ;;  %3111 = vmatprep.subr.mxu0 %v2743_v9  ;;  %v882_v8 = vld [vmem:[%s4991_s1 + $0x18] sm:$0xff] }
  0x69   : > { %1076 = vmatmul.mubr.f32.gmra.mxu1 %v3966_v24  ;;  %3112 = vmatpush3.msra.mxu0 %v2743_v9  ;;  %v881_v9 = vld [vmem:[%s4991_s1 + $0x10] sm:$0xff] }
  0x6a   : > { %3113 = vmatprep.subr.mxu0 %v2742_v10  ;;  %1080 = vmatprep.mubr.f32.mxu1 %v3631_v27  ;;  %v3993_v27 = vld [vmem:[#allocation2 + $0x3a] sm:$0xff] }
  0x6b   : > { %3114 = vmatpush3.msra.mxu0 %v2742_v10  ;;  %3115 = vmatprep.mubr.f32.mxu0 %v3973_v11  ;;  %v4104_v10 = vld [vmem:[#allocation2 + $0xc8] sm:$0xff] }
  0x6c   : > { %3116 = vmatmul.mubr.f32.vlgmr.msra.gmra.mxu0 %v3976_v12  ;;  %1426 = vmatprep.subr.mxu0 %v3434_v3 }
  0x6d   : > { %1081 = vmatmul.mubr.f32.gmra.mxu1 %v3979_v13  ;;  %1427 = vmatpush1.msra.mxu0 %v894_v26  ;;  %v4106_v26 = vld [vmem:[#allocation2 + $0xca] sm:$0xff] }
  0x6e   : > { %1428 = vmatprep.subr.mxu0 %v3434_v3  ;;  %1085 = vmatprep.mubr.f32.mxu1 %v3639_v29  ;;  %v4011_v29 = vld [vmem:[#allocation2 + $0x52] sm:$0xff] }
  0x6f   : > { %3118 = vmatprep.mubr.f32.mxu0 %v3987_v14  ;;  %1429 = vmatpush1.msra.mxu0 %v893_v15  ;;  %v880_v15 = vld [vmem:[%s4991_s1 + $0x8] sm:$0xff] }
  0x70   : > { %3119 = vmatmul.mubr.f32.gmra.mxu0 %v3993_v27  ;;  %1430 = vmatprep.subr.mxu0 %v3434_v3 }
  0x71   : > { %1086 = vmatmul.mubr.f32.gmra.mxu1 %v3997_v18  ;;  %1431 = vmatpush1.msra.mxu0 %v892_v20  ;;  %v4114_v20 = vld [vmem:[#allocation2 + $0xda] sm:$0xff] }
  0x72   : > { %1432 = vmatprep.subr.mxu0 %v3434_v3  ;;  %1090 = vmatprep.mubr.f32.mxu1 %v3647_v31  ;;  %v4029_v31 = vld [vmem:[#allocation2 + $0x6a] sm:$0xff] }
  0x73   : > { %3121 = vmatprep.mubr.f32.mxu0 %v4005_v23  ;;  %1433 = vmatpush1.msra.mxu0 %v891_v25  ;;  %v918_v25 = vld [vmem:[%s4991_s1 + $0x138] sm:$0xff] }
  0x74   : > { %3122 = vmatmul.mubr.f32.gmra.mxu0 %v4011_v29  ;;  %1434 = vmatprep.subr.mxu0 %v3434_v3 }
  0x75   : > { %1091 = vmatmul.mubr.f32.gmra.mxu1 %v4015_v28  ;;  %1435 = vmatpush1.msra.mxu0 %v890_v30  ;;  %v4126_v30 = vld [vmem:[#allocation2 + $0xd8] sm:$0xff] }
  0x76   : > { %1436 = vmatprep.subr.mxu0 %v3434_v3  ;;  %1095 = vmatprep.mubr.f32.mxu1 %v3650_v32  ;;  %v4047_v32 = vld [vmem:[#allocation2 + $0x82] sm:$0xff] }
  0x77   : > { %3124 = vmatprep.mubr.f32.mxu0 %v4023_v33  ;;  %1437 = vmatpush1.msra.mxu0 %v889_v35  ;;  %v4129_v35 = vld [vmem:[#allocation2 + $0xe2] sm:$0xff] }
  0x78   : > { %3125 = vmatmul.mubr.f32.gmra.mxu0 %v4029_v31  ;;  %1438 = vmatprep.subr.mxu0 %v3434_v3 }
  0x79   : > { %1096 = vmatmul.mubr.f32.gmra.mxu1 %v4033_v38  ;;  %1439 = vmatpush1.msra.mxu0 %v888_v40  ;;  %v910_v40 = vld [vmem:[%s4991_s1 + $0xf8] sm:$0xff] }
  0x7a   : > { %1440 = vmatprep.subr.mxu0 %v3434_v3  ;;  %1100 = vmatprep.mubr.f32.mxu1 %v3658_v34  ;;  %v4065_v34 = vld [vmem:[#allocation2 + $0x9a] sm:$0xff] }
  0x7b   : > { %3127 = vmatprep.mubr.f32.mxu0 %v4041_v44  ;;  %1441 = vmatpush1.msra.mxu0 %v887_v47  ;;  %v909_v47 = vld [vmem:[%s4991_s1 + $0xf0] sm:$0xff] }
  0x7c   : > { %3128 = vmatmul.mubr.f32.gmra.mxu0 %v4047_v32  ;;  %1442 = vmatprep.subr.mxu0 %v3434_v3 }
  0x7d   : > { %1101 = vmatmul.mubr.f32.gmra.mxu1 %v4051_v51  ;;  %1443 = vmatpush1.msra.mxu0 %v886_v52  ;;  %v4143_v52 = vld [vmem:[#allocation2 + $0xe0] sm:$0xff] }
  0x7e   : > { %1444 = vmatprep.subr.mxu0 %v3434_v3  ;;  %1105 = vmatprep.mubr.f32.mxu1 %v3666_v36  ;;  %v4083_v36 = vld [vmem:[#allocation2 + $0xb2] sm:$0xff] }
  0x7f   : > { %3130 = vmatprep.mubr.f32.mxu0 %v4059_v16  ;;  %1445 = vmatpush1.msra.mxu0 %v885_v58  ;;  %v4145_v58 = vld [vmem:[#allocation2 + $0xfa] sm:$0xff] }
  0x80   : > { %3131 = vmatmul.mubr.f32.gmra.mxu0 %v4065_v34  ;;  %1446 = vmatprep.subr.mxu0 %v3434_v3 }
  0x81   : > { %1106 = vmatmul.mubr.f32.gmra.mxu1 %v4069_v60  ;;  %1447 = vmatpush1.msra.mxu0 %v884_v62  ;;  %v908_v62 = vld [vmem:[%s4991_s1 + $0xe8] sm:$0xff] }
  0x82   : > { %1448 = vmatprep.subr.mxu0 %v3434_v3  ;;  %1110 = vmatprep.mubr.f32.mxu1 %v3669_v37  ;;  %v4099_v37 = vld [vmem:[#allocation2 + $0xc2] sm:$0xff] }
  0x83   : > { %3133 = vmatprep.mubr.f32.mxu0 %v4077_v1  ;;  %1449 = vmatpush1.msra.mxu0 %v883_v5  ;;  %v4153_v5 = vld [vmem:[#allocation2 + $0x10a] sm:$0xff] }
  0x84   : > { %3134 = vmatmul.mubr.f32.gmra.mxu0 %v4083_v36  ;;  %1450 = vmatprep.subr.mxu0 %v3434_v3 }
  0x85   : > { %1111 = vmatmul.mubr.f32.gmra.mxu1 %v4087_v6  ;;  %3177 = vmatprep.subr.mxu1 %v919_v7 }
  0x86   : > { %1451 = vmatpush1.msra.mxu0 %v882_v8  ;;  %3178 = vmatpush3.msra.mxu1 %v919_v7  ;;  %v917_v7 = vld [vmem:[%s4991_s1 + $0x130] sm:$0xff] }
  0x87   : > { %1452 = vmatprep.subr.mxu0 %v3434_v3  ;;  %1115 = vmatprep.mubr.f32.mxu1 %v3677_v39  ;;  %v879_v39 = vld [vmem:[%s4991_s1] sm:$0xff]  ;;  %v4165_v8 = vld [vmem:[#allocation2 + $0xf0] sm:$0xff] }
  0x88   : > { %3136 = vmatprep.mubr.f32.mxu0 %v4099_v37  ;;  %1453 = vmatpush1.msra.mxu0 %v881_v9  ;;  %v4168_v9 = vld [vmem:[#allocation2 + $0x112] sm:$0xff] }
  0x89   : > { %1116 = vmatmul.mubr.f32.gmra.mxu1 %v4104_v10  ;;  %3137 = vmatmul.mubr.f32.gmra.mxu0 %v4106_v26 }
  0x8a   : > { %1454 = vmatprep.subr.mxu0 %v3434_v3  ;;  %1120 = vmatprep.mubr.f32.mxu1 %v3685_v41  ;;  %v4138_v41 = vld [vmem:[#allocation2 + $0xf2] sm:$0xff] }
  0x8b   : > { %1455 = vmatpush1.msra.mxu0 %v880_v15  ;;  %3139 = vmatprep.mubr.f32.mxu0 %v4114_v20  ;;  %v906_v15 = vld [vmem:[%s4991_s1 + $0xd8] sm:$0xff] }
  0x8c   : > { %1456 = vmatprep.subr.mxu0 %v3434_v3  ;;  %3179 = vmatprep.subr.mxu1 %v918_v25 }
  0x8d   : > { %1457 = vmatpush1.msra.mxu0 %v879_v39  ;;  %1121 = vmatmul.mubr.f32.gmra.mxu1 %v4126_v30  ;;  %v4184_v39 = vld [vmem:[#allocation2 + $0xf8] sm:$0xff] }
  0x8e   : > { %3140 = vmatmul.mubr.f32.gmra.mxu0 %v4129_v35  ;;  %1458 = vmatprep.subr.mxu0 %v3434_v3  ;;  %5005 = vst [vmem:[#allocation3_spill] sm:$0xff] %v4184_v39 }
  0x8f   : > { %1459 = vmatpush2.msra.mxu0 %v910_v40  ;;  %3180 = vmatpush3.msra.mxu1 %v918_v25  ;;  %v4179_v25 = vld [vmem:[#allocation2 + $0x122] sm:$0xff]  ;;  %v4186_v40 = vld [vmem:[#allocation2 + $0x12a] sm:$0xff] }
  0x90   : > { %1460 = vmatprep.subr.mxu0 %v3434_v3  ;;  %1125 = vmatprep.mubr.f32.mxu1 %v3692_v43  ;;  %v907_v43 = vld [vmem:[%s4991_s1 + $0xe0] sm:$0xff] }
  0x91   : > { %3142 = vmatprep.mubr.f32.mxu0 %v4138_v41  ;;  %1461 = vmatpush2.msra.mxu0 %v909_v47  ;;  %v904_v47 = vld [vmem:[%s4991_s1 + $0xc8] sm:$0xff] }
  0x92   : > { %1126 = vmatmul.mubr.f32.gmra.mxu1 %v4143_v52  ;;  %3143 = vmatmul.mubr.f32.gmra.mxu0 %v4145_v58 }
  0x93   : > { %1462 = vmatprep.subr.mxu0 %v3434_v3  ;;  %1130 = vmatprep.mubr.f32.mxu1 %v3700_v45  ;;  %v4176_v45 = vld [vmem:[#allocation2] sm:$0xff] }
  0x94   : > { %1463 = vmatpush2.msra.mxu0 %v908_v62  ;;  %3145 = vmatprep.mubr.f32.mxu0 %v4153_v5  ;;  %v4194_v62 = vld [vmem:[#allocation2 + $0x13a] sm:$0xff] }
  0x95   : > { %1464 = vmatprep.subr.mxu0 %v3434_v3  ;;  %3181 = vmatprep.subr.mxu1 %v917_v7  ;;  %v905_v3 = vld [vmem:[%s4991_s1 + $0xd0] sm:$0xff]  ;;  %5006 = vst [vmem:[#allocation4_spill] sm:$0xff] %v4194_v62 }
  0x96   : > { %1465 = vmatpush2.msra.mxu0 %v907_v43  ;;  %1131 = vmatmul.mubr.f32.gmra.mxu1 %v4165_v8  ;;  %v4206_v43 = vld [vmem:[#allocation2 + $0x108] sm:$0xff] }
  0x97   : > { %3146 = vmatmul.mubr.f32.gmra.mxu0 %v4168_v9  ;;  %1466 = vmatprep.subr.mxu0 %v4176_v45  ;;  %5007 = vst [vmem:[#allocation5_spill] sm:$0xff] %v4206_v43 }
  0x98   : > { %1467 = vmatpush2.msra.mxu0 %v906_v15  ;;  %3182 = vmatpush3.msra.mxu1 %v917_v7  ;;  %v916_v7 = vld [vmem:[%s4991_s1 + $0x128] sm:$0xff] }
  0x99   : > { %1468 = vmatprep.subr.mxu0 %v4176_v45  ;;  %1135 = vmatprep.mubr.f32.mxu1 %v3703_v46  ;;  %v903_v46 = vld [vmem:[%s4991_s1 + $0xc0] sm:$0xff] }
  0x9a   : > { %3148 = vmatprep.mubr.f32.mxu0 %v4179_v25  ;;  %1469 = vmatpush2.msra.mxu0 %v905_v3  ;;  %v4209_v15 = vld [vmem:[#allocation2 + $0x142] sm:$0xff]  ;;  %v902_v3 = vld [vmem:[%s4991_s1 + $0xb8] sm:$0xff] }
  0x9b   : > { %1136 = vmatmul.mubr.f32.gmra.mxu1 %v4184_v39  ;;  %3149 = vmatmul.mubr.f32.gmra.mxu0 %v4186_v40  ;;  %v4223_v39 = vld [vmem:[#allocation2 + $0x110] sm:$0xff] }
  0x9c   : > { %1470 = vmatprep.subr.mxu0 %v4176_v45  ;;  %1140 = vmatprep.mubr.f32.mxu1 %v3715_v49  ;;  %v4218_v49 = vld [vmem:[#allocation2 + $0x152] sm:$0xff]  ;;  %5008 = vst [vmem:[#allocation6_spill] sm:$0xff] %v4223_v39 }
  0x9d   : > { %1471 = vmatpush2.msra.mxu0 %v904_v47  ;;  %3151 = vmatprep.mubr.f32.mxu0 %v4194_v62  ;;  %v901_v47 = vld [vmem:[%s4991_s1 + $0xb0] sm:$0xff]  ;;  %v4225_v62 = vld [vmem:[#allocation2 + $0x15a] sm:$0xff] }
  0x9e   : > { %1472 = vmatprep.subr.mxu0 %v4176_v45  ;;  %3183 = vmatprep.subr.mxu1 %v916_v7  ;;  %5009 = vst [vmem:[#allocation7_spill] sm:$0xff] %v4225_v62 }
  0x9f   : > { %1473 = vmatpush2.msra.mxu0 %v903_v46  ;;  %1141 = vmatmul.mubr.f32.gmra.mxu1 %v4206_v43  ;;  %v900_v46 = vld [vmem:[%s4991_s1 + $0xa8] sm:$0xff] }
  0xa0   : > { %3152 = vmatmul.mubr.f32.gmra.mxu0 %v4209_v15  ;;  %1474 = vmatprep.subr.mxu0 %v4176_v45  ;;  %v4233_v43 = vld [vmem:[#allocation2 + $0x16a] sm:$0xff] }
  0xa1   : > { %1475 = vmatpush2.msra.mxu0 %v902_v3  ;;  %3184 = vmatpush3.msra.mxu1 %v916_v7  ;;  %5010 = vst [vmem:[#allocation8_spill] sm:$0xff] %v4233_v43  ;;  %v915_v7 = vld [vmem:[%s4991_s1 + $0x120] sm:$0xff] }
  0xa2   : > { %1476 = vmatprep.subr.mxu0 %v4176_v45  ;;  %1145 = vmatprep.mubr.f32.mxu1 %v3718_v50  ;;  %v899_v50 = vld [vmem:[%s4991_s1 + $0xa0] sm:$0xff] }
  0xa3   : > { %3154 = vmatprep.mubr.f32.mxu0 %v4218_v49  ;;  %1477 = vmatpush2.msra.mxu0 %v901_v47  ;;  %v4245_v3 = vld [vmem:[#allocation2 + $0x120] sm:$0xff]  ;;  %v4248_v47 = vld [vmem:[#allocation2 + $0x172] sm:$0xff] }
  0xa4   : > { %1146 = vmatmul.mubr.f32.gmra.mxu1 %v4223_v39  ;;  %3155 = vmatmul.mubr.f32.gmra.mxu0 %v4225_v62  ;;  %5011 = vst [vmem:[#allocation9_spill] sm:$0xff] %v4245_v3  ;;  %v898_v39 = vld [vmem:[%s4991_s1 + $0x98] sm:$0xff]  ;;  %v876_v62 = vld [vmem:[#allocation2 + $0x18a] sm:$0xff] }
  0xa5   : > { %1478 = vmatprep.subr.mxu0 %v4176_v45  ;;  %1150 = vmatprep.mubr.f32.mxu1 %v3730_v53  ;;  %v875_v53 = vld [vmem:[#allocation2 + $0x182] sm:$0xff] }
  0xa6   : > { %1479 = vmatpush2.msra.mxu0 %v900_v46  ;;  %3157 = vmatprep.mubr.f32.mxu0 %v4233_v43  ;;  %v897_v46 = vld [vmem:[%s4991_s1 + $0x90] sm:$0xff]  ;;  %v4260_v43 = vld [vmem:[#allocation2 + $0x128] sm:$0xff] }
  0xa7   : > { %1480 = vmatprep.subr.mxu0 %v4176_v45  ;;  %3185 = vmatprep.subr.mxu1 %v915_v7 }
  0xa8   : > { %1481 = vmatpush2.msra.mxu0 %v899_v50  ;;  %1151 = vmatmul.mubr.f32.gmra.mxu1 %v4245_v3  ;;  %v896_v50 = vld [vmem:[%s4991_s1 + $0x88] sm:$0xff] }
  0xa9   : > { %3158 = vmatmul.mubr.f32.gmra.mxu0 %v4248_v47  ;;  %1482 = vmatprep.subr.mxu0 %v4176_v45  ;;  %v807_v3 = vld [vmem:[#allocation2 + $0x1] sm:$0xff] }
  0xaa   : > { %1483 = vmatpush2.msra.mxu0 %v898_v39  ;;  %3186 = vmatpush3.msra.mxu1 %v915_v7  ;;  %v914_v39 = vld [vmem:[%s4991_s1 + $0x118] sm:$0xff] }
  0xab   : > { %1484 = vmatprep.subr.mxu0 %v4176_v45  ;;  %1155 = vmatprep.mubr.f32.mxu1 %v3733_v54  ;;  %v895_v54 = vld [vmem:[%s4991_s1 + $0x80] sm:$0xff]  ;;  %v4276_v7 = vld [vmem:[#allocation2 + $0x138] sm:$0xff] }
  0xac   : > { %3160 = vmatprep.mubr.f32.mxu0 %v875_v53  ;;  %1485 = vmatpush2.msra.mxu0 %v897_v46  ;;  %v913_v53 = vld [vmem:[%s4991_s1 + $0x110] sm:$0xff]  ;;  %v4287_v46 = vld [vmem:[#allocation2 + $0x140] sm:$0xff] }
  0xad   : > { %1156 = vmatmul.mubr.f32.gmra.mxu1 %v4260_v43  ;;  %3161 = vmatmul.mubr.f32.gmra.mxu0 %v876_v62  ;;  %v808_v62 = vld [vmem:[#allocation2 + $0x9] sm:$0xff] }
  0xae   : > { %1486 = vmatprep.subr.mxu0 %v4176_v45  ;;  %1160 = vmatprep.mubr.f32.mxu1 %v3741_v56  ;;  %v2805_v56 = vld [vmem:[%s4991_s1 + $0x478] sm:$0xff] }
  0xaf   : > { %1487 = vmatpush2.msra.mxu0 %v896_v50  ;;  %1490 = vmatprep.mubr.f32.mxu0 %v807_v3  ;;  %v912_v3 = vld [vmem:[%s4991_s1 + $0x108] sm:$0xff]  ;;  %v2804_v50 = vld [vmem:[%s4991_s1 + $0x470] sm:$0xff] }
  0xb0   : > { %1488 = vmatprep.subr.mxu0 %v4176_v45  ;;  %3187 = vmatprep.subr.mxu1 %v914_v39 }
  0xb1   : > { %1489 = vmatpush2.msra.mxu0 %v895_v54  ;;  %1161 = vmatmul.mubr.f32.gmra.mxu1 %v4276_v7  ;;  %v911_v54 = vld [vmem:[%s4991_s1 + $0x100] sm:$0xff] }
  0xb2   : > { %1491 = vmatmul.mubr.f32.vlgmr.msra.gmra.mxu0 %v4176_v45  ;;  %3188 = vmatpush3.msra.mxu1 %v914_v39  ;;  %v4299_v39 = vld [vmem:[#allocation2 + $0x150] sm:$0xff] }
  0xb3   : > { %1165 = vmatprep.mubr.f32.mxu1 %v3746_v57  ;;  %1495 = vmatprep.mubr.f32.mxu0 %v808_v62  ;;  %v3333_v57 = vld [vmem:[#allocation2 + $0x19] sm:$0xff]  ;;  %v2803_v62 = vld [vmem:[%s4991_s1 + $0x468] sm:$0xff] }
  0xb4   : > { %3189 = vmatprep.subr.mxu1 %v913_v53  ;;  %3243 = vmatprep.subr.mxu0 %v2805_v56 }
  0xb5   : > { %1166 = vmatmul.mubr.f32.gmra.mxu1 %v4287_v46  ;;  %3244 = vmatpush3.msra.mxu0 %v2805_v56  ;;  %v2802_v56 = vld [vmem:[%s4991_s1 + $0x460] sm:$0xff] }
  0xb6   : > { %1496 = vmatmul.mubr.f32.gmra.mxu0 %v4176_v45  ;;  %1170 = vmatprep.mubr.f32.mxu1 %v3753_v59  ;;  %v4310_v59 = vld [vmem:[#allocation2 + $0x158] sm:$0xff] }
  0xb7   : > { %1500 = vmatprep.mubr.f32.mxu0 %v3333_v57  ;;  %3190 = vmatpush3.msra.mxu1 %v913_v53  ;;  %v3334_v53 = vld [vmem:[#allocation2 + $0x21] sm:$0xff]  ;;  %v4344_v57 = vld [vmem:[#allocation2 + $0x49] sm:$0xff] }
  0xb8   : > { %3191 = vmatprep.subr.mxu1 %v912_v3  ;;  %3245 = vmatprep.subr.mxu0 %v2804_v50 }
  0xb9   : > { %1171 = vmatmul.mubr.f32.gmra.mxu1 %v4299_v39  ;;  %3246 = vmatpush3.msra.mxu0 %v2804_v50  ;;  %v4335_v50 = vld [vmem:[#allocation2 + $0x39] sm:$0xff] }
  0xba   : > { %1501 = vmatmul.mubr.f32.gmra.mxu0 %v3882_v42  ;;  %1175 = vmatprep.mubr.f32.mxu1 %v3761_v61  ;;  %v4318_v42 = vld [vmem:[#allocation2 + $0x168] sm:$0xff]  ;;  %v4320_v61 = vld [vmem:[#allocation2 + $0x31] sm:$0xff] }
  0xbb   : > { %1505 = vmatprep.mubr.f32.mxu0 %v3334_v53  ;;  %3192 = vmatpush3.msra.mxu1 %v912_v3  ;;  %v2801_v3 = vld [vmem:[%s4991_s1 + $0x458] sm:$0xff]  ;;  %v843_v53 = vld [vmem:[#allocation2 + $0x2] sm:$0xff] }
  0xbc   : > { %3193 = vmatprep.subr.mxu1 %v911_v54  ;;  %3247 = vmatprep.subr.mxu0 %v2803_v62 }
  0xbd   : > { %1176 = vmatmul.mubr.f32.gmra.mxu1 %v4310_v59  ;;  %3248 = vmatpush3.msra.mxu0 %v2803_v62  ;;  %v4355_v62 = vld [vmem:[#allocation2 + $0x51] sm:$0xff] }
  0xbe   : > { %1506 = vmatmul.mubr.f32.gmra.mxu0 %v3894_v48  ;;  %1180 = vmatprep.mubr.f32.mxu1 %v3769_v63  ;;  %v4330_v63 = vld [vmem:[#allocation2 + $0x170] sm:$0xff] }
  0xbf   : > { %1510 = vmatprep.mubr.f32.mxu0 %v4320_v61  ;;  %3194 = vmatpush3.msra.mxu1 %v911_v54  ;;  %v2800_v48 = vld [vmem:[%s4991_s1 + $0x450] sm:$0xff]  ;;  %v2798_v54 = vld [vmem:[%s4991_s1 + $0x440] sm:$0xff] }
  0xc0   : > { %1925 = vmatprep.subr.mxu1 %v4176_v45  ;;  %3249 = vmatprep.subr.mxu0 %v2802_v56 }
  0xc1   : > { %1181 = vmatmul.mubr.f32.gmra.mxu1 %v4318_v42  ;;  %3250 = vmatpush3.msra.mxu0 %v2802_v56  ;;  %v4362_v56 = vld [vmem:[#allocation2 + $0x61] sm:$0xff] }
  0xc2   : > { %1511 = vmatmul.mubr.f32.gmra.mxu0 %v3907_v55  ;;  %1185 = vmatprep.mubr.f32.mxu1 %v3772_v0  ;;  %v2799_v55 = vld [vmem:[%s4991_s1 + $0x448] sm:$0xff]  ;;  %v803_v0 = vld [vmem:[#allocation2 + $0x180] sm:$0xff] }
  0xc3   : > { %1515 = vmatprep.mubr.f32.mxu0 %v4335_v50  ;;  %3251 = vmatprep.subr.mxu0 %v2801_v3 }
  0xc4   : > { %3252 = vmatpush3.msra.mxu0 %v2801_v3  ;;  %v2773_v3 = vld [vmem:[%s4991_s1 + $0x378] sm:$0xff] }
  0xc5   : > { %1186 = vmatmul.mubr.f32.gmra.mxu1 %v4330_v63  ;;  %3253 = vmatprep.subr.mxu0 %v2800_v48 }
  0xc6   : > { %1516 = vmatmul.mubr.f32.gmra.mxu0 %v3919_v17  ;;  %1190 = vmatprep.mubr.f32.mxu1 %v3783_v2  ;;  %v804_v17 = vld [vmem:[#allocation2 + $0x188] sm:$0xff]  ;;  %v2797_v2 = vld [vmem:[%s4991_s1 + $0x438] sm:$0xff] }
  0xc7   : > { %1520 = vmatprep.mubr.f32.mxu0 %v4344_v57  ;;  %3254 = vmatpush3.msra.mxu0 %v2800_v48  ;;  %v2772_v48 = vld [vmem:[%s4991_s1 + $0x370] sm:$0xff] }
  0xc8   : > { %3255 = vmatprep.subr.mxu0 %v2799_v55 }
  0xc9   : > { %1191 = vmatmul.mubr.f32.gmra.mxu1 %v803_v0  ;;  %3256 = vmatpush3.msra.mxu0 %v2799_v55  ;;  %v2771_v55 = vld [vmem:[%s4991_s1 + $0x368] sm:$0xff]  ;;  %v4387_v0 = vld [vmem:[#allocation2 + $0x79] sm:$0xff] }
  0xca   : > { %1521 = vmatmul.mubr.f32.gmra.mxu0 %v3931_v19  ;;  %1195 = vmatprep.mubr.f32.mxu1 %v3786_v4  ;;  %v2796_v19 = vld [vmem:[%s4991_s1 + $0x430] sm:$0xff] }
  0xcb   : > { %1525 = vmatprep.mubr.f32.mxu0 %v4355_v62  ;;  %3257 = vmatprep.subr.mxu0 %v2798_v54  ;;  %v844_v4 = vld [vmem:[#allocation2 + $0xa] sm:$0xff] }
  0xcc   : > { %3258 = vmatpush3.msra.mxu0 %v2798_v54 }
  0xcd   : > { %1196 = vmatmul.mubr.f32.gmra.mxu1 %v804_v17  ;;  %3259 = vmatprep.subr.mxu0 %v2797_v2 }
  0xce   : > { %1526 = vmatmul.mubr.f32.gmra.mxu0 %v3943_v21  ;;  %3195 = vmatprep.mubr.f32.mxu1 %v843_v53  ;;  %v4373_v21 = vld [vmem:[#allocation2 + $0x69] sm:$0xff] }
  0xcf   : > { %1530 = vmatprep.mubr.f32.mxu0 %v4362_v56  ;;  %3260 = vmatpush3.msra.mxu0 %v2797_v2 }
  0xd0   : > { %3261 = vmatprep.subr.mxu0 %v2796_v19 }
  0xd1   : > { %3196 = vmatmul.mubr.f32.vlgmr.msra.gmra.mxu1 %v844_v4  ;;  %3262 = vmatpush3.msra.mxu0 %v2796_v19  ;;  %v2788_v4 = vld [vmem:[%s4991_s1 + $0x3f0] sm:$0xff] }
  0xd2   : > { %1531 = vmatmul.mubr.f32.gmra.mxu0 %v3955_v22  ;;  %1926 = vmatpush1.msra.mxu1 %v2773_v3  ;;  %v2770_v22 = vld [vmem:[%s4991_s1 + $0x360] sm:$0xff] }
  0xd3   : > { %1927 = vmatprep.subr.mxu1 %v4176_v45  ;;  %1535 = vmatprep.mubr.f32.mxu0 %v4373_v21 }
  0xd4   : > { %3198 = vmatprep.mubr.f32.mxu1 %v3973_v11  ;;  %1928 = vmatpush1.msra.mxu1 %v2772_v48  ;;  %v2769_v11 = vld [vmem:[%s4991_s1 + $0x358] sm:$0xff]  ;;  %v2787_v48 = vld [vmem:[%s4991_s1 + $0x3e8] sm:$0xff] }
  0xd5   : > { %3199 = vmatmul.mubr.f32.gmra.mxu1 %v3976_v12  ;;  %1929 = vmatprep.subr.mxu1 %v4176_v45  ;;  %v4401_v12 = vld [vmem:[#allocation2 + $0x81] sm:$0xff] }
  0xd6   : > { %1536 = vmatmul.mubr.f32.gmra.mxu0 %v3966_v24  ;;  %1930 = vmatpush1.msra.mxu1 %v2771_v55  ;;  %v2768_v24 = vld [vmem:[%s4991_s1 + $0x350] sm:$0xff] }
  0xd7   : > { %1931 = vmatprep.subr.mxu1 %v4176_v45  ;;  %1540 = vmatprep.mubr.f32.mxu0 %v4387_v0 }
  0xd8   : > { %3201 = vmatprep.mubr.f32.mxu1 %v3987_v14  ;;  %1932 = vmatpush1.msra.mxu1 %v2770_v22  ;;  %v2767_v14 = vld [vmem:[%s4991_s1 + $0x348] sm:$0xff] }
  0xd9   : > { %3202 = vmatmul.mubr.f32.gmra.mxu1 %v3993_v27  ;;  %1933 = vmatprep.subr.mxu1 %v4176_v45  ;;  %v4415_v27 = vld [vmem:[#allocation2 + $0x91] sm:$0xff] }
  0xda   : > { %1541 = vmatmul.mubr.f32.gmra.mxu0 %v3979_v13  ;;  %1934 = vmatpush1.msra.mxu1 %v2769_v11  ;;  %v2766_v13 = vld [vmem:[%s4991_s1 + $0x340] sm:$0xff] }
  0xdb   : > { %1935 = vmatprep.subr.mxu1 %v4176_v45  ;;  %1545 = vmatprep.mubr.f32.mxu0 %v4401_v12 }
  0xdc   : > { %3204 = vmatprep.mubr.f32.mxu1 %v4005_v23  ;;  %1936 = vmatpush1.msra.mxu1 %v2768_v24  ;;  %v2765_v23 = vld [vmem:[%s4991_s1 + $0x338] sm:$0xff]  ;;  %v2786_v24 = vld [vmem:[%s4991_s1 + $0x3e0] sm:$0xff] }
  0xdd   : > { %3205 = vmatmul.mubr.f32.gmra.mxu1 %v4011_v29  ;;  %1937 = vmatprep.subr.mxu1 %v4176_v45  ;;  %v4429_v29 = vld [vmem:[#allocation2 + $0x99] sm:$0xff] }
  0xde   : > { %1546 = vmatmul.mubr.f32.gmra.mxu0 %v3997_v18  ;;  %1938 = vmatpush1.msra.mxu1 %v2767_v14  ;;  %v2764_v18 = vld [vmem:[%s4991_s1 + $0x330] sm:$0xff] }
  0xdf   : > { %1939 = vmatprep.subr.mxu1 %v4176_v45  ;;  %1550 = vmatprep.mubr.f32.mxu0 %v4415_v27 }
  0xe0   : > { %3207 = vmatprep.mubr.f32.mxu1 %v4023_v33  ;;  %1940 = vmatpush1.msra.mxu1 %v2766_v13  ;;  %v2763_v33 = vld [vmem:[%s4991_s1 + $0x328] sm:$0xff] }
  0xe1   : > { %3208 = vmatmul.mubr.f32.gmra.mxu1 %v4029_v31  ;;  %1941 = vmatprep.subr.mxu1 %v4176_v45  ;;  %v4443_v31 = vld [vmem:[#allocation2 + $0xa9] sm:$0xff] }
  0xe2   : > { %1551 = vmatmul.mubr.f32.gmra.mxu0 %v4015_v28  ;;  %1942 = vmatpush1.msra.mxu1 %v2765_v23  ;;  %v2762_v28 = vld [vmem:[%s4991_s1 + $0x320] sm:$0xff] }
  0xe3   : > { %1943 = vmatprep.subr.mxu1 %v4176_v45  ;;  %1555 = vmatprep.mubr.f32.mxu0 %v4429_v29 }
  0xe4   : > { %3210 = vmatprep.mubr.f32.mxu1 %v4041_v44  ;;  %1944 = vmatpush1.msra.mxu1 %v2764_v18  ;;  %v2761_v44 = vld [vmem:[%s4991_s1 + $0x318] sm:$0xff] }
  0xe5   : > { %3211 = vmatmul.mubr.f32.gmra.mxu1 %v4047_v32  ;;  %1945 = vmatprep.subr.mxu1 %v4176_v45  ;;  %v4463_v32 = vld [vmem:[#allocation2 + $0xb1] sm:$0xff] }
  0xe6   : > { %1556 = vmatmul.mubr.f32.gmra.mxu0 %v4033_v38  ;;  %1946 = vmatpush1.msra.mxu1 %v2763_v33  ;;  %v2760_v38 = vld [vmem:[%s4991_s1 + $0x310] sm:$0xff] }
  0xe7   : > { %1947 = vmatprep.subr.mxu1 %v4176_v45  ;;  %1560 = vmatprep.mubr.f32.mxu0 %v4443_v31 }
  0xe8   : > { %3213 = vmatprep.mubr.f32.mxu1 %v4059_v16  ;;  %1948 = vmatpush1.msra.mxu1 %v2762_v28  ;;  %v2759_v16 = vld [vmem:[%s4991_s1 + $0x308] sm:$0xff] }
  0xe9   : > { %3214 = vmatmul.mubr.f32.gmra.mxu1 %v4065_v34  ;;  %1949 = vmatprep.subr.mxu1 %v4176_v45  ;;  %v2758_v34 = vld [vmem:[%s4991_s1 + $0x300] sm:$0xff] }
  0xea   : > { %1561 = vmatmul.mubr.f32.gmra.mxu0 %v4051_v51  ;;  %1950 = vmatpush1.msra.mxu1 %v2761_v44 }
  0xeb   : > { %1951 = vmatprep.subr.mxu1 %v4176_v45  ;;  %1565 = vmatprep.mubr.f32.mxu0 %v4463_v32 }
  0xec   : > { %3216 = vmatprep.mubr.f32.mxu1 %v4077_v1  ;;  %1952 = vmatpush1.msra.mxu1 %v2760_v38  ;;  %v3037_v51 = vpop.f32.mrf.mxu0  ;;  %v4478_v1 = vld [vmem:[#allocation2 + $0xc1] sm:$0xff]  ;;  %v2784_v38 = vld [vmem:[%s4991_s1 + $0x3d0] sm:$0xff] }
  0xed   : > { %3217 = vmatmul.mubr.f32.gmra.mxu1 %v4083_v36  ;;  %1953 = vmatprep.subr.mxu1 %v4176_v45  ;;  %559 = vst [vmem:[%s4460_s30 + $0x8] sm:$0xff] %v3037_v51  ;;  %v628_v54 = vmul.f32 %v3037_v51, %v3037_v51  ;;  %v2789_v36 = vld [vmem:[%s4991_s1 + $0x3f8] sm:$0xff] }
  0xee   : > { %1566 = vmatmul.mubr.f32.gmra.mxu0 %v4069_v60  ;;  %1954 = vmatpush1.msra.mxu1 %v2759_v16  ;;  %v399_v17 = vpop.f32.mrf.mxu0 }
  0xef   : > { %1955 = vmatprep.subr.mxu1 %v4176_v45  ;;  %1570 = vmatprep.mubr.f32.mxu0 %v4478_v1  ;;  %558 = vst [vmem:[%s4460_s30] sm:$0xff] %v399_v17  ;;  %v590_v2 = vadd.f32 %v3037_v51, %v399_v17  ;;  %v627_v53 = vmul.f32 %v399_v17, %v399_v17 }
  0xf0   : > { %3219 = vmatprep.mubr.f32.mxu1 %v4099_v37  ;;  %1956 = vmatpush1.msra.mxu1 %v2758_v34  ;;  %v3040_v60 = vpop.f32.mrf.mxu0  ;;  %v4494_v37 = vld [vmem:[#allocation2 + $0xc9] sm:$0xff] }
  0xf1   : > { %3220 = vmatmul.mubr.f32.gmra.mxu1 %v4106_v26  ;;  %1957 = vmatprep.subr.mxu1 %v4176_v45  ;;  %v659_v19 = vadd.f32 %v628_v54, %v627_v53  ;;  %561 = vst [vmem:[%s4460_s30 + $0x18] sm:$0xff] %v3040_v60  ;;  %v630_v26 = vmul.f32 %v3040_v60, %v3040_v60  ;;  %v2782_v53 = vld [vmem:[%s4991_s1 + $0x3c0] sm:$0xff] }
  0xf2   : > { %1571 = vmatmul.mubr.f32.gmra.mxu0 %v4087_v6  ;;  %1958 = vmatpush2.msra.mxu1 %v2789_v36  ;;  %v409_v3 = vpop.f32.mrf.mxu0 }
  0xf3   : > { %1959 = vmatprep.subr.mxu1 %v4176_v45  ;;  %1575 = vmatprep.mubr.f32.mxu0 %v4494_v37  ;;  %560 = vst [vmem:[%s4460_s30 + $0x10] sm:$0xff] %v409_v3  ;;  %v591_v55 = vadd.f32 %v590_v2, %v409_v3  ;;  %v629_v22 = vmul.f32 %v409_v3, %v409_v3 }
  0xf4   : > { %3222 = vmatprep.mubr.f32.mxu1 %v4114_v20  ;;  %1960 = vmatpush2.msra.mxu1 %v2788_v4  ;;  %v3043_v6 = vpop.f32.mrf.mxu0  ;;  %v4510_v20 = vld [vmem:[#allocation2 + $0xd9] sm:$0xff] }
  0xf5   : > { %3223 = vmatmul.mubr.f32.gmra.mxu1 %v4129_v35  ;;  %1961 = vmatprep.subr.mxu1 %v4176_v45  ;;  %v660_v11 = vadd.f32 %v659_v19, %v629_v22  ;;  %563 = vst [vmem:[%s4460_s30 + $0x28] sm:$0xff] %v3043_v6  ;;  %v592_v14 = vadd.f32 %v3040_v60, %v591_v55  ;;  %v2785_v35 = vld [vmem:[%s4991_s1 + $0x3d8] sm:$0xff]  ;;  %v2780_v22 = vld [vmem:[%s4991_s1 + $0x3b0] sm:$0xff] }
  0xf6   : > { %1576 = vmatmul.mubr.f32.gmra.mxu0 %v4104_v10  ;;  %1962 = vmatpush2.msra.mxu1 %v2787_v48  ;;  %v632_v13 = vmul.f32 %v3043_v6, %v3043_v6  ;;  %v419_v23 = vpop.f32.mrf.mxu0 }
  0xf7   : > { %1963 = vmatprep.subr.mxu1 %v4176_v45  ;;  %1580 = vmatprep.mubr.f32.mxu0 %v4510_v20  ;;  %562 = vst [vmem:[%s4460_s30 + $0x20] sm:$0xff] %v419_v23  ;;  %v593_v18 = vadd.f32 %v592_v14, %v419_v23  ;;  %v631_v33 = vmul.f32 %v419_v23, %v419_v23 }
  0xf8   : > { %v661_v28 = vadd.f32 %v660_v11, %v630_v26  ;;  %3225 = vmatprep.mubr.f32.mxu1 %v4138_v41  ;;  %1964 = vmatpush2.msra.mxu1 %v2786_v24  ;;  %v3046_v10 = vpop.f32.mrf.mxu0  ;;  %v4526_v41 = vld [vmem:[#allocation2 + $0xe1] sm:$0xff] }
  0xf9   : > { %3226 = vmatmul.mubr.f32.gmra.mxu1 %v4145_v58  ;;  %1965 = vmatprep.subr.mxu1 %v4176_v45  ;;  %565 = vst [vmem:[%s4460_s30 + $0x38] sm:$0xff] %v3046_v10  ;;  %v594_v16 = vadd.f32 %v3043_v6, %v593_v18  ;;  %v634_v51 = vmul.f32 %v3046_v10, %v3046_v10  ;;  %v2783_v58 = vld [vmem:[%s4991_s1 + $0x3c8] sm:$0xff] }
  0xfa   : > { %v662_v44 = vadd.f32 %v661_v28, %v631_v33  ;;  %1581 = vmatmul.mubr.f32.gmra.mxu0 %v4126_v30  ;;  %1966 = vmatpush2.msra.mxu1 %v2785_v35  ;;  %v429_v34 = vpop.f32.mrf.mxu0  ;;  %v5012_v35 = vld [vmem:[#allocation4_spill] sm:$0xff]  ;;  %v2778_v33 = vld [vmem:[%s4991_s1 + $0x3a0] sm:$0xff] }
  0xfb   : > { %1967 = vmatprep.subr.mxu1 %v4176_v45  ;;  %1585 = vmatprep.mubr.f32.mxu0 %v4526_v41  ;;  %564 = vst [vmem:[%s4460_s30 + $0x30] sm:$0xff] %v429_v34  ;;  %v595_v54 = vadd.f32 %v594_v16, %v429_v34  ;;  %v633_v17 = vmul.f32 %v429_v34, %v429_v34  ;;  %v4574_v16 = vld [vmem:[#allocation2 + $0x109] sm:$0xff] }
  0xfc   : > { %v663_v36 = vadd.f32 %v662_v44, %v632_v13  ;;  %3228 = vmatprep.mubr.f32.mxu1 %v4153_v5  ;;  %1968 = vmatpush2.msra.mxu1 %v2784_v38  ;;  %v3049_v30 = vpop.f32.mrf.mxu0  ;;  %v4542_v5 = vld [vmem:[#allocation2 + $0xf1] sm:$0xff] }
  0xfd   : > { %3229 = vmatmul.mubr.f32.gmra.mxu1 %v4168_v9  ;;  %1969 = vmatprep.subr.mxu1 %v4176_v45  ;;  %567 = vst [vmem:[%s4460_s30 + $0x48] sm:$0xff] %v3049_v30  ;;  %v596_v60 = vadd.f32 %v3046_v10, %v595_v54  ;;  %v636_v19 = vmul.f32 %v3049_v30, %v3049_v30  ;;  %v2781_v9 = vld [vmem:[%s4991_s1 + $0x3b8] sm:$0xff]  ;;  %v5013_v10 = vld [vmem:[#allocation3_spill] sm:$0xff] }
  0xfe   : > { %v664_v2 = vadd.f32 %v663_v36, %v633_v17  ;;  %1586 = vmatmul.mubr.f32.gmra.mxu0 %v4143_v52  ;;  %1970 = vmatpush2.msra.mxu1 %v2783_v58  ;;  %v439_v4 = vpop.f32.mrf.mxu0  ;;  %v5014_v17 = vld [vmem:[#allocation7_spill] sm:$0xff] }
  0xff   : > { %1971 = vmatprep.subr.mxu1 %v4176_v45  ;;  %1590 = vmatprep.mubr.f32.mxu0 %v4542_v5  ;;  %566 = vst [vmem:[%s4460_s30 + $0x40] sm:$0xff] %v439_v4  ;;  %v597_v3 = vadd.f32 %v596_v60, %v439_v4  ;;  %v635_v26 = vmul.f32 %v439_v4, %v439_v4  ;;  %v2775_v4 = vld [vmem:[%s4991_s1 + $0x388] sm:$0xff] }
 0x100   : > { %v665_v48 = vadd.f32 %v664_v2, %v634_v51  ;;  %3231 = vmatprep.mubr.f32.mxu1 %v4179_v25  ;;  %1972 = vmatpush2.msra.mxu1 %v2782_v53  ;;  %v3052_v52 = vpop.f32.mrf.mxu0  ;;  %v4558_v25 = vld [vmem:[#allocation2 + $0xf9] sm:$0xff] }
 0x101   : > { %3232 = vmatmul.mubr.f32.gmra.mxu1 %v4186_v40  ;;  %1973 = vmatprep.subr.mxu1 %v4176_v45  ;;  %569 = vst [vmem:[%s4460_s30 + $0x58] sm:$0xff] %v3052_v52  ;;  %v598_v6 = vadd.f32 %v3049_v30, %v597_v3  ;;  %v638_v11 = vmul.f32 %v3052_v52, %v3052_v52  ;;  %v2779_v40 = vld [vmem:[%s4991_s1 + $0x3a8] sm:$0xff]  ;;  %v2776_v30 = vld [vmem:[%s4991_s1 + $0x390] sm:$0xff]  ;;  %v5015_v53 = vld [vmem:[#allocation5_spill] sm:$0xff] }
 0x102   : > { %v666_v55 = vadd.f32 %v665_v48, %v635_v26  ;;  %1591 = vmatmul.mubr.f32.gmra.mxu0 %v4165_v8  ;;  %1974 = vmatpush2.msra.mxu1 %v2781_v9  ;;  %v449_v24 = vpop.f32.mrf.mxu0  ;;  %v5016_v48 = vld [vmem:[#allocation8_spill] sm:$0xff] }
 0x103   : > { %1975 = vmatprep.subr.mxu1 %v4176_v45  ;;  %1595 = vmatprep.mubr.f32.mxu0 %v4558_v25  ;;  %568 = vst [vmem:[%s4460_s30 + $0x50] sm:$0xff] %v449_v24  ;;  %v599_v14 = vadd.f32 %v598_v6, %v449_v24  ;;  %v637_v13 = vmul.f32 %v449_v24, %v449_v24  ;;  %v5017_v24 = vld [vmem:[#allocation6_spill] sm:$0xff] }
 0x104   : > { %v667_v23 = vadd.f32 %v666_v55, %v636_v19  ;;  %3234 = vmatprep.mubr.f32.mxu1 %v5012_v35  ;;  %1976 = vmatpush2.msra.mxu1 %v2780_v22  ;;  %v3055_v8 = vpop.f32.mrf.mxu0  ;;  %v2774_v22 = vld [vmem:[%s4991_s1 + $0x380] sm:$0xff] }
 0x105   : > { %3235 = vmatmul.mubr.f32.gmra.mxu1 %v4209_v15  ;;  %1977 = vmatprep.subr.mxu1 %v4176_v45  ;;  %571 = vst [vmem:[%s4460_s30 + $0x68] sm:$0xff] %v3055_v8  ;;  %v600_v28 = vadd.f32 %v3052_v52, %v599_v14  ;;  %v640_v44 = vmul.f32 %v3055_v8, %v3055_v8  ;;  %v2777_v15 = vld [vmem:[%s4991_s1 + $0x398] sm:$0xff] }
 0x106   : > { %v668_v18 = vadd.f32 %v667_v23, %v637_v13  ;;  %1596 = vmatmul.mubr.f32.gmra.mxu0 %v5013_v10  ;;  %1978 = vmatpush2.msra.mxu1 %v2779_v40  ;;  %v459_v38 = vpop.f32.mrf.mxu0  ;;  %v4611_v13 = vld [vmem:[#allocation2 + $0x121] sm:$0xff] }
 0x107   : > { %1979 = vmatprep.subr.mxu1 %v4176_v45  ;;  %1600 = vmatprep.mubr.f32.mxu0 %v4574_v16  ;;  %570 = vst [vmem:[%s4460_s30 + $0x60] sm:$0xff] %v459_v38  ;;  %v601_v51 = vadd.f32 %v600_v28, %v459_v38  ;;  %v639_v34 = vmul.f32 %v459_v38, %v459_v38  ;;  %v3356_v28 = vld [vmem:[#allocation2 + $0x30] sm:$0xff]  ;;  %v2794_v38 = vld [vmem:[%s4991_s1 + $0x420] sm:$0xff] }
 0x108   : > { %v669_v58 = vadd.f32 %v668_v18, %v638_v11  ;;  %3237 = vmatprep.mubr.f32.mxu1 %v4218_v49  ;;  %1980 = vmatpush2.msra.mxu1 %v2778_v33  ;;  %v3058_v54 = vpop.f32.mrf.mxu0  ;;  %v4590_v49 = vld [vmem:[#allocation2 + $0x111] sm:$0xff] }
 0x109   : > { %3238 = vmatmul.mubr.f32.gmra.mxu1 %v5014_v17  ;;  %1981 = vmatprep.subr.mxu1 %v4176_v45  ;;  %573 = vst [vmem:[%s4460_s30 + $0x78] sm:$0xff] %v3058_v54  ;;  %v602_v2 = vadd.f32 %v3055_v8, %v601_v51  ;;  %v642_v60 = vmul.f32 %v3058_v54, %v3058_v54 }
 0x10a   : > { %v670_v36 = vadd.f32 %v669_v58, %v639_v34  ;;  %1601 = vmatmul.mubr.f32.gmra.mxu0 %v5015_v53  ;;  %1982 = vmatpush2.msra.mxu1 %v2777_v15  ;;  %v469_v19 = vpop.f32.mrf.mxu0  ;;  %v5018_v15 = vld [vmem:[#allocation9_spill] sm:$0xff]  ;;  %v4624_v34 = vld [vmem:[#allocation2 + $0x129] sm:$0xff] }
 0x10b   : > { %1983 = vmatprep.subr.mxu1 %v4176_v45  ;;  %1605 = vmatprep.mubr.f32.mxu0 %v4590_v49  ;;  %572 = vst [vmem:[%s4460_s30 + $0x70] sm:$0xff] %v469_v19  ;;  %v603_v9 = vadd.f32 %v602_v2, %v469_v19  ;;  %v641_v3 = vmul.f32 %v469_v19, %v469_v19  ;;  %v3358_v2 = vld [vmem:[#allocation2 + $0x38] sm:$0xff] }
 0x10c   : > { %v671_v26 = vadd.f32 %v670_v36, %v640_v44  ;;  %3240 = vmatprep.mubr.f32.mxu1 %v5016_v48  ;;  %1984 = vmatpush2.msra.mxu1 %v2776_v30  ;;  %v3061_v52 = vpop.f32.mrf.mxu0 }
 0x10d   : > { %3241 = vmatmul.mubr.f32.gmra.mxu1 %v4248_v47  ;;  %1985 = vmatprep.subr.mxu1 %v4176_v45  ;;  %575 = vst [vmem:[%s4460_s30 + $0x88] sm:$0xff] %v3061_v52  ;;  %v4604_v6 = vpop.f32.mrf.mxu1  ;;  %v604_v11 = vadd.f32 %v3058_v54, %v603_v9  ;;  %v644_v40 = vmul.f32 %v3061_v52, %v3061_v52  ;;  %v2795_v47 = vld [vmem:[%s4991_s1 + $0x428] sm:$0xff] }
 0x10e   : > { %v672_v55 = vadd.f32 %v671_v26, %v641_v3  ;;  %1606 = vmatmul.mubr.f32.gmra.mxu0 %v5017_v24  ;;  %1986 = vmatpush2.msra.mxu1 %v2775_v4  ;;  %v479_v14 = vpop.f32.mrf.mxu0  ;;  %v2792_v3 = vld [vmem:[%s4991_s1 + $0x410] sm:$0xff]  ;;  %v4639_v26 = vld [vmem:[#allocation2 + $0x139] sm:$0xff] }
 0x10f   : > { %1987 = vmatprep.subr.mxu1 %v4176_v45  ;;  %1610 = vmatprep.mubr.f32.mxu0 %v4611_v13  ;;  %574 = vst [vmem:[%s4460_s30 + $0x80] sm:$0xff] %v479_v14  ;;  %v605_v23 = vadd.f32 %v604_v11, %v479_v14  ;;  %v643_v35 = vmul.f32 %v479_v14, %v479_v14  ;;  %v1044_v18 = vpop.f32.mrf.mxu1  ;;  %v2791_v14 = vld [vmem:[%s4991_s1 + $0x408] sm:$0xff] }
 0x110   : > { %v673_v8 = vadd.f32 %v672_v55, %v642_v60  ;;  %1988 = vmatpush2.msra.mxu1 %v2774_v22  ;;  %1989 = vmatprep.mubr.f32.mxu1 %v4320_v61  ;;  %v3064_v33 = vpop.f32.mrf.mxu0 }
 0x111   : > { %1990 = vmatmul.mubr.f32.vlgmr.msra.gmra.mxu1 %v3356_v28  ;;  %577 = vst [vmem:[%s4460_s30 + $0x98] sm:$0xff] %v3064_v33  ;;  %v4617_v44 = vpop.f32.mrf.mxu1  ;;  %v606_v45 = vadd.f32 %v3061_v52, %v605_v23  ;;  %3263 = vmatprep.subr.mxu0 %v2795_v47  ;;  %v646_v51 = vmul.f32 %v3064_v33, %v3064_v33 }
 0x112   : > { %v674_v10 = vadd.f32 %v673_v8, %v643_v35  ;;  %1611 = vmatmul.mubr.f32.gmra.mxu0 %v5018_v15  ;;  %1994 = vmatprep.mubr.f32.mxu1 %v4335_v50  ;;  %v489_v61 = vpop.f32.mrf.mxu0  ;;  %v2793_v50 = vld [vmem:[%s4991_s1 + $0x418] sm:$0xff]  ;;  %v4651_v35 = vld [vmem:[#allocation2 + $0x141] sm:$0xff] }
 0x113   : > { %1615 = vmatprep.mubr.f32.mxu0 %v4624_v34  ;;  %576 = vst [vmem:[%s4460_s30 + $0x90] sm:$0xff] %v489_v61  ;;  %v607_v58 = vadd.f32 %v606_v45, %v489_v61  ;;  %v645_v54 = vmul.f32 %v489_v61, %v489_v61  ;;  %v1049_v36 = vpop.f32.mrf.mxu1  ;;  %3264 = vmatpush3.msra.mxu0 %v2795_v47 }
 0x114   : > { %v675_v17 = vadd.f32 %v674_v10, %v644_v40  ;;  %v3067_v30 = vpop.f32.mrf.mxu0  ;;  %3265 = vmatprep.subr.mxu0 %v2794_v38 }
 0x115   : > { %1995 = vmatmul.mubr.f32.gmra.mxu1 %v3358_v2  ;;  %579 = vst [vmem:[%s4460_s30 + $0xa8] sm:$0xff] %v3067_v30  ;;  %v4632_v60 = vpop.f32.mrf.mxu1  ;;  %v608_v19 = vadd.f32 %v3064_v33, %v607_v58  ;;  %3266 = vmatpush3.msra.mxu0 %v2794_v38  ;;  %v648_v4 = vmul.f32 %v3067_v30, %v3067_v30  ;;  %v4663_v58 = vld [vmem:[#allocation2 + $0x151] sm:$0xff]  ;;  %v3364_v2 = vld [vmem:[#allocation2 + $0x60] sm:$0xff] }
 0x116   : > { %v676_v53 = vadd.f32 %v675_v17, %v645_v54  ;;  %1616 = vmatmul.mubr.f32.gmra.mxu0 %v4260_v43  ;;  %1999 = vmatprep.mubr.f32.mxu1 %v4344_v57  ;;  %v499_v9 = vpop.f32.mrf.mxu0  ;;  %v3360_v57 = vld [vmem:[#allocation2 + $0x48] sm:$0xff] }
 0x117   : > { %1620 = vmatprep.mubr.f32.mxu0 %v4639_v26  ;;  %578 = vst [vmem:[%s4460_s30 + $0xa0] sm:$0xff] %v499_v9  ;;  %v609_v48 = vadd.f32 %v608_v19, %v499_v9  ;;  %v647_v52 = vmul.f32 %v499_v9, %v499_v9  ;;  %v1054_v22 = vpop.f32.mrf.mxu1  ;;  %3267 = vmatprep.subr.mxu0 %v2793_v50 }
 0x118   : > { %v677_v55 = vadd.f32 %v676_v53, %v646_v51  ;;  %v3070_v43 = vpop.f32.mrf.mxu0  ;;  %3268 = vmatpush3.msra.mxu0 %v2793_v50 }
 0x119   : > { %2000 = vmatmul.mubr.f32.gmra.mxu1 %v3360_v57  ;;  %581 = vst [vmem:[%s4460_s30 + $0xb8] sm:$0xff] %v3070_v43  ;;  %v4644_v24 = vpop.f32.mrf.mxu1  ;;  %v610_v40 = vadd.f32 %v3067_v30, %v609_v48  ;;  %3269 = vmatprep.subr.mxu0 %v2792_v3  ;;  %v650_v47 = vmul.f32 %v3070_v43, %v3070_v43 }
 0x11a   : > { %v678_v11 = vadd.f32 %v677_v55, %v647_v52  ;;  %1621 = vmatmul.mubr.f32.gmra.mxu0 %v4276_v7  ;;  %2004 = vmatprep.mubr.f32.mxu1 %v4355_v62  ;;  %v509_v23 = vpop.f32.mrf.mxu0  ;;  %v2790_v7 = vld [vmem:[%s4991_s1 + $0x400] sm:$0xff]  ;;  %v3362_v62 = vld [vmem:[#allocation2 + $0x50] sm:$0xff] }
 0x11b   : > { %1625 = vmatprep.mubr.f32.mxu0 %v4651_v35  ;;  %580 = vst [vmem:[%s4460_s30 + $0xb0] sm:$0xff] %v509_v23  ;;  %v611_v8 = vadd.f32 %v610_v40, %v509_v23  ;;  %v649_v18 = vmul.f32 %v509_v23, %v509_v23  ;;  %v1059_v28 = vpop.f32.mrf.mxu1  ;;  %3270 = vmatpush3.msra.mxu0 %v2792_v3  ;;  %v4681_v40 = vld [vmem:[#allocation2 + $0x169] sm:$0xff] }
 0x11c   : > { %v679_v33 = vadd.f32 %v678_v11, %v648_v4  ;;  %v3073_v10 = vpop.f32.mrf.mxu0  ;;  %3271 = vmatprep.subr.mxu0 %v2791_v14  ;;  %v4672_v4 = vld [vmem:[#allocation2 + $0x159] sm:$0xff] }
 0x11d   : > { %2005 = vmatmul.mubr.f32.gmra.mxu1 %v3362_v62  ;;  %583 = vst [vmem:[%s4460_s30 + $0xc8] sm:$0xff] %v3073_v10  ;;  %v4659_v38 = vpop.f32.mrf.mxu1  ;;  %v612_v15 = vadd.f32 %v3070_v43, %v611_v8  ;;  %3272 = vmatpush3.msra.mxu0 %v2791_v14  ;;  %v652_v51 = vmul.f32 %v3073_v10, %v3073_v10  ;;  %v3366_v43 = vld [vmem:[#allocation2 + $0x68] sm:$0xff]  ;;  %v3368_v28 = vld [vmem:[#allocation2 + $0x78] sm:$0xff] }
 0x11e   : > { %v680_v45 = vadd.f32 %v679_v33, %v649_v18  ;;  %1626 = vmatmul.mubr.f32.gmra.mxu0 %v4287_v46  ;;  %2009 = vmatprep.mubr.f32.mxu1 %v4362_v56  ;;  %v519_v61 = vpop.f32.mrf.mxu0  ;;  %v4690_v62 = vld [vmem:[#allocation2 + $0x171] sm:$0xff] }
 0x11f   : > { %1630 = vmatprep.mubr.f32.mxu0 %v4663_v58  ;;  %582 = vst [vmem:[%s4460_s30 + $0xc0] sm:$0xff] %v519_v61  ;;  %v613_v54 = vadd.f32 %v612_v15, %v519_v61  ;;  %v651_v17 = vmul.f32 %v519_v61, %v519_v61  ;;  %v1064_v30 = vpop.f32.mrf.mxu1  ;;  %3273 = vmatprep.subr.mxu0 %v2790_v7 }
 0x120   : > { %v681_v36 = vadd.f32 %v680_v45, %v650_v47  ;;  %v3076_v50 = vpop.f32.mrf.mxu0  ;;  %3274 = vmatpush3.msra.mxu0 %v2790_v7 }
 0x121   : > { %2010 = vmatmul.mubr.f32.gmra.mxu1 %v3364_v2  ;;  %585 = vst [vmem:[%s4460_s30 + $0xd8] sm:$0xff] %v3076_v50  ;;  %v4668_v56 = vpop.f32.mrf.mxu1  ;;  %v614_v53 = vadd.f32 %v3073_v10, %v613_v54  ;;  %v654_v9 = vmul.f32 %v3076_v50, %v3076_v50 }
 0x122   : > { %v682_v46 = vadd.f32 %v681_v36, %v651_v17  ;;  %1631 = vmatmul.mubr.f32.gmra.mxu0 %v4299_v39  ;;  %2014 = vmatprep.mubr.f32.mxu1 %v4373_v21  ;;  %v529_v19 = vpop.f32.mrf.mxu0  ;;  %v3370_v36 = vld [vmem:[#allocation2 + $0x80] sm:$0xff] }
 0x123   : > { %1635 = vmatprep.mubr.f32.mxu0 %v4672_v4  ;;  %584 = vst [vmem:[%s4460_s30 + $0xd0] sm:$0xff] %v529_v19  ;;  %v615_v3 = vadd.f32 %v614_v53, %v529_v19  ;;  %v653_v48 = vmul.f32 %v529_v19, %v529_v19  ;;  %v1069_v55 = vpop.f32.mrf.mxu1  ;;  %v3371_v19 = vld [vmem:[#allocation2 + $0x32] sm:$0xff] }
 0x124   : > { %v683_v52 = vadd.f32 %v682_v46, %v652_v51  ;;  %v3079_v22 = vpop.f32.mrf.mxu0 }
 0x125   : > { %2015 = vmatmul.mubr.f32.gmra.mxu1 %v3366_v43  ;;  %587 = vst [vmem:[%s4460_s30 + $0xe8] sm:$0xff] %v3079_v22  ;;  %v4677_v39 = vpop.f32.mrf.mxu1  ;;  %v616_v21 = vadd.f32 %v3076_v50, %v615_v3  ;;  %v656_v14 = vmul.f32 %v3079_v22, %v3079_v22 }
 0x126   : > { %v684_v57 = vadd.f32 %v683_v52, %v653_v48  ;;  %1636 = vmatmul.mubr.f32.gmra.mxu0 %v4310_v59  ;;  %2019 = vmatprep.mubr.f32.mxu1 %v4387_v0  ;;  %v539_v11 = vpop.f32.mrf.mxu0 }
 0x127   : > { %1640 = vmatprep.mubr.f32.mxu0 %v4681_v40  ;;  %586 = vst [vmem:[%s4460_s30 + $0xe0] sm:$0xff] %v539_v11  ;;  %v617_v47 = vadd.f32 %v616_v21, %v539_v11  ;;  %v655_v23 = vmul.f32 %v539_v11, %v539_v11  ;;  %v1074_v18 = vpop.f32.mrf.mxu1  ;;  %v3374_v11 = vld [vmem:[#allocation2 + $0x4a] sm:$0xff] }
 0x128   : > { %v685_v8 = vadd.f32 %v684_v57, %v654_v9  ;;  %v3082_v33 = vpop.f32.mrf.mxu0  ;;  %v3375_v18 = vld [vmem:[#allocation2 + $0x98] sm:$0xff] }
 0x129   : > { %2020 = vmatmul.mubr.f32.gmra.mxu1 %v3368_v28  ;;  %589 = vst [vmem:[%s4460_s30 + $0xf8] sm:$0xff] %v3082_v33  ;;  %v4686_v59 = vpop.f32.mrf.mxu1  ;;  %v618_v0 = vadd.f32 %v3079_v22, %v617_v47  ;;  %v658_v45 = vmul.f32 %v3082_v33, %v3082_v33  ;;  %v3372_v22 = vld [vmem:[#allocation2 + $0x90] sm:$0xff] }
 0x12a   : > { %v686_v10 = vadd.f32 %v685_v8, %v655_v23  ;;  %1641 = vmatmul.mubr.f32.gmra.mxu0 %v4318_v42  ;;  %2024 = vmatprep.mubr.f32.mxu1 %v4401_v12  ;;  %v549_v7 = vpop.f32.mrf.mxu0 }
 0x12b   : > { %1645 = vmatprep.mubr.f32.mxu0 %v4690_v62  ;;  %588 = vst [vmem:[%s4460_s30 + $0xf0] sm:$0xff] %v549_v7  ;;  %v619_v15 = vadd.f32 %v618_v0, %v549_v7  ;;  %v657_v51 = vmul.f32 %v549_v7, %v549_v7  ;;  %v1079_v54 = vpop.f32.mrf.mxu1  ;;  %v3377_v7 = vld [vmem:[#allocation2 + $0x62] sm:$0xff]  ;;  %s2708_s30 = sshll.u32 %s5020_s22, 1 }
 0x12c   : > { %v687_v61 = vadd.f32 %v686_v10, %v656_v14  ;;  %v3117_v17 = vpop.f32.mrf.mxu0  ;;  %s284_s17 = scalar_lea.vmem %s4996_s6, %s2708_s30  ;;  %s280_s24 = scalar_lea.vmem %s4995_s5, %s2708_s30 }
 0x12d   : > { %2025 = vmatmul.mubr.f32.gmra.mxu1 %v3370_v36  ;;  %v620_v30 = vadd.f32 %v3082_v33, %v619_v15  ;;  %v4694_v2 = vpop.f32.mrf.mxu1  ;;  %v4697_v42 = vadd.f32 %v3117_v17, %v4617_v44 }
 0x12e   : > { %v688_v50 = vadd.f32 %v687_v61, %v657_v51  ;;  %1646 = vmatmul.mubr.f32.gmra.mxu0 %v4330_v63  ;;  %2029 = vmatprep.mubr.f32.mxu1 %v4415_v27  ;;  %v1267_v12 = vpop.f32.mrf.mxu0  ;;  %v3373_v63 = vld [vmem:[#allocation2 + $0x3a] sm:$0xff] }
 0x12f   : > { %v621_v46 = vrot.slane %v620_v30, 4  ;;  %3275 = vmatprep.mubr.f32.mxu0 %v3371_v19  ;;  %v1084_v9 = vpop.f32.mrf.mxu1  ;;  %v4702_v3 = vadd.f32 %v1267_v12, %v4604_v6 }
 0x130   : > { %v689_v53 = vadd.f32 %v688_v50, %v658_v45  ;;  %v3120_v48 = vpop.f32.mrf.mxu0  ;;  %v3382_v9 = vld [vmem:[#allocation2 + $0x82] sm:$0xff] }
 0x131   : > { %v622_v52 = vadd.f32 %v621_v46, %v620_v30  ;;  %2030 = vmatmul.mubr.f32.gmra.mxu1 %v3372_v22  ;;  %v1087_v44 = vpop.f32.mrf.mxu1  ;;  %v4705_v43 = vadd.f32 %v3120_v48, %v4644_v24  ;;  %v3380_v30 = vld [vmem:[#allocation2 + $0x7a] sm:$0xff] }
 0x132   : > { %v690_v55 = vrot.slane %v689_v53, 4  ;;  %3276 = vmatmul.mubr.f32.vlgmr.msra.gmra.mxu0 %v3373_v63  ;;  %2034 = vmatprep.mubr.f32.mxu1 %v4429_v29  ;;  %v1277_v27 = vpop.f32.mrf.mxu0  ;;  %v3376_v29 = vld [vmem:[#allocation2 + $0x52] sm:$0xff]  ;;  %v3384_v63 = vld [vmem:[#allocation2 + $0xc0] sm:$0xff] }
 0x133   : > { %v623_v57 = vrot.slane %v622_v52, 2  ;;  %3278 = vmatprep.mubr.f32.mxu0 %v3374_v11  ;;  %v1089_v6 = vpop.f32.mrf.mxu1  ;;  %v4709_v14 = vadd.f32 %v1277_v27, %v4632_v60  ;;  %v3386_v11 = vld [vmem:[#allocation2 + $0xaa] sm:$0xff] }
 0x134   : > { %v691_v21 = vadd.f32 %v690_v55, %v689_v53  ;;  %v3123_v47 = vpop.f32.mrf.mxu0  ;;  %v3381_v53 = vld [vmem:[#allocation2 + $0xb0] sm:$0xff] }
 0x135   : > { %v624_v23 = vadd.f32 %v623_v57, %v622_v52  ;;  %2035 = vmatmul.mubr.f32.gmra.mxu1 %v3375_v18  ;;  %v1092_v24 = vpop.f32.mrf.mxu1  ;;  %v4712_v33 = vadd.f32 %v3123_v47, %v4668_v56  ;;  %v3378_v56 = vld [vmem:[#allocation2 + $0xa8] sm:$0xff]  ;;  %v3383_v52 = vld [vmem:[#allocation2 + $0x92] sm:$0xff] }
 0x136   : > { %v692_v8 = vrot.slane %v691_v21, 2  ;;  %3279 = vmatmul.mubr.f32.gmra.mxu0 %v3376_v29  ;;  %2039 = vmatprep.mubr.f32.mxu1 %v4443_v31  ;;  %v1287_v28 = vpop.f32.mrf.mxu0  ;;  %v3379_v31 = vld [vmem:[#allocation2 + $0x6a] sm:$0xff]  ;;  %v3388_v18 = vld [vmem:[#allocation2 + $0xb2] sm:$0xff] }
 0x137   : > { %v625_v10 = vrot.slane %v624_v23, 1  ;;  %3281 = vmatprep.mubr.f32.mxu0 %v3377_v7  ;;  %v1094_v60 = vpop.f32.mrf.mxu1  ;;  %v4716_v45 = vadd.f32 %v1287_v28, %v4659_v38  ;;  %v3389_v28 = vld [vmem:[#allocation2 + $0xc2] sm:$0xff] }
 0x138   : > { %v693_v0 = vadd.f32 %v692_v8, %v691_v21  ;;  %v3126_v15 = vpop.f32.mrf.mxu0  ;;  %v3391_v60 = vld [vmem:[#allocation2 + $0xca] sm:$0xff] }
 0x139   : > { %v626_v51 = vadd.f32 %v625_v10, %v624_v23  ;;  %2040 = vmatmul.mubr.f32.gmra.mxu1 %v3378_v56  ;;  %v1097_v54 = vpop.f32.mrf.mxu1  ;;  %v4720_v17 = vadd.f32 %v3126_v15, %v4686_v59  ;;  %v3387_v23 = vld [vmem:[#allocation2 + $0xc8] sm:$0xff] }
 0x13a   : > { %v694_v61 = vrot.slane %v693_v0, 1  ;;  %3282 = vmatmul.mubr.f32.gmra.mxu0 %v3379_v31  ;;  %2044 = vmatprep.mubr.f32.mxu1 %v4463_v32  ;;  %v1297_v36 = vpop.f32.mrf.mxu0 }
 0x13b   : > { %3284 = vmatprep.mubr.f32.mxu0 %v3380_v30  ;;  %v1099_v50 = vpop.f32.mrf.mxu1  ;;  %v4729_v12 = vadd.f32 %v1297_v36, %v4677_v39  ;;  %v3394_v36 = vld [vmem:[#allocation2 + $0xe2] sm:$0xff]  ;;  %v3395_v30 = vld [vmem:[#allocation2 + $0xf2] sm:$0xff] }
 0x13c   : > { %v695_v38 = vadd.f32 %v694_v61, %v693_v0  ;;  %v3129_v59 = vpop.f32.mrf.mxu0  ;;  %v3390_v0 = vld [vmem:[#allocation2 + $0xd8] sm:$0xff] }
 0x13d   : > { %2045 = vmatmul.mubr.f32.gmra.mxu1 %v3381_v53  ;;  %v1102_v19 = vpop.f32.mrf.mxu1  ;;  %v4732_v32 = vadd.f32 %v3129_v59, %v1087_v44  ;;  %v3385_v44 = vld [vmem:[#allocation2 + $0x9a] sm:$0xff]  ;;  %v3396_v59 = vld [vmem:[#allocation2 + $0xf0] sm:$0xff] }
 0x13e   : > { %v697_v46 = vsel %vm696_vm0, %v626_v51, %v695_v38  ;;  %3285 = vmatmul.mubr.f32.gmra.mxu0 %v3382_v9  ;;  %2049 = vmatprep.mubr.f32.mxu1 %v4478_v1  ;;  %v1307_v48 = vpop.f32.mrf.mxu0  ;;  %v3392_v51 = vld [vmem:[#allocation2 + $0xda] sm:$0xff] }
 0x13f   : > { %698 = vst [vmem:[%s284_s17] sm:$0x3] %v697_v46  ;;  %3287 = vmatprep.mubr.f32.mxu0 %v3383_v52  ;;  %v1104_v55 = vpop.f32.mrf.mxu1  ;;  %v4736_v39 = vadd.f32 %v1307_v48, %v4694_v2  ;;  %v3397_v53 = vld [vmem:[#allocation2 + $0xfa] sm:$0xff]  ;;  %v3398_v52 = vld [vmem:[#allocation2 + $0x10a] sm:$0xff] }
 0x140   : > { %v3132_v22 = vpop.f32.mrf.mxu0 }
 0x141   : > { %2050 = vmatmul.mubr.f32.gmra.mxu1 %v3384_v63  ;;  %v1107_v27 = vpop.f32.mrf.mxu1  ;;  %v4738_v57 = vadd.f32 %v3132_v22, %v1097_v54  ;;  %v3393_v54 = vld [vmem:[#allocation2 + $0xe0] sm:$0xff]  ;;  %v3399_v22 = vld [vmem:[#allocation2 + $0xf8] sm:$0xff] }
 0x142   : > { %3288 = vmatmul.mubr.f32.gmra.mxu0 %v3385_v44  ;;  %2054 = vmatprep.mubr.f32.mxu1 %v4494_v37  ;;  %v1317_v21 = vpop.f32.mrf.mxu0  ;;  %v3400_v63 = vld [vmem:[#allocation2 + $0x112] sm:$0xff] }
 0x143   : > { %3290 = vmatprep.mubr.f32.mxu0 %v3386_v11  ;;  %v1109_v1 = vpop.f32.mrf.mxu1  ;;  %v4741_v6 = vadd.f32 %v1317_v21, %v1092_v24  ;;  %v3401_v11 = vld [vmem:[#allocation2 + $0x122] sm:$0xff] }
 0x144   : > { %v3135_v47 = vpop.f32.mrf.mxu0  ;;  %v3402_v1 = vld [vmem:[#allocation2 + $0x108] sm:$0xff] }
 0x145   : > { %2055 = vmatmul.mubr.f32.gmra.mxu1 %v3387_v23  ;;  %v1112_v2 = vpop.f32.mrf.mxu1  ;;  %v4743_v8 = vadd.f32 %v3135_v47, %v1107_v27  ;;  %v3403_v23 = vld [vmem:[#allocation2 + $0x12a] sm:$0xff] }
 0x146   : > { %3291 = vmatmul.mubr.f32.gmra.mxu0 %v3388_v18  ;;  %2059 = vmatprep.mubr.f32.mxu1 %v4510_v20  ;;  %v1327_v29 = vpop.f32.mrf.mxu0 }
 0x147   : > { %3293 = vmatprep.mubr.f32.mxu0 %v3389_v28  ;;  %v1114_v37 = vpop.f32.mrf.mxu1  ;;  %v4746_v10 = vadd.f32 %v1327_v29, %v1102_v19  ;;  %v3404_v29 = vld [vmem:[#allocation2 + $0x13a] sm:$0xff] }
 0x149   : > { %2060 = vmatmul.mubr.f32.gmra.mxu1 %v3390_v0  ;;  %v1117_v24 = vpop.f32.mrf.mxu1  ;;  %v3138_v7 = vpop.f32.mrf.mxu0 }
 0x14a   : > { %3294 = vmatmul.mubr.f32.gmra.mxu0 %v3391_v60  ;;  %2064 = vmatprep.mubr.f32.mxu1 %v4526_v41  ;;  %v4749_v15 = vadd.f32 %v3138_v7, %v1117_v24  ;;  %v3406_v24 = vld [vmem:[#allocation2 + $0x142] sm:$0xff]  ;;  %v3407_v60 = vld [vmem:[#allocation2 + $0x152] sm:$0xff] }
 0x14b   : > { %3296 = vmatprep.mubr.f32.mxu0 %v3392_v51  ;;  %v1119_v61 = vpop.f32.mrf.mxu1  ;;  %v1337_v20 = vpop.f32.mrf.mxu0 }
 0x14c   : > { %v4751_v56 = vadd.f32 %v1337_v20, %v1112_v2  ;;  %v3408_v61 = vld [vmem:[#allocation2 + $0x120] sm:$0xff] }
 0x14d   : > { %2065 = vmatmul.mubr.f32.gmra.mxu1 %v3393_v54  ;;  %v1122_v31 = vpop.f32.mrf.mxu1 }
 0x14e   : > { %3297 = vmatmul.mubr.f32.gmra.mxu0 %v3394_v36  ;;  %2069 = vmatprep.mubr.f32.mxu1 %v4542_v5  ;;  %v3141_v38 = vpop.f32.mrf.mxu0  ;;  %v3410_v36 = vld [vmem:[#allocation2 + $0x16a] sm:$0xff] }
 0x14f   : > { %3299 = vmatprep.mubr.f32.mxu0 %v3395_v30  ;;  %v1124_v50 = vpop.f32.mrf.mxu1 }
 0x150   : > { %v1347_v41 = vpop.f32.mrf.mxu0  ;;  %v3411_v50 = vld [vmem:[#allocation2 + $0x128] sm:$0xff] }
 0x151   : > { %2070 = vmatmul.mubr.f32.gmra.mxu1 %v3396_v59  ;;  %v4754_v46 = vadd.f32 %v1347_v41, %v1122_v31  ;;  %v3409_v31 = vld [vmem:[#allocation2 + $0x15a] sm:$0xff] }
 0x152   : > { %3300 = vmatmul.mubr.f32.gmra.mxu0 %v3397_v53  ;;  %2074 = vmatprep.mubr.f32.mxu1 %v4558_v25  ;;  %v1127_v19 = vpop.f32.mrf.mxu1  ;;  %v3144_v9 = vpop.f32.mrf.mxu0  ;;  %v3412_v53 = vld [vmem:[#allocation2 + $0x172] sm:$0xff] }
 0x153   : > { %v4757_v48 = vadd.f32 %v3141_v38, %v1127_v19  ;;  %3302 = vmatprep.mubr.f32.mxu0 %v3398_v52  ;;  %v3413_v19 = vld [vmem:[#allocation2 + $0x182] sm:$0xff] }
 0x154   : > { %v1129_v5 = vpop.f32.mrf.mxu1  ;;  %v1357_v55 = vpop.f32.mrf.mxu0 }
 0x155   : > { %2075 = vmatmul.mubr.f32.gmra.mxu1 %v3399_v22 }
 0x156   : > { %3303 = vmatmul.mubr.f32.gmra.mxu0 %v3400_v63  ;;  %2079 = vmatprep.mubr.f32.mxu1 %v4574_v16  ;;  %v1132_v27 = vpop.f32.mrf.mxu1  ;;  %v3405_v16 = vld [vmem:[#allocation2 + $0x110] sm:$0xff] }
 0x157   : > { %v4760_v44 = vadd.f32 %v1357_v55, %v1132_v27  ;;  %v3147_v21 = vpop.f32.mrf.mxu0  ;;  %3305 = vmatprep.mubr.f32.mxu0 %v3401_v11  ;;  %v3414_v55 = vld [vmem:[#allocation2 + $0x138] sm:$0xff]  ;;  %v3415_v63 = vld [vmem:[#allocation2 + $0x18a] sm:$0xff] }
 0x158   : > { %v1134_v25 = vpop.f32.mrf.mxu1 }
 0x159   : > { %2080 = vmatmul.mubr.f32.gmra.mxu1 %v3402_v1  ;;  %v1367_v47 = vpop.f32.mrf.mxu0  ;;  %v3416_v25 = vld [vmem:[#allocation2 + $0x140] sm:$0xff] }
 0x15a   : > { %2084 = vmatprep.mubr.f32.mxu1 %v4590_v49  ;;  %3306 = vmatmul.mubr.f32.gmra.mxu0 %v3403_v23 }
 0x15b   : > { %v1137_v2 = vpop.f32.mrf.mxu1  ;;  %v3150_v18 = vpop.f32.mrf.mxu0  ;;  %3308 = vmatprep.mubr.f32.mxu0 %v3404_v29  ;;  %v3417_v29 = vld [vmem:[#allocation2 + $0x150] sm:$0xff] }
 0x15c   : > { %v4763_v28 = vadd.f32 %v3144_v9, %v1137_v2  ;;  %v877_v9 = vld [vmem:[#allocation2 + $0x19a] sm:$0xff] }
 0x15d   : > { %2085 = vmatmul.mubr.f32.gmra.mxu1 %v3405_v16  ;;  %v1139_v37 = vpop.f32.mrf.mxu1  ;;  %v1377_v0 = vpop.f32.mrf.mxu0 }
 0x15e   : > { %2089 = vmatprep.mubr.f32.mxu1 %v4611_v13  ;;  %3309 = vmatmul.mubr.f32.gmra.mxu0 %v3406_v24 }
 0x15f   : > { %v1142_v7 = vpop.f32.mrf.mxu1  ;;  %3311 = vmatprep.mubr.f32.mxu0 %v3407_v60 }
 0x160   : > { %v4766_v49 = vadd.f32 %v1367_v47, %v1142_v7  ;;  %v3153_v51 = vpop.f32.mrf.mxu0  ;;  %v3418_v7 = vld [vmem:[#allocation2 + $0x158] sm:$0xff] }
 0x161   : > { %2090 = vmatmul.mubr.f32.gmra.mxu1 %v3408_v61  ;;  %v1144_v20 = vpop.f32.mrf.mxu1 }
 0x162   : > { %v1387_v54 = vpop.f32.mrf.mxu0  ;;  %2094 = vmatprep.mubr.f32.mxu1 %v4624_v34  ;;  %3312 = vmatmul.mubr.f32.gmra.mxu0 %v3409_v31 }
 0x163   : > { %3314 = vmatprep.mubr.f32.mxu0 %v3410_v36  ;;  %v3419_v36 = vld [vmem:[#allocation2 + $0x168] sm:$0xff] }
 0x164   : > { %v1147_v38 = vpop.f32.mrf.mxu1  ;;  %v4769_v13 = vpop.f32.mrf.mxu0 }
 0x165   : > { %v4771_v30 = vadd.f32 %v3147_v21, %v1147_v38  ;;  %2095 = vmatmul.mubr.f32.gmra.mxu1 %v3411_v50 }
 0x166   : > { %v1149_v41 = vpop.f32.mrf.mxu1  ;;  %v1397_v59 = vpop.f32.mrf.mxu0  ;;  %2099 = vmatprep.mubr.f32.mxu1 %v4639_v26  ;;  %3315 = vmatmul.mubr.f32.gmra.mxu0 %v3412_v53  ;;  %v878_v26 = vld [vmem:[#allocation2 + $0x1a2] sm:$0xff]  ;;  %v3420_v53 = vld [vmem:[#allocation2 + $0x170] sm:$0xff] }
 0x167   : > { %3317 = vmatprep.mubr.f32.mxu0 %v3413_v19  ;;  %v3421_v19 = vld [vmem:[#allocation2 + $0x181] sm:$0xff] }
 0x168   : > { %v1152_v34 = vpop.f32.mrf.mxu1 }
 0x169   : > { %v4774_v52 = vadd.f32 %v1377_v0, %v1152_v34  ;;  %v4776_v5 = vpop.f32.mrf.mxu0  ;;  %2100 = vmatmul.mubr.f32.gmra.mxu1 %v3414_v55 }
 0x16a   : > { %v1154_v22 = vpop.f32.mrf.mxu1  ;;  %2104 = vmatprep.mubr.f32.mxu1 %v4651_v35  ;;  %3318 = vmatmul.mubr.f32.gmra.mxu0 %v3415_v63  ;;  %v3423_v63 = vld [vmem:[#allocation2 + $0x189] sm:$0xff] }
 0x16b   : > { %v1407_v27 = vpop.f32.mrf.mxu0  ;;  %3320 = vmatprep.mubr.f32.mxu0 %v877_v9 }
 0x16d   : > { %v1157_v21 = vpop.f32.mrf.mxu1  ;;  %v4779_v11 = vpop.f32.mrf.mxu0  ;;  %2105 = vmatmul.mubr.f32.gmra.mxu1 %v3416_v25 }
 0x16e   : > { %v4781_v1 = vadd.f32 %v3150_v18, %v1157_v21  ;;  %2109 = vmatprep.mubr.f32.mxu1 %v4663_v58  ;;  %3321 = vmatmul.mubr.f32.gmra.mxu0 %v878_v26 }
 0x16f   : > { %v1159_v47 = vpop.f32.mrf.mxu1  ;;  %v1417_v23 = vpop.f32.mrf.mxu0 }
 0x171   : > { %v1162_v2 = vpop.f32.mrf.mxu1  ;;  %2110 = vmatmul.mubr.f32.gmra.mxu1 %v3417_v29 }
 0x172   : > { %v4784_v35 = vadd.f32 %v1387_v54, %v1162_v2  ;;  %v1492_v16 = vpop.f32.mrf.mxu0  ;;  %2114 = vmatprep.mubr.f32.mxu1 %v4672_v4  ;;  %v3424_v2 = vld [vmem:[#allocation2 + $0x188] sm:$0xff] }
 0x173   : > { %v4788_v37 = vadd.f32 %v1492_v16, %v4702_v3  ;;  %v1164_v0 = vpop.f32.mrf.mxu1 }
 0x174   : > { %v1494_v24 = vpop.f32.mrf.mxu0  ;;  %v842_v0 = vld [vmem:[#allocation2 + $0x1a1] sm:$0xff] }
 0x175   : > { %v1167_v18 = vpop.f32.mrf.mxu1  ;;  %2115 = vmatmul.mubr.f32.gmra.mxu1 %v3418_v7  ;;  %v3425_v7 = vld [vmem:[#allocation2] sm:$0xff] }
 0x176   : > { %v4790_v58 = vadd.f32 %v3153_v51, %v1167_v18  ;;  %v1497_v60 = vpop.f32.mrf.mxu0  ;;  %2119 = vmatprep.mubr.f32.mxu1 %v4681_v40 }
 0x177   : > { %v1498_v61 = vadd.f32 %v1497_v60, %v4697_v42  ;;  %v1169_v20 = vpop.f32.mrf.mxu1 }
 0x178   : > { %v1499_v54 = vpop.f32.mrf.mxu0 }
 0x179   : > { %v1172_v31 = vpop.f32.mrf.mxu1  ;;  %2120 = vmatmul.mubr.f32.gmra.mxu1 %v3419_v36 }
 0x17a   : > { %v4794_v4 = vadd.f32 %v1397_v59, %v1172_v31  ;;  %v1502_v3 = vpop.f32.mrf.mxu0  ;;  %2124 = vmatprep.mubr.f32.mxu1 %v4690_v62  ;;  %v3422_v62 = vld [vmem:[#allocation2 + $0x180] sm:$0xff] }
 0x17b   : > { %v4798_v38 = vadd.f32 %v1502_v3, %v4709_v14  ;;  %v1174_v51 = vpop.f32.mrf.mxu1 }
 0x17c   : > { %v1504_v50 = vpop.f32.mrf.mxu0 }
 0x17d   : > { %v1177_v41 = vpop.f32.mrf.mxu1  ;;  %2125 = vmatmul.mubr.f32.gmra.mxu1 %v3420_v53 }
 0x17e   : > { %v4801_v40 = vadd.f32 %v4769_v13, %v1177_v41  ;;  %v1507_v42 = vpop.f32.mrf.mxu0  ;;  %2129 = vmatprep.mubr.f32.mxu1 %v3421_v19  ;;  %v841_v13 = vld [vmem:[#allocation2 + $0x199] sm:$0xff] }
 0x17f   : > { %v1508_v59 = vadd.f32 %v1507_v42, %v4705_v43  ;;  %v1179_v34 = vpop.f32.mrf.mxu1 }
 0x180   : > { %v1509_v9 = vpop.f32.mrf.mxu0 }
 0x181   : > { %v1182_v55 = vpop.f32.mrf.mxu1  ;;  %2130 = vmatmul.mubr.f32.gmra.mxu1 %v3422_v62 }
 0x182   : > { %v4804_v14 = vadd.f32 %v1407_v27, %v1182_v55  ;;  %v1512_v22 = vpop.f32.mrf.mxu0  ;;  %2134 = vmatprep.mubr.f32.mxu1 %v3423_v63 }
 0x183   : > { %v1513_v26 = vadd.f32 %v1512_v22, %v4716_v45  ;;  %v1184_v21 = vpop.f32.mrf.mxu1 }
 0x184   : > { %v1514_v25 = vpop.f32.mrf.mxu0 }
 0x185   : > { %v1187_v47 = vpop.f32.mrf.mxu1  ;;  %2135 = vmatmul.mubr.f32.gmra.mxu1 %v3424_v2 }
 0x186   : > { %v4808_v43 = vadd.f32 %v4776_v5, %v1187_v47  ;;  %v1517_v29 = vpop.f32.mrf.mxu0  ;;  %2139 = vmatprep.mubr.f32.mxu1 %v841_v13 }
 0x187   : > { %v1518_v16 = vadd.f32 %v1517_v29, %v4712_v33  ;;  %v1189_v27 = vpop.f32.mrf.mxu1 }
 0x188   : > { %v1519_v24 = vpop.f32.mrf.mxu0 }
 0x189   : > { %v1192_v18 = vpop.f32.mrf.mxu1  ;;  %2140 = vmatmul.mubr.f32.gmra.mxu1 %v3425_v7 }
 0x18a   : > { %v4811_v45 = vadd.f32 %v1417_v23, %v1192_v18  ;;  %v1522_v60 = vpop.f32.mrf.mxu0  ;;  %2144 = vmatprep.mubr.f32.mxu1 %v842_v0 }
 0x18b   : > { %v1523_v20 = vadd.f32 %v1522_v60, %v4729_v12  ;;  %v1194_v54 = vpop.f32.mrf.mxu1 }
 0x18c   : > { %v1524_v31 = vpop.f32.mrf.mxu0 }
 0x18d   : > { %v1197_v5 = vpop.f32.mrf.mxu1  ;;  %2145 = vmatmul.mubr.f32.gmra.mxu1 %v3425_v7 }
 0x18e   : > { %v4815_v36 = vadd.f32 %v4779_v11, %v1197_v5  ;;  %v1527_v33 = vpop.f32.mrf.mxu0 }
 0x18f   : > { %v1528_v3 = vadd.f32 %v1527_v33, %v4720_v17  ;;  %v1199_v51 = vpop.f32.mrf.mxu1 }
 0x190   : > { %v1529_v50 = vpop.f32.mrf.mxu0 }
 0x191   : > { %v3197_v41 = vpop.f32.mrf.mxu1 }
 0x192   : > { %v1532_v53 = vpop.f32.mrf.mxu0  ;;  %v4818_v23 = vadd.f32 %v3197_v41, %v1498_v61 }
 0x193   : > { %v1533_v42 = vadd.f32 %v1532_v53, %v4736_v39  ;;  %v1717_v19 = vpop.f32.mrf.mxu1 }
 0x194   : > { %v1534_v12 = vpop.f32.mrf.mxu0  ;;  %v4822_v34 = vadd.f32 %v1717_v19, %v4788_v37 }
 0x195   : > { %v3200_v9 = vpop.f32.mrf.mxu1 }
 0x196   : > { %v1537_v55 = vpop.f32.mrf.mxu0  ;;  %v4824_v11 = vadd.f32 %v3200_v9, %v1508_v59 }
 0x197   : > { %v1538_v62 = vadd.f32 %v1537_v55, %v4732_v32  ;;  %v1727_v17 = vpop.f32.mrf.mxu1 }
 0x198   : > { %v1539_v22 = vpop.f32.mrf.mxu0  ;;  %v4828_v63 = vadd.f32 %v1727_v17, %v4798_v38 }
 0x199   : > { %v3203_v61 = vpop.f32.mrf.mxu1 }
 0x19a   : > { %v1542_v21 = vpop.f32.mrf.mxu0  ;;  %v4830_v13 = vadd.f32 %v3203_v61, %v1518_v16 }
 0x19b   : > { %v1543_v39 = vadd.f32 %v1542_v21, %v4741_v6  ;;  %v1737_v25 = vpop.f32.mrf.mxu1 }
 0x19c   : > { %v1544_v37 = vpop.f32.mrf.mxu0  ;;  %v4833_v47 = vadd.f32 %v1737_v25, %v1513_v26 }
 0x19d   : > { %v3206_v2 = vpop.f32.mrf.mxu1 }
 0x19e   : > { %v1547_v59 = vpop.f32.mrf.mxu0  ;;  %v4835_v29 = vadd.f32 %v3206_v2, %v1528_v3 }
 0x19f   : > { %v1548_v32 = vadd.f32 %v1547_v59, %v4738_v57  ;;  %v1747_v27 = vpop.f32.mrf.mxu1 }
 0x1a0   : > { %v1549_v0 = vpop.f32.mrf.mxu0  ;;  %v4838_v38 = vadd.f32 %v1747_v27, %v1523_v20 }
 0x1a1   : > { %v3209_v24 = vpop.f32.mrf.mxu1 }
 0x1a2   : > { %v1552_v18 = vpop.f32.mrf.mxu0  ;;  %v4840_v16 = vadd.f32 %v3209_v24, %v1538_v62 }
 0x1a3   : > { %v1553_v6 = vadd.f32 %v1552_v18, %v4746_v10  ;;  %v1757_v7 = vpop.f32.mrf.mxu1 }
 0x1a4   : > { %v1554_v60 = vpop.f32.mrf.mxu0  ;;  %v4843_v26 = vadd.f32 %v1757_v7, %v1533_v42 }
 0x1a5   : > { %v3212_v54 = vpop.f32.mrf.mxu1 }
 0x1a6   : > { %v1557_v31 = vpop.f32.mrf.mxu0  ;;  %v4845_v5 = vadd.f32 %v3212_v54, %v1548_v32 }
 0x1a7   : > { %v1558_v57 = vadd.f32 %v1557_v31, %v4743_v8  ;;  %v1767_v33 = vpop.f32.mrf.mxu1 }
 0x1a8   : > { %v1559_v3 = vpop.f32.mrf.mxu0  ;;  %v4848_v20 = vadd.f32 %v1767_v33, %v1543_v39 }
 0x1a9   : > { %v3215_v51 = vpop.f32.mrf.mxu1 }
 0x1aa   : > { %v1562_v50 = vpop.f32.mrf.mxu0  ;;  %v4850_v41 = vadd.f32 %v3215_v51, %v1558_v57 }
 0x1ab   : > { %v1563_v10 = vadd.f32 %v1562_v50, %v4751_v56  ;;  %v1777_v53 = vpop.f32.mrf.mxu1 }
 0x1ac   : > { %v1564_v19 = vpop.f32.mrf.mxu0  ;;  %v4853_v42 = vadd.f32 %v1777_v53, %v1553_v6 }
 0x1ad   : > { %v3218_v12 = vpop.f32.mrf.mxu1 }
 0x1ae   : > { %v1567_v9 = vpop.f32.mrf.mxu0 }
 0x1af   : > { %v1568_v55 = vadd.f32 %v1567_v9, %v4749_v15  ;;  %v1787_v62 = vpop.f32.mrf.mxu1 }
 0x1b0   : > { %v1569_v8 = vpop.f32.mrf.mxu0  ;;  %v4856_v17 = vadd.f32 %v1787_v62, %v1563_v10 }
 0x1b1   : > { %v4858_v22 = vadd.f32 %v3218_v12, %v1568_v55  ;;  %v3221_v61 = vpop.f32.mrf.mxu1 }
 0x1b2   : > { %v1572_v21 = vpop.f32.mrf.mxu0 }
 0x1b3   : > { %v1573_v39 = vadd.f32 %v1572_v21, %v4754_v46  ;;  %v1797_v25 = vpop.f32.mrf.mxu1 }
 0x1b4   : > { %v1574_v56 = vpop.f32.mrf.mxu0 }
 0x1b5   : > { %v4861_v37 = vadd.f32 %v1797_v25, %v1573_v39  ;;  %v3224_v2 = vpop.f32.mrf.mxu1 }
 0x1b6   : > { %v1577_v59 = vpop.f32.mrf.mxu0 }
 0x1b7   : > { %v1578_v32 = vadd.f32 %v1577_v59, %v4757_v48  ;;  %v1807_v27 = vpop.f32.mrf.mxu1 }
 0x1b8   : > { %v1579_v15 = vpop.f32.mrf.mxu0 }
 0x1b9   : > { %v4864_v0 = vadd.f32 %v3221_v61, %v1578_v32  ;;  %v3227_v24 = vpop.f32.mrf.mxu1 }
 0x1ba   : > { %v1582_v18 = vpop.f32.mrf.mxu0 }
 0x1bb   : > { %v1583_v6 = vadd.f32 %v1582_v18, %v4760_v44  ;;  %v1817_v7 = vpop.f32.mrf.mxu1 }
 0x1bc   : > { %v1584_v60 = vpop.f32.mrf.mxu0 }
 0x1bd   : > { %v4867_v54 = vadd.f32 %v1807_v27, %v1583_v6  ;;  %v3230_v46 = vpop.f32.mrf.mxu1 }
 0x1be   : > { %v1587_v31 = vpop.f32.mrf.mxu0 }
 0x1bf   : > { %v1588_v57 = vadd.f32 %v1587_v31, %v4763_v28  ;;  %v1827_v33 = vpop.f32.mrf.mxu1 }
 0x1c0   : > { %v1589_v3 = vpop.f32.mrf.mxu0 }
 0x1c1   : > { %v4870_v51 = vadd.f32 %v3224_v2, %v1588_v57  ;;  %v3233_v48 = vpop.f32.mrf.mxu1 }
 0x1c2   : > { %v1592_v50 = vpop.f32.mrf.mxu0 }
 0x1c3   : > { %v1593_v10 = vadd.f32 %v1592_v50, %v4766_v49  ;;  %v1837_v53 = vpop.f32.mrf.mxu1 }
 0x1c4   : > { %v1594_v19 = vpop.f32.mrf.mxu0 }
 0x1c5   : > { %v4873_v12 = vadd.f32 %v1817_v7, %v1593_v10  ;;  %v3236_v44 = vpop.f32.mrf.mxu1 }
 0x1c6   : > { %v1597_v9 = vpop.f32.mrf.mxu0 }
 0x1c7   : > { %v1598_v55 = vadd.f32 %v1597_v9, %v4771_v30  ;;  %v1847_v62 = vpop.f32.mrf.mxu1 }
 0x1c8   : > { %v1599_v8 = vpop.f32.mrf.mxu0 }
 0x1c9   : > { %v4876_v61 = vadd.f32 %v3227_v24, %v1598_v55  ;;  %v3239_v28 = vpop.f32.mrf.mxu1 }
 0x1ca   : > { %v1602_v21 = vpop.f32.mrf.mxu0 }
 0x1cb   : > { %v1603_v39 = vadd.f32 %v1602_v21, %v4774_v52  ;;  %v1857_v25 = vpop.f32.mrf.mxu1 }
 0x1cc   : > { %v1604_v56 = vpop.f32.mrf.mxu0 }
 0x1cd   : > { %v4879_v2 = vadd.f32 %v1827_v33, %v1603_v39  ;;  %v3242_v49 = vpop.f32.mrf.mxu1 }
 0x1ce   : > { %v1607_v59 = vpop.f32.mrf.mxu0 }
 0x1cf   : > { %v1608_v32 = vadd.f32 %v1607_v59, %v4781_v1  ;;  %v1867_v27 = vpop.f32.mrf.mxu1 }
 0x1d0   : > { %v1609_v15 = vpop.f32.mrf.mxu0 }
 0x1d1   : > { %v4882_v18 = vadd.f32 %v3230_v46, %v1608_v32  ;;  %v1991_v30 = vpop.f32.mrf.mxu1 }
 0x1d2   : > { %v1612_v6 = vpop.f32.mrf.mxu0 }
 0x1d3   : > { %v1613_v24 = vadd.f32 %v1612_v6, %v4784_v35  ;;  %v1993_v7 = vpop.f32.mrf.mxu1 }
 0x1d4   : > { %v1614_v60 = vpop.f32.mrf.mxu0 }
 0x1d5   : > { %v4885_v31 = vadd.f32 %v1837_v53, %v1613_v24  ;;  %v1996_v52 = vpop.f32.mrf.mxu1 }
 0x1d6   : > { %v1617_v57 = vpop.f32.mrf.mxu0 }
 0x1d7   : > { %v1618_v33 = vadd.f32 %v1617_v57, %v4790_v58  ;;  %v1998_v3 = vpop.f32.mrf.mxu1 }
 0x1d8   : > { %v1619_v50 = vpop.f32.mrf.mxu0 }
 0x1d9   : > { %v4888_v10 = vadd.f32 %v3233_v48, %v1618_v33  ;;  %v2001_v1 = vpop.f32.mrf.mxu1 }
 0x1da   : > { %v1622_v19 = vpop.f32.mrf.mxu0 }
 0x1db   : > { %v1623_v46 = vadd.f32 %v1622_v19, %v4794_v4  ;;  %v2003_v9 = vpop.f32.mrf.mxu1 }
 0x1dc   : > { %v1624_v55 = vpop.f32.mrf.mxu0 }
 0x1dd   : > { %v4891_v8 = vadd.f32 %v1847_v62, %v1623_v46  ;;  %v2006_v35 = vpop.f32.mrf.mxu1 }
 0x1de   : > { %v1627_v21 = vpop.f32.mrf.mxu0 }
 0x1df   : > { %v1628_v53 = vadd.f32 %v1627_v21, %v4801_v40  ;;  %v2008_v39 = vpop.f32.mrf.mxu1 }
 0x1e0   : > { %v1629_v56 = vpop.f32.mrf.mxu0 }
 0x1e1   : > { %v4894_v59 = vadd.f32 %v3236_v44, %v1628_v53  ;;  %v2011_v58 = vpop.f32.mrf.mxu1 }
 0x1e2   : > { %v1632_v32 = vpop.f32.mrf.mxu0 }
 0x1e3   : > { %v1633_v48 = vadd.f32 %v1632_v32, %v4804_v14  ;;  %v2013_v15 = vpop.f32.mrf.mxu1 }
 0x1e4   : > { %v1634_v6 = vpop.f32.mrf.mxu0 }
 0x1e5   : > { %v4897_v24 = vadd.f32 %v1857_v25, %v1633_v48  ;;  %v2016_v4 = vpop.f32.mrf.mxu1 }
 0x1e6   : > { %v1637_v7 = vpop.f32.mrf.mxu0 }
 0x1e7   : > { %v1638_v62 = vadd.f32 %v1637_v7, %v4808_v43  ;;  %v2018_v60 = vpop.f32.mrf.mxu1 }
 0x1e8   : > { %v1639_v57 = vpop.f32.mrf.mxu0 }
 0x1e9   : > { %v4900_v33 = vadd.f32 %v3239_v28, %v1638_v62  ;;  %v2021_v40 = vpop.f32.mrf.mxu1 }
 0x1ea   : > { %v1642_v44 = vpop.f32.mrf.mxu0 }
 0x1eb   : > { %v1643_v3 = vadd.f32 %v1642_v44, %v4811_v45  ;;  %v2023_v50 = vpop.f32.mrf.mxu1 }
 0x1ec   : > { %v1644_v19 = vpop.f32.mrf.mxu0 }
 0x1ed   : > { %v4903_v14 = vadd.f32 %v1867_v27, %v1643_v3  ;;  %v2026_v46 = vpop.f32.mrf.mxu1 }
 0x1ee   : > { %v1647_v25 = vpop.f32.mrf.mxu0 }
 0x1ef   : > { %v1648_v9 = vadd.f32 %v1647_v25, %v4815_v36  ;;  %v2028_v55 = vpop.f32.mrf.mxu1 }
 0x1f0   : > { %v1649_v21 = vpop.f32.mrf.mxu0 }
 0x1f1   : > { %v4906_v43 = vadd.f32 %v3242_v49, %v1648_v9  ;;  %v4908_v53 = vpop.f32.mrf.mxu1 }
 0x1f2   : > { %v3277_v28 = vpop.f32.mrf.mxu0 }
 0x1f3   : > { %v2222_v39 = vadd.f32 %v3277_v28, %v1996_v52  ;;  %v2033_v56 = vpop.f32.mrf.mxu1 }
 0x1f4   : > { %v2216_v45 = vpop.f32.mrf.mxu0 }
 0x1f5   : > { %v2376_v27 = vadd.f32 %v2222_v39, %v4818_v23  ;;  %v2217_v36 = vadd.f32 %v2216_v45, %v1991_v30  ;;  %v2036_v32 = vpop.f32.mrf.mxu1 }
 0x1f6   : > { %v3280_v49 = vpop.f32.mrf.mxu0 }
 0x1f7   : > { %2408 = vst [vmem:[%s4914_s20 + $0x8] sm:$0xff] %v2376_v27  ;;  %v2375_v48 = vadd.f32 %v2217_v36, %v4822_v34  ;;  %v2232_v15 = vadd.f32 %v3280_v49, %v2006_v35  ;;  %v2038_v52 = vpop.f32.mrf.mxu1  ;;  %v2477_v6 = vmul.f32 %v2376_v27, %v2376_v27 }
 0x1f8   : > { %v2226_v7 = vpop.f32.mrf.mxu0 }
 0x1f9   : > { %2407 = vst [vmem:[%s4914_s20] sm:$0xff] %v2375_v48  ;;  %v2439_v62 = vadd.f32 %v2376_v27, %v2375_v48  ;;  %v2476_v60 = vmul.f32 %v2375_v48, %v2375_v48  ;;  %v2378_v57 = vadd.f32 %v2232_v15, %v4824_v11  ;;  %v2227_v44 = vadd.f32 %v2226_v7, %v2001_v1  ;;  %v2041_v3 = vpop.f32.mrf.mxu1 }
 0x1fa   : > { %v3283_v23 = vpop.f32.mrf.mxu0 }
 0x1fb   : > { %v2508_v30 = vadd.f32 %v2477_v6, %v2476_v60  ;;  %2410 = vst [vmem:[%s4914_s20 + $0x18] sm:$0xff] %v2378_v57  ;;  %v2377_v50 = vadd.f32 %v2227_v44, %v4828_v63  ;;  %v2242_v19 = vadd.f32 %v3283_v23, %v2016_v4  ;;  %v2043_v34 = vpop.f32.mrf.mxu1  ;;  %v2479_v1 = vmul.f32 %v2378_v57, %v2378_v57 }
 0x1fc   : > { %v2236_v35 = vpop.f32.mrf.mxu0 }
 0x1fd   : > { %2409 = vst [vmem:[%s4914_s20 + $0x10] sm:$0xff] %v2377_v50  ;;  %v2440_v25 = vadd.f32 %v2439_v62, %v2377_v50  ;;  %v2478_v9 = vmul.f32 %v2377_v50, %v2377_v50  ;;  %v2380_v55 = vadd.f32 %v2242_v19, %v4830_v13  ;;  %v2237_v21 = vadd.f32 %v2236_v35, %v2011_v58  ;;  %v2046_v28 = vpop.f32.mrf.mxu1 }
 0x1fe   : > { %v3286_v11 = vpop.f32.mrf.mxu0 }
 0x1ff   : > { %v2509_v39 = vadd.f32 %v2508_v30, %v2478_v9  ;;  %2412 = vst [vmem:[%s4914_s20 + $0x28] sm:$0xff] %v2380_v55  ;;  %v2379_v56 = vadd.f32 %v2237_v21, %v4833_v47  ;;  %v2441_v45 = vadd.f32 %v2440_v25, %v2378_v57  ;;  %v2048_v27 = vpop.f32.mrf.mxu1  ;;  %v2252_v63 = vadd.f32 %v3286_v11, %v2026_v46 }
 0x200   : > { %v2246_v4 = vpop.f32.mrf.mxu0  ;;  %v2481_v58 = vmul.f32 %v2380_v55, %v2380_v55 }
 0x201   : > { %2411 = vst [vmem:[%s4914_s20 + $0x20] sm:$0xff] %v2379_v56  ;;  %v2442_v36 = vadd.f32 %v2441_v45, %v2379_v56  ;;  %v2480_v49 = vmul.f32 %v2379_v56, %v2379_v56  ;;  %v2510_v48 = vadd.f32 %v2509_v39, %v2479_v1  ;;  %v2247_v15 = vadd.f32 %v2246_v4, %v2021_v40  ;;  %v2051_v13 = vpop.f32.mrf.mxu1 }
 0x202   : > { %v2382_v52 = vadd.f32 %v2252_v63, %v4835_v29  ;;  %v3289_v6 = vpop.f32.mrf.mxu0 }
 0x203   : > { %v2511_v7 = vadd.f32 %v2510_v48, %v2480_v49  ;;  %v2381_v62 = vadd.f32 %v2247_v15, %v4838_v38  ;;  %v2443_v47 = vadd.f32 %v2442_v36, %v2380_v55  ;;  %v2262_v60 = vadd.f32 %v3289_v6, %v2036_v32  ;;  %v2053_v46 = vpop.f32.mrf.mxu1 }
 0x204   : > { %2414 = vst [vmem:[%s4914_s20 + $0x38] sm:$0xff] %v2382_v52  ;;  %v2256_v57 = vpop.f32.mrf.mxu0  ;;  %v2483_v34 = vmul.f32 %v2382_v52, %v2382_v52 }
 0x205   : > { %2413 = vst [vmem:[%s4914_s20 + $0x30] sm:$0xff] %v2381_v62  ;;  %v2444_v44 = vadd.f32 %v2443_v47, %v2381_v62  ;;  %v2482_v23 = vmul.f32 %v2381_v62, %v2381_v62  ;;  %v2512_v30 = vadd.f32 %v2511_v7, %v2481_v58  ;;  %v2384_v40 = vadd.f32 %v2262_v60, %v4840_v16  ;;  %v2056_v50 = vpop.f32.mrf.mxu1 }
 0x206   : > { %v2257_v29 = vadd.f32 %v2256_v57, %v4908_v53  ;;  %v3292_v19 = vpop.f32.mrf.mxu0 }
 0x207   : > { %v2513_v38 = vadd.f32 %v2512_v30, %v2482_v23  ;;  %2416 = vst [vmem:[%s4914_s20 + $0x48] sm:$0xff] %v2384_v40  ;;  %v2445_v35 = vadd.f32 %v2444_v44, %v2382_v52  ;;  %v2272_v32 = vadd.f32 %v3292_v19, %v2046_v28  ;;  %v2058_v25 = vpop.f32.mrf.mxu1  ;;  %v2485_v63 = vmul.f32 %v2384_v40, %v2384_v40 }
 0x208   : > { %v2383_v9 = vadd.f32 %v2257_v29, %v4843_v26  ;;  %v2266_v55 = vpop.f32.mrf.mxu0 }
 0x209   : > { %v2514_v21 = vadd.f32 %v2513_v38, %v2483_v34  ;;  %v2386_v11 = vadd.f32 %v2272_v32, %v4845_v5  ;;  %v2267_v16 = vadd.f32 %v2266_v55, %v2041_v3  ;;  %v2061_v1 = vpop.f32.mrf.mxu1 }
 0x20a   : > { %2415 = vst [vmem:[%s4914_s20 + $0x40] sm:$0xff] %v2383_v9  ;;  %v2446_v39 = vadd.f32 %v2445_v35, %v2383_v9  ;;  %v2484_v53 = vmul.f32 %v2383_v9, %v2383_v9  ;;  %v3295_v56 = vpop.f32.mrf.mxu0 }
 0x20b   : > { %2418 = vst [vmem:[%s4914_s20 + $0x58] sm:$0xff] %v2386_v11  ;;  %v2385_v45 = vadd.f32 %v2267_v16, %v4848_v20  ;;  %v2282_v27 = vadd.f32 %v3295_v56, %v2056_v50  ;;  %v2063_v28 = vpop.f32.mrf.mxu1  ;;  %v2487_v62 = vmul.f32 %v2386_v11, %v2386_v11 }
 0x20c   : > { %v2515_v4 = vadd.f32 %v2514_v21, %v2484_v53  ;;  %v2447_v26 = vadd.f32 %v2446_v39, %v2384_v40  ;;  %v2276_v36 = vpop.f32.mrf.mxu0 }
 0x20d   : > { %2417 = vst [vmem:[%s4914_s20 + $0x50] sm:$0xff] %v2385_v45  ;;  %v2486_v49 = vmul.f32 %v2385_v45, %v2385_v45  ;;  %v2388_v5 = vadd.f32 %v2282_v27, %v4850_v41  ;;  %v2277_v3 = vadd.f32 %v2276_v36, %v2051_v13  ;;  %v2066_v48 = vpop.f32.mrf.mxu1 }
 0x20e   : > { %v2448_v15 = vadd.f32 %v2447_v26, %v2385_v45  ;;  %v2516_v58 = vadd.f32 %v2515_v4, %v2485_v63  ;;  %v3298_v52 = vpop.f32.mrf.mxu0 }
 0x20f   : > { %2420 = vst [vmem:[%s4914_s20 + $0x68] sm:$0xff] %v2388_v5  ;;  %v2387_v20 = vadd.f32 %v2277_v3, %v4853_v42  ;;  %v2292_v6 = vadd.f32 %v3298_v52, %v2066_v48  ;;  %v2068_v7 = vpop.f32.mrf.mxu1  ;;  %v2489_v29 = vmul.f32 %v2388_v5, %v2388_v5 }
 0x210   : > { %v2517_v47 = vadd.f32 %v2516_v58, %v2486_v49  ;;  %v2449_v60 = vadd.f32 %v2448_v15, %v2386_v11  ;;  %v2286_v46 = vpop.f32.mrf.mxu0 }
 0x211   : > { %2419 = vst [vmem:[%s4914_s20 + $0x60] sm:$0xff] %v2387_v20  ;;  %v2488_v57 = vmul.f32 %v2387_v20, %v2387_v20  ;;  %v2390_v41 = vadd.f32 %v2292_v6, %v4858_v22  ;;  %v2287_v13 = vadd.f32 %v2286_v46, %v2061_v1  ;;  %v2071_v44 = vpop.f32.mrf.mxu1 }
 0x212   : > { %v2450_v23 = vadd.f32 %v2449_v60, %v2387_v20  ;;  %v2518_v30 = vadd.f32 %v2517_v47, %v2487_v62  ;;  %v3301_v40 = vpop.f32.mrf.mxu0 }
 0x213   : > { %2422 = vst [vmem:[%s4914_s20 + $0x78] sm:$0xff] %v2390_v41  ;;  %v2389_v50 = vadd.f32 %v2287_v13, %v4856_v17  ;;  %v2073_v42 = vpop.f32.mrf.mxu1  ;;  %v2491_v1 = vmul.f32 %v2390_v41, %v2390_v41 }
 0x214   : > { %v2519_v19 = vadd.f32 %v2518_v30, %v2488_v57  ;;  %v2451_v34 = vadd.f32 %v2450_v23, %v2388_v5  ;;  %v2296_v38 = vpop.f32.mrf.mxu0 }
 0x215   : > { %2421 = vst [vmem:[%s4914_s20 + $0x70] sm:$0xff] %v2389_v50  ;;  %v2490_v35 = vmul.f32 %v2389_v50, %v2389_v50  ;;  %v2297_v32 = vadd.f32 %v2296_v38, %v2071_v44  ;;  %v2076_v25 = vpop.f32.mrf.mxu1 }
 0x216   : > { %v2452_v9 = vadd.f32 %v2451_v34, %v2389_v50  ;;  %v2520_v22 = vadd.f32 %v2519_v19, %v2489_v29  ;;  %v2302_v55 = vadd.f32 %v3301_v40, %v2076_v25  ;;  %v3304_v21 = vpop.f32.mrf.mxu0 }
 0x217   : > { %v2391_v11 = vadd.f32 %v2297_v32, %v4861_v37  ;;  %v2078_v16 = vpop.f32.mrf.mxu1 }
 0x218   : > { %v2521_v17 = vadd.f32 %v2520_v22, %v2490_v35  ;;  %v2453_v39 = vadd.f32 %v2452_v9, %v2390_v41  ;;  %v2392_v53 = vadd.f32 %v2302_v55, %v4864_v0  ;;  %v2306_v56 = vpop.f32.mrf.mxu0 }
 0x219   : > { %2423 = vst [vmem:[%s4914_s20 + $0x80] sm:$0xff] %v2391_v11  ;;  %v2492_v45 = vmul.f32 %v2391_v11, %v2391_v11  ;;  %v2081_v27 = vpop.f32.mrf.mxu1 }
 0x21a   : > { %v2454_v28 = vadd.f32 %v2453_v39, %v2391_v11  ;;  %v2522_v63 = vadd.f32 %v2521_v17, %v2491_v1  ;;  %2424 = vst [vmem:[%s4914_s20 + $0x88] sm:$0xff] %v2392_v53  ;;  %v2493_v4 = vmul.f32 %v2392_v53, %v2392_v53  ;;  %v2307_v26 = vadd.f32 %v2306_v56, %v2081_v27  ;;  %v3307_v49 = vpop.f32.mrf.mxu0 }
 0x21b   : > { %v2083_v36 = vpop.f32.mrf.mxu1 }
 0x21c   : > { %v2523_v37 = vadd.f32 %v2522_v63, %v2492_v45  ;;  %v2455_v5 = vadd.f32 %v2454_v28, %v2392_v53  ;;  %v2393_v3 = vadd.f32 %v2307_v26, %v4867_v54  ;;  %v2316_v6 = vpop.f32.mrf.mxu0 }
 0x21d   : > { %v2086_v48 = vpop.f32.mrf.mxu1 }
 0x21e   : > { %v2524_v15 = vadd.f32 %v2523_v37, %v2493_v4  ;;  %2425 = vst [vmem:[%s4914_s20 + $0x90] sm:$0xff] %v2393_v3  ;;  %v2456_v0 = vadd.f32 %v2455_v5, %v2393_v3  ;;  %v2494_v58 = vmul.f32 %v2393_v3, %v2393_v3  ;;  %v2312_v52 = vadd.f32 %v3304_v21, %v2086_v48  ;;  %v3310_v54 = vpop.f32.mrf.mxu0 }
 0x21f   : > { %v2088_v20 = vpop.f32.mrf.mxu1 }
 0x220   : > { %v2525_v7 = vadd.f32 %v2524_v15, %v2494_v58  ;;  %v2394_v62 = vadd.f32 %v2312_v52, %v4870_v51  ;;  %v2326_v29 = vpop.f32.mrf.mxu0 }
 0x221   : > { %v2091_v47 = vpop.f32.mrf.mxu1 }
 0x222   : > { %2426 = vst [vmem:[%s4914_s20 + $0x98] sm:$0xff] %v2394_v62  ;;  %v2457_v60 = vadd.f32 %v2456_v0, %v2394_v62  ;;  %v2495_v46 = vmul.f32 %v2394_v62, %v2394_v62  ;;  %v2317_v57 = vadd.f32 %v2316_v6, %v2091_v47  ;;  %v3313_v9 = vpop.f32.mrf.mxu0 }
 0x223   : > { %v2093_v41 = vpop.f32.mrf.mxu1 }
 0x224   : > { %v2526_v13 = vadd.f32 %v2525_v7, %v2495_v46  ;;  %v2395_v44 = vadd.f32 %v2317_v57, %v4873_v12  ;;  %v2336_v17 = vpop.f32.mrf.mxu0 }
 0x225   : > { %v2096_v23 = vpop.f32.mrf.mxu1 }
 0x226   : > { %2427 = vst [vmem:[%s4914_s20 + $0xa0] sm:$0xff] %v2395_v44  ;;  %v2458_v30 = vadd.f32 %v2457_v60, %v2395_v44  ;;  %v2496_v40 = vmul.f32 %v2395_v44, %v2395_v44  ;;  %v2322_v50 = vadd.f32 %v3307_v49, %v2096_v23  ;;  %v3316_v63 = vpop.f32.mrf.mxu0 }
 0x227   : > { %v2098_v42 = vpop.f32.mrf.mxu1 }
 0x228   : > { %v2527_v51 = vadd.f32 %v2526_v13, %v2496_v40  ;;  %v2396_v19 = vadd.f32 %v2322_v50, %v4876_v61  ;;  %v2346_v3 = vpop.f32.mrf.mxu0 }
 0x229   : > { %v2101_v34 = vpop.f32.mrf.mxu1 }
 0x22a   : > { %2428 = vst [vmem:[%s4914_s20 + $0xa8] sm:$0xff] %v2396_v19  ;;  %v2459_v38 = vadd.f32 %v2458_v30, %v2396_v19  ;;  %v2497_v35 = vmul.f32 %v2396_v19, %v2396_v19  ;;  %v2327_v32 = vadd.f32 %v2326_v29, %v2101_v34  ;;  %v3319_v6 = vpop.f32.mrf.mxu0 }
 0x22b   : > { %v2103_v25 = vpop.f32.mrf.mxu1 }
 0x22c   : > { %v2528_v12 = vadd.f32 %v2527_v51, %v2497_v35  ;;  %v2397_v22 = vadd.f32 %v2327_v32, %v4879_v2  ;;  %v2356_v41 = vpop.f32.mrf.mxu0 }
 0x22d   : > { %v2106_v55 = vpop.f32.mrf.mxu1 }
 0x22e   : > { %2429 = vst [vmem:[%s4914_s20 + $0xb0] sm:$0xff] %v2397_v22  ;;  %v2460_v21 = vadd.f32 %v2459_v38, %v2397_v22  ;;  %v2498_v11 = vmul.f32 %v2397_v22, %v2397_v22  ;;  %v2332_v16 = vadd.f32 %v3310_v54, %v2106_v55  ;;  %v3322_v50 = vpop.f32.mrf.mxu0 }
 0x22f   : > { %v2108_v1 = vpop.f32.mrf.mxu1 }
 0x230   : > { %v2529_v61 = vadd.f32 %v2528_v12, %v2498_v11  ;;  %v2398_v39 = vadd.f32 %v2332_v16, %v4882_v18  ;;  %v2366_v35 = vpop.f32.mrf.mxu0 }
 0x231   : > { %v2111_v53 = vpop.f32.mrf.mxu1 }
 0x232   : > { %2430 = vst [vmem:[%s4914_s20 + $0xb8] sm:$0xff] %v2398_v39  ;;  %v2461_v56 = vadd.f32 %v2460_v21, %v2398_v39  ;;  %v2499_v45 = vmul.f32 %v2398_v39, %v2398_v39  ;;  %v2337_v27 = vadd.f32 %v2336_v17, %v2111_v53 }
 0x233   : > { %v2113_v28 = vpop.f32.mrf.mxu1 }
 0x234   : > { %v2530_v2 = vadd.f32 %v2529_v61, %v2499_v45  ;;  %v2399_v4 = vadd.f32 %v2337_v27, %v4885_v31 }
 0x235   : > { %v2116_v26 = vpop.f32.mrf.mxu1 }
 0x236   : > { %2431 = vst [vmem:[%s4914_s20 + $0xc0] sm:$0xff] %v2399_v4  ;;  %v2462_v36 = vadd.f32 %v2461_v56, %v2399_v4  ;;  %v2500_v49 = vmul.f32 %v2399_v4, %v2399_v4  ;;  %v2342_v37 = vadd.f32 %v3313_v9, %v2116_v26 }
 0x237   : > { %v2118_v5 = vpop.f32.mrf.mxu1 }
 0x238   : > { %v2531_v18 = vadd.f32 %v2530_v2, %v2500_v49  ;;  %v2400_v48 = vadd.f32 %v2342_v37, %v4888_v10 }
 0x239   : > { %v2121_v15 = vpop.f32.mrf.mxu1 }
 0x23a   : > { %2432 = vst [vmem:[%s4914_s20 + $0xc8] sm:$0xff] %v2400_v48  ;;  %v2463_v0 = vadd.f32 %v2462_v36, %v2400_v48  ;;  %v2501_v58 = vmul.f32 %v2400_v48, %v2400_v48  ;;  %v2347_v52 = vadd.f32 %v2346_v3, %v2121_v15 }
 0x23b   : > { %v2123_v20 = vpop.f32.mrf.mxu1 }
 0x23c   : > { %v2532_v31 = vadd.f32 %v2531_v18, %v2501_v58  ;;  %v2401_v7 = vadd.f32 %v2347_v52, %v4891_v8 }
 0x23d   : > { %v2126_v62 = vpop.f32.mrf.mxu1 }
 0x23e   : > { %2433 = vst [vmem:[%s4914_s20 + $0xd0] sm:$0xff] %v2401_v7  ;;  %v2464_v47 = vadd.f32 %v2463_v0, %v2401_v7  ;;  %v2502_v60 = vmul.f32 %v2401_v7, %v2401_v7  ;;  %v2352_v46 = vadd.f32 %v3316_v63, %v2126_v62 }
 0x23f   : > { %v2128_v57 = vpop.f32.mrf.mxu1 }
 0x240   : > { %v2533_v10 = vadd.f32 %v2532_v31, %v2502_v60  ;;  %v2402_v54 = vadd.f32 %v2352_v46, %v4894_v59 }
 0x241   : > { %v2131_v13 = vpop.f32.mrf.mxu1 }
 0x242   : > { %2434 = vst [vmem:[%s4914_s20 + $0xd8] sm:$0xff] %v2402_v54  ;;  %v2465_v44 = vadd.f32 %v2464_v47, %v2402_v54  ;;  %v2503_v23 = vmul.f32 %v2402_v54, %v2402_v54  ;;  %v2357_v30 = vadd.f32 %v2356_v41, %v2131_v13 }
 0x243   : > { %v2133_v40 = vpop.f32.mrf.mxu1 }
 0x244   : > { %v2534_v8 = vadd.f32 %v2533_v10, %v2503_v23  ;;  %v2403_v42 = vadd.f32 %v2357_v30, %v4897_v24 }
 0x245   : > { %v2136_v29 = vpop.f32.mrf.mxu1 }
 0x246   : > { %2435 = vst [vmem:[%s4914_s20 + $0xe0] sm:$0xff] %v2403_v42  ;;  %v2466_v51 = vadd.f32 %v2465_v44, %v2403_v42  ;;  %v2504_v19 = vmul.f32 %v2403_v42, %v2403_v42  ;;  %v2362_v34 = vadd.f32 %v3319_v6, %v2136_v29 }
 0x247   : > { %v2138_v38 = vpop.f32.mrf.mxu1 }
 0x248   : > { %v2535_v59 = vadd.f32 %v2534_v8, %v2504_v19  ;;  %v2404_v32 = vadd.f32 %v2362_v34, %v4900_v33 }
 0x249   : > { %v2141_v25 = vpop.f32.mrf.mxu1 }
 0x24a   : > { %2436 = vst [vmem:[%s4914_s20 + $0xe8] sm:$0xff] %v2404_v32  ;;  %v2467_v9 = vadd.f32 %v2466_v51, %v2404_v32  ;;  %v2505_v12 = vmul.f32 %v2404_v32, %v2404_v32  ;;  %v2367_v22 = vadd.f32 %v2366_v35, %v2141_v25 }
 0x24b   : > { %v2143_v55 = vpop.f32.mrf.mxu1 }
 0x24c   : > { %v2536_v21 = vadd.f32 %v2535_v59, %v2505_v12  ;;  %v2405_v24 = vadd.f32 %v2367_v22, %v4903_v14 }
 0x24d   : > { %v2146_v11 = vpop.f32.mrf.mxu1 }
 0x24e   : > { %2437 = vst [vmem:[%s4914_s20 + $0xf0] sm:$0xff] %v2405_v24  ;;  %v2468_v16 = vadd.f32 %v2467_v9, %v2405_v24  ;;  %v2506_v1 = vmul.f32 %v2405_v24, %v2405_v24  ;;  %v2372_v17 = vadd.f32 %v3322_v50, %v2146_v11 }
 0x24f   : > { %v2148_v61 = vpop.f32.mrf.mxu1 }
 0x250   : > { %v2537_v39 = vadd.f32 %v2536_v21, %v2506_v1  ;;  %v2406_v33 = vadd.f32 %v2372_v17, %v4906_v43 }
 0x252   : > { %2438 = vst [vmem:[%s4914_s20 + $0xf8] sm:$0xff] %v2406_v33  ;;  %v2469_v53 = vadd.f32 %v2468_v16, %v2406_v33  ;;  %v2507_v56 = vmul.f32 %v2406_v33, %v2406_v33 }
 0x254   : > { %v2470_v45 = vrot.slane %v2469_v53, 4  ;;  %v2538_v27 = vadd.f32 %v2537_v39, %v2507_v56 }
 0x256   : > { %v2471_v28 = vadd.f32 %v2470_v45, %v2469_v53  ;;  %v2539_v63 = vrot.slane %v2538_v27, 4 }
 0x258   : > { %v2472_v2 = vrot.slane %v2471_v28, 2  ;;  %v2540_v4 = vadd.f32 %v2539_v63, %v2538_v27 }
 0x25a   : > { %v2473_v14 = vadd.f32 %v2472_v2, %v2471_v28  ;;  %v2541_v26 = vrot.slane %v2540_v4, 2 }
 0x25c   : > { %v2474_v36 = vrot.slane %v2473_v14, 1  ;;  %v2542_v49 = vadd.f32 %v2541_v26, %v2540_v4 }
 0x25e   : > { %v2543_v37 = vrot.slane %v2542_v49, 1  ;;  %v2475_v43 = vadd.f32 %v2474_v36, %v2473_v14 }
 0x260   : > { %v2544_v5 = vadd.f32 %v2543_v37, %v2542_v49 }
 0x262   : > { %v2545_v3 = vsel %vm696_vm0, %v2475_v43, %v2544_v5 }
 0x263   : > { %2546 = vst [vmem:[%s280_s24] sm:$0x3] %v2545_v3 }
 0x264 PF: > { %s17_s21 = sadd.s32 1, %s3432_s21  }
 0x265   : > { %p14_p4 = scmp.ge.s32.totalorder %s17_s21, 4  }
 0x267   :  { %16 = sbr.rel (!%p14_p4) target bundleno = 1 (0x1), region = 102 }

</bundles_post_ra>
